<compile_context>
chip_gen: v5e
topology: v5e:2x2
jax: 0.10.0
libtpu: 0.0.40
codegen_flags: <defaults>
</compile_context>

<pallas_src>
import functools
from typing import NamedTuple

import jax
import jax.numpy as jnp
from jax.experimental import pallas as pl
from jax.experimental.pallas import tpu as pltpu

HIDDEN = 512
NEG_SLOPE = 0.1

_BUFFERED_OK = hasattr(pl, "Buffered")   # single-buffer constant blocks when supported


def _leaky_relu(x):
    # 0.1 < 1, so max(x, 0.1*x) == LeakyReLU(0.1); 2 VALU ops instead of 3.
    return jnp.maximum(x, NEG_SLOPE * x)


def _round_up(x, m):
    return ((x + m - 1) // m) * m


@functools.lru_cache(maxsize=None)
def _vmem_budget_bytes():
    """Per-core VMEM budget with headroom (generation aware)."""
    cap = 64 << 20
    try:
        cap = int(pltpu.get_tpu_info().vmem_capacity_bytes)
    except Exception:
        pass  # fall back to the most conservative assumption (v7x: 64 MiB/TC)
    # ~48 MiB on v7x (64 MiB physical), ~96-100 MiB on v5e/v6e (128 MiB physical).
    return min(cap * 3 // 4, 100 << 20)


def _default_batch_tile(itemsize):
    # Bigger batch tiles on 128 MiB parts (v5e/v6e) -> fewer W1 re-streams from HBM;
    # 256 on 64 MiB / 2-TC parts (v7x) so multiple tiles can split across cores.
    return 512 if _vmem_budget_bytes() >= (80 << 20) else 256


def _choose_k_tile(kp, itemsize, bm_hint, k_tile_max):
    """Pick the layer-1 K tile so the double-buffered x/W1 streams fill VMEM."""
    budget = _vmem_budget_bytes()
    fixed = (2 * (2 * HIDDEN * HIDDEN + 3 * 8 * HIDDEN) * itemsize  # W2/W3/biases (worst case 2x)
             + 3 * bm_hint * HIDDEN * 4                              # out (x2) + fp32 accumulator
             + (2 << 20))                                            # headroom
    per_k = 2 * (bm_hint + HIDDEN) * itemsize                        # x tile + W1 tile, double-buffered
    tk = max(128, (budget - fixed) // per_k)
    tk = min(kp, k_tile_max, tk)
    return max(128, (tk // 128) * 128)


class PreparedParams(NamedTuple):
    w1: jax.Array   # (Kp, 512), weight dtype, K-padded
    b1: jax.Array   # (1, 512)
    w2: jax.Array   # (512, 512)
    b2: jax.Array   # (1, 512)
    w3: jax.Array   # (512, 512)
    b3: jax.Array   # (1, 512)
    k: int          # original flattened input size
    kp: int         # padded K
    tk: int         # layer-1 K tile


def prepare_params(params, *, weight_dtype=jnp.bfloat16, k_tile_max=None,
                   batch_tile_hint=None):
    """Cast / pad ResizeNet weights ONCE, outside the forward path.

    Weights must already be (in, out) layout (transpose of torch.nn.Linear.weight);
    biases may be (512,) or (1, 512). Pass the result to resize_net_forward and
    reuse it across calls so the fp32->bf16 cast and K-pad are not re-streamed
    through HBM every step.
    """
    if isinstance(params, PreparedParams):
        return params
    w1, b1, w2, b2, w3, b3 = params
    dt = jnp.dtype(weight_dtype)
    itemsize = dt.itemsize

    # Defensive reshape: PyTorch nn.Linear biases are (512,).
    b1, b2, b3 = (jnp.asarray(b).reshape(1, HIDDEN) for b in (b1, b2, b3))

    K = w1.shape[0]
    if batch_tile_hint is None:
        batch_tile_hint = _default_batch_tile(itemsize)
    if k_tile_max is None:
        # bf16: stream big W1 tiles; fp32 is validation-only -> smaller tiles.
        k_tile_max = 8192 if itemsize <= 2 else 2048

    kp0 = _round_up(K, 128)
    tk = _choose_k_tile(kp0, itemsize, batch_tile_hint, k_tile_max)
    kp = _round_up(kp0, tk)

    # TODO(synk): optional fp8 (e4m3) W1 streaming with per-output-channel scales for v7x.
    cast = lambda a: jnp.asarray(a, dt)
    w1p = jnp.pad(cast(w1), ((0, kp - K), (0, 0)))
    return PreparedParams(w1p, cast(b1), cast(w2), cast(b2), cast(w3), cast(b3),
                          k=K, kp=kp, tk=tk)


# ---------------------------------------------------------------------------
# Kernels
# ---------------------------------------------------------------------------

def _mlp_epilogue(h, b1_ref, w2_ref, b2_ref, w3_ref, b3_ref, o_ref):
    """fp32 layer-1 pre-activation `h` -> layers 2/3 -> output block."""
    h = _leaky_relu(h + b1_ref[...].astype(jnp.float32))
    h = jnp.dot(h.astype(w2_ref.dtype), w2_ref[...],
                preferred_element_type=jnp.float32)
    h = _leaky_relu(h + b2_ref[...].astype(jnp.float32))
    h = jnp.dot(h.astype(w3_ref.dtype), w3_ref[...],
                preferred_element_type=jnp.float32)
    o_ref[...] = (h + b3_ref[...].astype(jnp.float32)).astype(o_ref.dtype)


def _mlp_kernel_single_k(x_ref, w1_ref, b1_ref, w2_ref, b2_ref, w3_ref, b3_ref,
                         o_ref):
    # Whole flattened K fits in one tile: no VMEM accumulator round-trips.
    h = jnp.dot(x_ref[...], w1_ref[...], preferred_element_type=jnp.float32)
    _mlp_epilogue(h, b1_ref, w2_ref, b2_ref, w3_ref, b3_ref, o_ref)


def _mlp_kernel_multi_k(x_ref, w1_ref, b1_ref, w2_ref, b2_ref, w3_ref, b3_ref,
                        o_ref, acc_ref):
    k = pl.program_id(1)
    part = jnp.dot(x_ref[...], w1_ref[...], preferred_element_type=jnp.float32)

    @pl.when(k == 0)
    def _():
        acc_ref[...] = part          # overwrite: no zero-init store + re-read

    @pl.when(k > 0)
    def _():
        acc_ref[...] += part

    @pl.when(k == pl.num_programs(1) - 1)
    def _():
        _mlp_epilogue(acc_ref[...], b1_ref, w2_ref, b2_ref, w3_ref, b3_ref, o_ref)


# ---------------------------------------------------------------------------
# pallas_call wrapper
# ---------------------------------------------------------------------------

def _const_spec(shape, index_map, buffered):
    """BlockSpec for a grid-invariant operand (fetched once)."""
    if buffered:
        try:
            return pl.BlockSpec(shape, index_map, pipeline_mode=pl.Buffered(1))
        except TypeError:
            pass
    return pl.BlockSpec(shape, index_map)


def _pallas_forward(x_pad, p: PreparedParams, bm, buffered):
    Bp = x_pad.shape[0]
    Kp, tk = p.kp, p.tk
    itemsize = x_pad.dtype.itemsize
    n_bt, n_kt = Bp // bm, Kp // tk
    cbuf = 1 if buffered else 2

    flops = 2 * Bp * (Kp + 2 * HIDDEN) * HIDDEN
    bytes_accessed = ((Bp * Kp + Kp * HIDDEN + 2 * HIDDEN * HIDDEN + 3 * HIDDEN)
                      * itemsize + Bp * HIDDEN * 4)
    cost = pl.CostEstimate(flops=int(flops), transcendentals=0,
                           bytes_accessed=int(bytes_accessed))

    if n_kt == 1:
        grid = (n_bt,)
        in_specs = [
            pl.BlockSpec((bm, Kp), lambda i: (i, 0)),                       # x tile
            _const_spec((Kp, HIDDEN), lambda i: (0, 0), buffered),          # W1
            _const_spec((1, HIDDEN), lambda i: (0, 0), buffered),           # b1
            _const_spec((HIDDEN, HIDDEN), lambda i: (0, 0), buffered),      # W2
            _const_spec((1, HIDDEN), lambda i: (0, 0), buffered),           # b2
            _const_spec((HIDDEN, HIDDEN), lambda i: (0, 0), buffered),      # W3
            _const_spec((1, HIDDEN), lambda i: (0, 0), buffered),           # b3
        ]
        out_specs = pl.BlockSpec((bm, HIDDEN), lambda i: (i, 0))
        scratch = []
        kernel = _mlp_kernel_single_k
        sem = ("parallel",)
        vmem = (2 * bm * Kp * itemsize
                + cbuf * (Kp * HIDDEN + 2 * HIDDEN * HIDDEN + 3 * 8 * HIDDEN) * itemsize
                + 2 * bm * HIDDEN * 4
                + (2 << 20))
    else:
        grid = (n_bt, n_kt)
        in_specs = [
            pl.BlockSpec((bm, tk), lambda i, k: (i, k)),                    # x tile
            pl.BlockSpec((tk, HIDDEN), lambda i, k: (k, 0)),                # W1 tile (streamed)
            _const_spec((1, HIDDEN), lambda i, k: (0, 0), buffered),        # b1
            _const_spec((HIDDEN, HIDDEN), lambda i, k: (0, 0), buffered),   # W2
            _const_spec((1, HIDDEN), lambda i, k: (0, 0), buffered),        # b2
            _const_spec((HIDDEN, HIDDEN), lambda i, k: (0, 0), buffered),   # W3
            _const_spec((1, HIDDEN), lambda i, k: (0, 0), buffered),        # b3
        ]
        out_specs = pl.BlockSpec((bm, HIDDEN), lambda i, k: (i, 0))
        scratch = [pltpu.VMEM((bm, HIDDEN), jnp.float32)]
        kernel = _mlp_kernel_multi_k
        sem = ("parallel", "arbitrary")
        vmem = (2 * (bm * tk + tk * HIDDEN) * itemsize
                + cbuf * (2 * HIDDEN * HIDDEN + 3 * 8 * HIDDEN) * itemsize
                + 2 * bm * HIDDEN * 4
                + bm * HIDDEN * 4
                + (2 << 20))

    vmem = min(int(vmem), _vmem_budget_bytes())

    return pl.pallas_call(
        kernel,
        out_shape=jax.ShapeDtypeStruct((Bp, HIDDEN), jnp.float32),
        grid_spec=pltpu.PrefetchScalarGridSpec(
            num_scalar_prefetch=0,
            grid=grid,
            in_specs=in_specs,
            out_specs=out_specs,
            scratch_shapes=scratch,
        ),
        compiler_params=pltpu.CompilerParams(
            dimension_semantics=sem,
            vmem_limit_bytes=vmem,
        ),
        cost_estimate=cost,
    )(x_pad, p.w1, p.b1, p.w2, p.b2, p.w3, p.b3)


def resize_net_forward(feature_vector, params, *, weight_dtype=jnp.bfloat16,
                       batch_tile=None, k_tile_max=None):
    """ResizeNet forward. feature_vector: (B, C, H, W) or (B, K); returns (B, 512) fp32.

    `params` may be a raw (w1, b1, w2, b2, w3, b3) tuple or a PreparedParams
    (preferred: prepare once with prepare_params and reuse, so the weight
    cast/pad is not re-done every call). NOTE: the default weight_dtype=bf16
    path is NOT bit-faithful to the fp32 PyTorch module (fp32 MXU accumulation,
    ~1e-2 relative error); pass weight_dtype=jnp.float32 for exact validation.
    """
    p = prepare_params(params, weight_dtype=weight_dtype,
                       k_tile_max=k_tile_max, batch_tile_hint=batch_tile)
    dt = p.w1.dtype
    itemsize = dt.itemsize

    B = feature_vector.shape[0]
    x = feature_vector.reshape(B, -1).astype(dt)        # nn.Flatten()
    K = x.shape[1]
    if K != p.k:
        raise ValueError(f"flattened input size {K} != prepared weight size {p.k}")

    # Batch padding / tiling: sublane-aligned M tiles -> lane-dense, unmasked stores.
    b_align = max(8, 32 // itemsize)                    # fp32: 8, bf16: 16
    if batch_tile is None:
        batch_tile = _default_batch_tile(itemsize)
    Bp0 = _round_up(B, b_align)
    bm = Bp0 if Bp0 <= batch_tile else _round_up(batch_tile, b_align)
    n_bt = -(-Bp0 // bm)
    if n_bt > 1 and n_bt % 2 == 1 and _vmem_budget_bytes() < (80 << 20):
        # v7x-like part (2 TCs, batch axis "parallel"): prefer an even tile count.
        bm = _round_up(-(-Bp0 // (n_bt + 1)), b_align)
    Bp = _round_up(Bp0, bm)

    if Bp != B or p.kp != K:
        x = jnp.pad(x, ((0, Bp - B), (0, p.kp - K)))

    global _BUFFERED_OK
    if _BUFFERED_OK:
        try:
            out = _pallas_forward(x, p, bm, buffered=True)
        except Exception:
            _BUFFERED_OK = False
            out = _pallas_forward(x, p, bm, buffered=False)
    else:
        out = _pallas_forward(x, p, bm, buffered=False)
    return out[:B]


# ---------------------------------------------------------------------------
# Test harness
# ---------------------------------------------------------------------------

def init_params(key, input_size):
    """Synthetic fp32 params with the same shapes as the nn.Linear layers
    ((in, out) weights, (out,) biases like PyTorch)."""
    ks = jax.random.split(key, 6)
    s1 = 1.0 / float(input_size) ** 0.5
    s2 = 1.0 / float(HIDDEN) ** 0.5
    w1 = jax.random.uniform(ks[0], (input_size, HIDDEN), jnp.float32, -s1, s1)
    b1 = jax.random.uniform(ks[1], (HIDDEN,), jnp.float32, -s1, s1)
    w2 = jax.random.uniform(ks[2], (HIDDEN, HIDDEN), jnp.float32, -s2, s2)
    b2 = jax.random.uniform(ks[3], (HIDDEN,), jnp.float32, -s2, s2)
    w3 = jax.random.uniform(ks[4], (HIDDEN, HIDDEN), jnp.float32, -s2, s2)
    b3 = jax.random.uniform(ks[5], (HIDDEN,), jnp.float32, -s2, s2)
    return (w1, b1, w2, b2, w3, b3)


def _reference(feature_vector, params):
    w1, b1, w2, b2, w3, b3 = params
    x = feature_vector.reshape(feature_vector.shape[0], -1)
    h = jax.nn.leaky_relu(x @ w1 + b1, NEG_SLOPE)
    h = jax.nn.leaky_relu(h @ w2 + b2, NEG_SLOPE)
    return h @ w3 + b3


if __name__ == "__main__":
    key = jax.random.PRNGKey(0)
    k_x, k_p, k_x2, k_p2 = jax.random.split(key, 4)

    # Test 1/2: B=2, C=4, H=W=16 -> K = 1024 after Flatten (single K tile path).
    B, C, H, W = 2, 4, 16, 16
    x = jax.random.normal(k_x, (B, C, H, W), jnp.float32)
    params = init_params(k_p, C * H * W)
    ref = _reference(x, params)

    # fp32 weight path (bit-faithful), prepared once and reused across calls.
    p32 = prepare_params(params, weight_dtype=jnp.float32)
    out_f32 = jax.block_until_ready(resize_net_forward(x, p32))
    assert out_f32.shape == (B, HIDDEN)
    assert jnp.allclose(out_f32, ref, atol=1e-4, rtol=1e-4)
    out_f32b = jax.block_until_ready(resize_net_forward(x, p32))   # reuse: no re-cast/pad
    assert jnp.allclose(out_f32b, out_f32)

    # bf16 weight streaming (fp32 MXU accumulation) — the fast, memory-bound path.
    p16 = prepare_params(params, weight_dtype=jnp.bfloat16)
    out_bf16 = jax.block_until_ready(resize_net_forward(x, p16))
    assert out_bf16.shape == (B, HIDDEN)
    assert jnp.allclose(out_bf16, ref, atol=5e-2, rtol=5e-2)

    # Test 3: non-aligned B and K + forced multi-step K accumulation
    # (B=20 -> pad 24; K=675 -> pad 768, 3 K tiles of 256) with raw params.
    B2, C2, H2, W2 = 20, 3, 15, 15
    x2 = jax.random.normal(k_x2, (B2, C2, H2, W2), jnp.float32)
    params2 = init_params(k_p2, C2 * H2 * W2)
    out2 = jax.block_until_ready(
        resize_net_forward(x2, params2, weight_dtype=jnp.float32, k_tile_max=256))
    assert out2.shape == (B2, HIDDEN)
    assert jnp.allclose(out2, _reference(x2, params2), atol=1e-4, rtol=1e-4)

    print("KERNEL_OK")
</pallas_src>

<mosaic_0001>
module attributes {stable_mosaic.version = 11 : i64} {
  func.func @_mlp_kernel_single_k(%arg0: i32, %arg1: memref<8x1024xf32, #tpu.memory_space<vmem>>, %arg2: memref<1024x512xf32, #tpu.memory_space<vmem>>, %arg3: memref<1x512xf32, #tpu.memory_space<vmem>>, %arg4: memref<512x512xf32, #tpu.memory_space<vmem>>, %arg5: memref<1x512xf32, #tpu.memory_space<vmem>>, %arg6: memref<512x512xf32, #tpu.memory_space<vmem>>, %arg7: memref<1x512xf32, #tpu.memory_space<vmem>>, %arg8: memref<8x512xf32, #tpu.memory_space<vmem>>) attributes {dimension_semantics = [#tpu.dimension_semantics<parallel>], iteration_bounds = array<i64: 1>, scalar_prefetch = 0 : i64, scratch_operands = 0 : i64, tpu.core_type = #tpu.core_type<tc>, window_params = [{transform_indices = @transform_0, window_bounds = array<i64: 8, 1024>}, {pipeline_mode = #tpu.pipeline_mode<synchronous>, transform_indices = @transform_1, window_bounds = array<i64: 1024, 512>}, {pipeline_mode = #tpu.pipeline_mode<synchronous>, transform_indices = @transform_2, window_bounds = array<i64: 1, 512>}, {pipeline_mode = #tpu.pipeline_mode<synchronous>, transform_indices = @transform_3, window_bounds = array<i64: 512, 512>}, {pipeline_mode = #tpu.pipeline_mode<synchronous>, transform_indices = @transform_4, window_bounds = array<i64: 1, 512>}, {pipeline_mode = #tpu.pipeline_mode<synchronous>, transform_indices = @transform_5, window_bounds = array<i64: 512, 512>}, {pipeline_mode = #tpu.pipeline_mode<synchronous>, transform_indices = @transform_6, window_bounds = array<i64: 1, 512>}, {transform_indices = @transform_7, window_bounds = array<i64: 8, 512>}]} {
    %c0 = arith.constant 0 : index
    %c0_0 = arith.constant 0 : index
    %0 = vector.load %arg1[%c0, %c0_0] : memref<8x1024xf32, #tpu.memory_space<vmem>>, vector<8x1024xf32>
    %c0_1 = arith.constant 0 : index
    %c0_2 = arith.constant 0 : index
    %1 = vector.load %arg2[%c0_1, %c0_2] : memref<1024x512xf32, #tpu.memory_space<vmem>>, vector<1024x512xf32>
    %cst = arith.constant dense<0.000000e+00> : vector<8x512xf32>
    %2 = tpu.matmul %0, %1, %cst {dimension_numbers = #tpu.dot_dimension_numbers<[1], [0], [0], [1], [0, 0, 1, 1], [], []>} : vector<8x1024xf32>, vector<1024x512xf32>, vector<8x512xf32> -> vector<8x512xf32>
    %c0_3 = arith.constant 0 : index
    %c0_4 = arith.constant 0 : index
    %3 = vector.load %arg3[%c0_3, %c0_4] : memref<1x512xf32, #tpu.memory_space<vmem>>, vector<1x512xf32>
    %4 = vector.broadcast %3 : vector<1x512xf32> to vector<8x512xf32>
    %5 = arith.addf %2, %4 : vector<8x512xf32>
    %cst_5 = arith.constant 1.000000e-01 : f32
    %6 = vector.broadcast %cst_5 : f32 to vector<8x512xf32>
    %7 = arith.mulf %6, %5 : vector<8x512xf32>
    %8 = arith.maximumf %5, %7 : vector<8x512xf32>
    %c0_6 = arith.constant 0 : index
    %c0_7 = arith.constant 0 : index
    %9 = vector.load %arg4[%c0_6, %c0_7] : memref<512x512xf32, #tpu.memory_space<vmem>>, vector<512x512xf32>
    %cst_8 = arith.constant dense<0.000000e+00> : vector<8x512xf32>
    %10 = tpu.matmul %8, %9, %cst_8 {dimension_numbers = #tpu.dot_dimension_numbers<[1], [0], [0], [1], [0, 0, 1, 1], [], []>} : vector<8x512xf32>, vector<512x512xf32>, vector<8x512xf32> -> vector<8x512xf32>
    %c0_9 = arith.constant 0 : index
    %c0_10 = arith.constant 0 : index
    %11 = vector.load %arg5[%c0_9, %c0_10] : memref<1x512xf32, #tpu.memory_space<vmem>>, vector<1x512xf32>
    %12 = vector.broadcast %11 : vector<1x512xf32> to vector<8x512xf32>
    %13 = arith.addf %10, %12 : vector<8x512xf32>
    %cst_11 = arith.constant 1.000000e-01 : f32
    %14 = vector.broadcast %cst_11 : f32 to vector<8x512xf32>
    %15 = arith.mulf %14, %13 : vector<8x512xf32>
    %16 = arith.maximumf %13, %15 : vector<8x512xf32>
    %c0_12 = arith.constant 0 : index
    %c0_13 = arith.constant 0 : index
    %17 = vector.load %arg6[%c0_12, %c0_13] : memref<512x512xf32, #tpu.memory_space<vmem>>, vector<512x512xf32>
    %cst_14 = arith.constant dense<0.000000e+00> : vector<8x512xf32>
    %18 = tpu.matmul %16, %17, %cst_14 {dimension_numbers = #tpu.dot_dimension_numbers<[1], [0], [0], [1], [0, 0, 1, 1], [], []>} : vector<8x512xf32>, vector<512x512xf32>, vector<8x512xf32> -> vector<8x512xf32>
    %c0_15 = arith.constant 0 : index
    %c0_16 = arith.constant 0 : index
    %19 = vector.load %arg7[%c0_15, %c0_16] : memref<1x512xf32, #tpu.memory_space<vmem>>, vector<1x512xf32>
    %20 = vector.broadcast %19 : vector<1x512xf32> to vector<8x512xf32>
    %21 = arith.addf %18, %20 : vector<8x512xf32>
    %c0_17 = arith.constant 0 : index
    %c0_18 = arith.constant 0 : index
    %22 = vector.load %arg8[%c0_17, %c0_18] : memref<8x512xf32, #tpu.memory_space<vmem>>, vector<8x512xf32>
    tpu.vector_store %arg8[%c0_17, %c0_18], %21 {strides = array<i32>} : memref<8x512xf32, #tpu.memory_space<vmem>>, vector<8x512xf32>,
    return
  }
  func.func @transform_0(%arg0: i32) -> (i32, i32) {
    %c0_i32 = arith.constant 0 : i32
    %c0_i32_0 = arith.constant 0 : i32
    return %arg0, %c0_i32 : i32, i32
  }
  func.func @transform_1(%arg0: i32) -> (i32, i32) {
    %c0_i32 = arith.constant 0 : i32
    %c0_i32_0 = arith.constant 0 : i32
    %c0_i32_1 = arith.constant 0 : i32
    return %c0_i32, %c0_i32_0 : i32, i32
  }
  func.func @transform_2(%arg0: i32) -> (i32, i32) {
    %c0_i32 = arith.constant 0 : i32
    %c0_i32_0 = arith.constant 0 : i32
    %c0_i32_1 = arith.constant 0 : i32
    return %c0_i32, %c0_i32_0 : i32, i32
  }
  func.func @transform_3(%arg0: i32) -> (i32, i32) {
    %c0_i32 = arith.constant 0 : i32
    %c0_i32_0 = arith.constant 0 : i32
    %c0_i32_1 = arith.constant 0 : i32
    return %c0_i32, %c0_i32_0 : i32, i32
  }
  func.func @transform_4(%arg0: i32) -> (i32, i32) {
    %c0_i32 = arith.constant 0 : i32
    %c0_i32_0 = arith.constant 0 : i32
    %c0_i32_1 = arith.constant 0 : i32
    return %c0_i32, %c0_i32_0 : i32, i32
  }
  func.func @transform_5(%arg0: i32) -> (i32, i32) {
    %c0_i32 = arith.constant 0 : i32
    %c0_i32_0 = arith.constant 0 : i32
    %c0_i32_1 = arith.constant 0 : i32
    return %c0_i32, %c0_i32_0 : i32, i32
  }
  func.func @transform_6(%arg0: i32) -> (i32, i32) {
    %c0_i32 = arith.constant 0 : i32
    %c0_i32_0 = arith.constant 0 : i32
    %c0_i32_1 = arith.constant 0 : i32
    return %c0_i32, %c0_i32_0 : i32, i32
  }
  func.func @transform_7(%arg0: i32) -> (i32, i32) {
    %c0_i32 = arith.constant 0 : i32
    %c0_i32_0 = arith.constant 0 : i32
    return %arg0, %c0_i32 : i32, i32
  }
}

module attributes {stable_mosaic.version = 11 : i64} {
  func.func @_mlp_kernel_single_k(%arg0: i32, %arg1: memref<8x1024xf32, #tpu.memory_space<vmem>>, %arg2: memref<1024x512xf32, #tpu.memory_space<vmem>>, %arg3: memref<1x512xf32, #tpu.memory_space<vmem>>, %arg4: memref<512x512xf32, #tpu.memory_space<vmem>>, %arg5: memref<1x512xf32, #tpu.memory_space<vmem>>, %arg6: memref<512x512xf32, #tpu.memory_space<vmem>>, %arg7: memref<1x512xf32, #tpu.memory_space<vmem>>, %arg8: memref<8x512xf32, #tpu.memory_space<vmem>>) attributes {dimension_semantics = [#tpu.dimension_semantics<parallel>], iteration_bounds = array<i64: 1>, scalar_prefetch = 0 : i64, scratch_operands = 0 : i64, tpu.core_type = #tpu.core_type<tc>, window_params = [{transform_indices = @transform_0, window_bounds = array<i64: 8, 1024>}, {pipeline_mode = #tpu.pipeline_mode<synchronous>, transform_indices = @transform_1, window_bounds = array<i64: 1024, 512>}, {pipeline_mode = #tpu.pipeline_mode<synchronous>, transform_indices = @transform_2, window_bounds = array<i64: 1, 512>}, {pipeline_mode = #tpu.pipeline_mode<synchronous>, transform_indices = @transform_3, window_bounds = array<i64: 512, 512>}, {pipeline_mode = #tpu.pipeline_mode<synchronous>, transform_indices = @transform_4, window_bounds = array<i64: 1, 512>}, {pipeline_mode = #tpu.pipeline_mode<synchronous>, transform_indices = @transform_5, window_bounds = array<i64: 512, 512>}, {pipeline_mode = #tpu.pipeline_mode<synchronous>, transform_indices = @transform_6, window_bounds = array<i64: 1, 512>}, {transform_indices = @transform_7, window_bounds = array<i64: 8, 512>}]} {
    %c0 = arith.constant 0 : index
    %c0_0 = arith.constant 0 : index
    %0 = vector.load %arg1[%c0, %c0_0] : memref<8x1024xf32, #tpu.memory_space<vmem>>, vector<8x1024xf32>
    %c0_1 = arith.constant 0 : index
    %c0_2 = arith.constant 0 : index
    %1 = vector.load %arg2[%c0_1, %c0_2] : memref<1024x512xf32, #tpu.memory_space<vmem>>, vector<1024x512xf32>
    %cst = arith.constant dense<0.000000e+00> : vector<8x512xf32>
    %2 = tpu.matmul %0, %1, %cst {dimension_numbers = #tpu.dot_dimension_numbers<[1], [0], [0], [1], [0, 0, 1, 1], [], []>} : vector<8x1024xf32>, vector<1024x512xf32>, vector<8x512xf32> -> vector<8x512xf32>
    %c0_3 = arith.constant 0 : index
    %c0_4 = arith.constant 0 : index
    %3 = vector.load %arg3[%c0_3, %c0_4] : memref<1x512xf32, #tpu.memory_space<vmem>>, vector<1x512xf32>
    %4 = vector.broadcast %3 : vector<1x512xf32> to vector<8x512xf32>
    %5 = arith.addf %2, %4 : vector<8x512xf32>
    %cst_5 = arith.constant 1.000000e-01 : f32
    %6 = vector.broadcast %cst_5 : f32 to vector<8x512xf32>
    %7 = arith.mulf %6, %5 : vector<8x512xf32>
    %8 = arith.maximumf %5, %7 : vector<8x512xf32>
    %c0_6 = arith.constant 0 : index
    %c0_7 = arith.constant 0 : index
    %9 = vector.load %arg4[%c0_6, %c0_7] : memref<512x512xf32, #tpu.memory_space<vmem>>, vector<512x512xf32>
    %cst_8 = arith.constant dense<0.000000e+00> : vector<8x512xf32>
    %10 = tpu.matmul %8, %9, %cst_8 {dimension_numbers = #tpu.dot_dimension_numbers<[1], [0], [0], [1], [0, 0, 1, 1], [], []>} : vector<8x512xf32>, vector<512x512xf32>, vector<8x512xf32> -> vector<8x512xf32>
    %c0_9 = arith.constant 0 : index
    %c0_10 = arith.constant 0 : index
    %11 = vector.load %arg5[%c0_9, %c0_10] : memref<1x512xf32, #tpu.memory_space<vmem>>, vector<1x512xf32>
    %12 = vector.broadcast %11 : vector<1x512xf32> to vector<8x512xf32>
    %13 = arith.addf %10, %12 : vector<8x512xf32>
    %cst_11 = arith.constant 1.000000e-01 : f32
    %14 = vector.broadcast %cst_11 : f32 to vector<8x512xf32>
    %15 = arith.mulf %14, %13 : vector<8x512xf32>
    %16 = arith.maximumf %13, %15 : vector<8x512xf32>
    %c0_12 = arith.constant 0 : index
    %c0_13 = arith.constant 0 : index
    %17 = vector.load %arg6[%c0_12, %c0_13] : memref<512x512xf32, #tpu.memory_space<vmem>>, vector<512x512xf32>
    %cst_14 = arith.constant dense<0.000000e+00> : vector<8x512xf32>
    %18 = tpu.matmul %16, %17, %cst_14 {dimension_numbers = #tpu.dot_dimension_numbers<[1], [0], [0], [1], [0, 0, 1, 1], [], []>} : vector<8x512xf32>, vector<512x512xf32>, vector<8x512xf32> -> vector<8x512xf32>
    %c0_15 = arith.constant 0 : index
    %c0_16 = arith.constant 0 : index
    %19 = vector.load %arg7[%c0_15, %c0_16] : memref<1x512xf32, #tpu.memory_space<vmem>>, vector<1x512xf32>
    %20 = vector.broadcast %19 : vector<1x512xf32> to vector<8x512xf32>
    %21 = arith.addf %18, %20 : vector<8x512xf32>
    %c0_17 = arith.constant 0 : index
    %c0_18 = arith.constant 0 : index
    %22 = vector.load %arg8[%c0_17, %c0_18] : memref<8x512xf32, #tpu.memory_space<vmem>>, vector<8x512xf32>
    tpu.vector_store %arg8[%c0_17, %c0_18], %21 {strides = array<i32>} : memref<8x512xf32, #tpu.memory_space<vmem>>, vector<8x512xf32>,
    return
  }
  func.func @transform_0(%arg0: i32) -> (i32, i32) {
    %c0_i32 = arith.constant 0 : i32
    %c0_i32_0 = arith.constant 0 : i32
    return %arg0, %c0_i32 : i32, i32
  }
  func.func @transform_1(%arg0: i32) -> (i32, i32) {
    %c0_i32 = arith.constant 0 : i32
    %c0_i32_0 = arith.constant 0 : i32
    %c0_i32_1 = arith.constant 0 : i32
    return %c0_i32, %c0_i32_0 : i32, i32
  }
  func.func @transform_2(%arg0: i32) -> (i32, i32) {
    %c0_i32 = arith.constant 0 : i32
    %c0_i32_0 = arith.constant 0 : i32
    %c0_i32_1 = arith.constant 0 : i32
    return %c0_i32, %c0_i32_0 : i32, i32
  }
  func.func @transform_3(%arg0: i32) -> (i32, i32) {
    %c0_i32 = arith.constant 0 : i32
    %c0_i32_0 = arith.constant 0 : i32
    %c0_i32_1 = arith.constant 0 : i32
    return %c0_i32, %c0_i32_0 : i32, i32
  }
  func.func @transform_4(%arg0: i32) -> (i32, i32) {
    %c0_i32 = arith.constant 0 : i32
    %c0_i32_0 = arith.constant 0 : i32
    %c0_i32_1 = arith.constant 0 : i32
    return %c0_i32, %c0_i32_0 : i32, i32
  }
  func.func @transform_5(%arg0: i32) -> (i32, i32) {
    %c0_i32 = arith.constant 0 : i32
    %c0_i32_0 = arith.constant 0 : i32
    %c0_i32_1 = arith.constant 0 : i32
    return %c0_i32, %c0_i32_0 : i32, i32
  }
  func.func @transform_6(%arg0: i32) -> (i32, i32) {
    %c0_i32 = arith.constant 0 : i32
    %c0_i32_0 = arith.constant 0 : i32
    %c0_i32_1 = arith.constant 0 : i32
    return %c0_i32, %c0_i32_0 : i32, i32
  }
  func.func @transform_7(%arg0: i32) -> (i32, i32) {
    %c0_i32 = arith.constant 0 : i32
    %c0_i32_0 = arith.constant 0 : i32
    return %arg0, %c0_i32 : i32, i32
  }
}

</mosaic_0001>

<bundles_post_ra>
// kernel: tpu_custom_call.1
= control target key start
LH: loop header
LB: loop body
LE: loop exit
PB: predicated region body
PF: predicated region fallthrough
CT: control target
= control target key end

     0   :  { %12 = vsyncpa [#allocation3], 0  ;;  %s2952_s0 = inlined_call_operand.hbm [shape: f32[8,1024], index: 0, kind: input, shape index: {}]   ;;  %s2953_s1 = inlined_call_operand.hbm [shape: f32[1024,512], index: 1, kind: input, shape index: {}]   ;;  %s2954_s2 = inlined_call_operand.hbm [shape: f32[1,512], index: 2, kind: input, shape index: {}]   ;;  %s2955_s3 = inlined_call_operand.hbm [shape: f32[512,512], index: 3, kind: input, shape index: {}]   ;;  %s2956_s4 = inlined_call_operand.hbm [shape: f32[1,512], index: 4, kind: input, shape index: {}]   ;;  %s2957_s5 = inlined_call_operand.hbm [shape: f32[512,512], index: 5, kind: input, shape index: {}]   ;;  %s2958_s6 = inlined_call_operand.hbm [shape: f32[1,512], index: 6, kind: input, shape index: {}]   ;;  %s2959_s7 = inlined_call_operand.hbm [shape: f32[8,512], index: 7, kind: output, shape index: {}]  }
   0x1   :  { %13 = vsyncpa [#allocation6], 0 }
   0x2   :  { %14 = vsyncpa [#allocation9], 0 }
   0x3   :  { %15 = vsyncpa [#allocation12], 0  ;;  %s32_s26 = sshll.u32 %s2953_s1, 4  ;;  %s33_s26 = int_to_ptr.hbm [resolvable:$true] %s32_s26 }
   0x4   :  { %16 = vsyncpa [#allocation4], 0  ;;  %s2730_s27 = smov [#allocation5]   ;;  %s56_s8 = sshll.u32 %s2955_s3, 4  ;;  %s57_s8 = int_to_ptr.hbm [resolvable:$true] %s56_s8 }
   0x5   :  { %s34_s28 = sshll.u32 %s2730_s27, 4  ;;  %s2731_s9 = smov 512   ;;  %s35_s28 = int_to_ptr.vmem [resolvable:$true] %s34_s28 }
   0x6   :  { %s2732_s10 = smov 32   ;;  %s2733_s11 = smov [#allocation8]  }
   0x7   :  { %40 = dma.hbm_to_vmem [thread:$0]  %s33_s26, 65536, %s35_s28, [#allocation6], %s2731_s9, %s2731_s9, %s2732_s10  }
   0x8   :  { %s58_s12 = sshll.u32 %s2733_s11, 4  ;;  %s80_s15 = sshll.u32 %s2957_s5, 4  ;;  %s59_s12 = int_to_ptr.vmem [resolvable:$true] %s58_s12  ;;  %s81_s15 = int_to_ptr.hbm [resolvable:$true] %s80_s15 }
   0x9   :  { %64 = dma.hbm_to_vmem [thread:$0]  %s57_s8, 32768, %s59_s12, [#allocation9], %s2731_s9, %s2731_s9, %s2732_s10  }
   0xa   :  { %s22_s17 = sshll.u32 %s2952_s0, 4  ;;  %s2734_s18 = smov [#allocation11]   ;;  %s23_s17 = int_to_ptr.hbm [resolvable:$true] %s22_s17 }
   0xb   :  { %s82_s19 = sshll.u32 %s2734_s18, 4  ;;  %s2735_s3 = smov [#allocation2]   ;;  %s83_s19 = int_to_ptr.vmem [resolvable:$true] %s82_s19 }
   0xc   :  { %88 = dma.hbm_to_vmem [thread:$0]  %s81_s15, 32768, %s83_s19, [#allocation12], %s2731_s9, %s2731_s9, %s2732_s10  }
   0xd   :  { %s24_s20 = sshll.u32 %s2735_s3, 4  ;;  %s46_s23 = sshll.u32 %s2954_s2, 4  ;;  %s25_s20 = int_to_ptr.vmem [resolvable:$true] %s24_s20  ;;  %s47_s23 = int_to_ptr.hbm [resolvable:$true] %s46_s23 }
   0xe   :  { %27 = dma.hbm_to_vmem [thread:$0]  %s23_s17, 1024, %s25_s20, [#allocation3]  }
   0xf   :  { %s70_s25 = sshll.u32 %s2956_s4, 4  ;;  %s2736_s26 = smov [#allocation7]   ;;  %s71_s25 = int_to_ptr.hbm [resolvable:$true] %s70_s25 }
  0x10   :  { %s48_s0 = sshll.u32 %s2736_s26, 4  ;;  %s2737_s27 = smov [#allocation10]   ;;  %s49_s0 = int_to_ptr.vmem [resolvable:$true] %s48_s0 }
  0x11   :  { %51 = dma.hbm_to_vmem [thread:$0]  %s47_s23, 64, %s49_s0, [#allocation6]  }
  0x12   :  { %s72_s28 = sshll.u32 %s2737_s27, 4  ;;  %s94_s8 = sshll.u32 %s2958_s6, 4  ;;  %s73_s28 = int_to_ptr.vmem [resolvable:$true] %s72_s28  ;;  %s95_s8 = int_to_ptr.hbm [resolvable:$true] %s94_s8 }
  0x13   :  { %75 = dma.hbm_to_vmem [thread:$0]  %s71_s25, 64, %s73_s28, [#allocation9]  }
  0x14   :  { %s2738_s2 = smov [#allocation13]  }
  0x15   :  { %s96_s9 = sshll.u32 %s2738_s2, 4  ;;  %s97_s9 = int_to_ptr.vmem [resolvable:$true] %s96_s9 }
  0x16   :  { %99 = dma.hbm_to_vmem [thread:$0]  %s95_s8, 64, %s97_s9, [#allocation12]  }
  0x17   :  { %2720 = dma.done.wait [#allocation3], 1024  }
  0x18   :  { %2721 = vsyncadd [#allocation3], 4294966272 }
  0x19   :  { %2722 = dma.done.wait [#allocation6], 65600  }
  0x1a   :  { %2723 = vsyncadd [#allocation6], 4294901696 }
  0x1b   :  { %2724 = dma.done.wait [#allocation9], 32832  }
  0x1c   :  { %2725 = vsyncadd [#allocation9], 4294934464 }
  0x1d   :  { %2726 = dma.done.wait [#allocation12], 32832  }
  0x1e   :  { %2727 = vsyncadd [#allocation12], 4294934464  ;;  %v196_v0 = vld [vmem:[#allocation5 + $0x1e0] sm:$0xff]  ;;  %s2739_s4 = smov [#allocation14]   ;;  %s2497_s12 = sshll.u32 %s2959_s7, 4  ;;  %s2498_s12 = int_to_ptr.hbm [resolvable:$true] %s2497_s12 }
  0x1f   :  { %v260_v1 = vld [vmem:[#allocation5 + $0x3e0] sm:$0xff]  ;;  %658 = vmatpush.msra.mxu0 %v196_v0  ;;  %s2495_s6 = sshll.u32 %s2739_s4, 4  ;;  %s2496_s6 = int_to_ptr.vmem [resolvable:$true] %s2495_s6 }
  0x20   :  { %v324_v2 = vld [vmem:[#allocation5 + $0x5e0] sm:$0xff]  ;;  %678 = vmatpush.msra.mxu1 %v260_v1 }
  0x21   :  { %v192_v3 = vld [vmem:[#allocation5 + $0x1c0] sm:$0xff]  ;;  %698 = vmatpush.msra.mxu2 %v324_v2 }
  0x22   :  { %v256_v4 = vld [vmem:[#allocation5 + $0x3c0] sm:$0xff]  ;;  %659 = vmatpush.msra.mxu0 %v192_v3 }
  0x23   :  { %v320_v5 = vld [vmem:[#allocation5 + $0x5c0] sm:$0xff]  ;;  %679 = vmatpush.msra.mxu1 %v256_v4 }
  0x24   :  { %v388_v6 = vld [vmem:[#allocation5 + $0x7e0] sm:$0xff]  ;;  %699 = vmatpush.msra.mxu2 %v320_v5 }
  0x25   :  { %v188_v7 = vld [vmem:[#allocation5 + $0x1a0] sm:$0xff]  ;;  %718 = vmatpush.msra.mxu3 %v388_v6 }
  0x26   :  { %v252_v8 = vld [vmem:[#allocation5 + $0x3a0] sm:$0xff]  ;;  %660 = vmatpush.msra.mxu0 %v188_v7 }
  0x27   :  { %v316_v9 = vld [vmem:[#allocation5 + $0x5a0] sm:$0xff]  ;;  %680 = vmatpush.msra.mxu1 %v252_v8 }
  0x28   :  { %v384_v10 = vld [vmem:[#allocation5 + $0x7c0] sm:$0xff]  ;;  %700 = vmatpush.msra.mxu2 %v316_v9 }
  0x29   :  { %v184_v11 = vld [vmem:[#allocation5 + $0x180] sm:$0xff]  ;;  %719 = vmatpush.msra.mxu3 %v384_v10 }
  0x2a   :  { %v248_v12 = vld [vmem:[#allocation5 + $0x380] sm:$0xff]  ;;  %661 = vmatpush.msra.mxu0 %v184_v11 }
  0x2b   :  { %v312_v13 = vld [vmem:[#allocation5 + $0x580] sm:$0xff]  ;;  %681 = vmatpush.msra.mxu1 %v248_v12 }
  0x2c   :  { %v380_v14 = vld [vmem:[#allocation5 + $0x7a0] sm:$0xff]  ;;  %701 = vmatpush.msra.mxu2 %v312_v13 }
  0x2d   :  { %v180_v15 = vld [vmem:[#allocation5 + $0x160] sm:$0xff]  ;;  %720 = vmatpush.msra.mxu3 %v380_v14 }
  0x2e   :  { %v244_v16 = vld [vmem:[#allocation5 + $0x360] sm:$0xff]  ;;  %662 = vmatpush.msra.mxu0 %v180_v15 }
  0x2f   :  { %v308_v17 = vld [vmem:[#allocation5 + $0x560] sm:$0xff]  ;;  %682 = vmatpush.msra.mxu1 %v244_v16 }
  0x30   :  { %v376_v18 = vld [vmem:[#allocation5 + $0x780] sm:$0xff]  ;;  %702 = vmatpush.msra.mxu2 %v308_v17 }
  0x31   :  { %v176_v19 = vld [vmem:[#allocation5 + $0x140] sm:$0xff]  ;;  %721 = vmatpush.msra.mxu3 %v376_v18 }
  0x32   :  { %v240_v20 = vld [vmem:[#allocation5 + $0x340] sm:$0xff]  ;;  %663 = vmatpush.msra.mxu0 %v176_v19 }
  0x33   :  { %v304_v21 = vld [vmem:[#allocation5 + $0x540] sm:$0xff]  ;;  %683 = vmatpush.msra.mxu1 %v240_v20 }
  0x34   :  { %v372_v22 = vld [vmem:[#allocation5 + $0x760] sm:$0xff]  ;;  %703 = vmatpush.msra.mxu2 %v304_v21 }
  0x35   :  { %v172_v23 = vld [vmem:[#allocation5 + $0x120] sm:$0xff]  ;;  %722 = vmatpush.msra.mxu3 %v372_v22 }
  0x36   :  { %v236_v24 = vld [vmem:[#allocation5 + $0x320] sm:$0xff]  ;;  %664 = vmatpush.msra.mxu0 %v172_v23 }
  0x37   :  { %v300_v25 = vld [vmem:[#allocation5 + $0x520] sm:$0xff]  ;;  %684 = vmatpush.msra.mxu1 %v236_v24 }
  0x38   :  { %v368_v26 = vld [vmem:[#allocation5 + $0x740] sm:$0xff]  ;;  %704 = vmatpush.msra.mxu2 %v300_v25 }
  0x39   :  { %v168_v27 = vld [vmem:[#allocation5 + $0x100] sm:$0xff]  ;;  %723 = vmatpush.msra.mxu3 %v368_v26 }
  0x3a   :  { %v232_v28 = vld [vmem:[#allocation5 + $0x300] sm:$0xff]  ;;  %665 = vmatpush.msra.mxu0 %v168_v27 }
  0x3b   :  { %v296_v29 = vld [vmem:[#allocation5 + $0x500] sm:$0xff]  ;;  %685 = vmatpush.msra.mxu1 %v232_v28 }
  0x3c   :  { %v364_v30 = vld [vmem:[#allocation5 + $0x720] sm:$0xff]  ;;  %705 = vmatpush.msra.mxu2 %v296_v29 }
  0x3d   :  { %v164_v31 = vld [vmem:[#allocation5 + $0xe0] sm:$0xff]  ;;  %724 = vmatpush.msra.mxu3 %v364_v30 }
  0x3e   :  { %v228_v32 = vld [vmem:[#allocation5 + $0x2e0] sm:$0xff]  ;;  %666 = vmatpush.msra.mxu0 %v164_v31 }
  0x3f   :  { %v292_v33 = vld [vmem:[#allocation5 + $0x4e0] sm:$0xff]  ;;  %686 = vmatpush.msra.mxu1 %v228_v32 }
  0x40   :  { %v360_v34 = vld [vmem:[#allocation5 + $0x700] sm:$0xff]  ;;  %706 = vmatpush.msra.mxu2 %v292_v33 }
  0x41   :  { %v160_v35 = vld [vmem:[#allocation5 + $0xc0] sm:$0xff]  ;;  %725 = vmatpush.msra.mxu3 %v360_v34 }
  0x42   :  { %v224_v36 = vld [vmem:[#allocation5 + $0x2c0] sm:$0xff]  ;;  %667 = vmatpush.msra.mxu0 %v160_v35 }
  0x43   :  { %v288_v37 = vld [vmem:[#allocation5 + $0x4c0] sm:$0xff]  ;;  %687 = vmatpush.msra.mxu1 %v224_v36 }
  0x44   :  { %v356_v38 = vld [vmem:[#allocation5 + $0x6e0] sm:$0xff]  ;;  %707 = vmatpush.msra.mxu2 %v288_v37 }
  0x45   :  { %v156_v39 = vld [vmem:[#allocation5 + $0xa0] sm:$0xff]  ;;  %726 = vmatpush.msra.mxu3 %v356_v38 }
  0x46   :  { %v220_v40 = vld [vmem:[#allocation5 + $0x2a0] sm:$0xff]  ;;  %668 = vmatpush.msra.mxu0 %v156_v39 }
  0x47   :  { %v284_v41 = vld [vmem:[#allocation5 + $0x4a0] sm:$0xff]  ;;  %688 = vmatpush.msra.mxu1 %v220_v40 }
  0x48   :  { %v352_v42 = vld [vmem:[#allocation5 + $0x6c0] sm:$0xff]  ;;  %708 = vmatpush.msra.mxu2 %v284_v41 }
  0x49   :  { %v152_v43 = vld [vmem:[#allocation5 + $0x80] sm:$0xff]  ;;  %727 = vmatpush.msra.mxu3 %v352_v42 }
  0x4a   :  { %v216_v44 = vld [vmem:[#allocation5 + $0x280] sm:$0xff]  ;;  %669 = vmatpush.msra.mxu0 %v152_v43 }
  0x4b   :  { %v280_v45 = vld [vmem:[#allocation5 + $0x480] sm:$0xff]  ;;  %689 = vmatpush.msra.mxu1 %v216_v44 }
  0x4c   :  { %v348_v46 = vld [vmem:[#allocation5 + $0x6a0] sm:$0xff]  ;;  %709 = vmatpush.msra.mxu2 %v280_v45 }
  0x4d   :  { %v148_v47 = vld [vmem:[#allocation5 + $0x60] sm:$0xff]  ;;  %728 = vmatpush.msra.mxu3 %v348_v46 }
  0x4e   :  { %v212_v48 = vld [vmem:[#allocation5 + $0x260] sm:$0xff]  ;;  %670 = vmatpush.msra.mxu0 %v148_v47 }
  0x4f   :  { %v276_v49 = vld [vmem:[#allocation5 + $0x460] sm:$0xff]  ;;  %690 = vmatpush.msra.mxu1 %v212_v48 }
  0x50   :  { %v344_v50 = vld [vmem:[#allocation5 + $0x680] sm:$0xff]  ;;  %710 = vmatpush.msra.mxu2 %v276_v49 }
  0x51   :  { %v144_v51 = vld [vmem:[#allocation5 + $0x40] sm:$0xff]  ;;  %729 = vmatpush.msra.mxu3 %v344_v50 }
  0x52   :  { %v208_v52 = vld [vmem:[#allocation5 + $0x240] sm:$0xff]  ;;  %671 = vmatpush.msra.mxu0 %v144_v51 }
  0x53   :  { %v272_v53 = vld [vmem:[#allocation5 + $0x440] sm:$0xff]  ;;  %691 = vmatpush.msra.mxu1 %v208_v52 }
  0x54   :  { %v340_v54 = vld [vmem:[#allocation5 + $0x660] sm:$0xff]  ;;  %711 = vmatpush.msra.mxu2 %v272_v53 }
  0x55   :  { %v140_v55 = vld [vmem:[#allocation5 + $0x20] sm:$0xff]  ;;  %730 = vmatpush.msra.mxu3 %v340_v54 }
  0x56   :  { %v204_v56 = vld [vmem:[#allocation5 + $0x220] sm:$0xff]  ;;  %672 = vmatpush.msra.mxu0 %v140_v55 }
  0x57   :  { %v268_v57 = vld [vmem:[#allocation5 + $0x420] sm:$0xff]  ;;  %692 = vmatpush.msra.mxu1 %v204_v56 }
  0x58   :  { %v336_v58 = vld [vmem:[#allocation5 + $0x640] sm:$0xff]  ;;  %712 = vmatpush.msra.mxu2 %v268_v57 }
  0x59   :  { %v136_v59 = vld [vmem:[#allocation5] sm:$0xff]  ;;  %731 = vmatpush.msra.mxu3 %v336_v58 }
  0x5a   :  { %v200_v60 = vld [vmem:[#allocation5 + $0x200] sm:$0xff]  ;;  %673 = vmatpush.msra.mxu0 %v136_v59  ;;  %v2801_v59 = vld [vmem:[#allocation2 + $0x10] sm:$0xff] }
  0x5b   :  { %v264_v61 = vld [vmem:[#allocation5 + $0x400] sm:$0xff]  ;;  %693 = vmatpush.msra.mxu1 %v200_v60 }
  0x5c   :  { %v332_v62 = vld [vmem:[#allocation5 + $0x620] sm:$0xff]  ;;  %713 = vmatpush.msra.mxu2 %v264_v61 }
  0x5d   :  { %v452_v63 = vld [vmem:[#allocation5 + $0x9e0] sm:$0xff]  ;;  %732 = vmatpush.msra.mxu3 %v332_v62  ;;  %714 = vmatmul.f32.vlgmr.msra.gmra.mxu2 %v2801_v59 }
  0x5e   :  { %v516_v0 = vld [vmem:[#allocation5 + $0xbe0] sm:$0xff]  ;;  %738 = vmatpush.msrb.mxu0 %v452_v63 }
  0x5f   :  { %v580_v1 = vld [vmem:[#allocation5 + $0xde0] sm:$0xff]  ;;  %758 = vmatpush.msrb.mxu1 %v516_v0 }
  0x60   :  { %v328_v2 = vld [vmem:[#allocation5 + $0x600] sm:$0xff]  ;;  %778 = vmatpush.msrb.mxu2 %v580_v1  ;;  %v2806_v1 = vld [vmem:[#allocation2 + $0x8] sm:$0xff] }
  0x61   :  { %v448_v3 = vld [vmem:[#allocation5 + $0x9c0] sm:$0xff]  ;;  %733 = vmatpush.msra.mxu3 %v328_v2  ;;  %v2808_v2 = vld [vmem:[#allocation2 + $0x18] sm:$0xff]  ;;  %694 = vmatmul.f32.vlgmr.msra.gmra.mxu1 %v2806_v1 }
  0x62   :  { %v512_v4 = vld [vmem:[#allocation5 + $0xbc0] sm:$0xff]  ;;  %739 = vmatpush.msrb.mxu0 %v448_v3  ;;  %v197_v3 = vld [vmem:[#allocation5 + $0x1e8] sm:$0xff]  ;;  %734 = vmatmul.f32.vlgmr.msra.gmra.mxu3 %v2808_v2 }
  0x63   :  { %v576_v5 = vld [vmem:[#allocation5 + $0xdc0] sm:$0xff]  ;;  %759 = vmatpush.msrb.mxu1 %v512_v4  ;;  %v261_v4 = vld [vmem:[#allocation5 + $0x3e8] sm:$0xff] }
  0x64   :  { %v644_v6 = vld [vmem:[#allocation5 + $0xfe0] sm:$0xff]  ;;  %779 = vmatpush.msrb.mxu2 %v576_v5  ;;  %v325_v5 = vld [vmem:[#allocation5 + $0x5e8] sm:$0xff] }
  0x65   :  { %v444_v7 = vld [vmem:[#allocation5 + $0x9a0] sm:$0xff]  ;;  %798 = vmatpush.msrb.mxu3 %v644_v6 }
  0x66   :  { %v508_v8 = vld [vmem:[#allocation5 + $0xba0] sm:$0xff]  ;;  %740 = vmatpush.msrb.mxu0 %v444_v7  ;;  %v193_v7 = vld [vmem:[#allocation5 + $0x1c8] sm:$0xff] }
  0x67   :  { %v572_v9 = vld [vmem:[#allocation5 + $0xda0] sm:$0xff]  ;;  %760 = vmatpush.msrb.mxu1 %v508_v8  ;;  %v257_v8 = vld [vmem:[#allocation5 + $0x3c8] sm:$0xff] }
  0x68   :  { %v640_v10 = vld [vmem:[#allocation5 + $0xfc0] sm:$0xff]  ;;  %780 = vmatpush.msrb.mxu2 %v572_v9  ;;  %v321_v9 = vld [vmem:[#allocation5 + $0x5c8] sm:$0xff] }
  0x69   :  { %v440_v11 = vld [vmem:[#allocation5 + $0x980] sm:$0xff]  ;;  %799 = vmatpush.msrb.mxu3 %v640_v10  ;;  %v389_v10 = vld [vmem:[#allocation5 + $0x7e8] sm:$0xff] }
  0x6a   :  { %v504_v12 = vld [vmem:[#allocation5 + $0xb80] sm:$0xff]  ;;  %741 = vmatpush.msrb.mxu0 %v440_v11  ;;  %v189_v11 = vld [vmem:[#allocation5 + $0x1a8] sm:$0xff] }
  0x6b   :  { %v568_v13 = vld [vmem:[#allocation5 + $0xd80] sm:$0xff]  ;;  %761 = vmatpush.msrb.mxu1 %v504_v12  ;;  %v253_v12 = vld [vmem:[#allocation5 + $0x3a8] sm:$0xff] }
  0x6c   :  { %v636_v14 = vld [vmem:[#allocation5 + $0xfa0] sm:$0xff]  ;;  %781 = vmatpush.msrb.mxu2 %v568_v13  ;;  %v317_v13 = vld [vmem:[#allocation5 + $0x5a8] sm:$0xff] }
  0x6d   :  { %v436_v15 = vld [vmem:[#allocation5 + $0x960] sm:$0xff]  ;;  %800 = vmatpush.msrb.mxu3 %v636_v14  ;;  %v385_v14 = vld [vmem:[#allocation5 + $0x7c8] sm:$0xff] }
  0x6e   :  { %v500_v16 = vld [vmem:[#allocation5 + $0xb60] sm:$0xff]  ;;  %742 = vmatpush.msrb.mxu0 %v436_v15  ;;  %v2813_v15 = vld [vmem:[#allocation2 + $0x30] sm:$0xff] }
  0x6f   :  { %v564_v17 = vld [vmem:[#allocation5 + $0xd60] sm:$0xff]  ;;  %762 = vmatpush.msrb.mxu1 %v500_v16  ;;  %v185_v16 = vld [vmem:[#allocation5 + $0x188] sm:$0xff] }
  0x70   :  { %v632_v18 = vld [vmem:[#allocation5 + $0xf80] sm:$0xff]  ;;  %782 = vmatpush.msrb.mxu2 %v564_v17  ;;  %v249_v17 = vld [vmem:[#allocation5 + $0x388] sm:$0xff] }
  0x71   :  { %v432_v19 = vld [vmem:[#allocation5 + $0x940] sm:$0xff]  ;;  %801 = vmatpush.msrb.mxu3 %v632_v18  ;;  %v313_v18 = vld [vmem:[#allocation5 + $0x588] sm:$0xff] }
  0x72   :  { %v496_v20 = vld [vmem:[#allocation5 + $0xb40] sm:$0xff]  ;;  %743 = vmatpush.msrb.mxu0 %v432_v19  ;;  %v381_v19 = vld [vmem:[#allocation5 + $0x7a8] sm:$0xff] }
  0x73   :  { %v560_v21 = vld [vmem:[#allocation5 + $0xd40] sm:$0xff]  ;;  %763 = vmatpush.msrb.mxu1 %v496_v20 }
  0x74   :  { %v628_v22 = vld [vmem:[#allocation5 + $0xf60] sm:$0xff]  ;;  %783 = vmatpush.msrb.mxu2 %v560_v21  ;;  %v2818_v21 = vld [vmem:[#allocation2 + $0x38] sm:$0xff] }
  0x75   :  { %v428_v23 = vld [vmem:[#allocation5 + $0x920] sm:$0xff]  ;;  %802 = vmatpush.msrb.mxu3 %v628_v22  ;;  %v181_v22 = vld [vmem:[#allocation5 + $0x168] sm:$0xff] }
  0x76   :  { %v492_v24 = vld [vmem:[#allocation5 + $0xb20] sm:$0xff]  ;;  %744 = vmatpush.msrb.mxu0 %v428_v23  ;;  %v245_v23 = vld [vmem:[#allocation5 + $0x368] sm:$0xff] }
  0x77   :  { %v556_v25 = vld [vmem:[#allocation5 + $0xd20] sm:$0xff]  ;;  %764 = vmatpush.msrb.mxu1 %v492_v24  ;;  %v309_v24 = vld [vmem:[#allocation5 + $0x568] sm:$0xff] }
  0x78   :  { %v624_v26 = vld [vmem:[#allocation5 + $0xf40] sm:$0xff]  ;;  %784 = vmatpush.msrb.mxu2 %v556_v25  ;;  %v377_v25 = vld [vmem:[#allocation5 + $0x788] sm:$0xff] }
  0x79   :  { %v424_v27 = vld [vmem:[#allocation5 + $0x900] sm:$0xff]  ;;  %803 = vmatpush.msrb.mxu3 %v624_v26  ;;  %v2821_v26 = vld [vmem:[#allocation2 + $0x28] sm:$0xff] }
  0x7a   :  { %v488_v28 = vld [vmem:[#allocation5 + $0xb00] sm:$0xff]  ;;  %745 = vmatpush.msrb.mxu0 %v424_v27  ;;  %v177_v27 = vld [vmem:[#allocation5 + $0x148] sm:$0xff] }
  0x7b   :  { %v552_v29 = vld [vmem:[#allocation5 + $0xd00] sm:$0xff]  ;;  %765 = vmatpush.msrb.mxu1 %v488_v28  ;;  %v241_v28 = vld [vmem:[#allocation5 + $0x348] sm:$0xff] }
  0x7c   :  { %v620_v30 = vld [vmem:[#allocation5 + $0xf20] sm:$0xff]  ;;  %785 = vmatpush.msrb.mxu2 %v552_v29  ;;  %v305_v29 = vld [vmem:[#allocation5 + $0x548] sm:$0xff] }
  0x7d   :  { %v420_v31 = vld [vmem:[#allocation5 + $0x8e0] sm:$0xff]  ;;  %804 = vmatpush.msrb.mxu3 %v620_v30  ;;  %v373_v30 = vld [vmem:[#allocation5 + $0x768] sm:$0xff] }
  0x7e   :  { %v484_v32 = vld [vmem:[#allocation5 + $0xae0] sm:$0xff]  ;;  %746 = vmatpush.msrb.mxu0 %v420_v31  ;;  %v173_v31 = vld [vmem:[#allocation5 + $0x128] sm:$0xff] }
  0x7f   :  { %v548_v33 = vld [vmem:[#allocation5 + $0xce0] sm:$0xff]  ;;  %766 = vmatpush.msrb.mxu1 %v484_v32  ;;  %v237_v32 = vld [vmem:[#allocation5 + $0x328] sm:$0xff] }
  0x80   :  { %v616_v34 = vld [vmem:[#allocation5 + $0xf00] sm:$0xff]  ;;  %786 = vmatpush.msrb.mxu2 %v548_v33  ;;  %v301_v33 = vld [vmem:[#allocation5 + $0x528] sm:$0xff] }
  0x81   :  { %v416_v35 = vld [vmem:[#allocation5 + $0x8c0] sm:$0xff]  ;;  %805 = vmatpush.msrb.mxu3 %v616_v34  ;;  %v369_v34 = vld [vmem:[#allocation5 + $0x748] sm:$0xff] }
  0x82   :  { %v480_v36 = vld [vmem:[#allocation5 + $0xac0] sm:$0xff]  ;;  %747 = vmatpush.msrb.mxu0 %v416_v35  ;;  %v169_v35 = vld [vmem:[#allocation5 + $0x108] sm:$0xff] }
  0x83   :  { %v544_v37 = vld [vmem:[#allocation5 + $0xcc0] sm:$0xff]  ;;  %767 = vmatpush.msrb.mxu1 %v480_v36  ;;  %v233_v36 = vld [vmem:[#allocation5 + $0x308] sm:$0xff] }
  0x84   :  { %v612_v38 = vld [vmem:[#allocation5 + $0xee0] sm:$0xff]  ;;  %787 = vmatpush.msrb.mxu2 %v544_v37  ;;  %v297_v37 = vld [vmem:[#allocation5 + $0x508] sm:$0xff] }
  0x85   :  { %v412_v39 = vld [vmem:[#allocation5 + $0x8a0] sm:$0xff]  ;;  %806 = vmatpush.msrb.mxu3 %v612_v38  ;;  %v365_v38 = vld [vmem:[#allocation5 + $0x728] sm:$0xff] }
  0x86   :  { %v476_v40 = vld [vmem:[#allocation5 + $0xaa0] sm:$0xff]  ;;  %748 = vmatpush.msrb.mxu0 %v412_v39  ;;  %v165_v39 = vld [vmem:[#allocation5 + $0xe8] sm:$0xff] }
  0x87   :  { %v540_v41 = vld [vmem:[#allocation5 + $0xca0] sm:$0xff]  ;;  %768 = vmatpush.msrb.mxu1 %v476_v40  ;;  %v229_v40 = vld [vmem:[#allocation5 + $0x2e8] sm:$0xff] }
  0x88   :  { %v608_v42 = vld [vmem:[#allocation5 + $0xec0] sm:$0xff]  ;;  %788 = vmatpush.msrb.mxu2 %v540_v41  ;;  %v293_v41 = vld [vmem:[#allocation5 + $0x4e8] sm:$0xff] }
  0x89   :  { %v408_v43 = vld [vmem:[#allocation5 + $0x880] sm:$0xff]  ;;  %807 = vmatpush.msrb.mxu3 %v608_v42  ;;  %v361_v42 = vld [vmem:[#allocation5 + $0x708] sm:$0xff] }
  0x8a   :  { %v472_v44 = vld [vmem:[#allocation5 + $0xa80] sm:$0xff]  ;;  %749 = vmatpush.msrb.mxu0 %v408_v43  ;;  %v161_v43 = vld [vmem:[#allocation5 + $0xc8] sm:$0xff] }
  0x8b   :  { %v536_v45 = vld [vmem:[#allocation5 + $0xc80] sm:$0xff]  ;;  %769 = vmatpush.msrb.mxu1 %v472_v44  ;;  %v225_v44 = vld [vmem:[#allocation5 + $0x2c8] sm:$0xff] }
  0x8c   :  { %v604_v46 = vld [vmem:[#allocation5 + $0xea0] sm:$0xff]  ;;  %789 = vmatpush.msrb.mxu2 %v536_v45  ;;  %v289_v45 = vld [vmem:[#allocation5 + $0x4c8] sm:$0xff] }
  0x8d   :  { %v404_v47 = vld [vmem:[#allocation5 + $0x860] sm:$0xff]  ;;  %808 = vmatpush.msrb.mxu3 %v604_v46  ;;  %v357_v46 = vld [vmem:[#allocation5 + $0x6e8] sm:$0xff] }
  0x8e   :  { %v468_v48 = vld [vmem:[#allocation5 + $0xa60] sm:$0xff]  ;;  %750 = vmatpush.msrb.mxu0 %v404_v47  ;;  %v157_v47 = vld [vmem:[#allocation5 + $0xa8] sm:$0xff] }
  0x8f   :  { %v532_v49 = vld [vmem:[#allocation5 + $0xc60] sm:$0xff]  ;;  %770 = vmatpush.msrb.mxu1 %v468_v48  ;;  %v221_v48 = vld [vmem:[#allocation5 + $0x2a8] sm:$0xff] }
  0x90   :  { %v600_v50 = vld [vmem:[#allocation5 + $0xe80] sm:$0xff]  ;;  %790 = vmatpush.msrb.mxu2 %v532_v49  ;;  %v285_v49 = vld [vmem:[#allocation5 + $0x4a8] sm:$0xff] }
  0x91   :  { %v400_v51 = vld [vmem:[#allocation5 + $0x840] sm:$0xff]  ;;  %809 = vmatpush.msrb.mxu3 %v600_v50  ;;  %v353_v50 = vld [vmem:[#allocation5 + $0x6c8] sm:$0xff] }
  0x92   :  { %v464_v52 = vld [vmem:[#allocation5 + $0xa40] sm:$0xff]  ;;  %751 = vmatpush.msrb.mxu0 %v400_v51  ;;  %v153_v51 = vld [vmem:[#allocation5 + $0x88] sm:$0xff] }
  0x93   :  { %v528_v53 = vld [vmem:[#allocation5 + $0xc40] sm:$0xff]  ;;  %771 = vmatpush.msrb.mxu1 %v464_v52  ;;  %v217_v52 = vld [vmem:[#allocation5 + $0x288] sm:$0xff] }
  0x94   :  { %v596_v54 = vld [vmem:[#allocation5 + $0xe60] sm:$0xff]  ;;  %791 = vmatpush.msrb.mxu2 %v528_v53  ;;  %v281_v53 = vld [vmem:[#allocation5 + $0x488] sm:$0xff] }
  0x95   :  { %v396_v55 = vld [vmem:[#allocation5 + $0x820] sm:$0xff]  ;;  %810 = vmatpush.msrb.mxu3 %v596_v54  ;;  %v349_v54 = vld [vmem:[#allocation5 + $0x6a8] sm:$0xff] }
  0x96   :  { %v460_v56 = vld [vmem:[#allocation5 + $0xa20] sm:$0xff]  ;;  %752 = vmatpush.msrb.mxu0 %v396_v55  ;;  %v149_v55 = vld [vmem:[#allocation5 + $0x68] sm:$0xff] }
  0x97   :  { %v524_v57 = vld [vmem:[#allocation5 + $0xc20] sm:$0xff]  ;;  %772 = vmatpush.msrb.mxu1 %v460_v56  ;;  %v213_v56 = vld [vmem:[#allocation5 + $0x268] sm:$0xff] }
  0x98   :  { %v592_v58 = vld [vmem:[#allocation5 + $0xe40] sm:$0xff]  ;;  %792 = vmatpush.msrb.mxu2 %v524_v57  ;;  %v277_v57 = vld [vmem:[#allocation5 + $0x468] sm:$0xff] }
  0x99   :  { %v392_v60 = vld [vmem:[#allocation5 + $0x800] sm:$0xff]  ;;  %811 = vmatpush.msrb.mxu3 %v592_v58  ;;  %v345_v58 = vld [vmem:[#allocation5 + $0x688] sm:$0xff] }
  0x9a   :  { %v456_v61 = vld [vmem:[#allocation5 + $0xa00] sm:$0xff]  ;;  %753 = vmatpush.msrb.mxu0 %v392_v60  ;;  %v145_v60 = vld [vmem:[#allocation5 + $0x48] sm:$0xff] }
  0x9b   :  { %v520_v62 = vld [vmem:[#allocation5 + $0xc00] sm:$0xff]  ;;  %773 = vmatpush.msrb.mxu1 %v456_v61  ;;  %v209_v61 = vld [vmem:[#allocation5 + $0x248] sm:$0xff] }
  0x9c   :  { %v588_v63 = vld [vmem:[#allocation5 + $0xe20] sm:$0xff]  ;;  %793 = vmatpush.msrb.mxu2 %v520_v62  ;;  %774 = vmatmul.f32.vlgmr.msrb.gmra.mxu1 %v2821_v26  ;;  %v273_v62 = vld [vmem:[#allocation5 + $0x448] sm:$0xff] }
  0x9d   :  { %v2803_v0 = vld [vmem:[#allocation2] sm:$0xff]  ;;  %812 = vmatpush.msrb.mxu3 %v588_v63  ;;  %838 = vmatpush.msra.mxu1 %v261_v4  ;;  %v341_v63 = vld [vmem:[#allocation5 + $0x668] sm:$0xff] }
  0x9e   :  { %674 = vmatmul.f32.vlgmr.msra.gmra.mxu0 %v2803_v0  ;;  %v584_v6 = vld [vmem:[#allocation5 + $0xe00] sm:$0xff]  ;;  %858 = vmatpush.msra.mxu2 %v325_v5  ;;  %v205_v4 = vld [vmem:[#allocation5 + $0x228] sm:$0xff] }
  0x9f   :  { %818 = vmatpush.msra.mxu0 %v197_v3  ;;  %813 = vmatpush.msrb.mxu3 %v584_v6  ;;  %v2815_v20 = vld [vmem:[#allocation2 + $0x20] sm:$0xff]  ;;  %v141_v3 = vld [vmem:[#allocation5 + $0x28] sm:$0xff] }
  0xa0   :  { %839 = vmatpush.msra.mxu1 %v257_v8  ;;  %859 = vmatpush.msra.mxu2 %v321_v9  ;;  %v269_v5 = vld [vmem:[#allocation5 + $0x428] sm:$0xff] }
  0xa1   :  { %819 = vmatpush.msra.mxu0 %v193_v7  ;;  %878 = vmatpush.msra.mxu3 %v389_v10  ;;  %v337_v6 = vld [vmem:[#allocation5 + $0x648] sm:$0xff] }
  0xa2   :  { %840 = vmatpush.msra.mxu1 %v253_v12  ;;  %860 = vmatpush.msra.mxu2 %v317_v13  ;;  %v137_v7 = vld [vmem:[#allocation5 + $0x8] sm:$0xff] }
  0xa3   :  { %820 = vmatpush.msra.mxu0 %v189_v11  ;;  %879 = vmatpush.msra.mxu3 %v385_v14  ;;  %v201_v8 = vld [vmem:[#allocation5 + $0x208] sm:$0xff] }
  0xa4   :  { %794 = vmatmul.f32.vlgmr.msrb.gmra.mxu2 %v2813_v15  ;;  %841 = vmatpush.msra.mxu1 %v249_v17  ;;  %v265_v9 = vld [vmem:[#allocation5 + $0x408] sm:$0xff] }
  0xa5   :  { %821 = vmatpush.msra.mxu0 %v185_v16  ;;  %861 = vmatpush.msra.mxu2 %v313_v18  ;;  %v333_v10 = vld [vmem:[#allocation5 + $0x628] sm:$0xff] }
  0xa6   :  { %880 = vmatpush.msra.mxu3 %v381_v19  ;;  %754 = vmatmul.f32.vlgmr.msrb.gmra.mxu0 %v2815_v20  ;;  %v453_v11 = vld [vmem:[#allocation5 + $0x9e8] sm:$0xff] }
  0xa7   :  { %814 = vmatmul.f32.vlgmr.msrb.gmra.mxu3 %v2818_v21  ;;  %822 = vmatpush.msra.mxu0 %v181_v22  ;;  %v517_v12 = vld [vmem:[#allocation5 + $0xbe8] sm:$0xff] }
  0xa8   :  { %842 = vmatpush.msra.mxu1 %v245_v23  ;;  %862 = vmatpush.msra.mxu2 %v309_v24  ;;  %v581_v13 = vld [vmem:[#allocation5 + $0xde8] sm:$0xff] }
  0xa9   :  { %881 = vmatpush.msra.mxu3 %v377_v25  ;;  %823 = vmatpush.msra.mxu0 %v177_v27  ;;  %v329_v14 = vld [vmem:[#allocation5 + $0x608] sm:$0xff] }
  0xaa   :  { %843 = vmatpush.msra.mxu1 %v241_v28  ;;  %863 = vmatpush.msra.mxu2 %v305_v29  ;;  %v449_v16 = vld [vmem:[#allocation5 + $0x9c8] sm:$0xff] }
  0xab   :  { %882 = vmatpush.msra.mxu3 %v373_v30  ;;  %824 = vmatpush.msra.mxu0 %v173_v31  ;;  %v513_v17 = vld [vmem:[#allocation5 + $0xbc8] sm:$0xff] }
  0xac   :  { %844 = vmatpush.msra.mxu1 %v237_v32  ;;  %864 = vmatpush.msra.mxu2 %v301_v33  ;;  %v577_v18 = vld [vmem:[#allocation5 + $0xdc8] sm:$0xff] }
  0xad   :  { %883 = vmatpush.msra.mxu3 %v369_v34  ;;  %825 = vmatpush.msra.mxu0 %v169_v35  ;;  %v645_v19 = vld [vmem:[#allocation5 + $0xfe8] sm:$0xff] }
  0xae   :  { %845 = vmatpush.msra.mxu1 %v233_v36  ;;  %865 = vmatpush.msra.mxu2 %v297_v37  ;;  %v445_v22 = vld [vmem:[#allocation5 + $0x9a8] sm:$0xff] }
  0xaf   :  { %884 = vmatpush.msra.mxu3 %v365_v38  ;;  %826 = vmatpush.msra.mxu0 %v165_v39  ;;  %v509_v23 = vld [vmem:[#allocation5 + $0xba8] sm:$0xff] }
  0xb0   :  { %846 = vmatpush.msra.mxu1 %v229_v40  ;;  %866 = vmatpush.msra.mxu2 %v293_v41  ;;  %v573_v24 = vld [vmem:[#allocation5 + $0xda8] sm:$0xff] }
  0xb1   :  { %885 = vmatpush.msra.mxu3 %v361_v42  ;;  %827 = vmatpush.msra.mxu0 %v161_v43  ;;  %v641_v25 = vld [vmem:[#allocation5 + $0xfc8] sm:$0xff] }
  0xb2   :  { %847 = vmatpush.msra.mxu1 %v225_v44  ;;  %867 = vmatpush.msra.mxu2 %v289_v45  ;;  %v441_v27 = vld [vmem:[#allocation5 + $0x988] sm:$0xff] }
  0xb3   :  { %886 = vmatpush.msra.mxu3 %v357_v46  ;;  %828 = vmatpush.msra.mxu0 %v157_v47  ;;  %v505_v28 = vld [vmem:[#allocation5 + $0xb88] sm:$0xff] }
  0xb4   :  { %848 = vmatpush.msra.mxu1 %v221_v48  ;;  %868 = vmatpush.msra.mxu2 %v285_v49  ;;  %v569_v29 = vld [vmem:[#allocation5 + $0xd88] sm:$0xff] }
  0xb5   :  { %887 = vmatpush.msra.mxu3 %v353_v50  ;;  %829 = vmatpush.msra.mxu0 %v153_v51  ;;  %v637_v30 = vld [vmem:[#allocation5 + $0xfa8] sm:$0xff] }
  0xb6   :  { %849 = vmatpush.msra.mxu1 %v217_v52  ;;  %869 = vmatpush.msra.mxu2 %v281_v53  ;;  %v437_v31 = vld [vmem:[#allocation5 + $0x968] sm:$0xff] }
  0xb7   :  { %888 = vmatpush.msra.mxu3 %v349_v54  ;;  %830 = vmatpush.msra.mxu0 %v149_v55  ;;  %v501_v32 = vld [vmem:[#allocation5 + $0xb68] sm:$0xff] }
  0xb8   :  { %850 = vmatpush.msra.mxu1 %v213_v56  ;;  %870 = vmatpush.msra.mxu2 %v277_v57  ;;  %v565_v33 = vld [vmem:[#allocation5 + $0xd68] sm:$0xff] }
  0xb9   :  { %889 = vmatpush.msra.mxu3 %v345_v58  ;;  %831 = vmatpush.msra.mxu0 %v145_v60  ;;  %v633_v34 = vld [vmem:[#allocation5 + $0xf88] sm:$0xff] }
  0xba   :  { %851 = vmatpush.msra.mxu1 %v209_v61  ;;  %871 = vmatpush.msra.mxu2 %v273_v62  ;;  %v433_v35 = vld [vmem:[#allocation5 + $0x948] sm:$0xff] }
  0xbb   :  { %890 = vmatpush.msra.mxu3 %v341_v63  ;;  %832 = vmatpush.msra.mxu0 %v141_v3  ;;  %v497_v36 = vld [vmem:[#allocation5 + $0xb48] sm:$0xff] }
  0xbc   :  { %852 = vmatpush.msra.mxu1 %v205_v4  ;;  %872 = vmatpush.msra.mxu2 %v269_v5  ;;  %v561_v37 = vld [vmem:[#allocation5 + $0xd48] sm:$0xff] }
  0xbd   :  { %891 = vmatpush.msra.mxu3 %v337_v6  ;;  %833 = vmatpush.msra.mxu0 %v137_v7  ;;  %v629_v38 = vld [vmem:[#allocation5 + $0xf68] sm:$0xff] }
  0xbe   :  { %853 = vmatpush.msra.mxu1 %v201_v8  ;;  %873 = vmatpush.msra.mxu2 %v265_v9  ;;  %v429_v39 = vld [vmem:[#allocation5 + $0x928] sm:$0xff] }
  0xbf   :  { %892 = vmatpush.msra.mxu3 %v333_v10  ;;  %898 = vmatpush.msrb.mxu0 %v453_v11  ;;  %v493_v40 = vld [vmem:[#allocation5 + $0xb28] sm:$0xff] }
  0xc0   :  { %918 = vmatpush.msrb.mxu1 %v517_v12  ;;  %938 = vmatpush.msrb.mxu2 %v581_v13  ;;  %v557_v41 = vld [vmem:[#allocation5 + $0xd28] sm:$0xff] }
  0xc1   :  { %893 = vmatpush.msra.mxu3 %v329_v14  ;;  %899 = vmatpush.msrb.mxu0 %v449_v16  ;;  %v625_v42 = vld [vmem:[#allocation5 + $0xf48] sm:$0xff] }
  0xc2   :  { %919 = vmatpush.msrb.mxu1 %v513_v17  ;;  %939 = vmatpush.msrb.mxu2 %v577_v18  ;;  %v425_v43 = vld [vmem:[#allocation5 + $0x908] sm:$0xff] }
  0xc3   :  { %958 = vmatpush.msrb.mxu3 %v645_v19  ;;  %900 = vmatpush.msrb.mxu0 %v445_v22  ;;  %v489_v44 = vld [vmem:[#allocation5 + $0xb08] sm:$0xff]  ;;  %v198_v22 = vld [vmem:[#allocation5 + $0x1f0] sm:$0xff] }
  0xc4   :  { %920 = vmatpush.msrb.mxu1 %v509_v23  ;;  %940 = vmatpush.msrb.mxu2 %v573_v24  ;;  %v553_v45 = vld [vmem:[#allocation5 + $0xd08] sm:$0xff]  ;;  %v262_v23 = vld [vmem:[#allocation5 + $0x3f0] sm:$0xff] }
  0xc5   :  { %959 = vmatpush.msrb.mxu3 %v641_v25  ;;  %901 = vmatpush.msrb.mxu0 %v441_v27  ;;  %v621_v46 = vld [vmem:[#allocation5 + $0xf28] sm:$0xff]  ;;  %v326_v24 = vld [vmem:[#allocation5 + $0x5f0] sm:$0xff] }
  0xc6   :  { %921 = vmatpush.msrb.mxu1 %v505_v28  ;;  %941 = vmatpush.msrb.mxu2 %v569_v29  ;;  %v421_v47 = vld [vmem:[#allocation5 + $0x8e8] sm:$0xff]  ;;  %v194_v27 = vld [vmem:[#allocation5 + $0x1d0] sm:$0xff] }
  0xc7   :  { %960 = vmatpush.msrb.mxu3 %v637_v30  ;;  %902 = vmatpush.msrb.mxu0 %v437_v31  ;;  %v485_v48 = vld [vmem:[#allocation5 + $0xae8] sm:$0xff]  ;;  %v258_v28 = vld [vmem:[#allocation5 + $0x3d0] sm:$0xff] }
  0xc8   :  { %922 = vmatpush.msrb.mxu1 %v501_v32  ;;  %942 = vmatpush.msrb.mxu2 %v565_v33  ;;  %v549_v49 = vld [vmem:[#allocation5 + $0xce8] sm:$0xff]  ;;  %v322_v29 = vld [vmem:[#allocation5 + $0x5d0] sm:$0xff] }
  0xc9   :  { %961 = vmatpush.msrb.mxu3 %v633_v34  ;;  %903 = vmatpush.msrb.mxu0 %v433_v35  ;;  %v617_v50 = vld [vmem:[#allocation5 + $0xf08] sm:$0xff]  ;;  %v190_v30 = vld [vmem:[#allocation5 + $0x1b0] sm:$0xff] }
  0xca   :  { %923 = vmatpush.msrb.mxu1 %v497_v36  ;;  %943 = vmatpush.msrb.mxu2 %v561_v37  ;;  %v417_v51 = vld [vmem:[#allocation5 + $0x8c8] sm:$0xff]  ;;  %v254_v31 = vld [vmem:[#allocation5 + $0x3b0] sm:$0xff] }
  0xcb   :  { %962 = vmatpush.msrb.mxu3 %v629_v38  ;;  %904 = vmatpush.msrb.mxu0 %v429_v39  ;;  %v481_v52 = vld [vmem:[#allocation5 + $0xac8] sm:$0xff]  ;;  %v318_v32 = vld [vmem:[#allocation5 + $0x5b0] sm:$0xff] }
  0xcc   :  { %924 = vmatpush.msrb.mxu1 %v493_v40  ;;  %944 = vmatpush.msrb.mxu2 %v557_v41  ;;  %v545_v53 = vld [vmem:[#allocation5 + $0xcc8] sm:$0xff]  ;;  %v186_v33 = vld [vmem:[#allocation5 + $0x190] sm:$0xff] }
  0xcd   :  { %963 = vmatpush.msrb.mxu3 %v625_v42  ;;  %905 = vmatpush.msrb.mxu0 %v425_v43  ;;  %v613_v54 = vld [vmem:[#allocation5 + $0xee8] sm:$0xff]  ;;  %v382_v34 = vld [vmem:[#allocation5 + $0x7b0] sm:$0xff] }
  0xce   :  { %925 = vmatpush.msrb.mxu1 %v489_v44  ;;  %945 = vmatpush.msrb.mxu2 %v553_v45  ;;  %v413_v55 = vld [vmem:[#allocation5 + $0x8a8] sm:$0xff]  ;;  %v182_v35 = vld [vmem:[#allocation5 + $0x170] sm:$0xff] }
  0xcf   :  { %964 = vmatpush.msrb.mxu3 %v621_v46  ;;  %906 = vmatpush.msrb.mxu0 %v421_v47  ;;  %v477_v56 = vld [vmem:[#allocation5 + $0xaa8] sm:$0xff]  ;;  %v246_v36 = vld [vmem:[#allocation5 + $0x370] sm:$0xff] }
  0xd0   :  { %926 = vmatpush.msrb.mxu1 %v485_v48  ;;  %946 = vmatpush.msrb.mxu2 %v549_v49  ;;  %v541_v57 = vld [vmem:[#allocation5 + $0xca8] sm:$0xff]  ;;  %v310_v37 = vld [vmem:[#allocation5 + $0x570] sm:$0xff] }
  0xd1   :  { %965 = vmatpush.msrb.mxu3 %v617_v50  ;;  %907 = vmatpush.msrb.mxu0 %v417_v51  ;;  %v609_v58 = vld [vmem:[#allocation5 + $0xec8] sm:$0xff]  ;;  %v378_v38 = vld [vmem:[#allocation5 + $0x790] sm:$0xff] }
  0xd2   :  { %927 = vmatpush.msrb.mxu1 %v481_v52  ;;  %947 = vmatpush.msrb.mxu2 %v545_v53  ;;  %v409_v60 = vld [vmem:[#allocation5 + $0x888] sm:$0xff]  ;;  %v178_v39 = vld [vmem:[#allocation5 + $0x150] sm:$0xff] }
  0xd3   :  { %966 = vmatpush.msrb.mxu3 %v613_v54  ;;  %v473_v61 = vld [vmem:[#allocation5 + $0xa88] sm:$0xff]  ;;  %908 = vmatpush.msrb.mxu0 %v413_v55  ;;  %v242_v40 = vld [vmem:[#allocation5 + $0x350] sm:$0xff] }
  0xd4   :  { %928 = vmatpush.msrb.mxu1 %v477_v56  ;;  %v537_v62 = vld [vmem:[#allocation5 + $0xc88] sm:$0xff]  ;;  %948 = vmatpush.msrb.mxu2 %v541_v57  ;;  %v306_v41 = vld [vmem:[#allocation5 + $0x550] sm:$0xff] }
  0xd5   :  { %v605_v63 = vld [vmem:[#allocation5 + $0xea8] sm:$0xff]  ;;  %967 = vmatpush.msrb.mxu3 %v609_v58  ;;  %909 = vmatpush.msrb.mxu0 %v409_v60  ;;  %v374_v42 = vld [vmem:[#allocation5 + $0x770] sm:$0xff] }
  0xd6   :  { %v405_v3 = vld [vmem:[#allocation5 + $0x868] sm:$0xff]  ;;  %929 = vmatpush.msrb.mxu1 %v473_v61  ;;  %949 = vmatpush.msrb.mxu2 %v537_v62  ;;  %v238_v43 = vld [vmem:[#allocation5 + $0x330] sm:$0xff] }
  0xd7   :  { %v469_v4 = vld [vmem:[#allocation5 + $0xa68] sm:$0xff]  ;;  %968 = vmatpush.msrb.mxu3 %v605_v63  ;;  %910 = vmatpush.msrb.mxu0 %v405_v3  ;;  %v302_v44 = vld [vmem:[#allocation5 + $0x530] sm:$0xff] }
  0xd8   :  { %v533_v5 = vld [vmem:[#allocation5 + $0xc68] sm:$0xff]  ;;  %930 = vmatpush.msrb.mxu1 %v469_v4  ;;  %874 = vmatmul.f32.vlgmr.msra.gmra.mxu2 %v2801_v59  ;;  %v390_v59 = vld [vmem:[#allocation5 + $0x7f0] sm:$0xff] }
  0xd9   :  { %v601_v6 = vld [vmem:[#allocation5 + $0xe88] sm:$0xff]  ;;  %950 = vmatpush.msrb.mxu2 %v533_v5  ;;  %834 = vmatmul.f32.vlgmr.msra.gmra.mxu0 %v2803_v0  ;;  %v386_v0 = vld [vmem:[#allocation5 + $0x7d0] sm:$0xff] }
  0xda   :  { %v401_v7 = vld [vmem:[#allocation5 + $0x848] sm:$0xff]  ;;  %969 = vmatpush.msrb.mxu3 %v601_v6  ;;  %854 = vmatmul.f32.vlgmr.msra.gmra.mxu1 %v2806_v1  ;;  %v250_v1 = vld [vmem:[#allocation5 + $0x390] sm:$0xff] }
  0xdb   :  { %v465_v8 = vld [vmem:[#allocation5 + $0xa48] sm:$0xff]  ;;  %911 = vmatpush.msrb.mxu0 %v401_v7  ;;  %894 = vmatmul.f32.vlgmr.msra.gmra.mxu3 %v2808_v2  ;;  %v314_v2 = vld [vmem:[#allocation5 + $0x590] sm:$0xff] }
  0xdc   :  { %v529_v9 = vld [vmem:[#allocation5 + $0xc48] sm:$0xff]  ;;  %931 = vmatpush.msrb.mxu1 %v465_v8  ;;  %v370_v45 = vld [vmem:[#allocation5 + $0x750] sm:$0xff] }
  0xdd   :  { %v597_v10 = vld [vmem:[#allocation5 + $0xe68] sm:$0xff]  ;;  %951 = vmatpush.msrb.mxu2 %v529_v9  ;;  %v298_v46 = vld [vmem:[#allocation5 + $0x510] sm:$0xff] }
  0xde   :  { %v397_v11 = vld [vmem:[#allocation5 + $0x828] sm:$0xff]  ;;  %970 = vmatpush.msrb.mxu3 %v597_v10  ;;  %v366_v47 = vld [vmem:[#allocation5 + $0x730] sm:$0xff] }
  0xdf   :  { %v461_v12 = vld [vmem:[#allocation5 + $0xa28] sm:$0xff]  ;;  %912 = vmatpush.msrb.mxu0 %v397_v11  ;;  %v166_v48 = vld [vmem:[#allocation5 + $0xf0] sm:$0xff] }
  0xe0   :  { %v525_v13 = vld [vmem:[#allocation5 + $0xc28] sm:$0xff]  ;;  %932 = vmatpush.msrb.mxu1 %v461_v12  ;;  %v230_v49 = vld [vmem:[#allocation5 + $0x2f0] sm:$0xff] }
  0xe1   :  { %v593_v14 = vld [vmem:[#allocation5 + $0xe48] sm:$0xff]  ;;  %952 = vmatpush.msrb.mxu2 %v525_v13  ;;  %v362_v50 = vld [vmem:[#allocation5 + $0x710] sm:$0xff] }
  0xe2   :  { %v393_v16 = vld [vmem:[#allocation5 + $0x808] sm:$0xff]  ;;  %971 = vmatpush.msrb.mxu3 %v593_v14  ;;  %v162_v51 = vld [vmem:[#allocation5 + $0xd0] sm:$0xff] }
  0xe3   :  { %v457_v17 = vld [vmem:[#allocation5 + $0xa08] sm:$0xff]  ;;  %913 = vmatpush.msrb.mxu0 %v393_v16  ;;  %v226_v52 = vld [vmem:[#allocation5 + $0x2d0] sm:$0xff] }
  0xe4   :  { %v521_v18 = vld [vmem:[#allocation5 + $0xc08] sm:$0xff]  ;;  %933 = vmatpush.msrb.mxu1 %v457_v17  ;;  %914 = vmatmul.f32.vlgmr.msrb.gmra.mxu0 %v2815_v20  ;;  %v170_v20 = vld [vmem:[#allocation5 + $0x110] sm:$0xff] }
  0xe5   :  { %v589_v19 = vld [vmem:[#allocation5 + $0xe28] sm:$0xff]  ;;  %953 = vmatpush.msrb.mxu2 %v521_v18  ;;  %978 = vmatpush.msra.mxu0 %v198_v22  ;;  %v290_v53 = vld [vmem:[#allocation5 + $0x4d0] sm:$0xff] }
  0xe6   :  { %972 = vmatpush.msrb.mxu3 %v589_v19  ;;  %v585_v25 = vld [vmem:[#allocation5 + $0xe08] sm:$0xff]  ;;  %998 = vmatpush.msra.mxu1 %v262_v23  ;;  %v358_v54 = vld [vmem:[#allocation5 + $0x6f0] sm:$0xff] }
  0xe7   :  { %1018 = vmatpush.msra.mxu2 %v326_v24  ;;  %979 = vmatpush.msra.mxu0 %v194_v27  ;;  %v158_v55 = vld [vmem:[#allocation5 + $0xb0] sm:$0xff] }
  0xe8   :  { %973 = vmatpush.msrb.mxu3 %v585_v25  ;;  %999 = vmatpush.msra.mxu1 %v258_v28  ;;  %v222_v56 = vld [vmem:[#allocation5 + $0x2b0] sm:$0xff] }
  0xe9   :  { %1019 = vmatpush.msra.mxu2 %v322_v29  ;;  %980 = vmatpush.msra.mxu0 %v190_v30  ;;  %v286_v57 = vld [vmem:[#allocation5 + $0x4b0] sm:$0xff] }
  0xea   :  { %1038 = vmatpush.msra.mxu3 %v390_v59  ;;  %1000 = vmatpush.msra.mxu1 %v254_v31  ;;  %v354_v58 = vld [vmem:[#allocation5 + $0x6d0] sm:$0xff] }
  0xeb   :  { %1020 = vmatpush.msra.mxu2 %v318_v32  ;;  %981 = vmatpush.msra.mxu0 %v186_v33  ;;  %v154_v60 = vld [vmem:[#allocation5 + $0x90] sm:$0xff] }
  0xec   :  { %1039 = vmatpush.msra.mxu3 %v386_v0  ;;  %954 = vmatmul.f32.vlgmr.msrb.gmra.mxu2 %v2813_v15  ;;  %v174_v15 = vld [vmem:[#allocation5 + $0x130] sm:$0xff] }
  0xed   :  { %1001 = vmatpush.msra.mxu1 %v250_v1  ;;  %1021 = vmatpush.msra.mxu2 %v314_v2  ;;  %v218_v61 = vld [vmem:[#allocation5 + $0x290] sm:$0xff] }
  0xee   :  { %1040 = vmatpush.msra.mxu3 %v382_v34  ;;  %982 = vmatpush.msra.mxu0 %v182_v35  ;;  %v282_v62 = vld [vmem:[#allocation5 + $0x490] sm:$0xff] }
  0xef   :  { %974 = vmatmul.f32.vlgmr.msrb.gmra.mxu3 %v2818_v21  ;;  %1002 = vmatpush.msra.mxu1 %v246_v36  ;;  %v234_v21 = vld [vmem:[#allocation5 + $0x310] sm:$0xff] }
  0xf0   :  { %1022 = vmatpush.msra.mxu2 %v310_v37  ;;  %1041 = vmatpush.msra.mxu3 %v378_v38  ;;  %v350_v63 = vld [vmem:[#allocation5 + $0x6b0] sm:$0xff] }
  0xf1   :  { %934 = vmatmul.f32.vlgmr.msrb.gmra.mxu1 %v2821_v26  ;;  %983 = vmatpush.msra.mxu0 %v178_v39  ;;  %v294_v26 = vld [vmem:[#allocation5 + $0x4f0] sm:$0xff] }
  0xf2   :  { %1003 = vmatpush.msra.mxu1 %v242_v40  ;;  %1023 = vmatpush.msra.mxu2 %v306_v41  ;;  %v150_v3 = vld [vmem:[#allocation5 + $0x70] sm:$0xff] }
  0xf3   :  { %1042 = vmatpush.msra.mxu3 %v374_v42  ;;  %984 = vmatpush.msra.mxu0 %v174_v15  ;;  %v214_v4 = vld [vmem:[#allocation5 + $0x270] sm:$0xff] }
  0xf4   :  { %1004 = vmatpush.msra.mxu1 %v238_v43  ;;  %1024 = vmatpush.msra.mxu2 %v302_v44  ;;  %v278_v5 = vld [vmem:[#allocation5 + $0x470] sm:$0xff] }
  0xf5   :  { %1043 = vmatpush.msra.mxu3 %v370_v45  ;;  %985 = vmatpush.msra.mxu0 %v170_v20  ;;  %v346_v6 = vld [vmem:[#allocation5 + $0x690] sm:$0xff] }
  0xf6   :  { %1005 = vmatpush.msra.mxu1 %v234_v21  ;;  %1025 = vmatpush.msra.mxu2 %v298_v46  ;;  %v146_v7 = vld [vmem:[#allocation5 + $0x50] sm:$0xff] }
  0xf7   :  { %1044 = vmatpush.msra.mxu3 %v366_v47  ;;  %986 = vmatpush.msra.mxu0 %v166_v48  ;;  %v210_v8 = vld [vmem:[#allocation5 + $0x250] sm:$0xff] }
  0xf8   :  { %1006 = vmatpush.msra.mxu1 %v230_v49  ;;  %1026 = vmatpush.msra.mxu2 %v294_v26  ;;  %v274_v9 = vld [vmem:[#allocation5 + $0x450] sm:$0xff] }
  0xf9   :  { %1045 = vmatpush.msra.mxu3 %v362_v50  ;;  %987 = vmatpush.msra.mxu0 %v162_v51  ;;  %v342_v10 = vld [vmem:[#allocation5 + $0x670] sm:$0xff] }
  0xfa   :  { %1007 = vmatpush.msra.mxu1 %v226_v52  ;;  %1027 = vmatpush.msra.mxu2 %v290_v53  ;;  %v142_v11 = vld [vmem:[#allocation5 + $0x30] sm:$0xff] }
  0xfb   :  { %1046 = vmatpush.msra.mxu3 %v358_v54  ;;  %988 = vmatpush.msra.mxu0 %v158_v55  ;;  %v206_v12 = vld [vmem:[#allocation5 + $0x230] sm:$0xff] }
  0xfc   :  { %1008 = vmatpush.msra.mxu1 %v222_v56  ;;  %1028 = vmatpush.msra.mxu2 %v286_v57  ;;  %v270_v13 = vld [vmem:[#allocation5 + $0x430] sm:$0xff] }
  0xfd   :  { %1047 = vmatpush.msra.mxu3 %v354_v58  ;;  %989 = vmatpush.msra.mxu0 %v154_v60  ;;  %v338_v14 = vld [vmem:[#allocation5 + $0x650] sm:$0xff] }
  0xfe   :  { %1009 = vmatpush.msra.mxu1 %v218_v61  ;;  %1029 = vmatpush.msra.mxu2 %v282_v62  ;;  %v138_v16 = vld [vmem:[#allocation5 + $0x10] sm:$0xff] }
  0xff   :  { %1048 = vmatpush.msra.mxu3 %v350_v63  ;;  %990 = vmatpush.msra.mxu0 %v150_v3  ;;  %v202_v17 = vld [vmem:[#allocation5 + $0x210] sm:$0xff] }
 0x100   :  { %1010 = vmatpush.msra.mxu1 %v214_v4  ;;  %1030 = vmatpush.msra.mxu2 %v278_v5  ;;  %v266_v18 = vld [vmem:[#allocation5 + $0x410] sm:$0xff] }
 0x101   :  { %1049 = vmatpush.msra.mxu3 %v346_v6  ;;  %991 = vmatpush.msra.mxu0 %v146_v7  ;;  %v334_v19 = vld [vmem:[#allocation5 + $0x630] sm:$0xff] }
 0x102   :  { %1011 = vmatpush.msra.mxu1 %v210_v8  ;;  %1031 = vmatpush.msra.mxu2 %v274_v9  ;;  %v454_v22 = vld [vmem:[#allocation5 + $0x9f0] sm:$0xff] }
 0x103   :  { %1050 = vmatpush.msra.mxu3 %v342_v10  ;;  %992 = vmatpush.msra.mxu0 %v142_v11  ;;  %v518_v23 = vld [vmem:[#allocation5 + $0xbf0] sm:$0xff]  ;;  %v2836_v11 = vld [vmem:[#allocation2] sm:$0xff] }
 0x104   :  { %1012 = vmatpush.msra.mxu1 %v206_v12  ;;  %1032 = vmatpush.msra.mxu2 %v270_v13  ;;  %v582_v24 = vld [vmem:[#allocation5 + $0xdf0] sm:$0xff]  ;;  %v2839_v13 = vld [vmem:[#allocation2 + $0x18] sm:$0xff] }
 0x105   :  { %1051 = vmatpush.msra.mxu3 %v338_v14  ;;  %993 = vmatpush.msra.mxu0 %v138_v16  ;;  %v330_v25 = vld [vmem:[#allocation5 + $0x610] sm:$0xff] }
 0x106   :  { %1013 = vmatpush.msra.mxu1 %v202_v17  ;;  %1033 = vmatpush.msra.mxu2 %v266_v18  ;;  %v450_v27 = vld [vmem:[#allocation5 + $0x9d0] sm:$0xff] }
 0x107   :  { %1052 = vmatpush.msra.mxu3 %v334_v19  ;;  %v514_v28 = vld [vmem:[#allocation5 + $0xbd0] sm:$0xff]  ;;  %1058 = vmatpush.msrb.mxu0 %v454_v22  ;;  %v2842_v19 = vld [vmem:[#allocation2 + $0x8] sm:$0xff] }
 0x108   :  { %1078 = vmatpush.msrb.mxu1 %v518_v23  ;;  %v578_v29 = vld [vmem:[#allocation5 + $0xdd0] sm:$0xff]  ;;  %1098 = vmatpush.msrb.mxu2 %v582_v24 }
 0x109   :  { %v646_v59 = vld [vmem:[#allocation5 + $0xff0] sm:$0xff]  ;;  %1053 = vmatpush.msra.mxu3 %v330_v25  ;;  %1059 = vmatpush.msrb.mxu0 %v450_v27  ;;  %v199_v27 = vld [vmem:[#allocation5 + $0x1f8] sm:$0xff] }
 0x10a   :  { %v446_v30 = vld [vmem:[#allocation5 + $0x9b0] sm:$0xff]  ;;  %1079 = vmatpush.msrb.mxu1 %v514_v28  ;;  %1099 = vmatpush.msrb.mxu2 %v578_v29  ;;  %v263_v28 = vld [vmem:[#allocation5 + $0x3f8] sm:$0xff] }
 0x10b   :  { %v510_v31 = vld [vmem:[#allocation5 + $0xbb0] sm:$0xff]  ;;  %1118 = vmatpush.msrb.mxu3 %v646_v59  ;;  %1060 = vmatpush.msrb.mxu0 %v446_v30  ;;  %v327_v29 = vld [vmem:[#allocation5 + $0x5f8] sm:$0xff] }
 0x10c   :  { %v574_v32 = vld [vmem:[#allocation5 + $0xdb0] sm:$0xff]  ;;  %1080 = vmatpush.msrb.mxu1 %v510_v31  ;;  %994 = vmatmul.f32.vlgmr.msra.gmra.mxu0 %v2836_v11  ;;  %v195_v31 = vld [vmem:[#allocation5 + $0x1d8] sm:$0xff] }
 0x10d   :  { %v642_v0 = vld [vmem:[#allocation5 + $0xfd0] sm:$0xff]  ;;  %1100 = vmatpush.msrb.mxu2 %v574_v32  ;;  %1054 = vmatmul.f32.vlgmr.msra.gmra.mxu3 %v2839_v13  ;;  %v259_v32 = vld [vmem:[#allocation5 + $0x3d8] sm:$0xff] }
 0x10e   :  { %v442_v33 = vld [vmem:[#allocation5 + $0x990] sm:$0xff]  ;;  %1119 = vmatpush.msrb.mxu3 %v642_v0  ;;  %1014 = vmatmul.f32.vlgmr.msra.gmra.mxu1 %v2842_v19  ;;  %v323_v0 = vld [vmem:[#allocation5 + $0x5d8] sm:$0xff] }
 0x10f   :  { %v506_v1 = vld [vmem:[#allocation5 + $0xb90] sm:$0xff]  ;;  %1061 = vmatpush.msrb.mxu0 %v442_v33  ;;  %v2848_v33 = vld [vmem:[#allocation2 + $0x20] sm:$0xff] }
 0x110   :  { %v570_v2 = vld [vmem:[#allocation5 + $0xd90] sm:$0xff]  ;;  %1081 = vmatpush.msrb.mxu1 %v506_v1  ;;  %v391_v1 = vld [vmem:[#allocation5 + $0x7f8] sm:$0xff] }
 0x111   :  { %v638_v34 = vld [vmem:[#allocation5 + $0xfb0] sm:$0xff]  ;;  %1101 = vmatpush.msrb.mxu2 %v570_v2  ;;  %v2851_v2 = vld [vmem:[#allocation2 + $0x38] sm:$0xff] }
 0x112   :  { %v438_v35 = vld [vmem:[#allocation5 + $0x970] sm:$0xff]  ;;  %1120 = vmatpush.msrb.mxu3 %v638_v34  ;;  %v191_v34 = vld [vmem:[#allocation5 + $0x1b8] sm:$0xff] }
 0x113   :  { %v502_v36 = vld [vmem:[#allocation5 + $0xb70] sm:$0xff]  ;;  %1062 = vmatpush.msrb.mxu0 %v438_v35  ;;  %v255_v35 = vld [vmem:[#allocation5 + $0x3b8] sm:$0xff] }
 0x114   :  { %v566_v37 = vld [vmem:[#allocation5 + $0xd70] sm:$0xff]  ;;  %1082 = vmatpush.msrb.mxu1 %v502_v36  ;;  %v319_v36 = vld [vmem:[#allocation5 + $0x5b8] sm:$0xff] }
 0x115   :  { %v634_v38 = vld [vmem:[#allocation5 + $0xf90] sm:$0xff]  ;;  %1102 = vmatpush.msrb.mxu2 %v566_v37  ;;  %v387_v37 = vld [vmem:[#allocation5 + $0x7d8] sm:$0xff] }
 0x116   :  { %v434_v39 = vld [vmem:[#allocation5 + $0x950] sm:$0xff]  ;;  %1121 = vmatpush.msrb.mxu3 %v634_v38  ;;  %v2854_v38 = vld [vmem:[#allocation2 + $0x28] sm:$0xff] }
 0x117   :  { %v498_v40 = vld [vmem:[#allocation5 + $0xb50] sm:$0xff]  ;;  %1063 = vmatpush.msrb.mxu0 %v434_v39  ;;  %v187_v39 = vld [vmem:[#allocation5 + $0x198] sm:$0xff] }
 0x118   :  { %v562_v41 = vld [vmem:[#allocation5 + $0xd50] sm:$0xff]  ;;  %1083 = vmatpush.msrb.mxu1 %v498_v40  ;;  %v251_v40 = vld [vmem:[#allocation5 + $0x398] sm:$0xff] }
 0x119   :  { %v630_v42 = vld [vmem:[#allocation5 + $0xf70] sm:$0xff]  ;;  %1103 = vmatpush.msrb.mxu2 %v562_v41  ;;  %v315_v41 = vld [vmem:[#allocation5 + $0x598] sm:$0xff] }
 0x11a   :  { %v430_v15 = vld [vmem:[#allocation5 + $0x930] sm:$0xff]  ;;  %1122 = vmatpush.msrb.mxu3 %v630_v42  ;;  %v383_v42 = vld [vmem:[#allocation5 + $0x7b8] sm:$0xff] }
 0x11b   :  { %v494_v43 = vld [vmem:[#allocation5 + $0xb30] sm:$0xff]  ;;  %1064 = vmatpush.msrb.mxu0 %v430_v15  ;;  %v183_v15 = vld [vmem:[#allocation5 + $0x178] sm:$0xff] }
 0x11c   :  { %v558_v44 = vld [vmem:[#allocation5 + $0xd30] sm:$0xff]  ;;  %1084 = vmatpush.msrb.mxu1 %v494_v43  ;;  %v247_v43 = vld [vmem:[#allocation5 + $0x378] sm:$0xff] }
 0x11d   :  { %v626_v45 = vld [vmem:[#allocation5 + $0xf50] sm:$0xff]  ;;  %1104 = vmatpush.msrb.mxu2 %v558_v44  ;;  %v311_v44 = vld [vmem:[#allocation5 + $0x578] sm:$0xff] }
 0x11e   :  { %v426_v20 = vld [vmem:[#allocation5 + $0x910] sm:$0xff]  ;;  %1123 = vmatpush.msrb.mxu3 %v626_v45  ;;  %v379_v45 = vld [vmem:[#allocation5 + $0x798] sm:$0xff] }
 0x11f   :  { %v490_v21 = vld [vmem:[#allocation5 + $0xb10] sm:$0xff]  ;;  %1065 = vmatpush.msrb.mxu0 %v426_v20  ;;  %v179_v20 = vld [vmem:[#allocation5 + $0x158] sm:$0xff] }
 0x120   :  { %v554_v46 = vld [vmem:[#allocation5 + $0xd10] sm:$0xff]  ;;  %1085 = vmatpush.msrb.mxu1 %v490_v21  ;;  %v243_v21 = vld [vmem:[#allocation5 + $0x358] sm:$0xff] }
 0x121   :  { %v622_v47 = vld [vmem:[#allocation5 + $0xf30] sm:$0xff]  ;;  %1105 = vmatpush.msrb.mxu2 %v554_v46  ;;  %v307_v46 = vld [vmem:[#allocation5 + $0x558] sm:$0xff] }
 0x122   :  { %v422_v48 = vld [vmem:[#allocation5 + $0x8f0] sm:$0xff]  ;;  %1124 = vmatpush.msrb.mxu3 %v622_v47  ;;  %v375_v47 = vld [vmem:[#allocation5 + $0x778] sm:$0xff] }
 0x123   :  { %v486_v49 = vld [vmem:[#allocation5 + $0xaf0] sm:$0xff]  ;;  %1066 = vmatpush.msrb.mxu0 %v422_v48  ;;  %v175_v48 = vld [vmem:[#allocation5 + $0x138] sm:$0xff] }
 0x124   :  { %v550_v26 = vld [vmem:[#allocation5 + $0xcf0] sm:$0xff]  ;;  %1086 = vmatpush.msrb.mxu1 %v486_v49  ;;  %v239_v49 = vld [vmem:[#allocation5 + $0x338] sm:$0xff] }
 0x125   :  { %v618_v50 = vld [vmem:[#allocation5 + $0xf10] sm:$0xff]  ;;  %1106 = vmatpush.msrb.mxu2 %v550_v26  ;;  %v303_v26 = vld [vmem:[#allocation5 + $0x538] sm:$0xff] }
 0x126   :  { %v418_v51 = vld [vmem:[#allocation5 + $0x8d0] sm:$0xff]  ;;  %1125 = vmatpush.msrb.mxu3 %v618_v50  ;;  %v371_v50 = vld [vmem:[#allocation5 + $0x758] sm:$0xff] }
 0x127   :  { %v482_v52 = vld [vmem:[#allocation5 + $0xad0] sm:$0xff]  ;;  %1067 = vmatpush.msrb.mxu0 %v418_v51  ;;  %v171_v51 = vld [vmem:[#allocation5 + $0x118] sm:$0xff] }
 0x128   :  { %v546_v53 = vld [vmem:[#allocation5 + $0xcd0] sm:$0xff]  ;;  %1087 = vmatpush.msrb.mxu1 %v482_v52  ;;  %v235_v52 = vld [vmem:[#allocation5 + $0x318] sm:$0xff] }
 0x129   :  { %v614_v54 = vld [vmem:[#allocation5 + $0xef0] sm:$0xff]  ;;  %1107 = vmatpush.msrb.mxu2 %v546_v53  ;;  %v299_v53 = vld [vmem:[#allocation5 + $0x518] sm:$0xff] }
 0x12a   :  { %v414_v55 = vld [vmem:[#allocation5 + $0x8b0] sm:$0xff]  ;;  %1126 = vmatpush.msrb.mxu3 %v614_v54  ;;  %v367_v54 = vld [vmem:[#allocation5 + $0x738] sm:$0xff] }
 0x12b   :  { %v478_v56 = vld [vmem:[#allocation5 + $0xab0] sm:$0xff]  ;;  %1068 = vmatpush.msrb.mxu0 %v414_v55  ;;  %v167_v55 = vld [vmem:[#allocation5 + $0xf8] sm:$0xff] }
 0x12c   :  { %v542_v57 = vld [vmem:[#allocation5 + $0xcb0] sm:$0xff]  ;;  %1088 = vmatpush.msrb.mxu1 %v478_v56  ;;  %v231_v56 = vld [vmem:[#allocation5 + $0x2f8] sm:$0xff] }
 0x12d   :  { %v610_v58 = vld [vmem:[#allocation5 + $0xed0] sm:$0xff]  ;;  %1108 = vmatpush.msrb.mxu2 %v542_v57  ;;  %v295_v57 = vld [vmem:[#allocation5 + $0x4f8] sm:$0xff] }
 0x12e   :  { %v410_v60 = vld [vmem:[#allocation5 + $0x890] sm:$0xff]  ;;  %1127 = vmatpush.msrb.mxu3 %v610_v58  ;;  %v363_v58 = vld [vmem:[#allocation5 + $0x718] sm:$0xff] }
 0x12f   :  { %v474_v61 = vld [vmem:[#allocation5 + $0xa90] sm:$0xff]  ;;  %1069 = vmatpush.msrb.mxu0 %v410_v60  ;;  %v163_v60 = vld [vmem:[#allocation5 + $0xd8] sm:$0xff] }
 0x130   :  { %v538_v62 = vld [vmem:[#allocation5 + $0xc90] sm:$0xff]  ;;  %1089 = vmatpush.msrb.mxu1 %v474_v61  ;;  %v227_v61 = vld [vmem:[#allocation5 + $0x2d8] sm:$0xff] }
 0x131   :  { %v606_v63 = vld [vmem:[#allocation5 + $0xeb0] sm:$0xff]  ;;  %1109 = vmatpush.msrb.mxu2 %v538_v62  ;;  %v291_v62 = vld [vmem:[#allocation5 + $0x4d8] sm:$0xff] }
 0x132   :  { %v406_v3 = vld [vmem:[#allocation5 + $0x870] sm:$0xff]  ;;  %1128 = vmatpush.msrb.mxu3 %v606_v63  ;;  %v359_v63 = vld [vmem:[#allocation5 + $0x6f8] sm:$0xff] }
 0x133   :  { %v470_v4 = vld [vmem:[#allocation5 + $0xa70] sm:$0xff]  ;;  %1070 = vmatpush.msrb.mxu0 %v406_v3  ;;  %v159_v3 = vld [vmem:[#allocation5 + $0xb8] sm:$0xff] }
 0x134   :  { %v534_v5 = vld [vmem:[#allocation5 + $0xc70] sm:$0xff]  ;;  %1090 = vmatpush.msrb.mxu1 %v470_v4  ;;  %v223_v4 = vld [vmem:[#allocation5 + $0x2b8] sm:$0xff] }
 0x135   :  { %v602_v6 = vld [vmem:[#allocation5 + $0xe90] sm:$0xff]  ;;  %1110 = vmatpush.msrb.mxu2 %v534_v5  ;;  %v287_v5 = vld [vmem:[#allocation5 + $0x4b8] sm:$0xff] }
 0x136   :  { %v2833_v7 = vld [vmem:[#allocation2 + $0x10] sm:$0xff]  ;;  %1129 = vmatpush.msrb.mxu3 %v602_v6  ;;  %v355_v6 = vld [vmem:[#allocation5 + $0x6d8] sm:$0xff] }
 0x137   :  { %1034 = vmatmul.f32.vlgmr.msra.gmra.mxu2 %v2833_v7  ;;  %v402_v8 = vld [vmem:[#allocation5 + $0x850] sm:$0xff] }
 0x138   :  { %v466_v9 = vld [vmem:[#allocation5 + $0xa50] sm:$0xff]  ;;  %1071 = vmatpush.msrb.mxu0 %v402_v8  ;;  %v155_v8 = vld [vmem:[#allocation5 + $0x98] sm:$0xff] }
 0x139   :  { %v530_v10 = vld [vmem:[#allocation5 + $0xc50] sm:$0xff]  ;;  %1091 = vmatpush.msrb.mxu1 %v466_v9  ;;  %v219_v9 = vld [vmem:[#allocation5 + $0x298] sm:$0xff] }
 0x13a   :  { %v598_v12 = vld [vmem:[#allocation5 + $0xe70] sm:$0xff]  ;;  %1111 = vmatpush.msrb.mxu2 %v530_v10  ;;  %v283_v10 = vld [vmem:[#allocation5 + $0x498] sm:$0xff] }
 0x13b   :  { %v398_v14 = vld [vmem:[#allocation5 + $0x830] sm:$0xff]  ;;  %1130 = vmatpush.msrb.mxu3 %v598_v12  ;;  %v351_v12 = vld [vmem:[#allocation5 + $0x6b8] sm:$0xff] }
 0x13c   :  { %v462_v16 = vld [vmem:[#allocation5 + $0xa30] sm:$0xff]  ;;  %1072 = vmatpush.msrb.mxu0 %v398_v14  ;;  %v151_v14 = vld [vmem:[#allocation5 + $0x78] sm:$0xff] }
 0x13d   :  { %v526_v17 = vld [vmem:[#allocation5 + $0xc30] sm:$0xff]  ;;  %1092 = vmatpush.msrb.mxu1 %v462_v16  ;;  %v215_v16 = vld [vmem:[#allocation5 + $0x278] sm:$0xff] }
 0x13e   :  { %v594_v18 = vld [vmem:[#allocation5 + $0xe50] sm:$0xff]  ;;  %1112 = vmatpush.msrb.mxu2 %v526_v17  ;;  %v279_v17 = vld [vmem:[#allocation5 + $0x478] sm:$0xff] }
 0x13f   :  { %v394_v22 = vld [vmem:[#allocation5 + $0x810] sm:$0xff]  ;;  %1131 = vmatpush.msrb.mxu3 %v594_v18  ;;  %v347_v18 = vld [vmem:[#allocation5 + $0x698] sm:$0xff] }
 0x140   :  { %v458_v23 = vld [vmem:[#allocation5 + $0xa10] sm:$0xff]  ;;  %1073 = vmatpush.msrb.mxu0 %v394_v22  ;;  %v147_v22 = vld [vmem:[#allocation5 + $0x58] sm:$0xff] }
 0x141   :  { %v522_v24 = vld [vmem:[#allocation5 + $0xc10] sm:$0xff]  ;;  %1093 = vmatpush.msrb.mxu1 %v458_v23  ;;  %1074 = vmatmul.f32.vlgmr.msrb.gmra.mxu0 %v2848_v33  ;;  %v211_v23 = vld [vmem:[#allocation5 + $0x258] sm:$0xff] }
 0x142   :  { %v590_v25 = vld [vmem:[#allocation5 + $0xe30] sm:$0xff]  ;;  %1113 = vmatpush.msrb.mxu2 %v522_v24  ;;  %1138 = vmatpush.msra.mxu0 %v199_v27  ;;  %v275_v24 = vld [vmem:[#allocation5 + $0x458] sm:$0xff] }
 0x143   :  { %1132 = vmatpush.msrb.mxu3 %v590_v25  ;;  %v586_v59 = vld [vmem:[#allocation5 + $0xe10] sm:$0xff]  ;;  %1158 = vmatpush.msra.mxu1 %v263_v28  ;;  %v343_v25 = vld [vmem:[#allocation5 + $0x678] sm:$0xff] }
 0x144   :  { %v2845_v30 = vld [vmem:[#allocation2 + $0x30] sm:$0xff]  ;;  %1178 = vmatpush.msra.mxu2 %v327_v29  ;;  %1139 = vmatpush.msra.mxu0 %v195_v31  ;;  %v143_v27 = vld [vmem:[#allocation5 + $0x38] sm:$0xff] }
 0x145   :  { %1114 = vmatmul.f32.vlgmr.msrb.gmra.mxu2 %v2845_v30  ;;  %1133 = vmatpush.msrb.mxu3 %v586_v59  ;;  %v207_v28 = vld [vmem:[#allocation5 + $0x238] sm:$0xff] }
 0x146   :  { %1134 = vmatmul.f32.vlgmr.msrb.gmra.mxu3 %v2851_v2  ;;  %1159 = vmatpush.msra.mxu1 %v259_v32  ;;  %v271_v29 = vld [vmem:[#allocation5 + $0x438] sm:$0xff] }
 0x147   :  { %1179 = vmatpush.msra.mxu2 %v323_v0  ;;  %1198 = vmatpush.msra.mxu3 %v391_v1  ;;  %v339_v59 = vld [vmem:[#allocation5 + $0x658] sm:$0xff] }
 0x148   :  { %1094 = vmatmul.f32.vlgmr.msrb.gmra.mxu1 %v2854_v38  ;;  %1140 = vmatpush.msra.mxu0 %v191_v34  ;;  %v139_v31 = vld [vmem:[#allocation5 + $0x18] sm:$0xff] }
 0x149   :  { %1160 = vmatpush.msra.mxu1 %v255_v35  ;;  %1180 = vmatpush.msra.mxu2 %v319_v36  ;;  %v203_v32 = vld [vmem:[#allocation5 + $0x218] sm:$0xff] }
 0x14a   :  { %1199 = vmatpush.msra.mxu3 %v387_v37  ;;  %1141 = vmatpush.msra.mxu0 %v187_v39  ;;  %v267_v0 = vld [vmem:[#allocation5 + $0x418] sm:$0xff] }
 0x14b   :  { %1161 = vmatpush.msra.mxu1 %v251_v40  ;;  %1181 = vmatpush.msra.mxu2 %v315_v41  ;;  %v335_v1 = vld [vmem:[#allocation5 + $0x638] sm:$0xff] }
 0x14c   :  { %1200 = vmatpush.msra.mxu3 %v383_v42  ;;  %1142 = vmatpush.msra.mxu0 %v183_v15  ;;  %v455_v34 = vld [vmem:[#allocation5 + $0x9f8] sm:$0xff] }
 0x14d   :  { %1162 = vmatpush.msra.mxu1 %v247_v43  ;;  %1182 = vmatpush.msra.mxu2 %v311_v44  ;;  %v519_v35 = vld [vmem:[#allocation5 + $0xbf8] sm:$0xff] }
 0x14e   :  { %1201 = vmatpush.msra.mxu3 %v379_v45  ;;  %1143 = vmatpush.msra.mxu0 %v179_v20  ;;  %v583_v36 = vld [vmem:[#allocation5 + $0xdf8] sm:$0xff] }
 0x14f   :  { %1163 = vmatpush.msra.mxu1 %v243_v21  ;;  %1183 = vmatpush.msra.mxu2 %v307_v46  ;;  %v331_v37 = vld [vmem:[#allocation5 + $0x618] sm:$0xff] }
 0x150   :  { %1202 = vmatpush.msra.mxu3 %v375_v47  ;;  %1144 = vmatpush.msra.mxu0 %v175_v48  ;;  %v451_v39 = vld [vmem:[#allocation5 + $0x9d8] sm:$0xff] }
 0x151   :  { %1164 = vmatpush.msra.mxu1 %v239_v49  ;;  %1184 = vmatpush.msra.mxu2 %v303_v26  ;;  %v515_v40 = vld [vmem:[#allocation5 + $0xbd8] sm:$0xff] }
 0x152   :  { %1203 = vmatpush.msra.mxu3 %v371_v50  ;;  %1145 = vmatpush.msra.mxu0 %v171_v51  ;;  %v579_v41 = vld [vmem:[#allocation5 + $0xdd8] sm:$0xff]  ;;  %v2857_v51 = vpop.f32.mrf.mxu0 }
 0x153   :  { %1165 = vmatpush.msra.mxu1 %v235_v52  ;;  %1185 = vmatpush.msra.mxu2 %v299_v53  ;;  %v647_v42 = vld [vmem:[#allocation5 + $0xff8] sm:$0xff] }
 0x154   :  { %1204 = vmatpush.msra.mxu3 %v367_v54  ;;  %1146 = vmatpush.msra.mxu0 %v167_v55  ;;  %v447_v15 = vld [vmem:[#allocation5 + $0x9b8] sm:$0xff] }
 0x155   :  { %1166 = vmatpush.msra.mxu1 %v231_v56  ;;  %1186 = vmatpush.msra.mxu2 %v295_v57  ;;  %v511_v43 = vld [vmem:[#allocation5 + $0xbb8] sm:$0xff] }
 0x156   :  { %1205 = vmatpush.msra.mxu3 %v363_v58  ;;  %1147 = vmatpush.msra.mxu0 %v163_v60  ;;  %v575_v44 = vld [vmem:[#allocation5 + $0xdb8] sm:$0xff] }
 0x157   :  { %1167 = vmatpush.msra.mxu1 %v227_v61  ;;  %1187 = vmatpush.msra.mxu2 %v291_v62  ;;  %v643_v45 = vld [vmem:[#allocation5 + $0xfd8] sm:$0xff]  ;;  %v2859_v61 = vpop.f32.mrf.mxu1 }
 0x158   :  { %1206 = vmatpush.msra.mxu3 %v359_v63  ;;  %1148 = vmatpush.msra.mxu0 %v159_v3  ;;  %v443_v20 = vld [vmem:[#allocation5 + $0x998] sm:$0xff] }
 0x159   :  { %1168 = vmatpush.msra.mxu1 %v223_v4  ;;  %1188 = vmatpush.msra.mxu2 %v287_v5  ;;  %v507_v21 = vld [vmem:[#allocation5 + $0xb98] sm:$0xff] }
 0x15a   :  { %1207 = vmatpush.msra.mxu3 %v355_v6  ;;  %1149 = vmatpush.msra.mxu0 %v155_v8  ;;  %v571_v46 = vld [vmem:[#allocation5 + $0xd98] sm:$0xff] }
 0x15b   :  { %1169 = vmatpush.msra.mxu1 %v219_v9  ;;  %1189 = vmatpush.msra.mxu2 %v283_v10  ;;  %v639_v47 = vld [vmem:[#allocation5 + $0xfb8] sm:$0xff]  ;;  %v2861_v10 = vpop.f32.mrf.mxu2 }
 0x15c   :  { %1208 = vmatpush.msra.mxu3 %v351_v12  ;;  %1150 = vmatpush.msra.mxu0 %v151_v14  ;;  %v439_v48 = vld [vmem:[#allocation5 + $0x978] sm:$0xff] }
 0x15d   :  { %1170 = vmatpush.msra.mxu1 %v215_v16  ;;  %1190 = vmatpush.msra.mxu2 %v279_v17  ;;  %v503_v49 = vld [vmem:[#allocation5 + $0xb78] sm:$0xff] }
 0x15e   :  { %1209 = vmatpush.msra.mxu3 %v347_v18  ;;  %1151 = vmatpush.msra.mxu0 %v147_v22  ;;  %v567_v26 = vld [vmem:[#allocation5 + $0xd78] sm:$0xff]  ;;  %v2863_v18 = vpop.f32.mrf.mxu0 }
 0x15f   :  { %1171 = vmatpush.msra.mxu1 %v211_v23  ;;  %1191 = vmatpush.msra.mxu2 %v275_v24  ;;  %v635_v50 = vld [vmem:[#allocation5 + $0xf98] sm:$0xff] }
 0x160   :  { %1210 = vmatpush.msra.mxu3 %v343_v25  ;;  %1152 = vmatpush.msra.mxu0 %v143_v27  ;;  %v435_v52 = vld [vmem:[#allocation5 + $0x958] sm:$0xff]  ;;  %v2865_v27 = vpop.f32.mrf.mxu3 }
 0x161   :  { %1172 = vmatpush.msra.mxu1 %v207_v28  ;;  %1192 = vmatpush.msra.mxu2 %v271_v29  ;;  %v499_v53 = vld [vmem:[#allocation5 + $0xb58] sm:$0xff] }
 0x162   :  { %1211 = vmatpush.msra.mxu3 %v339_v59  ;;  %1153 = vmatpush.msra.mxu0 %v139_v31  ;;  %v563_v54 = vld [vmem:[#allocation5 + $0xd58] sm:$0xff] }
 0x163   :  { %1173 = vmatpush.msra.mxu1 %v203_v32  ;;  %1193 = vmatpush.msra.mxu2 %v267_v0  ;;  %v631_v55 = vld [vmem:[#allocation5 + $0xf78] sm:$0xff]  ;;  %v2867_v32 = vld [vmem:[#allocation7] sm:$0xf]  ;;  %v2869_v0 = vpop.f32.mrf.mxu1 }
 0x164   :  { %1212 = vmatpush.msra.mxu3 %v335_v1  ;;  %1218 = vmatpush.msrb.mxu0 %v455_v34  ;;  %v431_v56 = vld [vmem:[#allocation5 + $0x938] sm:$0xff] }
 0x165   :  { %1238 = vmatpush.msrb.mxu1 %v519_v35  ;;  %1258 = vmatpush.msrb.mxu2 %v583_v36  ;;  %v495_v57 = vld [vmem:[#allocation5 + $0xb38] sm:$0xff] }
 0x166   :  { %1213 = vmatpush.msra.mxu3 %v331_v37  ;;  %1219 = vmatpush.msrb.mxu0 %v451_v39  ;;  %v559_v58 = vld [vmem:[#allocation5 + $0xd38] sm:$0xff]  ;;  %v650_v37 = vperm.slane %v2867_v32, 0 }
 0x167   :  { %1239 = vmatpush.msrb.mxu1 %v515_v40  ;;  %1259 = vmatpush.msrb.mxu2 %v579_v41  ;;  %v627_v60 = vld [vmem:[#allocation5 + $0xf58] sm:$0xff]  ;;  %v651_v40 = vperm.slane %v2867_v32, 1  ;;  %v2874_v41 = vpop.f32.mrf.mxu2 }
 0x168   :  { %1278 = vmatpush.msrb.mxu3 %v647_v42  ;;  %1220 = vmatpush.msrb.mxu0 %v447_v15  ;;  %v427_v62 = vld [vmem:[#allocation5 + $0x918] sm:$0xff] }
 0x169   :  { %1240 = vmatpush.msrb.mxu1 %v511_v43  ;;  %1260 = vmatpush.msrb.mxu2 %v575_v44  ;;  %v491_v63 = vld [vmem:[#allocation5 + $0xb18] sm:$0xff]  ;;  %v835_v43 = vpop.f32.mrf.mxu0 }
 0x16a   :  { %1279 = vmatpush.msrb.mxu3 %v643_v45  ;;  %1221 = vmatpush.msrb.mxu0 %v443_v20  ;;  %v555_v3 = vld [vmem:[#allocation5 + $0xd18] sm:$0xff]  ;;  %v676_v20 = vadd.f32 %v2857_v51, %v650_v37  ;;  %v1366_v51 = vld [vmem:[#allocation8 + $0x1e0] sm:$0xff] }
 0x16b   :  { %1241 = vmatpush.msrb.mxu1 %v507_v21  ;;  %1261 = vmatpush.msrb.mxu2 %v571_v46  ;;  %v623_v4 = vld [vmem:[#allocation5 + $0xf38] sm:$0xff]  ;;  %v1330_v37 = vld [vmem:[#allocation8 + $0xc0] sm:$0xff] }
 0x16c   :  { %1280 = vmatpush.msrb.mxu3 %v639_v47  ;;  %1222 = vmatpush.msrb.mxu0 %v439_v48  ;;  %v423_v5 = vld [vmem:[#allocation5 + $0x8f8] sm:$0xff]  ;;  %v836_v47 = vadd.f32 %v835_v43, %v651_v40  ;;  %v2879_v48 = vpop.f32.mrf.mxu3  ;;  %v1462_v40 = vld [vmem:[#allocation8 + $0x4e0] sm:$0xff] }
 0x16d   :  { %1242 = vmatpush.msrb.mxu1 %v503_v49  ;;  %1262 = vmatpush.msrb.mxu2 %v567_v26  ;;  %v487_v6 = vld [vmem:[#allocation5 + $0xaf8] sm:$0xff]  ;;  %v855_v26 = vpop.f32.mrf.mxu1  ;;  %v1326_v43 = vld [vmem:[#allocation8 + $0xa0] sm:$0xff] }
 0x16e   :  { %1281 = vmatpush.msrb.mxu3 %v635_v50  ;;  %1223 = vmatpush.msrb.mxu0 %v435_v52  ;;  %v551_v8 = vld [vmem:[#allocation5 + $0xcf8] sm:$0xff]  ;;  %v696_v52 = vadd.f32 %v2859_v61, %v676_v20  ;;  %v1358_v61 = vld [vmem:[#allocation8 + $0x1a0] sm:$0xff] }
 0x16f   :  { %1243 = vmatpush.msrb.mxu1 %v499_v53  ;;  %1263 = vmatpush.msrb.mxu2 %v563_v54  ;;  %v619_v9 = vld [vmem:[#allocation5 + $0xf18] sm:$0xff]  ;;  %v1430_v53 = vld [vmem:[#allocation8 + $0x3e0] sm:$0xff] }
 0x170   :  { %1282 = vmatpush.msrb.mxu3 %v631_v55  ;;  %1224 = vmatpush.msrb.mxu0 %v431_v56  ;;  %v419_v12 = vld [vmem:[#allocation5 + $0x8d8] sm:$0xff]  ;;  %v856_v55 = vadd.f32 %v855_v26, %v836_v47  ;;  %v1362_v56 = vld [vmem:[#allocation8 + $0x1c0] sm:$0xff] }
 0x171   :  { %1244 = vmatpush.msrb.mxu1 %v495_v57  ;;  %1264 = vmatpush.msrb.mxu2 %v559_v58  ;;  %v483_v14 = vld [vmem:[#allocation5 + $0xad8] sm:$0xff]  ;;  %v1426_v57 = vld [vmem:[#allocation8 + $0x3c0] sm:$0xff] }
 0x172   :  { %1283 = vmatpush.msrb.mxu3 %v627_v60  ;;  %1225 = vmatpush.msrb.mxu0 %v427_v62  ;;  %v547_v16 = vld [vmem:[#allocation5 + $0xcd8] sm:$0xff]  ;;  %v1494_v58 = vld [vmem:[#allocation8 + $0x5e0] sm:$0xff]  ;;  %v716_v60 = vadd.f32 %v2861_v10, %v696_v52  ;;  %v915_v10 = vpop.f32.mrf.mxu0 }
 0x173   :  { %1245 = vmatpush.msrb.mxu1 %v491_v63  ;;  %1265 = vmatpush.msrb.mxu2 %v555_v3  ;;  %v615_v17 = vld [vmem:[#allocation5 + $0xef8] sm:$0xff]  ;;  %v1422_v62 = vld [vmem:[#allocation8 + $0x3a0] sm:$0xff] }
 0x174   :  { %1284 = vmatpush.msrb.mxu3 %v623_v4  ;;  %1226 = vmatpush.msrb.mxu0 %v423_v5  ;;  %v415_v22 = vld [vmem:[#allocation5 + $0x8b8] sm:$0xff]  ;;  %v895_v3 = vpop.f32.mrf.mxu3  ;;  %v1490_v4 = vld [vmem:[#allocation8 + $0x5c0] sm:$0xff] }
 0x175   :  { %1246 = vmatpush.msrb.mxu1 %v487_v6  ;;  %1266 = vmatpush.msrb.mxu2 %v551_v8  ;;  %v479_v23 = vld [vmem:[#allocation5 + $0xab8] sm:$0xff]  ;;  %v1418_v5 = vld [vmem:[#allocation8 + $0x380] sm:$0xff]  ;;  %v736_v8 = vadd.f32 %v2865_v27, %v716_v60  ;;  %v1431_v60 = vld [vmem:[#allocation8 + $0x3e8] sm:$0xff] }
 0x176   :  { %1285 = vmatpush.msrb.mxu3 %v619_v9  ;;  %1227 = vmatpush.msrb.mxu0 %v419_v12  ;;  %v543_v24 = vld [vmem:[#allocation5 + $0xcb8] sm:$0xff]  ;;  %v1486_v6 = vld [vmem:[#allocation8 + $0x5a0] sm:$0xff] }
 0x177   :  { %1247 = vmatpush.msrb.mxu1 %v483_v14  ;;  %v611_v25 = vld [vmem:[#allocation5 + $0xed8] sm:$0xff]  ;;  %1267 = vmatpush.msrb.mxu2 %v547_v16  ;;  %v1350_v9 = vld [vmem:[#allocation8 + $0x160] sm:$0xff] }
 0x178   :  { %1286 = vmatpush.msrb.mxu3 %v615_v17  ;;  %v411_v28 = vld [vmem:[#allocation5 + $0x898] sm:$0xff]  ;;  %1228 = vmatpush.msrb.mxu0 %v415_v22  ;;  %v1482_v12 = vld [vmem:[#allocation8 + $0x580] sm:$0xff]  ;;  %v756_v17 = vadd.f32 %v2863_v18, %v736_v8  ;;  %v1419_v8 = vld [vmem:[#allocation8 + $0x388] sm:$0xff] }
 0x179   :  { %v475_v29 = vld [vmem:[#allocation5 + $0xa98] sm:$0xff]  ;;  %1248 = vmatpush.msrb.mxu1 %v479_v23  ;;  %1268 = vmatpush.msrb.mxu2 %v543_v24  ;;  %v1346_v14 = vld [vmem:[#allocation8 + $0x140] sm:$0xff] }
 0x17a   :  { %v539_v59 = vld [vmem:[#allocation5 + $0xc98] sm:$0xff]  ;;  %1287 = vmatpush.msrb.mxu3 %v611_v25  ;;  %1229 = vmatpush.msrb.mxu0 %v411_v28  ;;  %v1410_v16 = vld [vmem:[#allocation8 + $0x340] sm:$0xff]  ;;  %v935_v25 = vpop.f32.mrf.mxu1 }
 0x17b   :  { %v607_v31 = vld [vmem:[#allocation5 + $0xeb8] sm:$0xff]  ;;  %1249 = vmatpush.msrb.mxu1 %v475_v29  ;;  %1269 = vmatpush.msrb.mxu2 %v539_v59  ;;  %v1342_v23 = vld [vmem:[#allocation8 + $0x120] sm:$0xff] }
 0x17c   :  { %v407_v1 = vld [vmem:[#allocation5 + $0x878] sm:$0xff]  ;;  %1288 = vmatpush.msrb.mxu3 %v607_v31  ;;  %1194 = vmatmul.f32.vlgmr.msra.gmra.mxu2 %v2833_v7  ;;  %v1406_v24 = vld [vmem:[#allocation8 + $0x320] sm:$0xff]  ;;  %v776_v31 = vadd.f32 %v2869_v0, %v756_v17  ;;  %v975_v0 = vpop.f32.mrf.mxu3  ;;  %v1407_v17 = vld [vmem:[#allocation8 + $0x328] sm:$0xff] }
 0x17d   :  { %v471_v34 = vld [vmem:[#allocation5 + $0xa78] sm:$0xff]  ;;  %1230 = vmatpush.msrb.mxu0 %v407_v1  ;;  %1214 = vmatmul.f32.vlgmr.msra.gmra.mxu3 %v2839_v13  ;;  %v1474_v27 = vld [vmem:[#allocation8 + $0x540] sm:$0xff] }
 0x17e   :  { %v535_v35 = vld [vmem:[#allocation5 + $0xc78] sm:$0xff]  ;;  %1250 = vmatpush.msrb.mxu1 %v471_v34  ;;  %1154 = vmatmul.f32.vlgmr.msra.gmra.mxu0 %v2836_v11  ;;  %v1338_v28 = vld [vmem:[#allocation8 + $0x100] sm:$0xff] }
 0x17f   :  { %v603_v36 = vld [vmem:[#allocation5 + $0xe98] sm:$0xff]  ;;  %1270 = vmatpush.msrb.mxu2 %v535_v35  ;;  %1174 = vmatmul.f32.vlgmr.msra.gmra.mxu1 %v2842_v19  ;;  %v875_v19 = vpop.f32.mrf.mxu2  ;;  %v1402_v29 = vld [vmem:[#allocation8 + $0x300] sm:$0xff] }
 0x180   :  { %v403_v39 = vld [vmem:[#allocation5 + $0x858] sm:$0xff]  ;;  %1289 = vmatpush.msrb.mxu3 %v603_v36  ;;  %v876_v63 = vadd.f32 %v875_v19, %v856_v55  ;;  %v1470_v59 = vld [vmem:[#allocation8 + $0x520] sm:$0xff] }
 0x181   :  { %v467_v42 = vld [vmem:[#allocation5 + $0xa58] sm:$0xff]  ;;  %1231 = vmatpush.msrb.mxu0 %v403_v39  ;;  %v1334_v34 = vld [vmem:[#allocation8 + $0xe0] sm:$0xff] }
 0x182   :  { %v531_v15 = vld [vmem:[#allocation5 + $0xc58] sm:$0xff]  ;;  %1251 = vmatpush.msrb.mxu1 %v467_v42  ;;  %v1398_v35 = vld [vmem:[#allocation8 + $0x2e0] sm:$0xff]  ;;  %v796_v42 = vadd.f32 %v2874_v41, %v776_v31 }
 0x183   :  { %v599_v44 = vld [vmem:[#allocation5 + $0xe78] sm:$0xff]  ;;  %1271 = vmatpush.msrb.mxu2 %v531_v15  ;;  %v1466_v36 = vld [vmem:[#allocation8 + $0x500] sm:$0xff] }
 0x184   :  { %v399_v45 = vld [vmem:[#allocation5 + $0x838] sm:$0xff]  ;;  %1290 = vmatpush.msrb.mxu3 %v599_v44  ;;  %v1394_v39 = vld [vmem:[#allocation8 + $0x2c0] sm:$0xff] }
 0x185   :  { %v463_v7 = vld [vmem:[#allocation5 + $0xa38] sm:$0xff]  ;;  %1232 = vmatpush.msrb.mxu0 %v399_v45  ;;  %v1390_v44 = vld [vmem:[#allocation8 + $0x2a0] sm:$0xff] }
 0x186   :  { %v527_v21 = vld [vmem:[#allocation5 + $0xc38] sm:$0xff]  ;;  %1252 = vmatpush.msrb.mxu1 %v463_v7  ;;  %v1458_v45 = vld [vmem:[#allocation8 + $0x4c0] sm:$0xff] }
 0x187   :  { %v595_v46 = vld [vmem:[#allocation5 + $0xe58] sm:$0xff]  ;;  %1272 = vmatpush.msrb.mxu2 %v527_v21  ;;  %v955_v18 = vpop.f32.mrf.mxu2  ;;  %v1322_v7 = vld [vmem:[#allocation8 + $0x80] sm:$0xff] }
 0x188   :  { %v395_v49 = vld [vmem:[#allocation5 + $0x818] sm:$0xff]  ;;  %1291 = vmatpush.msrb.mxu3 %v595_v46  ;;  %v1386_v20 = vld [vmem:[#allocation8 + $0x280] sm:$0xff]  ;;  %v816_v46 = vadd.f32 %v2879_v48, %v796_v42  ;;  %v1463_v42 = vld [vmem:[#allocation8 + $0x4e8] sm:$0xff] }
 0x189   :  { %v459_v11 = vld [vmem:[#allocation5 + $0xa18] sm:$0xff]  ;;  %1233 = vmatpush.msrb.mxu0 %v395_v49  ;;  %v1454_v21 = vld [vmem:[#allocation8 + $0x4a0] sm:$0xff] }
 0x18a   :  { %v523_v13 = vld [vmem:[#allocation5 + $0xc18] sm:$0xff]  ;;  %1253 = vmatpush.msrb.mxu1 %v459_v11  ;;  %1234 = vmatmul.f32.vlgmr.msrb.gmra.mxu0 %v2848_v33  ;;  %v896_v33 = vadd.f32 %v895_v3, %v876_v63  ;;  %v1318_v49 = vld [vmem:[#allocation8 + $0x60] sm:$0xff]  ;;  %v1427_v63 = vld [vmem:[#allocation8 + $0x3c8] sm:$0xff] }
 0x18b   :  { %v591_v50 = vld [vmem:[#allocation5 + $0xe38] sm:$0xff]  ;;  %1273 = vmatpush.msrb.mxu2 %v523_v13  ;;  %1572 = vmatpush.msra.mxu0 %v1366_v51  ;;  %v1382_v11 = vld [vmem:[#allocation8 + $0x260] sm:$0xff]  ;;  %v1298_v51 = vmul.f32 0.1, %v816_v46 }
 0x18c   :  { %v587_v54 = vld [vmem:[#allocation5 + $0xe18] sm:$0xff]  ;;  %1292 = vmatpush.msrb.mxu3 %v591_v50  ;;  %1274 = vmatmul.f32.vlgmr.msrb.gmra.mxu2 %v2845_v30  ;;  %v1354_v30 = vld [vmem:[#allocation8 + $0x180] sm:$0xff]  ;;  %v916_v22 = vadd.f32 %v915_v10, %v896_v33  ;;  %v1491_v33 = vld [vmem:[#allocation8 + $0x5c8] sm:$0xff] }
 0x18d   :  { %1592 = vmatpush.msra.mxu1 %v1430_v53  ;;  %1573 = vmatpush.msra.mxu0 %v1362_v56  ;;  %v1450_v41 = vld [vmem:[#allocation8 + $0x480] sm:$0xff]  ;;  %v2893_v56 = vmax.f32 %v816_v46, %v1298_v51  ;;  %v1487_v10 = vld [vmem:[#allocation8 + $0x5a8] sm:$0xff] }
 0x18e   :  { %1293 = vmatpush.msrb.mxu3 %v587_v54  ;;  %1254 = vmatmul.f32.vlgmr.msrb.gmra.mxu1 %v2854_v38  ;;  %v1478_v38 = vld [vmem:[#allocation8 + $0x560] sm:$0xff]  ;;  %v936_v1 = vadd.f32 %v935_v25, %v916_v22  ;;  %v1479_v22 = vld [vmem:[#allocation8 + $0x568] sm:$0xff] }
 0x18f   :  { %1294 = vmatmul.f32.vlgmr.msrb.gmra.mxu3 %v2851_v2  ;;  %1593 = vmatpush.msra.mxu1 %v1426_v57  ;;  %v1414_v2 = vld [vmem:[#allocation8 + $0x360] sm:$0xff]  ;;  %v1475_v25 = vld [vmem:[#allocation8 + $0x548] sm:$0xff] }
 0x190   :  { %1612 = vmatpush.msra.mxu2 %v1494_v58  ;;  %1574 = vmatpush.msra.mxu0 %v1358_v61  ;;  %v956_v15 = vadd.f32 %v955_v18, %v936_v1  ;;  %v1314_v26 = vld [vmem:[#allocation8 + $0x40] sm:$0xff]  ;;  %v1367_v58 = vld [vmem:[#allocation8 + $0x1e8] sm:$0xff] }
 0x191   :  { %1594 = vmatpush.msra.mxu1 %v1422_v62  ;;  %v1378_v13 = vld [vmem:[#allocation8 + $0x240] sm:$0xff]  ;;  %v1363_v62 = vld [vmem:[#allocation8 + $0x1c8] sm:$0xff] }
 0x192   :  { %1613 = vmatpush.msra.mxu2 %v1490_v4  ;;  %1575 = vmatpush.msra.mxu0 %v1354_v30  ;;  %v976_v47 = vadd.f32 %v975_v0, %v956_v15  ;;  %v1446_v50 = vld [vmem:[#allocation8 + $0x460] sm:$0xff]  ;;  %v1359_v4 = vld [vmem:[#allocation8 + $0x1a8] sm:$0xff]  ;;  %v1015_v0 = vpop.f32.mrf.mxu1 }
 0x193   :  { %1595 = vmatpush.msra.mxu1 %v1418_v5  ;;  %v1310_v53 = vld [vmem:[#allocation8 + $0x20] sm:$0xff]  ;;  %v1423_v30 = vld [vmem:[#allocation8 + $0x3a8] sm:$0xff] }
 0x194   :  { %1614 = vmatpush.msra.mxu2 %v1486_v6  ;;  %1576 = vmatpush.msra.mxu0 %v1350_v9  ;;  %v1299_v52 = vmul.f32 0.1, %v976_v47  ;;  %v1374_v54 = vld [vmem:[#allocation8 + $0x220] sm:$0xff]  ;;  %v1495_v5 = vld [vmem:[#allocation8 + $0x5e8] sm:$0xff] }
 0x195   :  { %1596 = vmatpush.msra.mxu1 %v1414_v2  ;;  %v1442_v48 = vld [vmem:[#allocation8 + $0x440] sm:$0xff]  ;;  %v1355_v6 = vld [vmem:[#allocation8 + $0x188] sm:$0xff] }
 0x196   :  { %1615 = vmatpush.msra.mxu2 %v1482_v12  ;;  %1577 = vmatpush.msra.mxu0 %v1346_v14  ;;  %v1306_v55 = vld [vmem:[#allocation8] sm:$0xff]  ;;  %v2895_v57 = vmax.f32 %v976_v47, %v1299_v52  ;;  %v1351_v9 = vld [vmem:[#allocation8 + $0x168] sm:$0xff] }
 0x197   :  { %1597 = vmatpush.msra.mxu1 %v1410_v16  ;;  %v1370_v19 = vld [vmem:[#allocation8 + $0x200] sm:$0xff]  ;;  %v1415_v2 = vld [vmem:[#allocation8 + $0x368] sm:$0xff] }
 0x198   :  { %1616 = vmatpush.msra.mxu2 %v1478_v38  ;;  %1578 = vmatpush.msra.mxu0 %v1342_v23  ;;  %v1438_v61 = vld [vmem:[#allocation8 + $0x420] sm:$0xff]  ;;  %v1347_v12 = vld [vmem:[#allocation8 + $0x148] sm:$0xff] }
 0x199   :  { %1598 = vmatpush.msra.mxu1 %v1406_v24  ;;  %v1434_v3 = vld [vmem:[#allocation8 + $0x400] sm:$0xff]  ;;  %v1411_v14 = vld [vmem:[#allocation8 + $0x348] sm:$0xff] }
 0x19a   :  { %1617 = vmatpush.msra.mxu2 %v1474_v27  ;;  %1579 = vmatpush.msra.mxu0 %v1338_v28  ;;  %v1483_v16 = vld [vmem:[#allocation8 + $0x588] sm:$0xff]  ;;  %v1558_v31 = vld [vmem:[#allocation8 + $0x7e0] sm:$0xff] }
 0x19b   :  { %1599 = vmatpush.msra.mxu1 %v1402_v29  ;;  %v1343_v38 = vld [vmem:[#allocation8 + $0x128] sm:$0xff]  ;;  %v652_v29 = vperm.slane %v2867_v32, 2  ;;  %1632 = vmatpush.msra.mxu3 %v1558_v31  ;;  %v1550_v15 = vld [vmem:[#allocation8 + $0x7a0] sm:$0xff] }
 0x19c   :  { %1618 = vmatpush.msra.mxu2 %v1470_v59  ;;  %1580 = vmatpush.msra.mxu0 %v1334_v34  ;;  %v1339_v23 = vld [vmem:[#allocation8 + $0x108] sm:$0xff] }
 0x19d   :  { %1600 = vmatpush.msra.mxu1 %v1398_v35  ;;  %v1403_v24 = vld [vmem:[#allocation8 + $0x308] sm:$0xff]  ;;  %v995_v35 = vpop.f32.mrf.mxu0 }
 0x19e   :  { %1619 = vmatpush.msra.mxu2 %v1466_v36  ;;  %1581 = vmatpush.msra.mxu0 %v1330_v37  ;;  %v1335_v27 = vld [vmem:[#allocation8 + $0xe8] sm:$0xff]  ;;  %v1554_v36 = vld [vmem:[#allocation8 + $0x7c0] sm:$0xff] }
 0x19f   :  { %1601 = vmatpush.msra.mxu1 %v1394_v39  ;;  %v1399_v28 = vld [vmem:[#allocation8 + $0x2e8] sm:$0xff]  ;;  %1633 = vmatpush.msra.mxu3 %v1554_v36  ;;  %v1510_v36 = vld [vmem:[#allocation8 + $0x660] sm:$0xff] }
 0x1a0   :  { %1620 = vmatpush.msra.mxu2 %v1462_v40  ;;  %1582 = vmatpush.msra.mxu0 %v1326_v43  ;;  %v1471_v59 = vld [vmem:[#allocation8 + $0x528] sm:$0xff]  ;;  %v996_v40 = vadd.f32 %v995_v35, %v652_v29  ;;  %v1352_v29 = vld [vmem:[#allocation8 + $0x170] sm:$0xff] }
 0x1a1   :  { %1602 = vmatpush.msra.mxu1 %v1390_v44  ;;  %v1331_v1 = vld [vmem:[#allocation8 + $0xc8] sm:$0xff]  ;;  %1634 = vmatpush.msra.mxu3 %v1550_v15  ;;  %v1412_v35 = vld [vmem:[#allocation8 + $0x350] sm:$0xff] }
 0x1a2   :  { %1621 = vmatpush.msra.mxu2 %v1458_v45  ;;  %1583 = vmatpush.msra.mxu0 %v1322_v7  ;;  %v1395_v34 = vld [vmem:[#allocation8 + $0x2c8] sm:$0xff]  ;;  %v1016_v45 = vadd.f32 %v1015_v0, %v996_v40  ;;  %v1492_v40 = vld [vmem:[#allocation8 + $0x5d0] sm:$0xff]  ;;  %v1502_v0 = vld [vmem:[#allocation8 + $0x620] sm:$0xff] }
 0x1a3   :  { %1603 = vmatpush.msra.mxu1 %v1386_v20  ;;  %v1467_v18 = vld [vmem:[#allocation8 + $0x508] sm:$0xff]  ;;  %v1340_v15 = vld [vmem:[#allocation8 + $0x110] sm:$0xff] }
 0x1a4   :  { %1622 = vmatpush.msra.mxu2 %v1454_v21  ;;  %1584 = vmatpush.msra.mxu0 %v1318_v49  ;;  %v1327_v37 = vld [vmem:[#allocation8 + $0xa8] sm:$0xff]  ;;  %v1546_v21 = vld [vmem:[#allocation8 + $0x780] sm:$0xff] }
 0x1a5   :  { %1604 = vmatpush.msra.mxu1 %v1382_v11  ;;  %v1391_v39 = vld [vmem:[#allocation8 + $0x2a8] sm:$0xff]  ;;  %1635 = vmatpush.msra.mxu3 %v1546_v21  ;;  %v1498_v21 = vld [vmem:[#allocation8 + $0x600] sm:$0xff] }
 0x1a6   :  { %1623 = vmatpush.msra.mxu2 %v1450_v41  ;;  %1585 = vmatpush.msra.mxu0 %v1314_v26  ;;  %v1323_v43 = vld [vmem:[#allocation8 + $0x88] sm:$0xff]  ;;  %v1542_v41 = vld [vmem:[#allocation8 + $0x760] sm:$0xff] }
 0x1a7   :  { %1605 = vmatpush.msra.mxu1 %v1378_v13  ;;  %v1387_v44 = vld [vmem:[#allocation8 + $0x288] sm:$0xff]  ;;  %1636 = vmatpush.msra.mxu3 %v1542_v41  ;;  %v1392_v41 = vld [vmem:[#allocation8 + $0x2b0] sm:$0xff] }
 0x1a8   :  { %1624 = vmatpush.msra.mxu2 %v1446_v50  ;;  %1586 = vmatpush.msra.mxu0 %v1310_v53  ;;  %v1459_v20 = vld [vmem:[#allocation8 + $0x4c8] sm:$0xff]  ;;  %v1055_v50 = vpop.f32.mrf.mxu3  ;;  %v1538_v53 = vld [vmem:[#allocation8 + $0x740] sm:$0xff] }
 0x1a9   :  { %1606 = vmatpush.msra.mxu1 %v1374_v54  ;;  %v1319_v46 = vld [vmem:[#allocation8 + $0x68] sm:$0xff]  ;;  %1637 = vmatpush.msra.mxu3 %v1538_v53  ;;  %v1476_v53 = vld [vmem:[#allocation8 + $0x550] sm:$0xff] }
 0x1aa   :  { %1625 = vmatpush.msra.mxu2 %v1442_v48  ;;  %1587 = vmatpush.msra.mxu0 %v1306_v55  ;;  %v1383_v47 = vld [vmem:[#allocation8 + $0x268] sm:$0xff] }
 0x1ab   :  { %1607 = vmatpush.msra.mxu1 %v1370_v19  ;;  %1588 = vmatmul.f32.vlgmr.msra.gmra.mxu0 %v2893_v56  ;;  %v1455_v11 = vld [vmem:[#allocation8 + $0x4a8] sm:$0xff] }
 0x1ac   :  { %1608 = vmatmul.f32.vlgmr.msra.gmra.mxu1 %v2895_v57  ;;  %1652 = vmatpush.msrb.mxu0 %v1367_v58  ;;  %v1315_v26 = vld [vmem:[#allocation8 + $0x48] sm:$0xff]  ;;  %v1534_v58 = vld [vmem:[#allocation8 + $0x720] sm:$0xff] }
 0x1ad   :  { %1672 = vmatpush.msrb.mxu1 %v1431_v60  ;;  %1626 = vmatpush.msra.mxu2 %v1438_v61  ;;  %v1379_v13 = vld [vmem:[#allocation8 + $0x248] sm:$0xff] }
 0x1ae   :  { %1653 = vmatpush.msrb.mxu0 %v1363_v62  ;;  %v1451_v52 = vld [vmem:[#allocation8 + $0x488] sm:$0xff]  ;;  %1638 = vmatpush.msra.mxu3 %v1534_v58  ;;  %v1316_v58 = vld [vmem:[#allocation8 + $0x50] sm:$0xff] }
 0x1af   :  { %1673 = vmatpush.msrb.mxu1 %v1427_v63  ;;  %1627 = vmatpush.msra.mxu2 %v1434_v3  ;;  %v1311_v54 = vld [vmem:[#allocation8 + $0x28] sm:$0xff]  ;;  %v1530_v63 = vld [vmem:[#allocation8 + $0x700] sm:$0xff]  ;;  %v1368_v3 = vld [vmem:[#allocation8 + $0x1f0] sm:$0xff] }
 0x1b0   :  { %1654 = vmatpush.msrb.mxu0 %v1359_v4  ;;  %v1375_v48 = vld [vmem:[#allocation8 + $0x228] sm:$0xff]  ;;  %v1432_v4 = vld [vmem:[#allocation8 + $0x3f0] sm:$0xff]  ;;  %1639 = vmatpush.msra.mxu3 %v1530_v63 }
 0x1b1   :  { %1674 = vmatpush.msrb.mxu1 %v1423_v30  ;;  %1692 = vmatpush.msrb.mxu2 %v1495_v5  ;;  %v1447_v19 = vld [vmem:[#allocation8 + $0x468] sm:$0xff]  ;;  %v1312_v63 = vld [vmem:[#allocation8 + $0x30] sm:$0xff] }
 0x1b2   :  { %1655 = vmatpush.msrb.mxu0 %v1355_v6  ;;  %v1307_v60 = vld [vmem:[#allocation8 + $0x8] sm:$0xff] }
 0x1b3   :  { %1675 = vmatpush.msrb.mxu1 %v1419_v8  ;;  %1693 = vmatpush.msrb.mxu2 %v1491_v33  ;;  %v1371_v61 = vld [vmem:[#allocation8 + $0x208] sm:$0xff]  ;;  %v1364_v33 = vld [vmem:[#allocation8 + $0x1d0] sm:$0xff] }
 0x1b4   :  { %1656 = vmatpush.msrb.mxu0 %v1351_v9  ;;  %v1443_v8 = vld [vmem:[#allocation8 + $0x448] sm:$0xff]  ;;  %v1428_v9 = vld [vmem:[#allocation8 + $0x3d0] sm:$0xff] }
 0x1b5   :  { %1676 = vmatpush.msrb.mxu1 %v1415_v2  ;;  %1694 = vmatpush.msrb.mxu2 %v1487_v10  ;;  %v1439_v10 = vld [vmem:[#allocation8 + $0x428] sm:$0xff] }
 0x1b6   :  { %1657 = vmatpush.msrb.mxu0 %v1347_v12  ;;  %v1526_v12 = vld [vmem:[#allocation8 + $0x6e0] sm:$0xff] }
 0x1b7   :  { %1677 = vmatpush.msrb.mxu1 %v1411_v14  ;;  %1695 = vmatpush.msrb.mxu2 %v1483_v16  ;;  %v1360_v14 = vld [vmem:[#allocation8 + $0x1b0] sm:$0xff] }
 0x1b8   :  { %1658 = vmatpush.msrb.mxu0 %v1343_v38  ;;  %v1424_v16 = vld [vmem:[#allocation8 + $0x3b0] sm:$0xff]  ;;  %1640 = vmatpush.msra.mxu3 %v1526_v12  ;;  %v1365_v12 = vld [vmem:[#allocation8 + $0x1d8] sm:$0xff] }
 0x1b9   :  { %1678 = vmatpush.msrb.mxu1 %v1407_v17  ;;  %1696 = vmatpush.msrb.mxu2 %v1479_v22  ;;  %v1435_v22 = vld [vmem:[#allocation8 + $0x408] sm:$0xff] }
 0x1ba   :  { %1659 = vmatpush.msrb.mxu0 %v1339_v23  ;;  %v1035_v7 = vpop.f32.mrf.mxu2  ;;  %v1522_v23 = vld [vmem:[#allocation8 + $0x6c0] sm:$0xff] }
 0x1bb   :  { %1679 = vmatpush.msrb.mxu1 %v1403_v24  ;;  %1697 = vmatpush.msrb.mxu2 %v1475_v25  ;;  %v1036_v49 = vadd.f32 %v1035_v7, %v1016_v45  ;;  %v1356_v24 = vld [vmem:[#allocation8 + $0x190] sm:$0xff] }
 0x1bc   :  { %1660 = vmatpush.msrb.mxu0 %v1335_v27  ;;  %v1420_v25 = vld [vmem:[#allocation8 + $0x390] sm:$0xff]  ;;  %1641 = vmatpush.msra.mxu3 %v1522_v23 }
 0x1bd   :  { %1680 = vmatpush.msrb.mxu1 %v1399_v28  ;;  %1698 = vmatpush.msrb.mxu2 %v1471_v59  ;;  %v1056_v51 = vadd.f32 %v1055_v50, %v1036_v49  ;;  %v1518_v28 = vld [vmem:[#allocation8 + $0x6a0] sm:$0xff]  ;;  %v1416_v59 = vld [vmem:[#allocation8 + $0x370] sm:$0xff] }
 0x1be   :  { %1661 = vmatpush.msrb.mxu0 %v1331_v1  ;;  %v1075_v55 = vpop.f32.mrf.mxu0  ;;  %1642 = vmatpush.msra.mxu3 %v1518_v28  ;;  %v1514_v1 = vld [vmem:[#allocation8 + $0x680] sm:$0xff]  ;;  %v1336_v45 = vld [vmem:[#allocation8 + $0xf0] sm:$0xff] }
 0x1bf   :  { %1681 = vmatpush.msrb.mxu1 %v1395_v34  ;;  %1699 = vmatpush.msrb.mxu2 %v1467_v18  ;;  %v1076_v62 = vadd.f32 %v1075_v55, %v1056_v51  ;;  %v1348_v34 = vld [vmem:[#allocation8 + $0x150] sm:$0xff]  ;;  %v1547_v55 = vld [vmem:[#allocation8 + $0x788] sm:$0xff] }
 0x1c0   :  { %1662 = vmatpush.msrb.mxu0 %v1327_v37  ;;  %1643 = vmatpush.msra.mxu3 %v1514_v1  ;;  %v1496_v18 = vld [vmem:[#allocation8 + $0x5f0] sm:$0xff]  ;;  %v1417_v1 = vld [vmem:[#allocation8 + $0x378] sm:$0xff] }
 0x1c1   :  { %1682 = vmatpush.msrb.mxu1 %v1391_v39  ;;  %1700 = vmatpush.msrb.mxu2 %v1463_v42  ;;  %v1344_v37 = vld [vmem:[#allocation8 + $0x130] sm:$0xff]  ;;  %v1506_v42 = vld [vmem:[#allocation8 + $0x640] sm:$0xff] }
 0x1c2   :  { %1663 = vmatpush.msrb.mxu0 %v1323_v43  ;;  %v1408_v39 = vld [vmem:[#allocation8 + $0x330] sm:$0xff]  ;;  %1644 = vmatpush.msra.mxu3 %v1510_v36  ;;  %v1413_v36 = vld [vmem:[#allocation8 + $0x358] sm:$0xff] }
 0x1c3   :  { %1683 = vmatpush.msrb.mxu1 %v1387_v44  ;;  %1701 = vmatpush.msrb.mxu2 %v1459_v20  ;;  %v1404_v43 = vld [vmem:[#allocation8 + $0x310] sm:$0xff] }
 0x1c4   :  { %1664 = vmatpush.msrb.mxu0 %v1319_v46  ;;  %1645 = vmatpush.msra.mxu3 %v1506_v42  ;;  %v1488_v44 = vld [vmem:[#allocation8 + $0x5b0] sm:$0xff]  ;;  %v1559_v46 = vld [vmem:[#allocation8 + $0x7e8] sm:$0xff]  ;;  %v1409_v42 = vld [vmem:[#allocation8 + $0x338] sm:$0xff] }
 0x1c5   :  { %1684 = vmatpush.msrb.mxu1 %v1383_v47  ;;  %1702 = vmatpush.msrb.mxu2 %v1455_v11  ;;  %v1095_v30 = vpop.f32.mrf.mxu1  ;;  %v1400_v7 = vld [vmem:[#allocation8 + $0x2f0] sm:$0xff] }
 0x1c6   :  { %1665 = vmatpush.msrb.mxu0 %v1315_v26  ;;  %v1096_v5 = vadd.f32 %v1095_v30, %v1076_v62  ;;  %1646 = vmatpush.msra.mxu3 %v1502_v0  ;;  %v1484_v20 = vld [vmem:[#allocation8 + $0x590] sm:$0xff]  ;;  %v1555_v26 = vld [vmem:[#allocation8 + $0x7c8] sm:$0xff]  ;;  %v1405_v0 = vld [vmem:[#allocation8 + $0x318] sm:$0xff] }
 0x1c7   :  { %1685 = vmatpush.msrb.mxu1 %v1379_v13  ;;  %1703 = vmatpush.msrb.mxu2 %v1451_v52  ;;  %v1332_v47 = vld [vmem:[#allocation8 + $0xd0] sm:$0xff]  ;;  %v1551_v52 = vld [vmem:[#allocation8 + $0x7a8] sm:$0xff] }
 0x1c8   :  { %1666 = vmatpush.msrb.mxu0 %v1311_v54  ;;  %v1115_v6 = vpop.f32.mrf.mxu2  ;;  %v1396_v49 = vld [vmem:[#allocation8 + $0x2d0] sm:$0xff]  ;;  %1647 = vmatpush.msra.mxu3 %v1498_v21  ;;  %v1497_v21 = vld [vmem:[#allocation8 + $0x5f8] sm:$0xff] }
 0x1c9   :  { %1686 = vmatpush.msrb.mxu1 %v1375_v48  ;;  %1704 = vmatpush.msrb.mxu2 %v1447_v19  ;;  %v1116_v2 = vadd.f32 %v1115_v6, %v1096_v5  ;;  %v1135_v38 = vpop.f32.mrf.mxu3  ;;  %v1328_v11 = vld [vmem:[#allocation8 + $0xb0] sm:$0xff] }
 0x1ca   :  { %1667 = vmatpush.msrb.mxu0 %v1307_v60  ;;  %1712 = vmatpush.msrb.mxu3 %v1559_v46  ;;  %v1480_v13 = vld [vmem:[#allocation8 + $0x570] sm:$0xff]  ;;  %v1499_v46 = vld [vmem:[#allocation8 + $0x608] sm:$0xff] }
 0x1cb   :  { %1687 = vmatpush.msrb.mxu1 %v1371_v61  ;;  %1668 = vmatmul.f32.vlgmr.msrb.gmra.mxu0 %v2893_v56  ;;  %v1136_v17 = vadd.f32 %v1135_v38, %v1116_v2  ;;  %v1324_v50 = vld [vmem:[#allocation8 + $0x90] sm:$0xff]  ;;  %v1543_v61 = vld [vmem:[#allocation8 + $0x768] sm:$0xff] }
 0x1cc   :  { %1688 = vmatmul.f32.vlgmr.msrb.gmra.mxu1 %v2895_v57  ;;  %1732 = vmatpush.msra.mxu0 %v1368_v3  ;;  %v1388_v51 = vld [vmem:[#allocation8 + $0x290] sm:$0xff]  ;;  %v1527_v38 = vld [vmem:[#allocation8 + $0x6e8] sm:$0xff] }
 0x1cd   :  { %1752 = vmatpush.msra.mxu1 %v1432_v4  ;;  %1705 = vmatpush.msrb.mxu2 %v1443_v8  ;;  %v1300_v27 = vmul.f32 0.1, %v1136_v17  ;;  %v1320_v54 = vld [vmem:[#allocation8 + $0x70] sm:$0xff]  ;;  %v1539_v4 = vld [vmem:[#allocation8 + $0x748] sm:$0xff] }
 0x1ce   :  { %1733 = vmatpush.msra.mxu0 %v1364_v33  ;;  %1713 = vmatpush.msrb.mxu3 %v1555_v26  ;;  %v1384_v48 = vld [vmem:[#allocation8 + $0x270] sm:$0xff]  ;;  %v1535_v8 = vld [vmem:[#allocation8 + $0x728] sm:$0xff]  ;;  %v1369_v33 = vld [vmem:[#allocation8 + $0x1f8] sm:$0xff] }
 0x1cf   :  { %1753 = vmatpush.msra.mxu1 %v1428_v9  ;;  %1706 = vmatpush.msrb.mxu2 %v1439_v10  ;;  %v2902_v31 = vmax.f32 %v1136_v17, %v1300_v27  ;;  %v1472_v19 = vld [vmem:[#allocation8 + $0x530] sm:$0xff]  ;;  %v1433_v9 = vld [vmem:[#allocation8 + $0x3f8] sm:$0xff]  ;;  %v1531_v10 = vld [vmem:[#allocation8 + $0x708] sm:$0xff] }
 0x1d0   :  { %1734 = vmatpush.msra.mxu0 %v1360_v14  ;;  %1714 = vmatpush.msrb.mxu3 %v1551_v52  ;;  %v1380_v60 = vld [vmem:[#allocation8 + $0x250] sm:$0xff]  ;;  %v1429_v14 = vld [vmem:[#allocation8 + $0x3d8] sm:$0xff] }
 0x1d1   :  { %1754 = vmatpush.msra.mxu1 %v1424_v16  ;;  %1707 = vmatpush.msrb.mxu2 %v1435_v22  ;;  %v1468_v62 = vld [vmem:[#allocation8 + $0x510] sm:$0xff]  ;;  %v1361_v17 = vld [vmem:[#allocation8 + $0x1b8] sm:$0xff] }
 0x1d2   :  { %1735 = vmatpush.msra.mxu0 %v1356_v24  ;;  %1628 = vmatmul.f32.vlgmr.msra.gmra.mxu2 %v2902_v31  ;;  %v1376_v3 = vld [vmem:[#allocation8 + $0x230] sm:$0xff]  ;;  %v1425_v22 = vld [vmem:[#allocation8 + $0x3b8] sm:$0xff]  ;;  %v1523_v24 = vld [vmem:[#allocation8 + $0x6c8] sm:$0xff] }
 0x1d3   :  { %1755 = vmatpush.msra.mxu1 %v1420_v25  ;;  %1772 = vmatpush.msra.mxu2 %v1496_v18  ;;  %v1464_v30 = vld [vmem:[#allocation8 + $0x4f0] sm:$0xff]  ;;  %v1357_v25 = vld [vmem:[#allocation8 + $0x198] sm:$0xff] }
 0x1d4   :  { %1736 = vmatpush.msra.mxu0 %v1352_v29  ;;  %1715 = vmatpush.msrb.mxu3 %v1547_v55  ;;  %v1308_v5 = vld [vmem:[#allocation8 + $0x10] sm:$0xff]  ;;  %v1421_v27 = vld [vmem:[#allocation8 + $0x398] sm:$0xff]  ;;  %v1519_v29 = vld [vmem:[#allocation8 + $0x6a8] sm:$0xff] }
 0x1d5   :  { %1756 = vmatpush.msra.mxu1 %v1416_v59  ;;  %1773 = vmatpush.msra.mxu2 %v1492_v40  ;;  %v1372_v6 = vld [vmem:[#allocation8 + $0x210] sm:$0xff]  ;;  %v1353_v59 = vld [vmem:[#allocation8 + $0x178] sm:$0xff] }
 0x1d6   :  { %1737 = vmatpush.msra.mxu0 %v1348_v34  ;;  %1716 = vmatpush.msrb.mxu3 %v1543_v61  ;;  %v1460_v2 = vld [vmem:[#allocation8 + $0x4d0] sm:$0xff]  ;;  %v1349_v18 = vld [vmem:[#allocation8 + $0x158] sm:$0xff] }
 0x1d7   :  { %1757 = vmatpush.msra.mxu1 %v1412_v35  ;;  %1774 = vmatpush.msra.mxu2 %v1488_v44  ;;  %v1456_v16 = vld [vmem:[#allocation8 + $0x4b0] sm:$0xff]  ;;  %v1515_v35 = vld [vmem:[#allocation8 + $0x688] sm:$0xff]  ;;  %v1345_v40 = vld [vmem:[#allocation8 + $0x138] sm:$0xff] }
 0x1d8   :  { %1738 = vmatpush.msra.mxu0 %v1344_v37  ;;  %1717 = vmatpush.msrb.mxu3 %v1539_v4  ;;  %v1452_v23 = vld [vmem:[#allocation8 + $0x490] sm:$0xff]  ;;  %v1341_v44 = vld [vmem:[#allocation8 + $0x118] sm:$0xff] }
 0x1d9   :  { %1758 = vmatpush.msra.mxu1 %v1408_v39  ;;  %1775 = vmatpush.msra.mxu2 %v1484_v20  ;;  %v1448_v28 = vld [vmem:[#allocation8 + $0x470] sm:$0xff]  ;;  %v1511_v39 = vld [vmem:[#allocation8 + $0x668] sm:$0xff]  ;;  %v1401_v20 = vld [vmem:[#allocation8 + $0x2f8] sm:$0xff] }
 0x1da   :  { %1739 = vmatpush.msra.mxu0 %v1340_v15  ;;  %1708 = vmatmul.f32.vlgmr.msrb.gmra.mxu2 %v2902_v31  ;;  %v1444_v34 = vld [vmem:[#allocation8 + $0x450] sm:$0xff]  ;;  %v1393_v26 = vld [vmem:[#allocation8 + $0x2b8] sm:$0xff] }
 0x1db   :  { %1759 = vmatpush.msra.mxu1 %v1404_v43  ;;  %1776 = vmatpush.msra.mxu2 %v1480_v13  ;;  %v1440_v37 = vld [vmem:[#allocation8 + $0x430] sm:$0xff]  ;;  %v1507_v43 = vld [vmem:[#allocation8 + $0x648] sm:$0xff]  ;;  %v653_v13 = vperm.slane %v2867_v32, 3  ;;  %v1389_v52 = vld [vmem:[#allocation8 + $0x298] sm:$0xff] }
 0x1dc   :  { %1740 = vmatpush.msra.mxu0 %v1336_v45  ;;  %1718 = vmatpush.msrb.mxu3 %v1535_v8  ;;  %v1436_v15 = vld [vmem:[#allocation8 + $0x410] sm:$0xff]  ;;  %v1503_v45 = vld [vmem:[#allocation8 + $0x628] sm:$0xff]  ;;  %v1385_v55 = vld [vmem:[#allocation8 + $0x278] sm:$0xff] }
 0x1dd   :  { %1760 = vmatpush.msra.mxu1 %v1400_v7  ;;  %1777 = vmatpush.msra.mxu2 %v1476_v53  ;;  %v1337_v7 = vld [vmem:[#allocation8 + $0xf8] sm:$0xff] }
 0x1de   :  { %1741 = vmatpush.msra.mxu0 %v1332_v47  ;;  %1719 = vmatpush.msrb.mxu3 %v1531_v10  ;;  %v1333_v47 = vld [vmem:[#allocation8 + $0xd8] sm:$0xff] }
 0x1df   :  { %1761 = vmatpush.msra.mxu1 %v1396_v49  ;;  %1778 = vmatpush.msra.mxu2 %v1472_v19  ;;  %v1397_v49 = vld [vmem:[#allocation8 + $0x2d8] sm:$0xff] }
 0x1e0   :  { %1742 = vmatpush.msra.mxu0 %v1328_v11  ;;  %1720 = vmatpush.msrb.mxu3 %v1527_v38  ;;  %v1493_v11 = vld [vmem:[#allocation8 + $0x5d8] sm:$0xff] }
 0x1e1   :  { %1762 = vmatpush.msra.mxu1 %v1392_v41  ;;  %1779 = vmatpush.msra.mxu2 %v1468_v62  ;;  %v1329_v41 = vld [vmem:[#allocation8 + $0xb8] sm:$0xff] }
 0x1e2   :  { %1743 = vmatpush.msra.mxu0 %v1324_v50  ;;  %1721 = vmatpush.msrb.mxu3 %v1523_v24  ;;  %v1489_v50 = vld [vmem:[#allocation8 + $0x5b8] sm:$0xff] }
 0x1e3   :  { %1763 = vmatpush.msra.mxu1 %v1388_v51  ;;  %1780 = vmatpush.msra.mxu2 %v1464_v30  ;;  %v1325_v51 = vld [vmem:[#allocation8 + $0x98] sm:$0xff] }
 0x1e4   :  { %1744 = vmatpush.msra.mxu0 %v1320_v54  ;;  %1722 = vmatpush.msrb.mxu3 %v1519_v29  ;;  %v1485_v53 = vld [vmem:[#allocation8 + $0x598] sm:$0xff] }
 0x1e5   :  { %1764 = vmatpush.msra.mxu1 %v1384_v48  ;;  %1781 = vmatpush.msra.mxu2 %v1460_v2  ;;  %v1321_v48 = vld [vmem:[#allocation8 + $0x78] sm:$0xff] }
 0x1e6   :  { %1745 = vmatpush.msra.mxu0 %v1316_v58  ;;  %1723 = vmatpush.msrb.mxu3 %v1515_v35  ;;  %v1481_v58 = vld [vmem:[#allocation8 + $0x578] sm:$0xff] }
 0x1e7   :  { %1765 = vmatpush.msra.mxu1 %v1380_v60  ;;  %1782 = vmatpush.msra.mxu2 %v1456_v16  ;;  %v1317_v32 = vld [vmem:[#allocation8 + $0x58] sm:$0xff] }
 0x1e8   :  { %1746 = vmatpush.msra.mxu0 %v1312_v63  ;;  %1724 = vmatpush.msrb.mxu3 %v1511_v39  ;;  %v1381_v60 = vld [vmem:[#allocation8 + $0x258] sm:$0xff]  ;;  %v1548_v39 = vld [vmem:[#allocation8 + $0x790] sm:$0xff] }
 0x1e9   :  { %1766 = vmatpush.msra.mxu1 %v1376_v3  ;;  %1783 = vmatpush.msra.mxu2 %v1452_v23  ;;  %v1477_v62 = vld [vmem:[#allocation8 + $0x558] sm:$0xff] }
 0x1ea   :  { %1747 = vmatpush.msra.mxu0 %v1308_v5  ;;  %1725 = vmatpush.msrb.mxu3 %v1507_v43  ;;  %v1313_v4 = vld [vmem:[#allocation8 + $0x38] sm:$0xff]  ;;  %v1532_v43 = vld [vmem:[#allocation8 + $0x710] sm:$0xff] }
 0x1eb   :  { %1767 = vmatpush.msra.mxu1 %v1372_v6  ;;  %1748 = vmatmul.f32.vlgmr.msra.gmra.mxu0 %v2893_v56  ;;  %v1377_v30 = vld [vmem:[#allocation8 + $0x238] sm:$0xff] }
 0x1ec   :  { %1768 = vmatmul.f32.vlgmr.msra.gmra.mxu1 %v2895_v57  ;;  %1812 = vmatpush.msrb.mxu0 %v1369_v33  ;;  %v1473_v5 = vld [vmem:[#allocation8 + $0x538] sm:$0xff] }
 0x1ed   :  { %1832 = vmatpush.msrb.mxu1 %v1433_v9  ;;  %1784 = vmatpush.msra.mxu2 %v1448_v28  ;;  %v1309_v8 = vld [vmem:[#allocation8 + $0x18] sm:$0xff] }
 0x1ee   :  { %1813 = vmatpush.msrb.mxu0 %v1365_v12  ;;  %1726 = vmatpush.msrb.mxu3 %v1503_v45  ;;  %v1373_v33 = vld [vmem:[#allocation8 + $0x218] sm:$0xff]  ;;  %v1520_v45 = vld [vmem:[#allocation8 + $0x6b0] sm:$0xff] }
 0x1ef   :  { %1833 = vmatpush.msrb.mxu1 %v1429_v14  ;;  %1785 = vmatpush.msra.mxu2 %v1444_v34  ;;  %v1469_v2 = vld [vmem:[#allocation8 + $0x518] sm:$0xff] }
 0x1f0   :  { %1814 = vmatpush.msrb.mxu0 %v1361_v17  ;;  %1727 = vmatpush.msrb.mxu3 %v1499_v46  ;;  %v1465_v12 = vld [vmem:[#allocation8 + $0x4f8] sm:$0xff]  ;;  %v1500_v46 = vld [vmem:[#allocation8 + $0x610] sm:$0xff] }
 0x1f1   :  { %1834 = vmatpush.msrb.mxu1 %v1425_v22  ;;  %1786 = vmatpush.msra.mxu2 %v1440_v37  ;;  %v1461_v38 = vld [vmem:[#allocation8 + $0x4d8] sm:$0xff]  ;;  %v1552_v37 = vld [vmem:[#allocation8 + $0x7b0] sm:$0xff] }
 0x1f2   :  { %1815 = vmatpush.msrb.mxu0 %v1357_v25  ;;  %v1457_v23 = vld [vmem:[#allocation8 + $0x4b8] sm:$0xff] }
 0x1f3   :  { %1835 = vmatpush.msrb.mxu1 %v1421_v27  ;;  %1787 = vmatpush.msra.mxu2 %v1436_v15  ;;  %v1453_v27 = vld [vmem:[#allocation8 + $0x498] sm:$0xff]  ;;  %v1536_v15 = vld [vmem:[#allocation8 + $0x730] sm:$0xff] }
 0x1f4   :  { %1816 = vmatpush.msrb.mxu0 %v1353_v59  ;;  %1788 = vmatmul.f32.vlgmr.msra.gmra.mxu2 %v2902_v31  ;;  %v1449_v59 = vld [vmem:[#allocation8 + $0x478] sm:$0xff] }
 0x1f5   :  { %1836 = vmatpush.msrb.mxu1 %v1417_v1  ;;  %1852 = vmatpush.msrb.mxu2 %v1497_v21  ;;  %v1445_v34 = vld [vmem:[#allocation8 + $0x458] sm:$0xff]  ;;  %v1504_v21 = vld [vmem:[#allocation8 + $0x630] sm:$0xff] }
 0x1f6   :  { %1817 = vmatpush.msrb.mxu0 %v1349_v18  ;;  %v1441_v35 = vld [vmem:[#allocation8 + $0x438] sm:$0xff]  ;;  %v1556_v18 = vld [vmem:[#allocation8 + $0x7d0] sm:$0xff] }
 0x1f7   :  { %1837 = vmatpush.msrb.mxu1 %v1413_v36  ;;  %1853 = vmatpush.msrb.mxu2 %v1493_v11  ;;  %v1437_v36 = vld [vmem:[#allocation8 + $0x418] sm:$0xff] }
 0x1f8   :  { %1818 = vmatpush.msrb.mxu0 %v1345_v40  ;;  %v1544_v40 = vld [vmem:[#allocation8 + $0x770] sm:$0xff]  ;;  %v1553_v11 = vld [vmem:[#allocation8 + $0x7b8] sm:$0xff] }
 0x1f9   :  { %1838 = vmatpush.msrb.mxu1 %v1409_v42  ;;  %1854 = vmatpush.msrb.mxu2 %v1489_v50  ;;  %v1540_v42 = vld [vmem:[#allocation8 + $0x750] sm:$0xff]  ;;  %v1541_v50 = vld [vmem:[#allocation8 + $0x758] sm:$0xff] }
 0x1fa   :  { %1819 = vmatpush.msrb.mxu0 %v1341_v44  ;;  %v1528_v44 = vld [vmem:[#allocation8 + $0x6f0] sm:$0xff] }
 0x1fb   :  { %1839 = vmatpush.msrb.mxu1 %v1405_v0  ;;  %v1155_v54 = vpop.f32.mrf.mxu0  ;;  %1855 = vmatpush.msrb.mxu2 %v1485_v53  ;;  %v1524_v0 = vld [vmem:[#allocation8 + $0x6d0] sm:$0xff]  ;;  %v1529_v53 = vld [vmem:[#allocation8 + $0x6f8] sm:$0xff] }
 0x1fc   :  { %1820 = vmatpush.msrb.mxu0 %v1337_v7  ;;  %v1156_v19 = vadd.f32 %v1155_v54, %v653_v13  ;;  %v1175_v61 = vpop.f32.mrf.mxu1  ;;  %v1516_v7 = vld [vmem:[#allocation8 + $0x690] sm:$0xff]  ;;  %v1545_v13 = vld [vmem:[#allocation8 + $0x778] sm:$0xff] }
 0x1fd   :  { %1840 = vmatpush.msrb.mxu1 %v1401_v20  ;;  %1856 = vmatpush.msrb.mxu2 %v1481_v58  ;;  %v1508_v20 = vld [vmem:[#allocation8 + $0x650] sm:$0xff]  ;;  %v1525_v54 = vld [vmem:[#allocation8 + $0x6d8] sm:$0xff]  ;;  %v1952_v58 = vld [vmem:[#allocation11 + $0x1a0] sm:$0xff] }
 0x1fe   :  { %1821 = vmatpush.msrb.mxu0 %v1333_v47  ;;  %v1176_v63 = vadd.f32 %v1175_v61, %v1156_v19  ;;  %v1561_v47 = vld [vmem:[#allocation8 + $0x7f8] sm:$0xff]  ;;  %v2020_v61 = vld [vmem:[#allocation11 + $0x3c0] sm:$0xff] }
 0x1ff   :  { %1841 = vmatpush.msrb.mxu1 %v1397_v49  ;;  %v1195_v3 = vpop.f32.mrf.mxu2  ;;  %1857 = vmatpush.msrb.mxu2 %v1477_v62  ;;  %v1557_v49 = vld [vmem:[#allocation8 + $0x7d8] sm:$0xff] }
 0x200   :  { %1822 = vmatpush.msrb.mxu0 %v1329_v41  ;;  %v1196_v6 = vadd.f32 %v1195_v3, %v1176_v63  ;;  %v1215_v9 = vpop.f32.mrf.mxu3  ;;  %v1960_v41 = vld [vmem:[#allocation11 + $0x1e0] sm:$0xff]  ;;  %v1517_v19 = vld [vmem:[#allocation8 + $0x698] sm:$0xff] }
 0x201   :  { %1842 = vmatpush.msrb.mxu1 %v1393_v26  ;;  %1858 = vmatpush.msrb.mxu2 %v1473_v5  ;;  %v1549_v26 = vld [vmem:[#allocation8 + $0x798] sm:$0xff]  ;;  %v1944_v63 = vld [vmem:[#allocation11 + $0x160] sm:$0xff] }
 0x202   :  { %1823 = vmatpush.msrb.mxu0 %v1325_v51  ;;  %v1216_v10 = vadd.f32 %v1215_v9, %v1196_v6  ;;  %v1537_v51 = vld [vmem:[#allocation8 + $0x738] sm:$0xff]  ;;  %v2016_v3 = vld [vmem:[#allocation11 + $0x3a0] sm:$0xff] }
 0x203   :  { %1843 = vmatpush.msrb.mxu1 %v1389_v52  ;;  %1859 = vmatpush.msrb.mxu2 %v1469_v2  ;;  %v1533_v52 = vld [vmem:[#allocation8 + $0x718] sm:$0xff]  ;;  %v2012_v5 = vld [vmem:[#allocation11 + $0x380] sm:$0xff] }
 0x204   :  { %1824 = vmatpush.msrb.mxu0 %v1321_v48  ;;  %v1521_v48 = vld [vmem:[#allocation8 + $0x6b8] sm:$0xff]  ;;  %v1932_v2 = vld [vmem:[#allocation11 + $0x100] sm:$0xff] }
 0x205   :  { %1844 = vmatpush.msrb.mxu1 %v1385_v55  ;;  %1860 = vmatpush.msrb.mxu2 %v1465_v12  ;;  %v1956_v55 = vld [vmem:[#allocation11 + $0x1c0] sm:$0xff]  ;;  %v1513_v62 = vld [vmem:[#allocation8 + $0x678] sm:$0xff] }
 0x206   :  { %1825 = vmatpush.msrb.mxu0 %v1317_v32  ;;  %v1948_v32 = vld [vmem:[#allocation11 + $0x180] sm:$0xff]  ;;  %v1505_v6 = vld [vmem:[#allocation8 + $0x638] sm:$0xff] }
 0x207   :  { %1845 = vmatpush.msrb.mxu1 %v1381_v60  ;;  %v1235_v14 = vpop.f32.mrf.mxu0  ;;  %1861 = vmatpush.msrb.mxu2 %v1461_v38  ;;  %v2024_v60 = vld [vmem:[#allocation11 + $0x3e0] sm:$0xff]  ;;  %v1501_v9 = vld [vmem:[#allocation8 + $0x618] sm:$0xff] }
 0x208   :  { %1826 = vmatpush.msrb.mxu0 %v1313_v4  ;;  %v1236_v16 = vadd.f32 %v1235_v14, %v1216_v10  ;;  %v1509_v4 = vld [vmem:[#allocation8 + $0x658] sm:$0xff]  ;;  %v2004_v10 = vld [vmem:[#allocation11 + $0x340] sm:$0xff] }
 0x209   :  { %1846 = vmatpush.msrb.mxu1 %v1377_v30  ;;  %1862 = vmatpush.msrb.mxu2 %v1457_v23  ;;  %v1940_v30 = vld [vmem:[#allocation11 + $0x140] sm:$0xff] }
 0x20a   :  { %1827 = vmatpush.msrb.mxu0 %v1309_v8  ;;  %v1936_v8 = vld [vmem:[#allocation11 + $0x120] sm:$0xff] }
 0x20b   :  { %1847 = vmatpush.msrb.mxu1 %v1373_v33  ;;  %1828 = vmatmul.f32.vlgmr.msrb.gmra.mxu0 %v2893_v56  ;;  %v1255_v17 = vpop.f32.mrf.mxu1  ;;  %v2008_v33 = vld [vmem:[#allocation11 + $0x360] sm:$0xff] }
 0x20c   :  { %1848 = vmatmul.f32.vlgmr.msrb.gmra.mxu1 %v2895_v57  ;;  %v1256_v22 = vadd.f32 %v1255_v17, %v1236_v16  ;;  %1863 = vmatpush.msrb.mxu2 %v1453_v27  ;;  %v1560_v57 = vld [vmem:[#allocation8 + $0x7f0] sm:$0xff]  ;;  %v1928_v12 = vld [vmem:[#allocation11 + $0xe0] sm:$0xff] }
 0x20d   :  { %2166 = vmatpush.msra.mxu0 %v1960_v41  ;;  %2186 = vmatpush.msra.mxu1 %v2024_v60  ;;  %v2000_v14 = vld [vmem:[#allocation11 + $0x320] sm:$0xff]  ;;  %v2013_v41 = vld [vmem:[#allocation11 + $0x388] sm:$0xff] }
 0x20e   :  { %1864 = vmatpush.msrb.mxu2 %v1449_v59  ;;  %v1924_v16 = vld [vmem:[#allocation11 + $0xc0] sm:$0xff] }
 0x20f   :  { %v1275_v24 = vpop.f32.mrf.mxu2  ;;  %2167 = vmatpush.msra.mxu0 %v1956_v55  ;;  %2187 = vmatpush.msra.mxu1 %v2020_v61  ;;  %v1996_v38 = vld [vmem:[#allocation11 + $0x300] sm:$0xff]  ;;  %v2001_v55 = vld [vmem:[#allocation11 + $0x328] sm:$0xff] }
 0x210   :  { %v1276_v25 = vadd.f32 %v1275_v24, %v1256_v22  ;;  %1865 = vmatpush.msrb.mxu2 %v1445_v34  ;;  %v1920_v17 = vld [vmem:[#allocation11 + $0xa0] sm:$0xff]  ;;  %v1913_v61 = vld [vmem:[#allocation11 + $0x68] sm:$0xff] }
 0x211   :  { %2168 = vmatpush.msra.mxu0 %v1952_v58  ;;  %2188 = vmatpush.msra.mxu1 %v2016_v3  ;;  %v1916_v22 = vld [vmem:[#allocation11 + $0x80] sm:$0xff]  ;;  %v1917_v58 = vld [vmem:[#allocation11 + $0x88] sm:$0xff] }
 0x212   :  { %v1295_v28 = vpop.f32.mrf.mxu3  ;;  %1866 = vmatpush.msrb.mxu2 %v1441_v35  ;;  %v1912_v23 = vld [vmem:[#allocation11 + $0x60] sm:$0xff]  ;;  %v1909_v3 = vld [vmem:[#allocation11 + $0x48] sm:$0xff] }
 0x213   :  { %v1296_v29 = vadd.f32 %v1295_v28, %v1276_v25  ;;  %2169 = vmatpush.msra.mxu0 %v1948_v32  ;;  %2189 = vmatpush.msra.mxu1 %v2012_v5  ;;  %v1992_v24 = vld [vmem:[#allocation11 + $0x2e0] sm:$0xff]  ;;  %v1997_v32 = vld [vmem:[#allocation11 + $0x308] sm:$0xff] }
 0x214   :  { %1867 = vmatpush.msrb.mxu2 %v1437_v36  ;;  %v1908_v25 = vld [vmem:[#allocation11 + $0x40] sm:$0xff]  ;;  %v1905_v5 = vld [vmem:[#allocation11 + $0x28] sm:$0xff] }
 0x215   :  { %v1301_v1 = vmul.f32 0.1, %v1296_v29  ;;  %1868 = vmatmul.f32.vlgmr.msrb.gmra.mxu2 %v2902_v31  ;;  %v1512_v31 = vld [vmem:[#allocation8 + $0x670] sm:$0xff]  ;;  %2170 = vmatpush.msra.mxu0 %v1944_v63  ;;  %v1988_v27 = vld [vmem:[#allocation11 + $0x2c0] sm:$0xff] }
 0x216   :  { %2190 = vmatpush.msra.mxu1 %v2008_v33  ;;  %v1904_v28 = vld [vmem:[#allocation11 + $0x20] sm:$0xff]  ;;  %v1901_v33 = vld [vmem:[#allocation11 + $0x8] sm:$0xff] }
 0x217   :  { %v2912_v56 = vmax.f32 %v1296_v29, %v1301_v1  ;;  %2171 = vmatpush.msra.mxu0 %v1940_v30  ;;  %v1984_v29 = vld [vmem:[#allocation11 + $0x2a0] sm:$0xff] }
 0x218   :  { %2191 = vmatpush.msra.mxu1 %v2004_v10  ;;  %v2088_v59 = vld [vmem:[#allocation11 + $0x5e0] sm:$0xff]  ;;  %v2089_v10 = vld [vmem:[#allocation11 + $0x5e8] sm:$0xff] }
 0x219   :  { %1648 = vmatmul.f32.vlgmr.msra.gmra.mxu3 %v2912_v56  ;;  %2172 = vmatpush.msra.mxu0 %v1936_v8  ;;  %v1900_v1 = vld [vmem:[#allocation11] sm:$0xff] }
 0x21a   :  { %1792 = vmatpush.msra.mxu3 %v1560_v57  ;;  %2192 = vmatpush.msra.mxu1 %v2000_v14  ;;  %v1980_v34 = vld [vmem:[#allocation11 + $0x280] sm:$0xff] }
 0x21b   :  { %2173 = vmatpush.msra.mxu0 %v1932_v2  ;;  %2206 = vmatpush.msra.mxu2 %v2088_v59  ;;  %v1976_v57 = vld [vmem:[#allocation11 + $0x260] sm:$0xff]  ;;  %v2073_v59 = vld [vmem:[#allocation11 + $0x568] sm:$0xff] }
 0x21c   :  { %1793 = vmatpush.msra.mxu3 %v1556_v18  ;;  %2193 = vmatpush.msra.mxu1 %v1996_v38  ;;  %v2084_v35 = vld [vmem:[#allocation11 + $0x5c0] sm:$0xff]  ;;  %v1957_v18 = vld [vmem:[#allocation11 + $0x1c8] sm:$0xff] }
 0x21d   :  { %2174 = vmatpush.msra.mxu0 %v1928_v12  ;;  %2207 = vmatpush.msra.mxu2 %v2084_v35  ;;  %v1972_v36 = vld [vmem:[#allocation11 + $0x240] sm:$0xff]  ;;  %v1977_v12 = vld [vmem:[#allocation11 + $0x268] sm:$0xff] }
 0x21e   :  { %1794 = vmatpush.msra.mxu3 %v1552_v37  ;;  %2194 = vmatpush.msra.mxu1 %v1992_v24  ;;  %v2080_v37 = vld [vmem:[#allocation11 + $0x5a0] sm:$0xff]  ;;  %v1973_v38 = vld [vmem:[#allocation11 + $0x248] sm:$0xff] }
 0x21f   :  { %2175 = vmatpush.msra.mxu0 %v1924_v16  ;;  %2208 = vmatpush.msra.mxu2 %v2080_v37  ;;  %v2040_v60 = vld [vmem:[#allocation11 + $0x460] sm:$0xff]  ;;  %v2085_v16 = vld [vmem:[#allocation11 + $0x5c8] sm:$0xff] }
 0x220   :  { %1795 = vmatpush.msra.mxu3 %v1548_v39  ;;  %2195 = vmatpush.msra.mxu1 %v1988_v27  ;;  %v1953_v39 = vld [vmem:[#allocation11 + $0x1a8] sm:$0xff]  ;;  %v2036_v63 = vld [vmem:[#allocation11 + $0x440] sm:$0xff] }
 0x221   :  { %1728 = vmatmul.f32.vlgmr.msrb.gmra.mxu3 %v2912_v56  ;;  %2176 = vmatpush.msra.mxu0 %v1920_v17  ;;  %v2032_v30 = vld [vmem:[#allocation11 + $0x420] sm:$0xff]  ;;  %v1965_v27 = vld [vmem:[#allocation11 + $0x208] sm:$0xff] }
 0x222   :  { %1796 = vmatpush.msra.mxu3 %v1544_v40  ;;  %2196 = vmatpush.msra.mxu1 %v1984_v29  ;;  %v1968_v40 = vld [vmem:[#allocation11 + $0x220] sm:$0xff]  ;;  %v2919_v29 = vld [vmem:[#allocation10] sm:$0xf]  ;;  %v2061_v37 = vld [vmem:[#allocation11 + $0x508] sm:$0xff] }
 0x223   :  { %2177 = vmatpush.msra.mxu0 %v1916_v22  ;;  %v2028_v8 = vld [vmem:[#allocation11 + $0x400] sm:$0xff]  ;;  %v2081_v22 = vld [vmem:[#allocation11 + $0x5a8] sm:$0xff] }
 0x224   :  { %1797 = vmatpush.msra.mxu3 %v1540_v42  ;;  %2197 = vmatpush.msra.mxu1 %v1980_v34  ;;  %v2076_v42 = vld [vmem:[#allocation11 + $0x580] sm:$0xff]  ;;  %v2069_v34 = vld [vmem:[#allocation11 + $0x548] sm:$0xff] }
 0x225   :  { %2178 = vmatpush.msra.mxu0 %v1912_v23  ;;  %2209 = vmatpush.msra.mxu2 %v2076_v42  ;;  %v2152_v2 = vld [vmem:[#allocation11 + $0x7e0] sm:$0xff]  ;;  %v1969_v23 = vld [vmem:[#allocation11 + $0x228] sm:$0xff] }
 0x226   :  { %1798 = vmatpush.msra.mxu3 %v1536_v15  ;;  %2198 = vmatpush.msra.mxu1 %v1976_v57  ;;  %v1949_v15 = vld [vmem:[#allocation11 + $0x188] sm:$0xff]  ;;  %v2148_v14 = vld [vmem:[#allocation11 + $0x7c0] sm:$0xff] }
 0x227   :  { %2179 = vmatpush.msra.mxu0 %v1908_v25  ;;  %v2144_v17 = vld [vmem:[#allocation11 + $0x7a0] sm:$0xff]  ;;  %v2077_v25 = vld [vmem:[#allocation11 + $0x588] sm:$0xff] }
 0x228   :  { %1799 = vmatpush.msra.mxu3 %v1532_v43  ;;  %2199 = vmatpush.msra.mxu1 %v1972_v36  ;;  %v1964_v43 = vld [vmem:[#allocation11 + $0x200] sm:$0xff]  ;;  %v1589_v35 = vpop.f32.mrf.mxu0 }
 0x229   :  { %2180 = vmatpush.msra.mxu0 %v1904_v28  ;;  %v2140_v24 = vld [vmem:[#allocation11 + $0x780] sm:$0xff] }
 0x22a   :  { %1800 = vmatpush.msra.mxu3 %v1528_v44  ;;  %2200 = vmatpush.msra.mxu1 %v1968_v40  ;;  %v2072_v44 = vld [vmem:[#allocation11 + $0x560] sm:$0xff] }
 0x22b   :  { %2181 = vmatpush.msra.mxu0 %v1900_v1  ;;  %2210 = vmatpush.msra.mxu2 %v2072_v44  ;;  %v2136_v28 = vld [vmem:[#allocation11 + $0x760] sm:$0xff]  ;;  %v1609_v44 = vpop.f32.mrf.mxu1 }
 0x22c   :  { %1801 = vmatpush.msra.mxu3 %v1524_v0  ;;  %v1945_v0 = vld [vmem:[#allocation11 + $0x168] sm:$0xff]  ;;  %2201 = vmatpush.msra.mxu1 %v1964_v43  ;;  %v2132_v1 = vld [vmem:[#allocation11 + $0x740] sm:$0xff] }
 0x22d   :  { %v2128_v57 = vld [vmem:[#allocation11 + $0x720] sm:$0xff] }
 0x22e   :  { %1802 = vmatpush.msra.mxu3 %v1520_v45  ;;  %v2025_v45 = vld [vmem:[#allocation11 + $0x3e8] sm:$0xff]  ;;  %v2124_v36 = vld [vmem:[#allocation11 + $0x700] sm:$0xff] }
 0x22f   :  { %2266 = vmatpush.msrb.mxu1 %v2025_v45  ;;  %v2120_v40 = vld [vmem:[#allocation11 + $0x6e0] sm:$0xff] }
 0x230   :  { %1803 = vmatpush.msra.mxu3 %v1516_v7  ;;  %v2068_v7 = vld [vmem:[#allocation11 + $0x540] sm:$0xff] }
 0x231   :  { %2211 = vmatpush.msra.mxu2 %v2068_v7  ;;  %v2116_v43 = vld [vmem:[#allocation11 + $0x6c0] sm:$0xff]  ;;  %v1565_v7 = vperm.slane %v2919_v29, 1 }
 0x232   :  { %1804 = vmatpush.msra.mxu3 %v1512_v31  ;;  %v1941_v31 = vld [vmem:[#allocation11 + $0x148] sm:$0xff] }
 0x234   :  { %1805 = vmatpush.msra.mxu3 %v1508_v20  ;;  %v2021_v20 = vld [vmem:[#allocation11 + $0x3c8] sm:$0xff] }
 0x235   :  { %2267 = vmatpush.msrb.mxu1 %v2021_v20 }
 0x236   :  { %1806 = vmatpush.msra.mxu3 %v1504_v21  ;;  %v2064_v21 = vld [vmem:[#allocation11 + $0x520] sm:$0xff] }
 0x237   :  { %2212 = vmatpush.msra.mxu2 %v2064_v21  ;;  %v2049_v21 = vld [vmem:[#allocation11 + $0x4a8] sm:$0xff] }
 0x238   :  { %1807 = vmatpush.msra.mxu3 %v1500_v46  ;;  %v1937_v46 = vld [vmem:[#allocation11 + $0x128] sm:$0xff] }
 0x239   :  { %1808 = vmatmul.f32.vlgmr.msra.gmra.mxu3 %v2912_v56 }
 0x23a   :  { %1872 = vmatpush.msrb.mxu3 %v1561_v47  ;;  %v2017_v47 = vld [vmem:[#allocation11 + $0x3a8] sm:$0xff] }
 0x23b   :  { %2268 = vmatpush.msrb.mxu1 %v2017_v47  ;;  %v2108_v47 = vld [vmem:[#allocation11 + $0x680] sm:$0xff] }
 0x23c   :  { %1873 = vmatpush.msrb.mxu3 %v1557_v49  ;;  %v2060_v49 = vld [vmem:[#allocation11 + $0x500] sm:$0xff] }
 0x23d   :  { %2213 = vmatpush.msra.mxu2 %v2060_v49  ;;  %2269 = vmatpush.msrb.mxu1 %v2013_v41 }
 0x23e   :  { %1874 = vmatpush.msrb.mxu3 %v1553_v11  ;;  %v1933_v11 = vld [vmem:[#allocation11 + $0x108] sm:$0xff] }
 0x240   :  { %1875 = vmatpush.msrb.mxu3 %v1549_v26  ;;  %v2056_v26 = vld [vmem:[#allocation11 + $0x4e0] sm:$0xff] }
 0x241   :  { %2214 = vmatpush.msra.mxu2 %v2056_v26 }
 0x242   :  { %1876 = vmatpush.msrb.mxu3 %v1545_v13  ;;  %v1929_v13 = vld [vmem:[#allocation11 + $0xe8] sm:$0xff] }
 0x244   :  { %1877 = vmatpush.msrb.mxu3 %v1541_v50  ;;  %v2009_v50 = vld [vmem:[#allocation11 + $0x368] sm:$0xff] }
 0x245   :  { %2270 = vmatpush.msrb.mxu1 %v2009_v50  ;;  %v2104_v50 = vld [vmem:[#allocation11 + $0x660] sm:$0xff] }
 0x246   :  { %1878 = vmatpush.msrb.mxu3 %v1537_v51  ;;  %v2052_v51 = vld [vmem:[#allocation11 + $0x4c0] sm:$0xff] }
 0x247   :  { %2215 = vmatpush.msra.mxu2 %v2052_v51  ;;  %v2041_v51 = vld [vmem:[#allocation11 + $0x468] sm:$0xff] }
 0x248   :  { %1879 = vmatpush.msrb.mxu3 %v1533_v52  ;;  %v1925_v52 = vld [vmem:[#allocation11 + $0xc8] sm:$0xff]  ;;  %v1669_v20 = vpop.f32.mrf.mxu0 }
 0x249   :  { %v1670_v41 = vadd.f32 %v1669_v20, %v1565_v7  ;;  %v1994_v20 = vld [vmem:[#allocation11 + $0x2f0] sm:$0xff] }
 0x24a   :  { %1880 = vmatpush.msrb.mxu3 %v1529_v53  ;;  %v2005_v53 = vld [vmem:[#allocation11 + $0x348] sm:$0xff] }
 0x24b   :  { %2271 = vmatpush.msrb.mxu1 %v2005_v53 }
 0x24c   :  { %1881 = vmatpush.msrb.mxu3 %v1525_v54  ;;  %v2048_v54 = vld [vmem:[#allocation11 + $0x4a0] sm:$0xff] }
 0x24d   :  { %2216 = vmatpush.msra.mxu2 %v2048_v54  ;;  %2272 = vmatpush.msrb.mxu1 %v2001_v55  ;;  %v1962_v55 = vld [vmem:[#allocation11 + $0x1f0] sm:$0xff] }
 0x24e   :  { %1882 = vmatpush.msrb.mxu3 %v1521_v48  ;;  %v1921_v48 = vld [vmem:[#allocation11 + $0xa8] sm:$0xff] }
 0x24f   :  { %2273 = vmatpush.msrb.mxu1 %v1997_v32  ;;  %v2096_v32 = vld [vmem:[#allocation11 + $0x620] sm:$0xff] }
 0x250   :  { %1883 = vmatpush.msrb.mxu3 %v1517_v19  ;;  %v2044_v19 = vld [vmem:[#allocation11 + $0x480] sm:$0xff] }
 0x251   :  { %2217 = vmatpush.msra.mxu2 %v2044_v19  ;;  %v2100_v19 = vld [vmem:[#allocation11 + $0x640] sm:$0xff] }
 0x252   :  { %1884 = vmatpush.msrb.mxu3 %v1513_v62  ;;  %v1993_v62 = vld [vmem:[#allocation11 + $0x2e8] sm:$0xff] }
 0x253   :  { %2218 = vmatpush.msra.mxu2 %v2040_v60  ;;  %2274 = vmatpush.msrb.mxu1 %v1993_v62  ;;  %v2033_v60 = vld [vmem:[#allocation11 + $0x428] sm:$0xff]  ;;  %v1958_v62 = vld [vmem:[#allocation11 + $0x1d0] sm:$0xff] }
 0x254   :  { %1885 = vmatpush.msrb.mxu3 %v1509_v4  ;;  %v1989_v4 = vld [vmem:[#allocation11 + $0x2c8] sm:$0xff] }
 0x255   :  { %2219 = vmatpush.msra.mxu2 %v2036_v63  ;;  %2275 = vmatpush.msrb.mxu1 %v1989_v4  ;;  %v1629_v42 = vpop.f32.mrf.mxu2  ;;  %v2092_v63 = vld [vmem:[#allocation11 + $0x600] sm:$0xff]  ;;  %v2029_v4 = vld [vmem:[#allocation11 + $0x408] sm:$0xff] }
 0x256   :  { %1886 = vmatpush.msrb.mxu3 %v1505_v6  ;;  %v1985_v6 = vld [vmem:[#allocation11 + $0x2a8] sm:$0xff] }
 0x257   :  { %2220 = vmatpush.msra.mxu2 %v2032_v30  ;;  %2276 = vmatpush.msrb.mxu1 %v1985_v6  ;;  %v2153_v6 = vld [vmem:[#allocation11 + $0x7e8] sm:$0xff] }
 0x258   :  { %1887 = vmatpush.msrb.mxu3 %v1501_v9  ;;  %v1981_v9 = vld [vmem:[#allocation11 + $0x288] sm:$0xff] }
 0x259   :  { %1888 = vmatmul.f32.vlgmr.msrb.gmra.mxu3 %v2912_v56  ;;  %v1961_v56 = vld [vmem:[#allocation11 + $0x1e8] sm:$0xff]  ;;  %2221 = vmatpush.msra.mxu2 %v2028_v8 }
 0x25a   :  { %2246 = vmatpush.msrb.mxu0 %v1961_v56  ;;  %2226 = vmatpush.msra.mxu3 %v2152_v2  ;;  %v1564_v56 = vperm.slane %v2919_v29, 0  ;;  %v2149_v8 = vld [vmem:[#allocation11 + $0x7c8] sm:$0xff] }
 0x25b   :  { %2277 = vmatpush.msrb.mxu1 %v1981_v9  ;;  %2286 = vmatpush.msrb.mxu2 %v2089_v10  ;;  %v1950_v9 = vld [vmem:[#allocation11 + $0x190] sm:$0xff] }
 0x25c   :  { %2247 = vmatpush.msrb.mxu0 %v1957_v18  ;;  %2227 = vmatpush.msra.mxu3 %v2148_v14  ;;  %v2065_v18 = vld [vmem:[#allocation11 + $0x528] sm:$0xff]  ;;  %v1946_v10 = vld [vmem:[#allocation11 + $0x170] sm:$0xff] }
 0x25d   :  { %2278 = vmatpush.msrb.mxu1 %v1977_v12  ;;  %2287 = vmatpush.msrb.mxu2 %v2085_v16  ;;  %v1709_v53 = vpop.f32.mrf.mxu2  ;;  %v2026_v12 = vld [vmem:[#allocation11 + $0x3f0] sm:$0xff]  ;;  %v2145_v14 = vld [vmem:[#allocation11 + $0x7a8] sm:$0xff] }
 0x25e   :  { %2248 = vmatpush.msrb.mxu0 %v1953_v39  ;;  %2228 = vmatpush.msra.mxu3 %v2144_v17  ;;  %v1590_v39 = vadd.f32 %v1589_v35, %v1564_v56  ;;  %v1942_v16 = vld [vmem:[#allocation11 + $0x150] sm:$0xff]  ;;  %v2141_v17 = vld [vmem:[#allocation11 + $0x788] sm:$0xff] }
 0x25f   :  { %2279 = vmatpush.msrb.mxu1 %v1973_v38  ;;  %2288 = vmatpush.msrb.mxu2 %v2081_v22  ;;  %v2022_v38 = vld [vmem:[#allocation11 + $0x3d0] sm:$0xff] }
 0x260   :  { %2249 = vmatpush.msrb.mxu0 %v1949_v15  ;;  %2229 = vmatpush.msra.mxu3 %v2140_v24  ;;  %v2057_v15 = vld [vmem:[#allocation11 + $0x4e8] sm:$0xff]  ;;  %v1610_v45 = vadd.f32 %v1609_v44, %v1590_v39  ;;  %v1938_v22 = vld [vmem:[#allocation11 + $0x130] sm:$0xff] }
 0x261   :  { %2280 = vmatpush.msrb.mxu1 %v1969_v23  ;;  %2289 = vmatpush.msrb.mxu2 %v2077_v25  ;;  %v2018_v23 = vld [vmem:[#allocation11 + $0x3b0] sm:$0xff]  ;;  %v2137_v24 = vld [vmem:[#allocation11 + $0x768] sm:$0xff] }
 0x262   :  { %2250 = vmatpush.msrb.mxu0 %v1945_v0  ;;  %2230 = vmatpush.msra.mxu3 %v2136_v28  ;;  %v2053_v0 = vld [vmem:[#allocation11 + $0x4c8] sm:$0xff]  ;;  %v1934_v25 = vld [vmem:[#allocation11 + $0x110] sm:$0xff] }
 0x263   :  { %2281 = vmatpush.msrb.mxu1 %v1965_v27  ;;  %2290 = vmatpush.msrb.mxu2 %v2073_v59  ;;  %v2014_v27 = vld [vmem:[#allocation11 + $0x390] sm:$0xff]  ;;  %v2133_v28 = vld [vmem:[#allocation11 + $0x748] sm:$0xff]  ;;  %v1566_v59 = vperm.slane %v2919_v29, 2 }
 0x264   :  { %2251 = vmatpush.msrb.mxu0 %v1941_v31  ;;  %2231 = vmatpush.msra.mxu3 %v2132_v1  ;;  %v2112_v31 = vld [vmem:[#allocation11 + $0x6a0] sm:$0xff]  ;;  %v1930_v1 = vld [vmem:[#allocation11 + $0xf0] sm:$0xff] }
 0x265   :  { %2291 = vmatpush.msrb.mxu2 %v2069_v34  ;;  %v2010_v34 = vld [vmem:[#allocation11 + $0x370] sm:$0xff] }
 0x266   :  { %2252 = vmatpush.msrb.mxu0 %v1937_v46  ;;  %2232 = vmatpush.msra.mxu3 %v2128_v57  ;;  %v1630_v46 = vadd.f32 %v1629_v42, %v1610_v45  ;;  %v2129_v57 = vld [vmem:[#allocation11 + $0x728] sm:$0xff]  ;;  %v1926_v35 = vld [vmem:[#allocation11 + $0xd0] sm:$0xff] }
 0x267   :  { %2292 = vmatpush.msrb.mxu2 %v2065_v18  ;;  %v2006_v18 = vld [vmem:[#allocation11 + $0x350] sm:$0xff]  ;;  %v2121_v42 = vld [vmem:[#allocation11 + $0x6e8] sm:$0xff] }
 0x268   :  { %2253 = vmatpush.msrb.mxu0 %v1933_v11  ;;  %2233 = vmatpush.msra.mxu3 %v2124_v36  ;;  %v2045_v11 = vld [vmem:[#allocation11 + $0x488] sm:$0xff]  ;;  %v1749_v56 = vpop.f32.mrf.mxu0  ;;  %v1922_v39 = vld [vmem:[#allocation11 + $0xb0] sm:$0xff] }
 0x269   :  { %2293 = vmatpush.msrb.mxu2 %v2061_v37  ;;  %v2125_v36 = vld [vmem:[#allocation11 + $0x708] sm:$0xff]  ;;  %v1750_v37 = vadd.f32 %v1749_v56, %v1566_v59  ;;  %v1567_v59 = vperm.slane %v2919_v29, 3  ;;  %v1931_v56 = vld [vmem:[#allocation11 + $0xf8] sm:$0xff] }
 0x26a   :  { %2254 = vmatpush.msrb.mxu0 %v1929_v13  ;;  %2234 = vmatpush.msra.mxu3 %v2120_v40  ;;  %v2002_v40 = vld [vmem:[#allocation11 + $0x330] sm:$0xff]  ;;  %v2117_v45 = vld [vmem:[#allocation11 + $0x6c8] sm:$0xff]  ;;  %v2003_v29 = vld [vmem:[#allocation11 + $0x338] sm:$0xff] }
 0x26b   :  { %2294 = vmatpush.msrb.mxu2 %v2057_v15  ;;  %v1918_v15 = vld [vmem:[#allocation11 + $0x90] sm:$0xff] }
 0x26c   :  { %2255 = vmatpush.msrb.mxu0 %v1925_v52  ;;  %2235 = vmatpush.msra.mxu3 %v2116_v43  ;;  %v1689_v52 = vpop.f32.mrf.mxu1  ;;  %v1998_v43 = vld [vmem:[#allocation11 + $0x310] sm:$0xff] }
 0x26d   :  { %2295 = vmatpush.msrb.mxu2 %v2053_v0  ;;  %v1690_v54 = vadd.f32 %v1689_v52, %v1670_v41  ;;  %v2109_v41 = vld [vmem:[#allocation11 + $0x688] sm:$0xff] }
 0x26e   :  { %2256 = vmatpush.msrb.mxu0 %v1921_v48  ;;  %2236 = vmatpush.msra.mxu3 %v2112_v31  ;;  %v1914_v31 = vld [vmem:[#allocation11 + $0x70] sm:$0xff] }
 0x26f   :  { %2296 = vmatpush.msrb.mxu2 %v2049_v21  ;;  %v2113_v21 = vld [vmem:[#allocation11 + $0x6a8] sm:$0xff] }
 0x270   :  { %2257 = vmatpush.msrb.mxu0 %v1917_v58  ;;  %2237 = vmatpush.msra.mxu3 %v2108_v47  ;;  %v2037_v58 = vld [vmem:[#allocation11 + $0x448] sm:$0xff]  ;;  %v1910_v47 = vld [vmem:[#allocation11 + $0x50] sm:$0xff] }
 0x271   :  { %2297 = vmatpush.msrb.mxu2 %v2045_v11 }
 0x272   :  { %2258 = vmatpush.msrb.mxu0 %v1913_v61  ;;  %2238 = vmatpush.msra.mxu3 %v2104_v50  ;;  %v1710_v61 = vadd.f32 %v1709_v53, %v1690_v54  ;;  %v1986_v50 = vld [vmem:[#allocation11 + $0x2b0] sm:$0xff] }
 0x273   :  { %2298 = vmatpush.msrb.mxu2 %v2041_v51  ;;  %v2105_v51 = vld [vmem:[#allocation11 + $0x668] sm:$0xff]  ;;  %v1902_v53 = vld [vmem:[#allocation11 + $0x10] sm:$0xff] }
 0x274   :  { %2259 = vmatpush.msrb.mxu0 %v1909_v3  ;;  %2239 = vmatpush.msra.mxu3 %v2100_v19  ;;  %v1769_v44 = vpop.f32.mrf.mxu1  ;;  %v1982_v54 = vld [vmem:[#allocation11 + $0x290] sm:$0xff] }
 0x275   :  { %2299 = vmatpush.msrb.mxu2 %v2037_v58  ;;  %v1770_v7 = vadd.f32 %v1769_v44, %v1750_v37  ;;  %v2090_v19 = vld [vmem:[#allocation11 + $0x5f0] sm:$0xff]  ;;  %v1963_v58 = vld [vmem:[#allocation11 + $0x1f8] sm:$0xff] }
 0x276   :  { %2260 = vmatpush.msrb.mxu0 %v1905_v5  ;;  %2240 = vmatpush.msra.mxu3 %v2096_v32  ;;  %v1954_v5 = vld [vmem:[#allocation11 + $0x1b0] sm:$0xff]  ;;  %v1919_v44 = vld [vmem:[#allocation11 + $0x98] sm:$0xff] }
 0x277   :  { %2300 = vmatpush.msrb.mxu2 %v2033_v60  ;;  %v1789_v0 = vpop.f32.mrf.mxu2  ;;  %v1978_v32 = vld [vmem:[#allocation11 + $0x270] sm:$0xff]  ;;  %v2101_v60 = vld [vmem:[#allocation11 + $0x648] sm:$0xff] }
 0x278   :  { %2261 = vmatpush.msrb.mxu0 %v1901_v33  ;;  %2241 = vmatpush.msra.mxu3 %v2092_v63  ;;  %v1974_v63 = vld [vmem:[#allocation11 + $0x250] sm:$0xff] }
 0x279   :  { %2301 = vmatpush.msrb.mxu2 %v2029_v4  ;;  %v2082_v4 = vld [vmem:[#allocation11 + $0x5b0] sm:$0xff] }
 0x27a   :  { %2306 = vmatpush.msrb.mxu3 %v2153_v6  ;;  %v2093_v6 = vld [vmem:[#allocation11 + $0x608] sm:$0xff] }
 0x27c   :  { %2307 = vmatpush.msrb.mxu3 %v2149_v8  ;;  %v2078_v8 = vld [vmem:[#allocation11 + $0x590] sm:$0xff] }
 0x27e   :  { %2308 = vmatpush.msrb.mxu3 %v2145_v14  ;;  %v2027_v14 = vld [vmem:[#allocation11 + $0x3f8] sm:$0xff] }
 0x280   :  { %2309 = vmatpush.msrb.mxu3 %v2141_v17  ;;  %v2023_v17 = vld [vmem:[#allocation11 + $0x3d8] sm:$0xff] }
 0x282   :  { %2310 = vmatpush.msrb.mxu3 %v2137_v24  ;;  %v2019_v24 = vld [vmem:[#allocation11 + $0x3b8] sm:$0xff] }
 0x284   :  { %2311 = vmatpush.msrb.mxu3 %v2133_v28  ;;  %v2015_v28 = vld [vmem:[#allocation11 + $0x398] sm:$0xff] }
 0x286   :  { %2312 = vmatpush.msrb.mxu3 %v2129_v57  ;;  %v2011_v57 = vld [vmem:[#allocation11 + $0x378] sm:$0xff] }
 0x288   :  { %2313 = vmatpush.msrb.mxu3 %v2125_v36  ;;  %v2007_v36 = vld [vmem:[#allocation11 + $0x358] sm:$0xff] }
 0x28a   :  { %2314 = vmatpush.msrb.mxu3 %v2121_v42  ;;  %v2046_v42 = vld [vmem:[#allocation11 + $0x490] sm:$0xff] }
 0x28c   :  { %2315 = vmatpush.msrb.mxu3 %v2117_v45 }
 0x28e   :  { %2316 = vmatpush.msrb.mxu3 %v2113_v21 }
 0x290   :  { %2317 = vmatpush.msrb.mxu3 %v2109_v41 }
 0x292   :  { %2318 = vmatpush.msrb.mxu3 %v2105_v51 }
 0x294   :  { %2319 = vmatpush.msrb.mxu3 %v2101_v60  ;;  %v1979_v60 = vld [vmem:[#allocation11 + $0x278] sm:$0xff] }
 0x29c   :  { %v1649_v49 = vpop.f32.mrf.mxu3 }
 0x29d   :  { %v1650_v26 = vadd.f32 %v1649_v49, %v1630_v46  ;;  %v1790_v46 = vadd.f32 %v1789_v0, %v1770_v7  ;;  %v1990_v49 = vld [vmem:[#allocation11 + $0x2d0] sm:$0xff]  ;;  %v1999_v0 = vld [vmem:[#allocation11 + $0x318] sm:$0xff] }
 0x29e   :  { %v2042_v7 = vld [vmem:[#allocation11 + $0x470] sm:$0xff] }
 0x29f   :  { %v1892_v13 = vmul.f32 0.1, %v1650_v26 }
 0x2a1   :  { %v2923_v48 = vmax.f32 %v1650_v26, %v1892_v13  ;;  %v1906_v13 = vld [vmem:[#allocation11 + $0x30] sm:$0xff] }
 0x2a3   :  { %2182 = vmatmul.f32.vlgmr.msra.gmra.mxu0 %v2923_v48 }
 0x2a4   :  { %2326 = vmatpush.msra.mxu0 %v1962_v55  ;;  %v1729_v3 = vpop.f32.mrf.mxu3 }
 0x2a5   :  { %v1730_v30 = vadd.f32 %v1729_v3, %v1710_v61  ;;  %v2086_v61 = vld [vmem:[#allocation11 + $0x5d0] sm:$0xff]  ;;  %v2097_v3 = vld [vmem:[#allocation11 + $0x628] sm:$0xff] }
 0x2a6   :  { %2327 = vmatpush.msra.mxu0 %v1958_v62  ;;  %v1959_v62 = vld [vmem:[#allocation11 + $0x1d8] sm:$0xff]  ;;  %2320 = vmatpush.msrb.mxu3 %v2097_v3  ;;  %v2146_v3 = vld [vmem:[#allocation11 + $0x7b0] sm:$0xff] }
 0x2a7   :  { %v1893_v33 = vmul.f32 0.1, %v1730_v30 }
 0x2a8   :  { %2328 = vmatpush.msra.mxu0 %v1954_v5  ;;  %v1970_v5 = vld [vmem:[#allocation11 + $0x230] sm:$0xff]  ;;  %2321 = vmatpush.msrb.mxu3 %v2093_v6  ;;  %v2079_v6 = vld [vmem:[#allocation11 + $0x598] sm:$0xff] }
 0x2a9   :  { %v2926_v2 = vmax.f32 %v1730_v30, %v1893_v33  ;;  %v1955_v30 = vld [vmem:[#allocation11 + $0x1b8] sm:$0xff] }
 0x2aa   :  { %2329 = vmatpush.msra.mxu0 %v1950_v9  ;;  %v1951_v33 = vld [vmem:[#allocation11 + $0x198] sm:$0xff]  ;;  %v1966_v9 = vld [vmem:[#allocation11 + $0x210] sm:$0xff] }
 0x2ab   :  { %2202 = vmatmul.f32.vlgmr.msra.gmra.mxu1 %v2926_v2  ;;  %2262 = vmatmul.f32.vlgmr.msrb.gmra.mxu0 %v2923_v48 }
 0x2ac   :  { %2330 = vmatpush.msra.mxu0 %v1946_v10  ;;  %2346 = vmatpush.msra.mxu1 %v2026_v12  ;;  %v2074_v10 = vld [vmem:[#allocation11 + $0x570] sm:$0xff]  ;;  %v1947_v12 = vld [vmem:[#allocation11 + $0x178] sm:$0xff] }
 0x2ae   :  { %2331 = vmatpush.msra.mxu0 %v1942_v16  ;;  %2347 = vmatpush.msra.mxu1 %v2022_v38  ;;  %v2070_v16 = vld [vmem:[#allocation11 + $0x550] sm:$0xff]  ;;  %v1943_v38 = vld [vmem:[#allocation11 + $0x158] sm:$0xff] }
 0x2b0   :  { %2332 = vmatpush.msra.mxu0 %v1938_v22  ;;  %2348 = vmatpush.msra.mxu1 %v2018_v23  ;;  %v2066_v22 = vld [vmem:[#allocation11 + $0x530] sm:$0xff]  ;;  %v1939_v23 = vld [vmem:[#allocation11 + $0x138] sm:$0xff] }
 0x2b2   :  { %2333 = vmatpush.msra.mxu0 %v1934_v25  ;;  %2349 = vmatpush.msra.mxu1 %v2014_v27  ;;  %v2062_v25 = vld [vmem:[#allocation11 + $0x510] sm:$0xff]  ;;  %v1935_v27 = vld [vmem:[#allocation11 + $0x118] sm:$0xff] }
 0x2b3   :  { %2282 = vmatmul.f32.vlgmr.msrb.gmra.mxu1 %v2926_v2 }
 0x2b4   :  { %2334 = vmatpush.msra.mxu0 %v1930_v1  ;;  %2350 = vmatpush.msra.mxu1 %v2010_v34  ;;  %v2058_v1 = vld [vmem:[#allocation11 + $0x4f0] sm:$0xff]  ;;  %v1829_v34 = vpop.f32.mrf.mxu0 }
 0x2b5   :  { %v1830_v37 = vadd.f32 %v1829_v34, %v1567_v59  ;;  %v2106_v59 = vld [vmem:[#allocation11 + $0x670] sm:$0xff] }
 0x2b6   :  { %2335 = vmatpush.msra.mxu0 %v1926_v35  ;;  %2351 = vmatpush.msra.mxu1 %v2006_v18  ;;  %v2054_v35 = vld [vmem:[#allocation11 + $0x4d0] sm:$0xff]  ;;  %v1927_v18 = vld [vmem:[#allocation11 + $0xd8] sm:$0xff] }
 0x2b7   :  { %v2102_v34 = vld [vmem:[#allocation11 + $0x650] sm:$0xff] }
 0x2b8   :  { %2336 = vmatpush.msra.mxu0 %v1922_v39  ;;  %2352 = vmatpush.msra.mxu1 %v2002_v40  ;;  %v2050_v39 = vld [vmem:[#allocation11 + $0x4b0] sm:$0xff]  ;;  %v1923_v40 = vld [vmem:[#allocation11 + $0xb8] sm:$0xff] }
 0x2ba   :  { %2337 = vmatpush.msra.mxu0 %v1918_v15  ;;  %2353 = vmatpush.msra.mxu1 %v1998_v43  ;;  %v1849_v15 = vpop.f32.mrf.mxu1  ;;  %v1869_v43 = vpop.f32.mrf.mxu2 }
 0x2bb   :  { %v1850_v45 = vadd.f32 %v1849_v15, %v1830_v37  ;;  %v2155_v37 = vld [vmem:[#allocation11 + $0x7f8] sm:$0xff] }
 0x2bc   :  { %v1809_v11 = vpop.f32.mrf.mxu3  ;;  %2338 = vmatpush.msra.mxu0 %v1914_v31  ;;  %2354 = vmatpush.msra.mxu1 %v1994_v20  ;;  %v1915_v31 = vld [vmem:[#allocation11 + $0x78] sm:$0xff] }
 0x2bd   :  { %v1810_v26 = vadd.f32 %v1809_v11, %v1790_v46  ;;  %v1995_v20 = vld [vmem:[#allocation11 + $0x2f8] sm:$0xff]  ;;  %v1870_v21 = vadd.f32 %v1869_v43, %v1850_v45  ;;  %v2038_v46 = vld [vmem:[#allocation11 + $0x450] sm:$0xff] }
 0x2be   :  { %2339 = vmatpush.msra.mxu0 %v1910_v47  ;;  %2355 = vmatpush.msra.mxu1 %v1990_v49  ;;  %v1911_v49 = vld [vmem:[#allocation11 + $0x58] sm:$0xff] }
 0x2bf   :  { %v1894_v52 = vmul.f32 0.1, %v1810_v26  ;;  %v1991_v11 = vld [vmem:[#allocation11 + $0x2d8] sm:$0xff] }
 0x2c0   :  { %2340 = vmatpush.msra.mxu0 %v1906_v13  ;;  %2356 = vmatpush.msra.mxu1 %v1986_v50  ;;  %v1907_v13 = vld [vmem:[#allocation11 + $0x38] sm:$0xff] }
 0x2c1   :  { %v2932_v55 = vmax.f32 %v1810_v26, %v1894_v52  ;;  %v2034_v26 = vld [vmem:[#allocation11 + $0x430] sm:$0xff]  ;;  %v1987_v50 = vld [vmem:[#allocation11 + $0x2b8] sm:$0xff] }
 0x2c2   :  { %2341 = vmatpush.msra.mxu0 %v1902_v53  ;;  %2357 = vmatpush.msra.mxu1 %v1982_v54  ;;  %v2030_v52 = vld [vmem:[#allocation11 + $0x410] sm:$0xff]  ;;  %v1903_v53 = vld [vmem:[#allocation11 + $0x18] sm:$0xff] }
 0x2c3   :  { %2222 = vmatmul.f32.vlgmr.msra.gmra.mxu2 %v2932_v55  ;;  %2342 = vmatmul.f32.vlgmr.msra.gmra.mxu0 %v2923_v48  ;;  %v1983_v54 = vld [vmem:[#allocation11 + $0x298] sm:$0xff] }
 0x2c4   :  { %2366 = vmatpush.msra.mxu2 %v2090_v19  ;;  %2406 = vmatpush.msrb.mxu0 %v1963_v58  ;;  %v2154_v58 = vld [vmem:[#allocation11 + $0x7f0] sm:$0xff]  ;;  %v2135_v15 = vld [vmem:[#allocation11 + $0x758] sm:$0xff] }
 0x2c5   :  { %2358 = vmatpush.msra.mxu1 %v1978_v32  ;;  %v2091_v32 = vld [vmem:[#allocation11 + $0x5f8] sm:$0xff] }
 0x2c6   :  { %2367 = vmatpush.msra.mxu2 %v2086_v61  ;;  %2407 = vmatpush.msrb.mxu0 %v1959_v62  ;;  %v2150_v61 = vld [vmem:[#allocation11 + $0x7d0] sm:$0xff]  ;;  %v2087_v62 = vld [vmem:[#allocation11 + $0x5d8] sm:$0xff] }
 0x2c7   :  { %2359 = vmatpush.msra.mxu1 %v1974_v63  ;;  %v1975_v63 = vld [vmem:[#allocation11 + $0x258] sm:$0xff] }
 0x2c8   :  { %2368 = vmatpush.msra.mxu2 %v2082_v4  ;;  %2408 = vmatpush.msrb.mxu0 %v1955_v30  ;;  %v2083_v4 = vld [vmem:[#allocation11 + $0x5b8] sm:$0xff] }
 0x2c9   :  { %2360 = vmatpush.msra.mxu1 %v1970_v5  ;;  %v1971_v30 = vld [vmem:[#allocation11 + $0x238] sm:$0xff]  ;;  %v2142_v5 = vld [vmem:[#allocation11 + $0x790] sm:$0xff] }
 0x2ca   :  { %2369 = vmatpush.msra.mxu2 %v2078_v8  ;;  %2409 = vmatpush.msrb.mxu0 %v1951_v33  ;;  %v1967_v8 = vld [vmem:[#allocation11 + $0x218] sm:$0xff]  ;;  %v2138_v33 = vld [vmem:[#allocation11 + $0x770] sm:$0xff] }
 0x2cb   :  { %2361 = vmatpush.msra.mxu1 %v1966_v9  ;;  %2302 = vmatmul.f32.vlgmr.msrb.gmra.mxu2 %v2932_v55  ;;  %v2075_v9 = vld [vmem:[#allocation11 + $0x578] sm:$0xff] }
 0x2cc   :  { %2362 = vmatmul.f32.vlgmr.msra.gmra.mxu1 %v2926_v2  ;;  %2370 = vmatpush.msra.mxu2 %v2074_v10  ;;  %v2071_v10 = vld [vmem:[#allocation11 + $0x558] sm:$0xff] }
 0x2cd   :  { %2410 = vmatpush.msrb.mxu0 %v1947_v12  ;;  %2426 = vmatpush.msrb.mxu1 %v2027_v14  ;;  %v2130_v12 = vld [vmem:[#allocation11 + $0x730] sm:$0xff]  ;;  %v2067_v14 = vld [vmem:[#allocation11 + $0x538] sm:$0xff] }
 0x2ce   :  { %2371 = vmatpush.msra.mxu2 %v2070_v16  ;;  %v2126_v16 = vld [vmem:[#allocation11 + $0x710] sm:$0xff]  ;;  %v2131_v43 = vld [vmem:[#allocation11 + $0x738] sm:$0xff] }
 0x2cf   :  { %2411 = vmatpush.msrb.mxu0 %v1943_v38  ;;  %2427 = vmatpush.msrb.mxu1 %v2023_v17  ;;  %v2063_v38 = vld [vmem:[#allocation11 + $0x518] sm:$0xff]  ;;  %v2122_v17 = vld [vmem:[#allocation11 + $0x6f0] sm:$0xff] }
 0x2d0   :  { %2372 = vmatpush.msra.mxu2 %v2066_v22  ;;  %v2059_v22 = vld [vmem:[#allocation11 + $0x4f8] sm:$0xff] }
 0x2d1   :  { %2412 = vmatpush.msrb.mxu0 %v1939_v23  ;;  %2428 = vmatpush.msrb.mxu1 %v2019_v24  ;;  %v2118_v23 = vld [vmem:[#allocation11 + $0x6d0] sm:$0xff]  ;;  %v2055_v24 = vld [vmem:[#allocation11 + $0x4d8] sm:$0xff] }
 0x2d2   :  { %2373 = vmatpush.msra.mxu2 %v2062_v25  ;;  %v2051_v25 = vld [vmem:[#allocation11 + $0x4b8] sm:$0xff] }
 0x2d3   :  { %2413 = vmatpush.msrb.mxu0 %v1935_v27  ;;  %2429 = vmatpush.msrb.mxu1 %v2015_v28  ;;  %v2110_v27 = vld [vmem:[#allocation11 + $0x690] sm:$0xff]  ;;  %v2047_v28 = vld [vmem:[#allocation11 + $0x498] sm:$0xff] }
 0x2d4   :  { %2374 = vmatpush.msra.mxu2 %v2058_v1  ;;  %v2043_v1 = vld [vmem:[#allocation11 + $0x478] sm:$0xff] }
 0x2d5   :  { %2414 = vmatpush.msrb.mxu0 %v1931_v56  ;;  %2430 = vmatpush.msrb.mxu1 %v2011_v57  ;;  %v2039_v56 = vld [vmem:[#allocation11 + $0x458] sm:$0xff]  ;;  %v2098_v57 = vld [vmem:[#allocation11 + $0x630] sm:$0xff] }
 0x2d6   :  { %2375 = vmatpush.msra.mxu2 %v2054_v35  ;;  %v2035_v35 = vld [vmem:[#allocation11 + $0x438] sm:$0xff] }
 0x2d7   :  { %2415 = vmatpush.msrb.mxu0 %v1927_v18  ;;  %2431 = vmatpush.msrb.mxu1 %v2007_v36  ;;  %v2094_v18 = vld [vmem:[#allocation11 + $0x610] sm:$0xff]  ;;  %v2031_v36 = vld [vmem:[#allocation11 + $0x418] sm:$0xff] }
 0x2d8   :  { %2376 = vmatpush.msra.mxu2 %v2050_v39  ;;  %v2151_v39 = vld [vmem:[#allocation11 + $0x7d8] sm:$0xff] }
 0x2d9   :  { %2416 = vmatpush.msrb.mxu0 %v1923_v40  ;;  %2432 = vmatpush.msrb.mxu1 %v2003_v29  ;;  %v2147_v40 = vld [vmem:[#allocation11 + $0x7b8] sm:$0xff] }
 0x2da   :  { %2377 = vmatpush.msra.mxu2 %v2046_v42  ;;  %v2143_v29 = vld [vmem:[#allocation11 + $0x798] sm:$0xff] }
 0x2db   :  { %2417 = vmatpush.msrb.mxu0 %v1919_v44  ;;  %2433 = vmatpush.msrb.mxu1 %v1999_v0  ;;  %v2139_v42 = vld [vmem:[#allocation11 + $0x778] sm:$0xff] }
 0x2dc   :  { %v1889_v47 = vpop.f32.mrf.mxu3  ;;  %2378 = vmatpush.msra.mxu2 %v2042_v7  ;;  %v2127_v44 = vld [vmem:[#allocation11 + $0x718] sm:$0xff] }
 0x2dd   :  { %v1890_v41 = vadd.f32 %v1889_v47, %v1870_v21  ;;  %2418 = vmatpush.msrb.mxu0 %v1915_v31  ;;  %2434 = vmatpush.msrb.mxu1 %v1995_v20  ;;  %v2123_v0 = vld [vmem:[#allocation11 + $0x6f8] sm:$0xff]  ;;  %v2156_v47 = vld [vmem:[#allocation13] sm:$0xf] }
 0x2de   :  { %2379 = vmatpush.msra.mxu2 %v2038_v46  ;;  %v2119_v45 = vld [vmem:[#allocation11 + $0x6d8] sm:$0xff] }
 0x2df   :  { %v1895_v51 = vmul.f32 0.1, %v1890_v41  ;;  %2419 = vmatpush.msrb.mxu0 %v1911_v49  ;;  %2435 = vmatpush.msrb.mxu1 %v1991_v11  ;;  %v2115_v7 = vld [vmem:[#allocation11 + $0x6b8] sm:$0xff]  ;;  %v2158_v49 = vperm.slane %v2156_v47, 0 }
 0x2e0   :  { %2380 = vmatpush.msra.mxu2 %v2034_v26  ;;  %v2107_v31 = vld [vmem:[#allocation11 + $0x678] sm:$0xff] }
 0x2e1   :  { %v2939_v19 = vmax.f32 %v1890_v41, %v1895_v51  ;;  %2420 = vmatpush.msrb.mxu0 %v1907_v13  ;;  %2436 = vmatpush.msrb.mxu1 %v1987_v50  ;;  %v2103_v20 = vld [vmem:[#allocation11 + $0x658] sm:$0xff] }
 0x2e2   :  { %2381 = vmatpush.msra.mxu2 %v2030_v52  ;;  %v2099_v21 = vld [vmem:[#allocation11 + $0x638] sm:$0xff]  ;;  %v2159_v52 = vperm.slane %v2156_v47, 1 }
 0x2e3   :  { %2421 = vmatpush.msrb.mxu0 %v1903_v53  ;;  %2437 = vmatpush.msrb.mxu1 %v1983_v54  ;;  %v2095_v46 = vld [vmem:[#allocation11 + $0x618] sm:$0xff] }
 0x2e4   :  { %2242 = vmatmul.f32.vlgmr.msra.gmra.mxu3 %v2939_v19  ;;  %2382 = vmatmul.f32.vlgmr.msra.gmra.mxu2 %v2932_v55 }
 0x2e5   :  { %2386 = vmatpush.msra.mxu3 %v2154_v58  ;;  %2422 = vmatmul.f32.vlgmr.msrb.gmra.mxu0 %v2923_v48  ;;  %v2134_v48 = vld [vmem:[#allocation11 + $0x750] sm:$0xff] }
 0x2e6   :  { %2446 = vmatpush.msrb.mxu2 %v2091_v32  ;;  %2438 = vmatpush.msrb.mxu1 %v1979_v60 }
 0x2e7   :  { %2387 = vmatpush.msra.mxu3 %v2150_v61 }
 0x2e8   :  { %2447 = vmatpush.msrb.mxu2 %v2087_v62  ;;  %2439 = vmatpush.msrb.mxu1 %v1975_v63 }
 0x2e9   :  { %2388 = vmatpush.msra.mxu3 %v2146_v3 }
 0x2ea   :  { %2448 = vmatpush.msrb.mxu2 %v2083_v4  ;;  %2440 = vmatpush.msrb.mxu1 %v1971_v30  ;;  %v2160_v4 = vperm.slane %v2156_v47, 2 }
 0x2eb   :  { %2389 = vmatpush.msra.mxu3 %v2142_v5 }
 0x2ec   :  { %2449 = vmatpush.msrb.mxu2 %v2079_v6  ;;  %2441 = vmatpush.msrb.mxu1 %v1967_v8 }
 0x2ed   :  { %2322 = vmatmul.f32.vlgmr.msrb.gmra.mxu3 %v2939_v19  ;;  %2442 = vmatmul.f32.vlgmr.msrb.gmra.mxu1 %v2926_v2  ;;  %v2114_v2 = vld [vmem:[#allocation11 + $0x6b0] sm:$0xff] }
 0x2ee   :  { %2390 = vmatpush.msra.mxu3 %v2138_v33  ;;  %2450 = vmatpush.msrb.mxu2 %v2075_v9 }
 0x2f0   :  { %2391 = vmatpush.msra.mxu3 %v2134_v48  ;;  %2451 = vmatpush.msrb.mxu2 %v2071_v10 }
 0x2f2   :  { %2392 = vmatpush.msra.mxu3 %v2130_v12  ;;  %2452 = vmatpush.msrb.mxu2 %v2067_v14  ;;  %v2161_v12 = vperm.slane %v2156_v47, 3 }
 0x2f4   :  { %2393 = vmatpush.msra.mxu3 %v2126_v16  ;;  %2453 = vmatpush.msrb.mxu2 %v2063_v38 }
 0x2f6   :  { %2394 = vmatpush.msra.mxu3 %v2122_v17  ;;  %2454 = vmatpush.msrb.mxu2 %v2059_v22 }
 0x2f8   :  { %2395 = vmatpush.msra.mxu3 %v2118_v23  ;;  %2455 = vmatpush.msrb.mxu2 %v2055_v24 }
 0x2fa   :  { %2396 = vmatpush.msra.mxu3 %v2114_v2  ;;  %2456 = vmatpush.msrb.mxu2 %v2051_v25 }
 0x2fc   :  { %2397 = vmatpush.msra.mxu3 %v2110_v27  ;;  %2457 = vmatpush.msrb.mxu2 %v2047_v28 }
 0x2fe   :  { %2398 = vmatpush.msra.mxu3 %v2106_v59  ;;  %2458 = vmatpush.msrb.mxu2 %v2043_v1 }
 0x300   :  { %2399 = vmatpush.msra.mxu3 %v2102_v34  ;;  %2459 = vmatpush.msrb.mxu2 %v2039_v56 }
 0x302   :  { %2400 = vmatpush.msra.mxu3 %v2098_v57  ;;  %2460 = vmatpush.msrb.mxu2 %v2035_v35 }
 0x304   :  { %2401 = vmatpush.msra.mxu3 %v2094_v18  ;;  %2461 = vmatpush.msrb.mxu2 %v2031_v36 }
 0x305   :  { %2402 = vmatmul.f32.vlgmr.msra.gmra.mxu3 %v2939_v19  ;;  %2462 = vmatmul.f32.vlgmr.msrb.gmra.mxu2 %v2932_v55  ;;  %v2111_v55 = vld [vmem:[#allocation11 + $0x698] sm:$0xff] }
 0x306   :  { %2466 = vmatpush.msrb.mxu3 %v2155_v37 }
 0x308   :  { %2467 = vmatpush.msrb.mxu3 %v2151_v39 }
 0x30a   :  { %2468 = vmatpush.msrb.mxu3 %v2147_v40 }
 0x30c   :  { %2469 = vmatpush.msrb.mxu3 %v2143_v29 }
 0x30e   :  { %2470 = vmatpush.msrb.mxu3 %v2139_v42 }
 0x310   :  { %2471 = vmatpush.msrb.mxu3 %v2135_v15 }
 0x312   :  { %2472 = vmatpush.msrb.mxu3 %v2131_v43 }
 0x314   :  { %2473 = vmatpush.msrb.mxu3 %v2127_v44 }
 0x316   :  { %2474 = vmatpush.msrb.mxu3 %v2123_v0 }
 0x318   :  { %2475 = vmatpush.msrb.mxu3 %v2119_v45 }
 0x31a   :  { %2476 = vmatpush.msrb.mxu3 %v2115_v7 }
 0x31c   :  { %2477 = vmatpush.msrb.mxu3 %v2111_v55 }
 0x31e   :  { %2478 = vmatpush.msrb.mxu3 %v2107_v31 }
 0x320   :  { %2479 = vmatpush.msrb.mxu3 %v2103_v20  ;;  %v2183_v11 = vpop.f32.mrf.mxu0 }
 0x321   :  { %v2184_v26 = vadd.f32 %v2183_v11, %v2158_v49 }
 0x322   :  { %2480 = vmatpush.msrb.mxu3 %v2099_v21 }
 0x324   :  { %2481 = vmatpush.msrb.mxu3 %v2095_v46 }
 0x325   :  { %2482 = vmatmul.f32.vlgmr.msrb.gmra.mxu3 %v2939_v19 }
 0x328   :  { %v2203_v41 = vpop.f32.mrf.mxu1  ;;  %v2263_v54 = vpop.f32.mrf.mxu0 }
 0x329   :  { %v2204_v50 = vadd.f32 %v2203_v41, %v2184_v26  ;;  %v2264_v60 = vadd.f32 %v2263_v54, %v2159_v52 }
 0x330   :  { %v2283_v32 = vpop.f32.mrf.mxu1 }
 0x331   :  { %v2284_v62 = vadd.f32 %v2283_v32, %v2264_v60 }
 0x340   :  { %v2343_v30 = vpop.f32.mrf.mxu0 }
 0x341   :  { %v2344_v6 = vadd.f32 %v2343_v30, %v2160_v4 }
 0x346   :  { %v2223_v13 = vpop.f32.mrf.mxu2 }
 0x347   :  { %v2224_v51 = vadd.f32 %v2223_v13, %v2204_v50 }
 0x349   :  { %v2363_v5 = vpop.f32.mrf.mxu1 }
 0x34a   :  { %v2364_v33 = vadd.f32 %v2363_v5, %v2344_v6 }
 0x34e   :  { %v2303_v61 = vpop.f32.mrf.mxu2 }
 0x34f   :  { %v2304_v63 = vadd.f32 %v2303_v61, %v2284_v62 }
 0x362   :  { %v2423_v14 = vpop.f32.mrf.mxu0 }
 0x363   :  { %v2424_v38 = vadd.f32 %v2423_v14, %v2161_v12 }
 0x367   :  { %v2243_v53 = vpop.f32.mrf.mxu3  ;;  %v2383_v8 = vpop.f32.mrf.mxu2 }
 0x368   :  { %v2244_v58 = vadd.f32 %v2243_v53, %v2224_v51  ;;  %v2384_v9 = vadd.f32 %v2383_v8, %v2364_v33 }
 0x36a   :  { %2486 = vst [vmem:[#allocation14] sm:$0xff] %v2244_v58  ;;  %v2443_v16 = vpop.f32.mrf.mxu1 }
 0x36b   :  { %v2444_v22 = vadd.f32 %v2443_v16, %v2424_v38 }
 0x370   :  { %v2323_v3 = vpop.f32.mrf.mxu3 }
 0x371   :  { %v2324_v19 = vadd.f32 %v2323_v3, %v2304_v63 }
 0x373   :  { %2487 = vst [vmem:[#allocation14 + $0x8] sm:$0xff] %v2324_v19 }
 0x388   :  { %v2403_v48 = vpop.f32.mrf.mxu3  ;;  %v2463_v17 = vpop.f32.mrf.mxu2 }
 0x389   :  { %v2404_v10 = vadd.f32 %v2403_v48, %v2384_v9  ;;  %v2464_v23 = vadd.f32 %v2463_v17, %v2444_v22 }
 0x38b   :  { %2488 = vst [vmem:[#allocation14 + $0x10] sm:$0xff] %v2404_v10 }
 0x3a8   :  { %v2483_v24 = vpop.f32.mrf.mxu3 }
 0x3a9   :  { %v2484_v2 = vadd.f32 %v2483_v24, %v2464_v23 }
 0x3ab   :  { %2489 = vst [vmem:[#allocation14 + $0x18] sm:$0xff] %v2484_v2 }
 0x3ac   :  { %2500 = dma.vmem_to_hbm [thread:$0]  %s2496_s6, 512, %s2498_s12, [#allocation4]  }
 0x3ad   :  { %2728 = dma.done.wait [#allocation4], 512  }
 0x3ae   :  { %2729 = vsyncadd [#allocation4], 4294966784 }
 0x3af   :  { %2505 = vsyncpa [#allocation3], 1 }
 0x3b0   :  { %2506 = vsyncpa [#allocation6], 1 }
 0x3b1   :  { %2507 = vsyncpa [#allocation9], 1 }
 0x3b2   :  { %2508 = vsyncpa [#allocation12], 1 }
 0x3b3   :  { %2509 = vsyncpa [#allocation4], 1 }

// kernel: tpu_custom_call.1
= control target key start
LH: loop header
LB: loop body
LE: loop exit
PB: predicated region body
PF: predicated region fallthrough
CT: control target
= control target key end

     0   :  { %12 = vsyncpa [#allocation3], 0  ;;  %s2952_s0 = inlined_call_operand.hbm [shape: f32[8,1024], index: 0, kind: input, shape index: {}]   ;;  %s2953_s1 = inlined_call_operand.hbm [shape: f32[1024,512], index: 1, kind: input, shape index: {}]   ;;  %s2954_s2 = inlined_call_operand.hbm [shape: f32[1,512], index: 2, kind: input, shape index: {}]   ;;  %s2955_s3 = inlined_call_operand.hbm [shape: f32[512,512], index: 3, kind: input, shape index: {}]   ;;  %s2956_s4 = inlined_call_operand.hbm [shape: f32[1,512], index: 4, kind: input, shape index: {}]   ;;  %s2957_s5 = inlined_call_operand.hbm [shape: f32[512,512], index: 5, kind: input, shape index: {}]   ;;  %s2958_s6 = inlined_call_operand.hbm [shape: f32[1,512], index: 6, kind: input, shape index: {}]   ;;  %s2959_s7 = inlined_call_operand.hbm [shape: f32[8,512], index: 7, kind: output, shape index: {}]  }
   0x1   :  { %13 = vsyncpa [#allocation6], 0 }
   0x2   :  { %14 = vsyncpa [#allocation9], 0 }
   0x3   :  { %15 = vsyncpa [#allocation12], 0  ;;  %s32_s26 = sshll.u32 %s2953_s1, 4  ;;  %s33_s26 = int_to_ptr.hbm [resolvable:$true] %s32_s26 }
   0x4   :  { %16 = vsyncpa [#allocation4], 0  ;;  %s2730_s27 = smov [#allocation5]   ;;  %s56_s8 = sshll.u32 %s2955_s3, 4  ;;  %s57_s8 = int_to_ptr.hbm [resolvable:$true] %s56_s8 }
   0x5   :  { %s34_s28 = sshll.u32 %s2730_s27, 4  ;;  %s2731_s9 = smov 512   ;;  %s35_s28 = int_to_ptr.vmem [resolvable:$true] %s34_s28 }
   0x6   :  { %s2732_s10 = smov 32   ;;  %s2733_s11 = smov [#allocation8]  }
   0x7   :  { %40 = dma.hbm_to_vmem [thread:$0]  %s33_s26, 65536, %s35_s28, [#allocation6], %s2731_s9, %s2731_s9, %s2732_s10  }
   0x8   :  { %s58_s12 = sshll.u32 %s2733_s11, 4  ;;  %s80_s15 = sshll.u32 %s2957_s5, 4  ;;  %s59_s12 = int_to_ptr.vmem [resolvable:$true] %s58_s12  ;;  %s81_s15 = int_to_ptr.hbm [resolvable:$true] %s80_s15 }
   0x9   :  { %64 = dma.hbm_to_vmem [thread:$0]  %s57_s8, 32768, %s59_s12, [#allocation9], %s2731_s9, %s2731_s9, %s2732_s10  }
   0xa   :  { %s22_s17 = sshll.u32 %s2952_s0, 4  ;;  %s2734_s18 = smov [#allocation11]   ;;  %s23_s17 = int_to_ptr.hbm [resolvable:$true] %s22_s17 }
   0xb   :  { %s82_s19 = sshll.u32 %s2734_s18, 4  ;;  %s2735_s3 = smov [#allocation2]   ;;  %s83_s19 = int_to_ptr.vmem [resolvable:$true] %s82_s19 }
   0xc   :  { %88 = dma.hbm_to_vmem [thread:$0]  %s81_s15, 32768, %s83_s19, [#allocation12], %s2731_s9, %s2731_s9, %s2732_s10  }
   0xd   :  { %s24_s20 = sshll.u32 %s2735_s3, 4  ;;  %s46_s23 = sshll.u32 %s2954_s2, 4  ;;  %s25_s20 = int_to_ptr.vmem [resolvable:$true] %s24_s20  ;;  %s47_s23 = int_to_ptr.hbm [resolvable:$true] %s46_s23 }
   0xe   :  { %27 = dma.hbm_to_vmem [thread:$0]  %s23_s17, 1024, %s25_s20, [#allocation3]  }
   0xf   :  { %s70_s25 = sshll.u32 %s2956_s4, 4  ;;  %s2736_s26 = smov [#allocation7]   ;;  %s71_s25 = int_to_ptr.hbm [resolvable:$true] %s70_s25 }
  0x10   :  { %s48_s0 = sshll.u32 %s2736_s26, 4  ;;  %s2737_s27 = smov [#allocation10]   ;;  %s49_s0 = int_to_ptr.vmem [resolvable:$true] %s48_s0 }
  0x11   :  { %51 = dma.hbm_to_vmem [thread:$0]  %s47_s23, 64, %s49_s0, [#allocation6]  }
  0x12   :  { %s72_s28 = sshll.u32 %s2737_s27, 4  ;;  %s94_s8 = sshll.u32 %s2958_s6, 4  ;;  %s73_s28 = int_to_ptr.vmem [resolvable:$true] %s72_s28  ;;  %s95_s8 = int_to_ptr.hbm [resolvable:$true] %s94_s8 }
  0x13   :  { %75 = dma.hbm_to_vmem [thread:$0]  %s71_s25, 64, %s73_s28, [#allocation9]  }
  0x14   :  { %s2738_s2 = smov [#allocation13]  }
  0x15   :  { %s96_s9 = sshll.u32 %s2738_s2, 4  ;;  %s97_s9 = int_to_ptr.vmem [resolvable:$true] %s96_s9 }
  0x16   :  { %99 = dma.hbm_to_vmem [thread:$0]  %s95_s8, 64, %s97_s9, [#allocation12]  }
  0x17   :  { %2720 = dma.done.wait [#allocation3], 1024  }
  0x18   :  { %2721 = vsyncadd [#allocation3], 4294966272 }
  0x19   :  { %2722 = dma.done.wait [#allocation6], 65600  }
  0x1a   :  { %2723 = vsyncadd [#allocation6], 4294901696 }
  0x1b   :  { %2724 = dma.done.wait [#allocation9], 32832  }
  0x1c   :  { %2725 = vsyncadd [#allocation9], 4294934464 }
  0x1d   :  { %2726 = dma.done.wait [#allocation12], 32832  }
  0x1e   :  { %2727 = vsyncadd [#allocation12], 4294934464  ;;  %v196_v0 = vld [vmem:[#allocation5 + $0x1e0] sm:$0xff]  ;;  %s2739_s4 = smov [#allocation14]   ;;  %s2497_s12 = sshll.u32 %s2959_s7, 4  ;;  %s2498_s12 = int_to_ptr.hbm [resolvable:$true] %s2497_s12 }
  0x1f   :  { %v260_v1 = vld [vmem:[#allocation5 + $0x3e0] sm:$0xff]  ;;  %658 = vmatpush.msra.mxu0 %v196_v0  ;;  %s2495_s6 = sshll.u32 %s2739_s4, 4  ;;  %s2496_s6 = int_to_ptr.vmem [resolvable:$true] %s2495_s6 }
  0x20   :  { %v324_v2 = vld [vmem:[#allocation5 + $0x5e0] sm:$0xff]  ;;  %678 = vmatpush.msra.mxu1 %v260_v1 }
  0x21   :  { %v192_v3 = vld [vmem:[#allocation5 + $0x1c0] sm:$0xff]  ;;  %698 = vmatpush.msra.mxu2 %v324_v2 }
  0x22   :  { %v256_v4 = vld [vmem:[#allocation5 + $0x3c0] sm:$0xff]  ;;  %659 = vmatpush.msra.mxu0 %v192_v3 }
  0x23   :  { %v320_v5 = vld [vmem:[#allocation5 + $0x5c0] sm:$0xff]  ;;  %679 = vmatpush.msra.mxu1 %v256_v4 }
  0x24   :  { %v388_v6 = vld [vmem:[#allocation5 + $0x7e0] sm:$0xff]  ;;  %699 = vmatpush.msra.mxu2 %v320_v5 }
  0x25   :  { %v188_v7 = vld [vmem:[#allocation5 + $0x1a0] sm:$0xff]  ;;  %718 = vmatpush.msra.mxu3 %v388_v6 }
  0x26   :  { %v252_v8 = vld [vmem:[#allocation5 + $0x3a0] sm:$0xff]  ;;  %660 = vmatpush.msra.mxu0 %v188_v7 }
  0x27   :  { %v316_v9 = vld [vmem:[#allocation5 + $0x5a0] sm:$0xff]  ;;  %680 = vmatpush.msra.mxu1 %v252_v8 }
  0x28   :  { %v384_v10 = vld [vmem:[#allocation5 + $0x7c0] sm:$0xff]  ;;  %700 = vmatpush.msra.mxu2 %v316_v9 }
  0x29   :  { %v184_v11 = vld [vmem:[#allocation5 + $0x180] sm:$0xff]  ;;  %719 = vmatpush.msra.mxu3 %v384_v10 }
  0x2a   :  { %v248_v12 = vld [vmem:[#allocation5 + $0x380] sm:$0xff]  ;;  %661 = vmatpush.msra.mxu0 %v184_v11 }
  0x2b   :  { %v312_v13 = vld [vmem:[#allocation5 + $0x580] sm:$0xff]  ;;  %681 = vmatpush.msra.mxu1 %v248_v12 }
  0x2c   :  { %v380_v14 = vld [vmem:[#allocation5 + $0x7a0] sm:$0xff]  ;;  %701 = vmatpush.msra.mxu2 %v312_v13 }
  0x2d   :  { %v180_v15 = vld [vmem:[#allocation5 + $0x160] sm:$0xff]  ;;  %720 = vmatpush.msra.mxu3 %v380_v14 }
  0x2e   :  { %v244_v16 = vld [vmem:[#allocation5 + $0x360] sm:$0xff]  ;;  %662 = vmatpush.msra.mxu0 %v180_v15 }
  0x2f   :  { %v308_v17 = vld [vmem:[#allocation5 + $0x560] sm:$0xff]  ;;  %682 = vmatpush.msra.mxu1 %v244_v16 }
  0x30   :  { %v376_v18 = vld [vmem:[#allocation5 + $0x780] sm:$0xff]  ;;  %702 = vmatpush.msra.mxu2 %v308_v17 }
  0x31   :  { %v176_v19 = vld [vmem:[#allocation5 + $0x140] sm:$0xff]  ;;  %721 = vmatpush.msra.mxu3 %v376_v18 }
  0x32   :  { %v240_v20 = vld [vmem:[#allocation5 + $0x340] sm:$0xff]  ;;  %663 = vmatpush.msra.mxu0 %v176_v19 }
  0x33   :  { %v304_v21 = vld [vmem:[#allocation5 + $0x540] sm:$0xff]  ;;  %683 = vmatpush.msra.mxu1 %v240_v20 }
  0x34   :  { %v372_v22 = vld [vmem:[#allocation5 + $0x760] sm:$0xff]  ;;  %703 = vmatpush.msra.mxu2 %v304_v21 }
  0x35   :  { %v172_v23 = vld [vmem:[#allocation5 + $0x120] sm:$0xff]  ;;  %722 = vmatpush.msra.mxu3 %v372_v22 }
  0x36   :  { %v236_v24 = vld [vmem:[#allocation5 + $0x320] sm:$0xff]  ;;  %664 = vmatpush.msra.mxu0 %v172_v23 }
  0x37   :  { %v300_v25 = vld [vmem:[#allocation5 + $0x520] sm:$0xff]  ;;  %684 = vmatpush.msra.mxu1 %v236_v24 }
  0x38   :  { %v368_v26 = vld [vmem:[#allocation5 + $0x740] sm:$0xff]  ;;  %704 = vmatpush.msra.mxu2 %v300_v25 }
  0x39   :  { %v168_v27 = vld [vmem:[#allocation5 + $0x100] sm:$0xff]  ;;  %723 = vmatpush.msra.mxu3 %v368_v26 }
  0x3a   :  { %v232_v28 = vld [vmem:[#allocation5 + $0x300] sm:$0xff]  ;;  %665 = vmatpush.msra.mxu0 %v168_v27 }
  0x3b   :  { %v296_v29 = vld [vmem:[#allocation5 + $0x500] sm:$0xff]  ;;  %685 = vmatpush.msra.mxu1 %v232_v28 }
  0x3c   :  { %v364_v30 = vld [vmem:[#allocation5 + $0x720] sm:$0xff]  ;;  %705 = vmatpush.msra.mxu2 %v296_v29 }
  0x3d   :  { %v164_v31 = vld [vmem:[#allocation5 + $0xe0] sm:$0xff]  ;;  %724 = vmatpush.msra.mxu3 %v364_v30 }
  0x3e   :  { %v228_v32 = vld [vmem:[#allocation5 + $0x2e0] sm:$0xff]  ;;  %666 = vmatpush.msra.mxu0 %v164_v31 }
  0x3f   :  { %v292_v33 = vld [vmem:[#allocation5 + $0x4e0] sm:$0xff]  ;;  %686 = vmatpush.msra.mxu1 %v228_v32 }
  0x40   :  { %v360_v34 = vld [vmem:[#allocation5 + $0x700] sm:$0xff]  ;;  %706 = vmatpush.msra.mxu2 %v292_v33 }
  0x41   :  { %v160_v35 = vld [vmem:[#allocation5 + $0xc0] sm:$0xff]  ;;  %725 = vmatpush.msra.mxu3 %v360_v34 }
  0x42   :  { %v224_v36 = vld [vmem:[#allocation5 + $0x2c0] sm:$0xff]  ;;  %667 = vmatpush.msra.mxu0 %v160_v35 }
  0x43   :  { %v288_v37 = vld [vmem:[#allocation5 + $0x4c0] sm:$0xff]  ;;  %687 = vmatpush.msra.mxu1 %v224_v36 }
  0x44   :  { %v356_v38 = vld [vmem:[#allocation5 + $0x6e0] sm:$0xff]  ;;  %707 = vmatpush.msra.mxu2 %v288_v37 }
  0x45   :  { %v156_v39 = vld [vmem:[#allocation5 + $0xa0] sm:$0xff]  ;;  %726 = vmatpush.msra.mxu3 %v356_v38 }
  0x46   :  { %v220_v40 = vld [vmem:[#allocation5 + $0x2a0] sm:$0xff]  ;;  %668 = vmatpush.msra.mxu0 %v156_v39 }
  0x47   :  { %v284_v41 = vld [vmem:[#allocation5 + $0x4a0] sm:$0xff]  ;;  %688 = vmatpush.msra.mxu1 %v220_v40 }
  0x48   :  { %v352_v42 = vld [vmem:[#allocation5 + $0x6c0] sm:$0xff]  ;;  %708 = vmatpush.msra.mxu2 %v284_v41 }
  0x49   :  { %v152_v43 = vld [vmem:[#allocation5 + $0x80] sm:$0xff]  ;;  %727 = vmatpush.msra.mxu3 %v352_v42 }
  0x4a   :  { %v216_v44 = vld [vmem:[#allocation5 + $0x280] sm:$0xff]  ;;  %669 = vmatpush.msra.mxu0 %v152_v43 }
  0x4b   :  { %v280_v45 = vld [vmem:[#allocation5 + $0x480] sm:$0xff]  ;;  %689 = vmatpush.msra.mxu1 %v216_v44 }
  0x4c   :  { %v348_v46 = vld [vmem:[#allocation5 + $0x6a0] sm:$0xff]  ;;  %709 = vmatpush.msra.mxu2 %v280_v45 }
  0x4d   :  { %v148_v47 = vld [vmem:[#allocation5 + $0x60] sm:$0xff]  ;;  %728 = vmatpush.msra.mxu3 %v348_v46 }
  0x4e   :  { %v212_v48 = vld [vmem:[#allocation5 + $0x260] sm:$0xff]  ;;  %670 = vmatpush.msra.mxu0 %v148_v47 }
  0x4f   :  { %v276_v49 = vld [vmem:[#allocation5 + $0x460] sm:$0xff]  ;;  %690 = vmatpush.msra.mxu1 %v212_v48 }
  0x50   :  { %v344_v50 = vld [vmem:[#allocation5 + $0x680] sm:$0xff]  ;;  %710 = vmatpush.msra.mxu2 %v276_v49 }
  0x51   :  { %v144_v51 = vld [vmem:[#allocation5 + $0x40] sm:$0xff]  ;;  %729 = vmatpush.msra.mxu3 %v344_v50 }
  0x52   :  { %v208_v52 = vld [vmem:[#allocation5 + $0x240] sm:$0xff]  ;;  %671 = vmatpush.msra.mxu0 %v144_v51 }
  0x53   :  { %v272_v53 = vld [vmem:[#allocation5 + $0x440] sm:$0xff]  ;;  %691 = vmatpush.msra.mxu1 %v208_v52 }
  0x54   :  { %v340_v54 = vld [vmem:[#allocation5 + $0x660] sm:$0xff]  ;;  %711 = vmatpush.msra.mxu2 %v272_v53 }
  0x55   :  { %v140_v55 = vld [vmem:[#allocation5 + $0x20] sm:$0xff]  ;;  %730 = vmatpush.msra.mxu3 %v340_v54 }
  0x56   :  { %v204_v56 = vld [vmem:[#allocation5 + $0x220] sm:$0xff]  ;;  %672 = vmatpush.msra.mxu0 %v140_v55 }
  0x57   :  { %v268_v57 = vld [vmem:[#allocation5 + $0x420] sm:$0xff]  ;;  %692 = vmatpush.msra.mxu1 %v204_v56 }
  0x58   :  { %v336_v58 = vld [vmem:[#allocation5 + $0x640] sm:$0xff]  ;;  %712 = vmatpush.msra.mxu2 %v268_v57 }
  0x59   :  { %v136_v59 = vld [vmem:[#allocation5] sm:$0xff]  ;;  %731 = vmatpush.msra.mxu3 %v336_v58 }
  0x5a   :  { %v200_v60 = vld [vmem:[#allocation5 + $0x200] sm:$0xff]  ;;  %673 = vmatpush.msra.mxu0 %v136_v59  ;;  %v2801_v59 = vld [vmem:[#allocation2 + $0x10] sm:$0xff] }
  0x5b   :  { %v264_v61 = vld [vmem:[#allocation5 + $0x400] sm:$0xff]  ;;  %693 = vmatpush.msra.mxu1 %v200_v60 }
  0x5c   :  { %v332_v62 = vld [vmem:[#allocation5 + $0x620] sm:$0xff]  ;;  %713 = vmatpush.msra.mxu2 %v264_v61 }
  0x5d   :  { %v452_v63 = vld [vmem:[#allocation5 + $0x9e0] sm:$0xff]  ;;  %732 = vmatpush.msra.mxu3 %v332_v62  ;;  %714 = vmatmul.f32.vlgmr.msra.gmra.mxu2 %v2801_v59 }
  0x5e   :  { %v516_v0 = vld [vmem:[#allocation5 + $0xbe0] sm:$0xff]  ;;  %738 = vmatpush.msrb.mxu0 %v452_v63 }
  0x5f   :  { %v580_v1 = vld [vmem:[#allocation5 + $0xde0] sm:$0xff]  ;;  %758 = vmatpush.msrb.mxu1 %v516_v0 }
  0x60   :  { %v328_v2 = vld [vmem:[#allocation5 + $0x600] sm:$0xff]  ;;  %778 = vmatpush.msrb.mxu2 %v580_v1  ;;  %v2806_v1 = vld [vmem:[#allocation2 + $0x8] sm:$0xff] }
  0x61   :  { %v448_v3 = vld [vmem:[#allocation5 + $0x9c0] sm:$0xff]  ;;  %733 = vmatpush.msra.mxu3 %v328_v2  ;;  %v2808_v2 = vld [vmem:[#allocation2 + $0x18] sm:$0xff]  ;;  %694 = vmatmul.f32.vlgmr.msra.gmra.mxu1 %v2806_v1 }
  0x62   :  { %v512_v4 = vld [vmem:[#allocation5 + $0xbc0] sm:$0xff]  ;;  %739 = vmatpush.msrb.mxu0 %v448_v3  ;;  %v197_v3 = vld [vmem:[#allocation5 + $0x1e8] sm:$0xff]  ;;  %734 = vmatmul.f32.vlgmr.msra.gmra.mxu3 %v2808_v2 }
  0x63   :  { %v576_v5 = vld [vmem:[#allocation5 + $0xdc0] sm:$0xff]  ;;  %759 = vmatpush.msrb.mxu1 %v512_v4  ;;  %v261_v4 = vld [vmem:[#allocation5 + $0x3e8] sm:$0xff] }
  0x64   :  { %v644_v6 = vld [vmem:[#allocation5 + $0xfe0] sm:$0xff]  ;;  %779 = vmatpush.msrb.mxu2 %v576_v5  ;;  %v325_v5 = vld [vmem:[#allocation5 + $0x5e8] sm:$0xff] }
  0x65   :  { %v444_v7 = vld [vmem:[#allocation5 + $0x9a0] sm:$0xff]  ;;  %798 = vmatpush.msrb.mxu3 %v644_v6 }
  0x66   :  { %v508_v8 = vld [vmem:[#allocation5 + $0xba0] sm:$0xff]  ;;  %740 = vmatpush.msrb.mxu0 %v444_v7  ;;  %v193_v7 = vld [vmem:[#allocation5 + $0x1c8] sm:$0xff] }
  0x67   :  { %v572_v9 = vld [vmem:[#allocation5 + $0xda0] sm:$0xff]  ;;  %760 = vmatpush.msrb.mxu1 %v508_v8  ;;  %v257_v8 = vld [vmem:[#allocation5 + $0x3c8] sm:$0xff] }
  0x68   :  { %v640_v10 = vld [vmem:[#allocation5 + $0xfc0] sm:$0xff]  ;;  %780 = vmatpush.msrb.mxu2 %v572_v9  ;;  %v321_v9 = vld [vmem:[#allocation5 + $0x5c8] sm:$0xff] }
  0x69   :  { %v440_v11 = vld [vmem:[#allocation5 + $0x980] sm:$0xff]  ;;  %799 = vmatpush.msrb.mxu3 %v640_v10  ;;  %v389_v10 = vld [vmem:[#allocation5 + $0x7e8] sm:$0xff] }
  0x6a   :  { %v504_v12 = vld [vmem:[#allocation5 + $0xb80] sm:$0xff]  ;;  %741 = vmatpush.msrb.mxu0 %v440_v11  ;;  %v189_v11 = vld [vmem:[#allocation5 + $0x1a8] sm:$0xff] }
  0x6b   :  { %v568_v13 = vld [vmem:[#allocation5 + $0xd80] sm:$0xff]  ;;  %761 = vmatpush.msrb.mxu1 %v504_v12  ;;  %v253_v12 = vld [vmem:[#allocation5 + $0x3a8] sm:$0xff] }
  0x6c   :  { %v636_v14 = vld [vmem:[#allocation5 + $0xfa0] sm:$0xff]  ;;  %781 = vmatpush.msrb.mxu2 %v568_v13  ;;  %v317_v13 = vld [vmem:[#allocation5 + $0x5a8] sm:$0xff] }
  0x6d   :  { %v436_v15 = vld [vmem:[#allocation5 + $0x960] sm:$0xff]  ;;  %800 = vmatpush.msrb.mxu3 %v636_v14  ;;  %v385_v14 = vld [vmem:[#allocation5 + $0x7c8] sm:$0xff] }
  0x6e   :  { %v500_v16 = vld [vmem:[#allocation5 + $0xb60] sm:$0xff]  ;;  %742 = vmatpush.msrb.mxu0 %v436_v15  ;;  %v2813_v15 = vld [vmem:[#allocation2 + $0x30] sm:$0xff] }
  0x6f   :  { %v564_v17 = vld [vmem:[#allocation5 + $0xd60] sm:$0xff]  ;;  %762 = vmatpush.msrb.mxu1 %v500_v16  ;;  %v185_v16 = vld [vmem:[#allocation5 + $0x188] sm:$0xff] }
  0x70   :  { %v632_v18 = vld [vmem:[#allocation5 + $0xf80] sm:$0xff]  ;;  %782 = vmatpush.msrb.mxu2 %v564_v17  ;;  %v249_v17 = vld [vmem:[#allocation5 + $0x388] sm:$0xff] }
  0x71   :  { %v432_v19 = vld [vmem:[#allocation5 + $0x940] sm:$0xff]  ;;  %801 = vmatpush.msrb.mxu3 %v632_v18  ;;  %v313_v18 = vld [vmem:[#allocation5 + $0x588] sm:$0xff] }
  0x72   :  { %v496_v20 = vld [vmem:[#allocation5 + $0xb40] sm:$0xff]  ;;  %743 = vmatpush.msrb.mxu0 %v432_v19  ;;  %v381_v19 = vld [vmem:[#allocation5 + $0x7a8] sm:$0xff] }
  0x73   :  { %v560_v21 = vld [vmem:[#allocation5 + $0xd40] sm:$0xff]  ;;  %763 = vmatpush.msrb.mxu1 %v496_v20 }
  0x74   :  { %v628_v22 = vld [vmem:[#allocation5 + $0xf60] sm:$0xff]  ;;  %783 = vmatpush.msrb.mxu2 %v560_v21  ;;  %v2818_v21 = vld [vmem:[#allocation2 + $0x38] sm:$0xff] }
  0x75   :  { %v428_v23 = vld [vmem:[#allocation5 + $0x920] sm:$0xff]  ;;  %802 = vmatpush.msrb.mxu3 %v628_v22  ;;  %v181_v22 = vld [vmem:[#allocation5 + $0x168] sm:$0xff] }
  0x76   :  { %v492_v24 = vld [vmem:[#allocation5 + $0xb20] sm:$0xff]  ;;  %744 = vmatpush.msrb.mxu0 %v428_v23  ;;  %v245_v23 = vld [vmem:[#allocation5 + $0x368] sm:$0xff] }
  0x77   :  { %v556_v25 = vld [vmem:[#allocation5 + $0xd20] sm:$0xff]  ;;  %764 = vmatpush.msrb.mxu1 %v492_v24  ;;  %v309_v24 = vld [vmem:[#allocation5 + $0x568] sm:$0xff] }
  0x78   :  { %v624_v26 = vld [vmem:[#allocation5 + $0xf40] sm:$0xff]  ;;  %784 = vmatpush.msrb.mxu2 %v556_v25  ;;  %v377_v25 = vld [vmem:[#allocation5 + $0x788] sm:$0xff] }
  0x79   :  { %v424_v27 = vld [vmem:[#allocation5 + $0x900] sm:$0xff]  ;;  %803 = vmatpush.msrb.mxu3 %v624_v26  ;;  %v2821_v26 = vld [vmem:[#allocation2 + $0x28] sm:$0xff] }
  0x7a   :  { %v488_v28 = vld [vmem:[#allocation5 + $0xb00] sm:$0xff]  ;;  %745 = vmatpush.msrb.mxu0 %v424_v27  ;;  %v177_v27 = vld [vmem:[#allocation5 + $0x148] sm:$0xff] }
  0x7b   :  { %v552_v29 = vld [vmem:[#allocation5 + $0xd00] sm:$0xff]  ;;  %765 = vmatpush.msrb.mxu1 %v488_v28  ;;  %v241_v28 = vld [vmem:[#allocation5 + $0x348] sm:$0xff] }
  0x7c   :  { %v620_v30 = vld [vmem:[#allocation5 + $0xf20] sm:$0xff]  ;;  %785 = vmatpush.msrb.mxu2 %v552_v29  ;;  %v305_v29 = vld [vmem:[#allocation5 + $0x548] sm:$0xff] }
  0x7d   :  { %v420_v31 = vld [vmem:[#allocation5 + $0x8e0] sm:$0xff]  ;;  %804 = vmatpush.msrb.mxu3 %v620_v30  ;;  %v373_v30 = vld [vmem:[#allocation5 + $0x768] sm:$0xff] }
  0x7e   :  { %v484_v32 = vld [vmem:[#allocation5 + $0xae0] sm:$0xff]  ;;  %746 = vmatpush.msrb.mxu0 %v420_v31  ;;  %v173_v31 = vld [vmem:[#allocation5 + $0x128] sm:$0xff] }
  0x7f   :  { %v548_v33 = vld [vmem:[#allocation5 + $0xce0] sm:$0xff]  ;;  %766 = vmatpush.msrb.mxu1 %v484_v32  ;;  %v237_v32 = vld [vmem:[#allocation5 + $0x328] sm:$0xff] }
  0x80   :  { %v616_v34 = vld [vmem:[#allocation5 + $0xf00] sm:$0xff]  ;;  %786 = vmatpush.msrb.mxu2 %v548_v33  ;;  %v301_v33 = vld [vmem:[#allocation5 + $0x528] sm:$0xff] }
  0x81   :  { %v416_v35 = vld [vmem:[#allocation5 + $0x8c0] sm:$0xff]  ;;  %805 = vmatpush.msrb.mxu3 %v616_v34  ;;  %v369_v34 = vld [vmem:[#allocation5 + $0x748] sm:$0xff] }
  0x82   :  { %v480_v36 = vld [vmem:[#allocation5 + $0xac0] sm:$0xff]  ;;  %747 = vmatpush.msrb.mxu0 %v416_v35  ;;  %v169_v35 = vld [vmem:[#allocation5 + $0x108] sm:$0xff] }
  0x83   :  { %v544_v37 = vld [vmem:[#allocation5 + $0xcc0] sm:$0xff]  ;;  %767 = vmatpush.msrb.mxu1 %v480_v36  ;;  %v233_v36 = vld [vmem:[#allocation5 + $0x308] sm:$0xff] }
  0x84   :  { %v612_v38 = vld [vmem:[#allocation5 + $0xee0] sm:$0xff]  ;;  %787 = vmatpush.msrb.mxu2 %v544_v37  ;;  %v297_v37 = vld [vmem:[#allocation5 + $0x508] sm:$0xff] }
  0x85   :  { %v412_v39 = vld [vmem:[#allocation5 + $0x8a0] sm:$0xff]  ;;  %806 = vmatpush.msrb.mxu3 %v612_v38  ;;  %v365_v38 = vld [vmem:[#allocation5 + $0x728] sm:$0xff] }
  0x86   :  { %v476_v40 = vld [vmem:[#allocation5 + $0xaa0] sm:$0xff]  ;;  %748 = vmatpush.msrb.mxu0 %v412_v39  ;;  %v165_v39 = vld [vmem:[#allocation5 + $0xe8] sm:$0xff] }
  0x87   :  { %v540_v41 = vld [vmem:[#allocation5 + $0xca0] sm:$0xff]  ;;  %768 = vmatpush.msrb.mxu1 %v476_v40  ;;  %v229_v40 = vld [vmem:[#allocation5 + $0x2e8] sm:$0xff] }
  0x88   :  { %v608_v42 = vld [vmem:[#allocation5 + $0xec0] sm:$0xff]  ;;  %788 = vmatpush.msrb.mxu2 %v540_v41  ;;  %v293_v41 = vld [vmem:[#allocation5 + $0x4e8] sm:$0xff] }
  0x89   :  { %v408_v43 = vld [vmem:[#allocation5 + $0x880] sm:$0xff]  ;;  %807 = vmatpush.msrb.mxu3 %v608_v42  ;;  %v361_v42 = vld [vmem:[#allocation5 + $0x708] sm:$0xff] }
  0x8a   :  { %v472_v44 = vld [vmem:[#allocation5 + $0xa80] sm:$0xff]  ;;  %749 = vmatpush.msrb.mxu0 %v408_v43  ;;  %v161_v43 = vld [vmem:[#allocation5 + $0xc8] sm:$0xff] }
  0x8b   :  { %v536_v45 = vld [vmem:[#allocation5 + $0xc80] sm:$0xff]  ;;  %769 = vmatpush.msrb.mxu1 %v472_v44  ;;  %v225_v44 = vld [vmem:[#allocation5 + $0x2c8] sm:$0xff] }
  0x8c   :  { %v604_v46 = vld [vmem:[#allocation5 + $0xea0] sm:$0xff]  ;;  %789 = vmatpush.msrb.mxu2 %v536_v45  ;;  %v289_v45 = vld [vmem:[#allocation5 + $0x4c8] sm:$0xff] }
  0x8d   :  { %v404_v47 = vld [vmem:[#allocation5 + $0x860] sm:$0xff]  ;;  %808 = vmatpush.msrb.mxu3 %v604_v46  ;;  %v357_v46 = vld [vmem:[#allocation5 + $0x6e8] sm:$0xff] }
  0x8e   :  { %v468_v48 = vld [vmem:[#allocation5 + $0xa60] sm:$0xff]  ;;  %750 = vmatpush.msrb.mxu0 %v404_v47  ;;  %v157_v47 = vld [vmem:[#allocation5 + $0xa8] sm:$0xff] }
  0x8f   :  { %v532_v49 = vld [vmem:[#allocation5 + $0xc60] sm:$0xff]  ;;  %770 = vmatpush.msrb.mxu1 %v468_v48  ;;  %v221_v48 = vld [vmem:[#allocation5 + $0x2a8] sm:$0xff] }
  0x90   :  { %v600_v50 = vld [vmem:[#allocation5 + $0xe80] sm:$0xff]  ;;  %790 = vmatpush.msrb.mxu2 %v532_v49  ;;  %v285_v49 = vld [vmem:[#allocation5 + $0x4a8] sm:$0xff] }
  0x91   :  { %v400_v51 = vld [vmem:[#allocation5 + $0x840] sm:$0xff]  ;;  %809 = vmatpush.msrb.mxu3 %v600_v50  ;;  %v353_v50 = vld [vmem:[#allocation5 + $0x6c8] sm:$0xff] }
  0x92   :  { %v464_v52 = vld [vmem:[#allocation5 + $0xa40] sm:$0xff]  ;;  %751 = vmatpush.msrb.mxu0 %v400_v51  ;;  %v153_v51 = vld [vmem:[#allocation5 + $0x88] sm:$0xff] }
  0x93   :  { %v528_v53 = vld [vmem:[#allocation5 + $0xc40] sm:$0xff]  ;;  %771 = vmatpush.msrb.mxu1 %v464_v52  ;;  %v217_v52 = vld [vmem:[#allocation5 + $0x288] sm:$0xff] }
  0x94   :  { %v596_v54 = vld [vmem:[#allocation5 + $0xe60] sm:$0xff]  ;;  %791 = vmatpush.msrb.mxu2 %v528_v53  ;;  %v281_v53 = vld [vmem:[#allocation5 + $0x488] sm:$0xff] }
  0x95   :  { %v396_v55 = vld [vmem:[#allocation5 + $0x820] sm:$0xff]  ;;  %810 = vmatpush.msrb.mxu3 %v596_v54  ;;  %v349_v54 = vld [vmem:[#allocation5 + $0x6a8] sm:$0xff] }
  0x96   :  { %v460_v56 = vld [vmem:[#allocation5 + $0xa20] sm:$0xff]  ;;  %752 = vmatpush.msrb.mxu0 %v396_v55  ;;  %v149_v55 = vld [vmem:[#allocation5 + $0x68] sm:$0xff] }
  0x97   :  { %v524_v57 = vld [vmem:[#allocation5 + $0xc20] sm:$0xff]  ;;  %772 = vmatpush.msrb.mxu1 %v460_v56  ;;  %v213_v56 = vld [vmem:[#allocation5 + $0x268] sm:$0xff] }
  0x98   :  { %v592_v58 = vld [vmem:[#allocation5 + $0xe40] sm:$0xff]  ;;  %792 = vmatpush.msrb.mxu2 %v524_v57  ;;  %v277_v57 = vld [vmem:[#allocation5 + $0x468] sm:$0xff] }
  0x99   :  { %v392_v60 = vld [vmem:[#allocation5 + $0x800] sm:$0xff]  ;;  %811 = vmatpush.msrb.mxu3 %v592_v58  ;;  %v345_v58 = vld [vmem:[#allocation5 + $0x688] sm:$0xff] }
  0x9a   :  { %v456_v61 = vld [vmem:[#allocation5 + $0xa00] sm:$0xff]  ;;  %753 = vmatpush.msrb.mxu0 %v392_v60  ;;  %v145_v60 = vld [vmem:[#allocation5 + $0x48] sm:$0xff] }
  0x9b   :  { %v520_v62 = vld [vmem:[#allocation5 + $0xc00] sm:$0xff]  ;;  %773 = vmatpush.msrb.mxu1 %v456_v61  ;;  %v209_v61 = vld [vmem:[#allocation5 + $0x248] sm:$0xff] }
  0x9c   :  { %v588_v63 = vld [vmem:[#allocation5 + $0xe20] sm:$0xff]  ;;  %793 = vmatpush.msrb.mxu2 %v520_v62  ;;  %774 = vmatmul.f32.vlgmr.msrb.gmra.mxu1 %v2821_v26  ;;  %v273_v62 = vld [vmem:[#allocation5 + $0x448] sm:$0xff] }
  0x9d   :  { %v2803_v0 = vld [vmem:[#allocation2] sm:$0xff]  ;;  %812 = vmatpush.msrb.mxu3 %v588_v63  ;;  %838 = vmatpush.msra.mxu1 %v261_v4  ;;  %v341_v63 = vld [vmem:[#allocation5 + $0x668] sm:$0xff] }
  0x9e   :  { %674 = vmatmul.f32.vlgmr.msra.gmra.mxu0 %v2803_v0  ;;  %v584_v6 = vld [vmem:[#allocation5 + $0xe00] sm:$0xff]  ;;  %858 = vmatpush.msra.mxu2 %v325_v5  ;;  %v205_v4 = vld [vmem:[#allocation5 + $0x228] sm:$0xff] }
  0x9f   :  { %818 = vmatpush.msra.mxu0 %v197_v3  ;;  %813 = vmatpush.msrb.mxu3 %v584_v6  ;;  %v2815_v20 = vld [vmem:[#allocation2 + $0x20] sm:$0xff]  ;;  %v141_v3 = vld [vmem:[#allocation5 + $0x28] sm:$0xff] }
  0xa0   :  { %839 = vmatpush.msra.mxu1 %v257_v8  ;;  %859 = vmatpush.msra.mxu2 %v321_v9  ;;  %v269_v5 = vld [vmem:[#allocation5 + $0x428] sm:$0xff] }
  0xa1   :  { %819 = vmatpush.msra.mxu0 %v193_v7  ;;  %878 = vmatpush.msra.mxu3 %v389_v10  ;;  %v337_v6 = vld [vmem:[#allocation5 + $0x648] sm:$0xff] }
  0xa2   :  { %840 = vmatpush.msra.mxu1 %v253_v12  ;;  %860 = vmatpush.msra.mxu2 %v317_v13  ;;  %v137_v7 = vld [vmem:[#allocation5 + $0x8] sm:$0xff] }
  0xa3   :  { %820 = vmatpush.msra.mxu0 %v189_v11  ;;  %879 = vmatpush.msra.mxu3 %v385_v14  ;;  %v201_v8 = vld [vmem:[#allocation5 + $0x208] sm:$0xff] }
  0xa4   :  { %794 = vmatmul.f32.vlgmr.msrb.gmra.mxu2 %v2813_v15  ;;  %841 = vmatpush.msra.mxu1 %v249_v17  ;;  %v265_v9 = vld [vmem:[#allocation5 + $0x408] sm:$0xff] }
  0xa5   :  { %821 = vmatpush.msra.mxu0 %v185_v16  ;;  %861 = vmatpush.msra.mxu2 %v313_v18  ;;  %v333_v10 = vld [vmem:[#allocation5 + $0x628] sm:$0xff] }
  0xa6   :  { %880 = vmatpush.msra.mxu3 %v381_v19  ;;  %754 = vmatmul.f32.vlgmr.msrb.gmra.mxu0 %v2815_v20  ;;  %v453_v11 = vld [vmem:[#allocation5 + $0x9e8] sm:$0xff] }
  0xa7   :  { %814 = vmatmul.f32.vlgmr.msrb.gmra.mxu3 %v2818_v21  ;;  %822 = vmatpush.msra.mxu0 %v181_v22  ;;  %v517_v12 = vld [vmem:[#allocation5 + $0xbe8] sm:$0xff] }
  0xa8   :  { %842 = vmatpush.msra.mxu1 %v245_v23  ;;  %862 = vmatpush.msra.mxu2 %v309_v24  ;;  %v581_v13 = vld [vmem:[#allocation5 + $0xde8] sm:$0xff] }
  0xa9   :  { %881 = vmatpush.msra.mxu3 %v377_v25  ;;  %823 = vmatpush.msra.mxu0 %v177_v27  ;;  %v329_v14 = vld [vmem:[#allocation5 + $0x608] sm:$0xff] }
  0xaa   :  { %843 = vmatpush.msra.mxu1 %v241_v28  ;;  %863 = vmatpush.msra.mxu2 %v305_v29  ;;  %v449_v16 = vld [vmem:[#allocation5 + $0x9c8] sm:$0xff] }
  0xab   :  { %882 = vmatpush.msra.mxu3 %v373_v30  ;;  %824 = vmatpush.msra.mxu0 %v173_v31  ;;  %v513_v17 = vld [vmem:[#allocation5 + $0xbc8] sm:$0xff] }
  0xac   :  { %844 = vmatpush.msra.mxu1 %v237_v32  ;;  %864 = vmatpush.msra.mxu2 %v301_v33  ;;  %v577_v18 = vld [vmem:[#allocation5 + $0xdc8] sm:$0xff] }
  0xad   :  { %883 = vmatpush.msra.mxu3 %v369_v34  ;;  %825 = vmatpush.msra.mxu0 %v169_v35  ;;  %v645_v19 = vld [vmem:[#allocation5 + $0xfe8] sm:$0xff] }
  0xae   :  { %845 = vmatpush.msra.mxu1 %v233_v36  ;;  %865 = vmatpush.msra.mxu2 %v297_v37  ;;  %v445_v22 = vld [vmem:[#allocation5 + $0x9a8] sm:$0xff] }
  0xaf   :  { %884 = vmatpush.msra.mxu3 %v365_v38  ;;  %826 = vmatpush.msra.mxu0 %v165_v39  ;;  %v509_v23 = vld [vmem:[#allocation5 + $0xba8] sm:$0xff] }
  0xb0   :  { %846 = vmatpush.msra.mxu1 %v229_v40  ;;  %866 = vmatpush.msra.mxu2 %v293_v41  ;;  %v573_v24 = vld [vmem:[#allocation5 + $0xda8] sm:$0xff] }
  0xb1   :  { %885 = vmatpush.msra.mxu3 %v361_v42  ;;  %827 = vmatpush.msra.mxu0 %v161_v43  ;;  %v641_v25 = vld [vmem:[#allocation5 + $0xfc8] sm:$0xff] }
  0xb2   :  { %847 = vmatpush.msra.mxu1 %v225_v44  ;;  %867 = vmatpush.msra.mxu2 %v289_v45  ;;  %v441_v27 = vld [vmem:[#allocation5 + $0x988] sm:$0xff] }
  0xb3   :  { %886 = vmatpush.msra.mxu3 %v357_v46  ;;  %828 = vmatpush.msra.mxu0 %v157_v47  ;;  %v505_v28 = vld [vmem:[#allocation5 + $0xb88] sm:$0xff] }
  0xb4   :  { %848 = vmatpush.msra.mxu1 %v221_v48  ;;  %868 = vmatpush.msra.mxu2 %v285_v49  ;;  %v569_v29 = vld [vmem:[#allocation5 + $0xd88] sm:$0xff] }
  0xb5   :  { %887 = vmatpush.msra.mxu3 %v353_v50  ;;  %829 = vmatpush.msra.mxu0 %v153_v51  ;;  %v637_v30 = vld [vmem:[#allocation5 + $0xfa8] sm:$0xff] }
  0xb6   :  { %849 = vmatpush.msra.mxu1 %v217_v52  ;;  %869 = vmatpush.msra.mxu2 %v281_v53  ;;  %v437_v31 = vld [vmem:[#allocation5 + $0x968] sm:$0xff] }
  0xb7   :  { %888 = vmatpush.msra.mxu3 %v349_v54  ;;  %830 = vmatpush.msra.mxu0 %v149_v55  ;;  %v501_v32 = vld [vmem:[#allocation5 + $0xb68] sm:$0xff] }
  0xb8   :  { %850 = vmatpush.msra.mxu1 %v213_v56  ;;  %870 = vmatpush.msra.mxu2 %v277_v57  ;;  %v565_v33 = vld [vmem:[#allocation5 + $0xd68] sm:$0xff] }
  0xb9   :  { %889 = vmatpush.msra.mxu3 %v345_v58  ;;  %831 = vmatpush.msra.mxu0 %v145_v60  ;;  %v633_v34 = vld [vmem:[#allocation5 + $0xf88] sm:$0xff] }
  0xba   :  { %851 = vmatpush.msra.mxu1 %v209_v61  ;;  %871 = vmatpush.msra.mxu2 %v273_v62  ;;  %v433_v35 = vld [vmem:[#allocation5 + $0x948] sm:$0xff] }
  0xbb   :  { %890 = vmatpush.msra.mxu3 %v341_v63  ;;  %832 = vmatpush.msra.mxu0 %v141_v3  ;;  %v497_v36 = vld [vmem:[#allocation5 + $0xb48] sm:$0xff] }
  0xbc   :  { %852 = vmatpush.msra.mxu1 %v205_v4  ;;  %872 = vmatpush.msra.mxu2 %v269_v5  ;;  %v561_v37 = vld [vmem:[#allocation5 + $0xd48] sm:$0xff] }
  0xbd   :  { %891 = vmatpush.msra.mxu3 %v337_v6  ;;  %833 = vmatpush.msra.mxu0 %v137_v7  ;;  %v629_v38 = vld [vmem:[#allocation5 + $0xf68] sm:$0xff] }
  0xbe   :  { %853 = vmatpush.msra.mxu1 %v201_v8  ;;  %873 = vmatpush.msra.mxu2 %v265_v9  ;;  %v429_v39 = vld [vmem:[#allocation5 + $0x928] sm:$0xff] }
  0xbf   :  { %892 = vmatpush.msra.mxu3 %v333_v10  ;;  %898 = vmatpush.msrb.mxu0 %v453_v11  ;;  %v493_v40 = vld [vmem:[#allocation5 + $0xb28] sm:$0xff] }
  0xc0   :  { %918 = vmatpush.msrb.mxu1 %v517_v12  ;;  %938 = vmatpush.msrb.mxu2 %v581_v13  ;;  %v557_v41 = vld [vmem:[#allocation5 + $0xd28] sm:$0xff] }
  0xc1   :  { %893 = vmatpush.msra.mxu3 %v329_v14  ;;  %899 = vmatpush.msrb.mxu0 %v449_v16  ;;  %v625_v42 = vld [vmem:[#allocation5 + $0xf48] sm:$0xff] }
  0xc2   :  { %919 = vmatpush.msrb.mxu1 %v513_v17  ;;  %939 = vmatpush.msrb.mxu2 %v577_v18  ;;  %v425_v43 = vld [vmem:[#allocation5 + $0x908] sm:$0xff] }
  0xc3   :  { %958 = vmatpush.msrb.mxu3 %v645_v19  ;;  %900 = vmatpush.msrb.mxu0 %v445_v22  ;;  %v489_v44 = vld [vmem:[#allocation5 + $0xb08] sm:$0xff]  ;;  %v198_v22 = vld [vmem:[#allocation5 + $0x1f0] sm:$0xff] }
  0xc4   :  { %920 = vmatpush.msrb.mxu1 %v509_v23  ;;  %940 = vmatpush.msrb.mxu2 %v573_v24  ;;  %v553_v45 = vld [vmem:[#allocation5 + $0xd08] sm:$0xff]  ;;  %v262_v23 = vld [vmem:[#allocation5 + $0x3f0] sm:$0xff] }
  0xc5   :  { %959 = vmatpush.msrb.mxu3 %v641_v25  ;;  %901 = vmatpush.msrb.mxu0 %v441_v27  ;;  %v621_v46 = vld [vmem:[#allocation5 + $0xf28] sm:$0xff]  ;;  %v326_v24 = vld [vmem:[#allocation5 + $0x5f0] sm:$0xff] }
  0xc6   :  { %921 = vmatpush.msrb.mxu1 %v505_v28  ;;  %941 = vmatpush.msrb.mxu2 %v569_v29  ;;  %v421_v47 = vld [vmem:[#allocation5 + $0x8e8] sm:$0xff]  ;;  %v194_v27 = vld [vmem:[#allocation5 + $0x1d0] sm:$0xff] }
  0xc7   :  { %960 = vmatpush.msrb.mxu3 %v637_v30  ;;  %902 = vmatpush.msrb.mxu0 %v437_v31  ;;  %v485_v48 = vld [vmem:[#allocation5 + $0xae8] sm:$0xff]  ;;  %v258_v28 = vld [vmem:[#allocation5 + $0x3d0] sm:$0xff] }
  0xc8   :  { %922 = vmatpush.msrb.mxu1 %v501_v32  ;;  %942 = vmatpush.msrb.mxu2 %v565_v33  ;;  %v549_v49 = vld [vmem:[#allocation5 + $0xce8] sm:$0xff]  ;;  %v322_v29 = vld [vmem:[#allocation5 + $0x5d0] sm:$0xff] }
  0xc9   :  { %961 = vmatpush.msrb.mxu3 %v633_v34  ;;  %903 = vmatpush.msrb.mxu0 %v433_v35  ;;  %v617_v50 = vld [vmem:[#allocation5 + $0xf08] sm:$0xff]  ;;  %v190_v30 = vld [vmem:[#allocation5 + $0x1b0] sm:$0xff] }
  0xca   :  { %923 = vmatpush.msrb.mxu1 %v497_v36  ;;  %943 = vmatpush.msrb.mxu2 %v561_v37  ;;  %v417_v51 = vld [vmem:[#allocation5 + $0x8c8] sm:$0xff]  ;;  %v254_v31 = vld [vmem:[#allocation5 + $0x3b0] sm:$0xff] }
  0xcb   :  { %962 = vmatpush.msrb.mxu3 %v629_v38  ;;  %904 = vmatpush.msrb.mxu0 %v429_v39  ;;  %v481_v52 = vld [vmem:[#allocation5 + $0xac8] sm:$0xff]  ;;  %v318_v32 = vld [vmem:[#allocation5 + $0x5b0] sm:$0xff] }
  0xcc   :  { %924 = vmatpush.msrb.mxu1 %v493_v40  ;;  %944 = vmatpush.msrb.mxu2 %v557_v41  ;;  %v545_v53 = vld [vmem:[#allocation5 + $0xcc8] sm:$0xff]  ;;  %v186_v33 = vld [vmem:[#allocation5 + $0x190] sm:$0xff] }
  0xcd   :  { %963 = vmatpush.msrb.mxu3 %v625_v42  ;;  %905 = vmatpush.msrb.mxu0 %v425_v43  ;;  %v613_v54 = vld [vmem:[#allocation5 + $0xee8] sm:$0xff]  ;;  %v382_v34 = vld [vmem:[#allocation5 + $0x7b0] sm:$0xff] }
  0xce   :  { %925 = vmatpush.msrb.mxu1 %v489_v44  ;;  %945 = vmatpush.msrb.mxu2 %v553_v45  ;;  %v413_v55 = vld [vmem:[#allocation5 + $0x8a8] sm:$0xff]  ;;  %v182_v35 = vld [vmem:[#allocation5 + $0x170] sm:$0xff] }
  0xcf   :  { %964 = vmatpush.msrb.mxu3 %v621_v46  ;;  %906 = vmatpush.msrb.mxu0 %v421_v47  ;;  %v477_v56 = vld [vmem:[#allocation5 + $0xaa8] sm:$0xff]  ;;  %v246_v36 = vld [vmem:[#allocation5 + $0x370] sm:$0xff] }
  0xd0   :  { %926 = vmatpush.msrb.mxu1 %v485_v48  ;;  %946 = vmatpush.msrb.mxu2 %v549_v49  ;;  %v541_v57 = vld [vmem:[#allocation5 + $0xca8] sm:$0xff]  ;;  %v310_v37 = vld [vmem:[#allocation5 + $0x570] sm:$0xff] }
  0xd1   :  { %965 = vmatpush.msrb.mxu3 %v617_v50  ;;  %907 = vmatpush.msrb.mxu0 %v417_v51  ;;  %v609_v58 = vld [vmem:[#allocation5 + $0xec8] sm:$0xff]  ;;  %v378_v38 = vld [vmem:[#allocation5 + $0x790] sm:$0xff] }
  0xd2   :  { %927 = vmatpush.msrb.mxu1 %v481_v52  ;;  %947 = vmatpush.msrb.mxu2 %v545_v53  ;;  %v409_v60 = vld [vmem:[#allocation5 + $0x888] sm:$0xff]  ;;  %v178_v39 = vld [vmem:[#allocation5 + $0x150] sm:$0xff] }
  0xd3   :  { %966 = vmatpush.msrb.mxu3 %v613_v54  ;;  %v473_v61 = vld [vmem:[#allocation5 + $0xa88] sm:$0xff]  ;;  %908 = vmatpush.msrb.mxu0 %v413_v55  ;;  %v242_v40 = vld [vmem:[#allocation5 + $0x350] sm:$0xff] }
  0xd4   :  { %928 = vmatpush.msrb.mxu1 %v477_v56  ;;  %v537_v62 = vld [vmem:[#allocation5 + $0xc88] sm:$0xff]  ;;  %948 = vmatpush.msrb.mxu2 %v541_v57  ;;  %v306_v41 = vld [vmem:[#allocation5 + $0x550] sm:$0xff] }
  0xd5   :  { %v605_v63 = vld [vmem:[#allocation5 + $0xea8] sm:$0xff]  ;;  %967 = vmatpush.msrb.mxu3 %v609_v58  ;;  %909 = vmatpush.msrb.mxu0 %v409_v60  ;;  %v374_v42 = vld [vmem:[#allocation5 + $0x770] sm:$0xff] }
  0xd6   :  { %v405_v3 = vld [vmem:[#allocation5 + $0x868] sm:$0xff]  ;;  %929 = vmatpush.msrb.mxu1 %v473_v61  ;;  %949 = vmatpush.msrb.mxu2 %v537_v62  ;;  %v238_v43 = vld [vmem:[#allocation5 + $0x330] sm:$0xff] }
  0xd7   :  { %v469_v4 = vld [vmem:[#allocation5 + $0xa68] sm:$0xff]  ;;  %968 = vmatpush.msrb.mxu3 %v605_v63  ;;  %910 = vmatpush.msrb.mxu0 %v405_v3  ;;  %v302_v44 = vld [vmem:[#allocation5 + $0x530] sm:$0xff] }
  0xd8   :  { %v533_v5 = vld [vmem:[#allocation5 + $0xc68] sm:$0xff]  ;;  %930 = vmatpush.msrb.mxu1 %v469_v4  ;;  %874 = vmatmul.f32.vlgmr.msra.gmra.mxu2 %v2801_v59  ;;  %v390_v59 = vld [vmem:[#allocation5 + $0x7f0] sm:$0xff] }
  0xd9   :  { %v601_v6 = vld [vmem:[#allocation5 + $0xe88] sm:$0xff]  ;;  %950 = vmatpush.msrb.mxu2 %v533_v5  ;;  %834 = vmatmul.f32.vlgmr.msra.gmra.mxu0 %v2803_v0  ;;  %v386_v0 = vld [vmem:[#allocation5 + $0x7d0] sm:$0xff] }
  0xda   :  { %v401_v7 = vld [vmem:[#allocation5 + $0x848] sm:$0xff]  ;;  %969 = vmatpush.msrb.mxu3 %v601_v6  ;;  %854 = vmatmul.f32.vlgmr.msra.gmra.mxu1 %v2806_v1  ;;  %v250_v1 = vld [vmem:[#allocation5 + $0x390] sm:$0xff] }
  0xdb   :  { %v465_v8 = vld [vmem:[#allocation5 + $0xa48] sm:$0xff]  ;;  %911 = vmatpush.msrb.mxu0 %v401_v7  ;;  %894 = vmatmul.f32.vlgmr.msra.gmra.mxu3 %v2808_v2  ;;  %v314_v2 = vld [vmem:[#allocation5 + $0x590] sm:$0xff] }
  0xdc   :  { %v529_v9 = vld [vmem:[#allocation5 + $0xc48] sm:$0xff]  ;;  %931 = vmatpush.msrb.mxu1 %v465_v8  ;;  %v370_v45 = vld [vmem:[#allocation5 + $0x750] sm:$0xff] }
  0xdd   :  { %v597_v10 = vld [vmem:[#allocation5 + $0xe68] sm:$0xff]  ;;  %951 = vmatpush.msrb.mxu2 %v529_v9  ;;  %v298_v46 = vld [vmem:[#allocation5 + $0x510] sm:$0xff] }
  0xde   :  { %v397_v11 = vld [vmem:[#allocation5 + $0x828] sm:$0xff]  ;;  %970 = vmatpush.msrb.mxu3 %v597_v10  ;;  %v366_v47 = vld [vmem:[#allocation5 + $0x730] sm:$0xff] }
  0xdf   :  { %v461_v12 = vld [vmem:[#allocation5 + $0xa28] sm:$0xff]  ;;  %912 = vmatpush.msrb.mxu0 %v397_v11  ;;  %v166_v48 = vld [vmem:[#allocation5 + $0xf0] sm:$0xff] }
  0xe0   :  { %v525_v13 = vld [vmem:[#allocation5 + $0xc28] sm:$0xff]  ;;  %932 = vmatpush.msrb.mxu1 %v461_v12  ;;  %v230_v49 = vld [vmem:[#allocation5 + $0x2f0] sm:$0xff] }
  0xe1   :  { %v593_v14 = vld [vmem:[#allocation5 + $0xe48] sm:$0xff]  ;;  %952 = vmatpush.msrb.mxu2 %v525_v13  ;;  %v362_v50 = vld [vmem:[#allocation5 + $0x710] sm:$0xff] }
  0xe2   :  { %v393_v16 = vld [vmem:[#allocation5 + $0x808] sm:$0xff]  ;;  %971 = vmatpush.msrb.mxu3 %v593_v14  ;;  %v162_v51 = vld [vmem:[#allocation5 + $0xd0] sm:$0xff] }
  0xe3   :  { %v457_v17 = vld [vmem:[#allocation5 + $0xa08] sm:$0xff]  ;;  %913 = vmatpush.msrb.mxu0 %v393_v16  ;;  %v226_v52 = vld [vmem:[#allocation5 + $0x2d0] sm:$0xff] }
  0xe4   :  { %v521_v18 = vld [vmem:[#allocation5 + $0xc08] sm:$0xff]  ;;  %933 = vmatpush.msrb.mxu1 %v457_v17  ;;  %914 = vmatmul.f32.vlgmr.msrb.gmra.mxu0 %v2815_v20  ;;  %v170_v20 = vld [vmem:[#allocation5 + $0x110] sm:$0xff] }
  0xe5   :  { %v589_v19 = vld [vmem:[#allocation5 + $0xe28] sm:$0xff]  ;;  %953 = vmatpush.msrb.mxu2 %v521_v18  ;;  %978 = vmatpush.msra.mxu0 %v198_v22  ;;  %v290_v53 = vld [vmem:[#allocation5 + $0x4d0] sm:$0xff] }
  0xe6   :  { %972 = vmatpush.msrb.mxu3 %v589_v19  ;;  %v585_v25 = vld [vmem:[#allocation5 + $0xe08] sm:$0xff]  ;;  %998 = vmatpush.msra.mxu1 %v262_v23  ;;  %v358_v54 = vld [vmem:[#allocation5 + $0x6f0] sm:$0xff] }
  0xe7   :  { %1018 = vmatpush.msra.mxu2 %v326_v24  ;;  %979 = vmatpush.msra.mxu0 %v194_v27  ;;  %v158_v55 = vld [vmem:[#allocation5 + $0xb0] sm:$0xff] }
  0xe8   :  { %973 = vmatpush.msrb.mxu3 %v585_v25  ;;  %999 = vmatpush.msra.mxu1 %v258_v28  ;;  %v222_v56 = vld [vmem:[#allocation5 + $0x2b0] sm:$0xff] }
  0xe9   :  { %1019 = vmatpush.msra.mxu2 %v322_v29  ;;  %980 = vmatpush.msra.mxu0 %v190_v30  ;;  %v286_v57 = vld [vmem:[#allocation5 + $0x4b0] sm:$0xff] }
  0xea   :  { %1038 = vmatpush.msra.mxu3 %v390_v59  ;;  %1000 = vmatpush.msra.mxu1 %v254_v31  ;;  %v354_v58 = vld [vmem:[#allocation5 + $0x6d0] sm:$0xff] }
  0xeb   :  { %1020 = vmatpush.msra.mxu2 %v318_v32  ;;  %981 = vmatpush.msra.mxu0 %v186_v33  ;;  %v154_v60 = vld [vmem:[#allocation5 + $0x90] sm:$0xff] }
  0xec   :  { %1039 = vmatpush.msra.mxu3 %v386_v0  ;;  %954 = vmatmul.f32.vlgmr.msrb.gmra.mxu2 %v2813_v15  ;;  %v174_v15 = vld [vmem:[#allocation5 + $0x130] sm:$0xff] }
  0xed   :  { %1001 = vmatpush.msra.mxu1 %v250_v1  ;;  %1021 = vmatpush.msra.mxu2 %v314_v2  ;;  %v218_v61 = vld [vmem:[#allocation5 + $0x290] sm:$0xff] }
  0xee   :  { %1040 = vmatpush.msra.mxu3 %v382_v34  ;;  %982 = vmatpush.msra.mxu0 %v182_v35  ;;  %v282_v62 = vld [vmem:[#allocation5 + $0x490] sm:$0xff] }
  0xef   :  { %974 = vmatmul.f32.vlgmr.msrb.gmra.mxu3 %v2818_v21  ;;  %1002 = vmatpush.msra.mxu1 %v246_v36  ;;  %v234_v21 = vld [vmem:[#allocation5 + $0x310] sm:$0xff] }
  0xf0   :  { %1022 = vmatpush.msra.mxu2 %v310_v37  ;;  %1041 = vmatpush.msra.mxu3 %v378_v38  ;;  %v350_v63 = vld [vmem:[#allocation5 + $0x6b0] sm:$0xff] }
  0xf1   :  { %934 = vmatmul.f32.vlgmr.msrb.gmra.mxu1 %v2821_v26  ;;  %983 = vmatpush.msra.mxu0 %v178_v39  ;;  %v294_v26 = vld [vmem:[#allocation5 + $0x4f0] sm:$0xff] }
  0xf2   :  { %1003 = vmatpush.msra.mxu1 %v242_v40  ;;  %1023 = vmatpush.msra.mxu2 %v306_v41  ;;  %v150_v3 = vld [vmem:[#allocation5 + $0x70] sm:$0xff] }
  0xf3   :  { %1042 = vmatpush.msra.mxu3 %v374_v42  ;;  %984 = vmatpush.msra.mxu0 %v174_v15  ;;  %v214_v4 = vld [vmem:[#allocation5 + $0x270] sm:$0xff] }
  0xf4   :  { %1004 = vmatpush.msra.mxu1 %v238_v43  ;;  %1024 = vmatpush.msra.mxu2 %v302_v44  ;;  %v278_v5 = vld [vmem:[#allocation5 + $0x470] sm:$0xff] }
  0xf5   :  { %1043 = vmatpush.msra.mxu3 %v370_v45  ;;  %985 = vmatpush.msra.mxu0 %v170_v20  ;;  %v346_v6 = vld [vmem:[#allocation5 + $0x690] sm:$0xff] }
  0xf6   :  { %1005 = vmatpush.msra.mxu1 %v234_v21  ;;  %1025 = vmatpush.msra.mxu2 %v298_v46  ;;  %v146_v7 = vld [vmem:[#allocation5 + $0x50] sm:$0xff] }
  0xf7   :  { %1044 = vmatpush.msra.mxu3 %v366_v47  ;;  %986 = vmatpush.msra.mxu0 %v166_v48  ;;  %v210_v8 = vld [vmem:[#allocation5 + $0x250] sm:$0xff] }
  0xf8   :  { %1006 = vmatpush.msra.mxu1 %v230_v49  ;;  %1026 = vmatpush.msra.mxu2 %v294_v26  ;;  %v274_v9 = vld [vmem:[#allocation5 + $0x450] sm:$0xff] }
  0xf9   :  { %1045 = vmatpush.msra.mxu3 %v362_v50  ;;  %987 = vmatpush.msra.mxu0 %v162_v51  ;;  %v342_v10 = vld [vmem:[#allocation5 + $0x670] sm:$0xff] }
  0xfa   :  { %1007 = vmatpush.msra.mxu1 %v226_v52  ;;  %1027 = vmatpush.msra.mxu2 %v290_v53  ;;  %v142_v11 = vld [vmem:[#allocation5 + $0x30] sm:$0xff] }
  0xfb   :  { %1046 = vmatpush.msra.mxu3 %v358_v54  ;;  %988 = vmatpush.msra.mxu0 %v158_v55  ;;  %v206_v12 = vld [vmem:[#allocation5 + $0x230] sm:$0xff] }
  0xfc   :  { %1008 = vmatpush.msra.mxu1 %v222_v56  ;;  %1028 = vmatpush.msra.mxu2 %v286_v57  ;;  %v270_v13 = vld [vmem:[#allocation5 + $0x430] sm:$0xff] }
  0xfd   :  { %1047 = vmatpush.msra.mxu3 %v354_v58  ;;  %989 = vmatpush.msra.mxu0 %v154_v60  ;;  %v338_v14 = vld [vmem:[#allocation5 + $0x650] sm:$0xff] }
  0xfe   :  { %1009 = vmatpush.msra.mxu1 %v218_v61  ;;  %1029 = vmatpush.msra.mxu2 %v282_v62  ;;  %v138_v16 = vld [vmem:[#allocation5 + $0x10] sm:$0xff] }
  0xff   :  { %1048 = vmatpush.msra.mxu3 %v350_v63  ;;  %990 = vmatpush.msra.mxu0 %v150_v3  ;;  %v202_v17 = vld [vmem:[#allocation5 + $0x210] sm:$0xff] }
 0x100   :  { %1010 = vmatpush.msra.mxu1 %v214_v4  ;;  %1030 = vmatpush.msra.mxu2 %v278_v5  ;;  %v266_v18 = vld [vmem:[#allocation5 + $0x410] sm:$0xff] }
 0x101   :  { %1049 = vmatpush.msra.mxu3 %v346_v6  ;;  %991 = vmatpush.msra.mxu0 %v146_v7  ;;  %v334_v19 = vld [vmem:[#allocation5 + $0x630] sm:$0xff] }
 0x102   :  { %1011 = vmatpush.msra.mxu1 %v210_v8  ;;  %1031 = vmatpush.msra.mxu2 %v274_v9  ;;  %v454_v22 = vld [vmem:[#allocation5 + $0x9f0] sm:$0xff] }
 0x103   :  { %1050 = vmatpush.msra.mxu3 %v342_v10  ;;  %992 = vmatpush.msra.mxu0 %v142_v11  ;;  %v518_v23 = vld [vmem:[#allocation5 + $0xbf0] sm:$0xff]  ;;  %v2836_v11 = vld [vmem:[#allocation2] sm:$0xff] }
 0x104   :  { %1012 = vmatpush.msra.mxu1 %v206_v12  ;;  %1032 = vmatpush.msra.mxu2 %v270_v13  ;;  %v582_v24 = vld [vmem:[#allocation5 + $0xdf0] sm:$0xff]  ;;  %v2839_v13 = vld [vmem:[#allocation2 + $0x18] sm:$0xff] }
 0x105   :  { %1051 = vmatpush.msra.mxu3 %v338_v14  ;;  %993 = vmatpush.msra.mxu0 %v138_v16  ;;  %v330_v25 = vld [vmem:[#allocation5 + $0x610] sm:$0xff] }
 0x106   :  { %1013 = vmatpush.msra.mxu1 %v202_v17  ;;  %1033 = vmatpush.msra.mxu2 %v266_v18  ;;  %v450_v27 = vld [vmem:[#allocation5 + $0x9d0] sm:$0xff] }
 0x107   :  { %1052 = vmatpush.msra.mxu3 %v334_v19  ;;  %v514_v28 = vld [vmem:[#allocation5 + $0xbd0] sm:$0xff]  ;;  %1058 = vmatpush.msrb.mxu0 %v454_v22  ;;  %v2842_v19 = vld [vmem:[#allocation2 + $0x8] sm:$0xff] }
 0x108   :  { %1078 = vmatpush.msrb.mxu1 %v518_v23  ;;  %v578_v29 = vld [vmem:[#allocation5 + $0xdd0] sm:$0xff]  ;;  %1098 = vmatpush.msrb.mxu2 %v582_v24 }
 0x109   :  { %v646_v59 = vld [vmem:[#allocation5 + $0xff0] sm:$0xff]  ;;  %1053 = vmatpush.msra.mxu3 %v330_v25  ;;  %1059 = vmatpush.msrb.mxu0 %v450_v27  ;;  %v199_v27 = vld [vmem:[#allocation5 + $0x1f8] sm:$0xff] }
 0x10a   :  { %v446_v30 = vld [vmem:[#allocation5 + $0x9b0] sm:$0xff]  ;;  %1079 = vmatpush.msrb.mxu1 %v514_v28  ;;  %1099 = vmatpush.msrb.mxu2 %v578_v29  ;;  %v263_v28 = vld [vmem:[#allocation5 + $0x3f8] sm:$0xff] }
 0x10b   :  { %v510_v31 = vld [vmem:[#allocation5 + $0xbb0] sm:$0xff]  ;;  %1118 = vmatpush.msrb.mxu3 %v646_v59  ;;  %1060 = vmatpush.msrb.mxu0 %v446_v30  ;;  %v327_v29 = vld [vmem:[#allocation5 + $0x5f8] sm:$0xff] }
 0x10c   :  { %v574_v32 = vld [vmem:[#allocation5 + $0xdb0] sm:$0xff]  ;;  %1080 = vmatpush.msrb.mxu1 %v510_v31  ;;  %994 = vmatmul.f32.vlgmr.msra.gmra.mxu0 %v2836_v11  ;;  %v195_v31 = vld [vmem:[#allocation5 + $0x1d8] sm:$0xff] }
 0x10d   :  { %v642_v0 = vld [vmem:[#allocation5 + $0xfd0] sm:$0xff]  ;;  %1100 = vmatpush.msrb.mxu2 %v574_v32  ;;  %1054 = vmatmul.f32.vlgmr.msra.gmra.mxu3 %v2839_v13  ;;  %v259_v32 = vld [vmem:[#allocation5 + $0x3d8] sm:$0xff] }
 0x10e   :  { %v442_v33 = vld [vmem:[#allocation5 + $0x990] sm:$0xff]  ;;  %1119 = vmatpush.msrb.mxu3 %v642_v0  ;;  %1014 = vmatmul.f32.vlgmr.msra.gmra.mxu1 %v2842_v19  ;;  %v323_v0 = vld [vmem:[#allocation5 + $0x5d8] sm:$0xff] }
 0x10f   :  { %v506_v1 = vld [vmem:[#allocation5 + $0xb90] sm:$0xff]  ;;  %1061 = vmatpush.msrb.mxu0 %v442_v33  ;;  %v2848_v33 = vld [vmem:[#allocation2 + $0x20] sm:$0xff] }
 0x110   :  { %v570_v2 = vld [vmem:[#allocation5 + $0xd90] sm:$0xff]  ;;  %1081 = vmatpush.msrb.mxu1 %v506_v1  ;;  %v391_v1 = vld [vmem:[#allocation5 + $0x7f8] sm:$0xff] }
 0x111   :  { %v638_v34 = vld [vmem:[#allocation5 + $0xfb0] sm:$0xff]  ;;  %1101 = vmatpush.msrb.mxu2 %v570_v2  ;;  %v2851_v2 = vld [vmem:[#allocation2 + $0x38] sm:$0xff] }
 0x112   :  { %v438_v35 = vld [vmem:[#allocation5 + $0x970] sm:$0xff]  ;;  %1120 = vmatpush.msrb.mxu3 %v638_v34  ;;  %v191_v34 = vld [vmem:[#allocation5 + $0x1b8] sm:$0xff] }
 0x113   :  { %v502_v36 = vld [vmem:[#allocation5 + $0xb70] sm:$0xff]  ;;  %1062 = vmatpush.msrb.mxu0 %v438_v35  ;;  %v255_v35 = vld [vmem:[#allocation5 + $0x3b8] sm:$0xff] }
 0x114   :  { %v566_v37 = vld [vmem:[#allocation5 + $0xd70] sm:$0xff]  ;;  %1082 = vmatpush.msrb.mxu1 %v502_v36  ;;  %v319_v36 = vld [vmem:[#allocation5 + $0x5b8] sm:$0xff] }
 0x115   :  { %v634_v38 = vld [vmem:[#allocation5 + $0xf90] sm:$0xff]  ;;  %1102 = vmatpush.msrb.mxu2 %v566_v37  ;;  %v387_v37 = vld [vmem:[#allocation5 + $0x7d8] sm:$0xff] }
 0x116   :  { %v434_v39 = vld [vmem:[#allocation5 + $0x950] sm:$0xff]  ;;  %1121 = vmatpush.msrb.mxu3 %v634_v38  ;;  %v2854_v38 = vld [vmem:[#allocation2 + $0x28] sm:$0xff] }
 0x117   :  { %v498_v40 = vld [vmem:[#allocation5 + $0xb50] sm:$0xff]  ;;  %1063 = vmatpush.msrb.mxu0 %v434_v39  ;;  %v187_v39 = vld [vmem:[#allocation5 + $0x198] sm:$0xff] }
 0x118   :  { %v562_v41 = vld [vmem:[#allocation5 + $0xd50] sm:$0xff]  ;;  %1083 = vmatpush.msrb.mxu1 %v498_v40  ;;  %v251_v40 = vld [vmem:[#allocation5 + $0x398] sm:$0xff] }
 0x119   :  { %v630_v42 = vld [vmem:[#allocation5 + $0xf70] sm:$0xff]  ;;  %1103 = vmatpush.msrb.mxu2 %v562_v41  ;;  %v315_v41 = vld [vmem:[#allocation5 + $0x598] sm:$0xff] }
 0x11a   :  { %v430_v15 = vld [vmem:[#allocation5 + $0x930] sm:$0xff]  ;;  %1122 = vmatpush.msrb.mxu3 %v630_v42  ;;  %v383_v42 = vld [vmem:[#allocation5 + $0x7b8] sm:$0xff] }
 0x11b   :  { %v494_v43 = vld [vmem:[#allocation5 + $0xb30] sm:$0xff]  ;;  %1064 = vmatpush.msrb.mxu0 %v430_v15  ;;  %v183_v15 = vld [vmem:[#allocation5 + $0x178] sm:$0xff] }
 0x11c   :  { %v558_v44 = vld [vmem:[#allocation5 + $0xd30] sm:$0xff]  ;;  %1084 = vmatpush.msrb.mxu1 %v494_v43  ;;  %v247_v43 = vld [vmem:[#allocation5 + $0x378] sm:$0xff] }
 0x11d   :  { %v626_v45 = vld [vmem:[#allocation5 + $0xf50] sm:$0xff]  ;;  %1104 = vmatpush.msrb.mxu2 %v558_v44  ;;  %v311_v44 = vld [vmem:[#allocation5 + $0x578] sm:$0xff] }
 0x11e   :  { %v426_v20 = vld [vmem:[#allocation5 + $0x910] sm:$0xff]  ;;  %1123 = vmatpush.msrb.mxu3 %v626_v45  ;;  %v379_v45 = vld [vmem:[#allocation5 + $0x798] sm:$0xff] }
 0x11f   :  { %v490_v21 = vld [vmem:[#allocation5 + $0xb10] sm:$0xff]  ;;  %1065 = vmatpush.msrb.mxu0 %v426_v20  ;;  %v179_v20 = vld [vmem:[#allocation5 + $0x158] sm:$0xff] }
 0x120   :  { %v554_v46 = vld [vmem:[#allocation5 + $0xd10] sm:$0xff]  ;;  %1085 = vmatpush.msrb.mxu1 %v490_v21  ;;  %v243_v21 = vld [vmem:[#allocation5 + $0x358] sm:$0xff] }
 0x121   :  { %v622_v47 = vld [vmem:[#allocation5 + $0xf30] sm:$0xff]  ;;  %1105 = vmatpush.msrb.mxu2 %v554_v46  ;;  %v307_v46 = vld [vmem:[#allocation5 + $0x558] sm:$0xff] }
 0x122   :  { %v422_v48 = vld [vmem:[#allocation5 + $0x8f0] sm:$0xff]  ;;  %1124 = vmatpush.msrb.mxu3 %v622_v47  ;;  %v375_v47 = vld [vmem:[#allocation5 + $0x778] sm:$0xff] }
 0x123   :  { %v486_v49 = vld [vmem:[#allocation5 + $0xaf0] sm:$0xff]  ;;  %1066 = vmatpush.msrb.mxu0 %v422_v48  ;;  %v175_v48 = vld [vmem:[#allocation5 + $0x138] sm:$0xff] }
 0x124   :  { %v550_v26 = vld [vmem:[#allocation5 + $0xcf0] sm:$0xff]  ;;  %1086 = vmatpush.msrb.mxu1 %v486_v49  ;;  %v239_v49 = vld [vmem:[#allocation5 + $0x338] sm:$0xff] }
 0x125   :  { %v618_v50 = vld [vmem:[#allocation5 + $0xf10] sm:$0xff]  ;;  %1106 = vmatpush.msrb.mxu2 %v550_v26  ;;  %v303_v26 = vld [vmem:[#allocation5 + $0x538] sm:$0xff] }
 0x126   :  { %v418_v51 = vld [vmem:[#allocation5 + $0x8d0] sm:$0xff]  ;;  %1125 = vmatpush.msrb.mxu3 %v618_v50  ;;  %v371_v50 = vld [vmem:[#allocation5 + $0x758] sm:$0xff] }
 0x127   :  { %v482_v52 = vld [vmem:[#allocation5 + $0xad0] sm:$0xff]  ;;  %1067 = vmatpush.msrb.mxu0 %v418_v51  ;;  %v171_v51 = vld [vmem:[#allocation5 + $0x118] sm:$0xff] }
 0x128   :  { %v546_v53 = vld [vmem:[#allocation5 + $0xcd0] sm:$0xff]  ;;  %1087 = vmatpush.msrb.mxu1 %v482_v52  ;;  %v235_v52 = vld [vmem:[#allocation5 + $0x318] sm:$0xff] }
 0x129   :  { %v614_v54 = vld [vmem:[#allocation5 + $0xef0] sm:$0xff]  ;;  %1107 = vmatpush.msrb.mxu2 %v546_v53  ;;  %v299_v53 = vld [vmem:[#allocation5 + $0x518] sm:$0xff] }
 0x12a   :  { %v414_v55 = vld [vmem:[#allocation5 + $0x8b0] sm:$0xff]  ;;  %1126 = vmatpush.msrb.mxu3 %v614_v54  ;;  %v367_v54 = vld [vmem:[#allocation5 + $0x738] sm:$0xff] }
 0x12b   :  { %v478_v56 = vld [vmem:[#allocation5 + $0xab0] sm:$0xff]  ;;  %1068 = vmatpush.msrb.mxu0 %v414_v55  ;;  %v167_v55 = vld [vmem:[#allocation5 + $0xf8] sm:$0xff] }
 0x12c   :  { %v542_v57 = vld [vmem:[#allocation5 + $0xcb0] sm:$0xff]  ;;  %1088 = vmatpush.msrb.mxu1 %v478_v56  ;;  %v231_v56 = vld [vmem:[#allocation5 + $0x2f8] sm:$0xff] }
 0x12d   :  { %v610_v58 = vld [vmem:[#allocation5 + $0xed0] sm:$0xff]  ;;  %1108 = vmatpush.msrb.mxu2 %v542_v57  ;;  %v295_v57 = vld [vmem:[#allocation5 + $0x4f8] sm:$0xff] }
 0x12e   :  { %v410_v60 = vld [vmem:[#allocation5 + $0x890] sm:$0xff]  ;;  %1127 = vmatpush.msrb.mxu3 %v610_v58  ;;  %v363_v58 = vld [vmem:[#allocation5 + $0x718] sm:$0xff] }
 0x12f   :  { %v474_v61 = vld [vmem:[#allocation5 + $0xa90] sm:$0xff]  ;;  %1069 = vmatpush.msrb.mxu0 %v410_v60  ;;  %v163_v60 = vld [vmem:[#allocation5 + $0xd8] sm:$0xff] }
 0x130   :  { %v538_v62 = vld [vmem:[#allocation5 + $0xc90] sm:$0xff]  ;;  %1089 = vmatpush.msrb.mxu1 %v474_v61  ;;  %v227_v61 = vld [vmem:[#allocation5 + $0x2d8] sm:$0xff] }
 0x131   :  { %v606_v63 = vld [vmem:[#allocation5 + $0xeb0] sm:$0xff]  ;;  %1109 = vmatpush.msrb.mxu2 %v538_v62  ;;  %v291_v62 = vld [vmem:[#allocation5 + $0x4d8] sm:$0xff] }
 0x132   :  { %v406_v3 = vld [vmem:[#allocation5 + $0x870] sm:$0xff]  ;;  %1128 = vmatpush.msrb.mxu3 %v606_v63  ;;  %v359_v63 = vld [vmem:[#allocation5 + $0x6f8] sm:$0xff] }
 0x133   :  { %v470_v4 = vld [vmem:[#allocation5 + $0xa70] sm:$0xff]  ;;  %1070 = vmatpush.msrb.mxu0 %v406_v3  ;;  %v159_v3 = vld [vmem:[#allocation5 + $0xb8] sm:$0xff] }
 0x134   :  { %v534_v5 = vld [vmem:[#allocation5 + $0xc70] sm:$0xff]  ;;  %1090 = vmatpush.msrb.mxu1 %v470_v4  ;;  %v223_v4 = vld [vmem:[#allocation5 + $0x2b8] sm:$0xff] }
 0x135   :  { %v602_v6 = vld [vmem:[#allocation5 + $0xe90] sm:$0xff]  ;;  %1110 = vmatpush.msrb.mxu2 %v534_v5  ;;  %v287_v5 = vld [vmem:[#allocation5 + $0x4b8] sm:$0xff] }
 0x136   :  { %v2833_v7 = vld [vmem:[#allocation2 + $0x10] sm:$0xff]  ;;  %1129 = vmatpush.msrb.mxu3 %v602_v6  ;;  %v355_v6 = vld [vmem:[#allocation5 + $0x6d8] sm:$0xff] }
 0x137   :  { %1034 = vmatmul.f32.vlgmr.msra.gmra.mxu2 %v2833_v7  ;;  %v402_v8 = vld [vmem:[#allocation5 + $0x850] sm:$0xff] }
 0x138   :  { %v466_v9 = vld [vmem:[#allocation5 + $0xa50] sm:$0xff]  ;;  %1071 = vmatpush.msrb.mxu0 %v402_v8  ;;  %v155_v8 = vld [vmem:[#allocation5 + $0x98] sm:$0xff] }
 0x139   :  { %v530_v10 = vld [vmem:[#allocation5 + $0xc50] sm:$0xff]  ;;  %1091 = vmatpush.msrb.mxu1 %v466_v9  ;;  %v219_v9 = vld [vmem:[#allocation5 + $0x298] sm:$0xff] }
 0x13a   :  { %v598_v12 = vld [vmem:[#allocation5 + $0xe70] sm:$0xff]  ;;  %1111 = vmatpush.msrb.mxu2 %v530_v10  ;;  %v283_v10 = vld [vmem:[#allocation5 + $0x498] sm:$0xff] }
 0x13b   :  { %v398_v14 = vld [vmem:[#allocation5 + $0x830] sm:$0xff]  ;;  %1130 = vmatpush.msrb.mxu3 %v598_v12  ;;  %v351_v12 = vld [vmem:[#allocation5 + $0x6b8] sm:$0xff] }
 0x13c   :  { %v462_v16 = vld [vmem:[#allocation5 + $0xa30] sm:$0xff]  ;;  %1072 = vmatpush.msrb.mxu0 %v398_v14  ;;  %v151_v14 = vld [vmem:[#allocation5 + $0x78] sm:$0xff] }
 0x13d   :  { %v526_v17 = vld [vmem:[#allocation5 + $0xc30] sm:$0xff]  ;;  %1092 = vmatpush.msrb.mxu1 %v462_v16  ;;  %v215_v16 = vld [vmem:[#allocation5 + $0x278] sm:$0xff] }
 0x13e   :  { %v594_v18 = vld [vmem:[#allocation5 + $0xe50] sm:$0xff]  ;;  %1112 = vmatpush.msrb.mxu2 %v526_v17  ;;  %v279_v17 = vld [vmem:[#allocation5 + $0x478] sm:$0xff] }
 0x13f   :  { %v394_v22 = vld [vmem:[#allocation5 + $0x810] sm:$0xff]  ;;  %1131 = vmatpush.msrb.mxu3 %v594_v18  ;;  %v347_v18 = vld [vmem:[#allocation5 + $0x698] sm:$0xff] }
 0x140   :  { %v458_v23 = vld [vmem:[#allocation5 + $0xa10] sm:$0xff]  ;;  %1073 = vmatpush.msrb.mxu0 %v394_v22  ;;  %v147_v22 = vld [vmem:[#allocation5 + $0x58] sm:$0xff] }
 0x141   :  { %v522_v24 = vld [vmem:[#allocation5 + $0xc10] sm:$0xff]  ;;  %1093 = vmatpush.msrb.mxu1 %v458_v23  ;;  %1074 = vmatmul.f32.vlgmr.msrb.gmra.mxu0 %v2848_v33  ;;  %v211_v23 = vld [vmem:[#allocation5 + $0x258] sm:$0xff] }
 0x142   :  { %v590_v25 = vld [vmem:[#allocation5 + $0xe30] sm:$0xff]  ;;  %1113 = vmatpush.msrb.mxu2 %v522_v24  ;;  %1138 = vmatpush.msra.mxu0 %v199_v27  ;;  %v275_v24 = vld [vmem:[#allocation5 + $0x458] sm:$0xff] }
 0x143   :  { %1132 = vmatpush.msrb.mxu3 %v590_v25  ;;  %v586_v59 = vld [vmem:[#allocation5 + $0xe10] sm:$0xff]  ;;  %1158 = vmatpush.msra.mxu1 %v263_v28  ;;  %v343_v25 = vld [vmem:[#allocation5 + $0x678] sm:$0xff] }
 0x144   :  { %v2845_v30 = vld [vmem:[#allocation2 + $0x30] sm:$0xff]  ;;  %1178 = vmatpush.msra.mxu2 %v327_v29  ;;  %1139 = vmatpush.msra.mxu0 %v195_v31  ;;  %v143_v27 = vld [vmem:[#allocation5 + $0x38] sm:$0xff] }
 0x145   :  { %1114 = vmatmul.f32.vlgmr.msrb.gmra.mxu2 %v2845_v30  ;;  %1133 = vmatpush.msrb.mxu3 %v586_v59  ;;  %v207_v28 = vld [vmem:[#allocation5 + $0x238] sm:$0xff] }
 0x146   :  { %1134 = vmatmul.f32.vlgmr.msrb.gmra.mxu3 %v2851_v2  ;;  %1159 = vmatpush.msra.mxu1 %v259_v32  ;;  %v271_v29 = vld [vmem:[#allocation5 + $0x438] sm:$0xff] }
 0x147   :  { %1179 = vmatpush.msra.mxu2 %v323_v0  ;;  %1198 = vmatpush.msra.mxu3 %v391_v1  ;;  %v339_v59 = vld [vmem:[#allocation5 + $0x658] sm:$0xff] }
 0x148   :  { %1094 = vmatmul.f32.vlgmr.msrb.gmra.mxu1 %v2854_v38  ;;  %1140 = vmatpush.msra.mxu0 %v191_v34  ;;  %v139_v31 = vld [vmem:[#allocation5 + $0x18] sm:$0xff] }
 0x149   :  { %1160 = vmatpush.msra.mxu1 %v255_v35  ;;  %1180 = vmatpush.msra.mxu2 %v319_v36  ;;  %v203_v32 = vld [vmem:[#allocation5 + $0x218] sm:$0xff] }
 0x14a   :  { %1199 = vmatpush.msra.mxu3 %v387_v37  ;;  %1141 = vmatpush.msra.mxu0 %v187_v39  ;;  %v267_v0 = vld [vmem:[#allocation5 + $0x418] sm:$0xff] }
 0x14b   :  { %1161 = vmatpush.msra.mxu1 %v251_v40  ;;  %1181 = vmatpush.msra.mxu2 %v315_v41  ;;  %v335_v1 = vld [vmem:[#allocation5 + $0x638] sm:$0xff] }
 0x14c   :  { %1200 = vmatpush.msra.mxu3 %v383_v42  ;;  %1142 = vmatpush.msra.mxu0 %v183_v15  ;;  %v455_v34 = vld [vmem:[#allocation5 + $0x9f8] sm:$0xff] }
 0x14d   :  { %1162 = vmatpush.msra.mxu1 %v247_v43  ;;  %1182 = vmatpush.msra.mxu2 %v311_v44  ;;  %v519_v35 = vld [vmem:[#allocation5 + $0xbf8] sm:$0xff] }
 0x14e   :  { %1201 = vmatpush.msra.mxu3 %v379_v45  ;;  %1143 = vmatpush.msra.mxu0 %v179_v20  ;;  %v583_v36 = vld [vmem:[#allocation5 + $0xdf8] sm:$0xff] }
 0x14f   :  { %1163 = vmatpush.msra.mxu1 %v243_v21  ;;  %1183 = vmatpush.msra.mxu2 %v307_v46  ;;  %v331_v37 = vld [vmem:[#allocation5 + $0x618] sm:$0xff] }
 0x150   :  { %1202 = vmatpush.msra.mxu3 %v375_v47  ;;  %1144 = vmatpush.msra.mxu0 %v175_v48  ;;  %v451_v39 = vld [vmem:[#allocation5 + $0x9d8] sm:$0xff] }
 0x151   :  { %1164 = vmatpush.msra.mxu1 %v239_v49  ;;  %1184 = vmatpush.msra.mxu2 %v303_v26  ;;  %v515_v40 = vld [vmem:[#allocation5 + $0xbd8] sm:$0xff] }
 0x152   :  { %1203 = vmatpush.msra.mxu3 %v371_v50  ;;  %1145 = vmatpush.msra.mxu0 %v171_v51  ;;  %v579_v41 = vld [vmem:[#allocation5 + $0xdd8] sm:$0xff]  ;;  %v2857_v51 = vpop.f32.mrf.mxu0 }
 0x153   :  { %1165 = vmatpush.msra.mxu1 %v235_v52  ;;  %1185 = vmatpush.msra.mxu2 %v299_v53  ;;  %v647_v42 = vld [vmem:[#allocation5 + $0xff8] sm:$0xff] }
 0x154   :  { %1204 = vmatpush.msra.mxu3 %v367_v54  ;;  %1146 = vmatpush.msra.mxu0 %v167_v55  ;;  %v447_v15 = vld [vmem:[#allocation5 + $0x9b8] sm:$0xff] }
 0x155   :  { %1166 = vmatpush.msra.mxu1 %v231_v56  ;;  %1186 = vmatpush.msra.mxu2 %v295_v57  ;;  %v511_v43 = vld [vmem:[#allocation5 + $0xbb8] sm:$0xff] }
 0x156   :  { %1205 = vmatpush.msra.mxu3 %v363_v58  ;;  %1147 = vmatpush.msra.mxu0 %v163_v60  ;;  %v575_v44 = vld [vmem:[#allocation5 + $0xdb8] sm:$0xff] }
 0x157   :  { %1167 = vmatpush.msra.mxu1 %v227_v61  ;;  %1187 = vmatpush.msra.mxu2 %v291_v62  ;;  %v643_v45 = vld [vmem:[#allocation5 + $0xfd8] sm:$0xff]  ;;  %v2859_v61 = vpop.f32.mrf.mxu1 }
 0x158   :  { %1206 = vmatpush.msra.mxu3 %v359_v63  ;;  %1148 = vmatpush.msra.mxu0 %v159_v3  ;;  %v443_v20 = vld [vmem:[#allocation5 + $0x998] sm:$0xff] }
 0x159   :  { %1168 = vmatpush.msra.mxu1 %v223_v4  ;;  %1188 = vmatpush.msra.mxu2 %v287_v5  ;;  %v507_v21 = vld [vmem:[#allocation5 + $0xb98] sm:$0xff] }
 0x15a   :  { %1207 = vmatpush.msra.mxu3 %v355_v6  ;;  %1149 = vmatpush.msra.mxu0 %v155_v8  ;;  %v571_v46 = vld [vmem:[#allocation5 + $0xd98] sm:$0xff] }
 0x15b   :  { %1169 = vmatpush.msra.mxu1 %v219_v9  ;;  %1189 = vmatpush.msra.mxu2 %v283_v10  ;;  %v639_v47 = vld [vmem:[#allocation5 + $0xfb8] sm:$0xff]  ;;  %v2861_v10 = vpop.f32.mrf.mxu2 }
 0x15c   :  { %1208 = vmatpush.msra.mxu3 %v351_v12  ;;  %1150 = vmatpush.msra.mxu0 %v151_v14  ;;  %v439_v48 = vld [vmem:[#allocation5 + $0x978] sm:$0xff] }
 0x15d   :  { %1170 = vmatpush.msra.mxu1 %v215_v16  ;;  %1190 = vmatpush.msra.mxu2 %v279_v17  ;;  %v503_v49 = vld [vmem:[#allocation5 + $0xb78] sm:$0xff] }
 0x15e   :  { %1209 = vmatpush.msra.mxu3 %v347_v18  ;;  %1151 = vmatpush.msra.mxu0 %v147_v22  ;;  %v567_v26 = vld [vmem:[#allocation5 + $0xd78] sm:$0xff]  ;;  %v2863_v18 = vpop.f32.mrf.mxu0 }
 0x15f   :  { %1171 = vmatpush.msra.mxu1 %v211_v23  ;;  %1191 = vmatpush.msra.mxu2 %v275_v24  ;;  %v635_v50 = vld [vmem:[#allocation5 + $0xf98] sm:$0xff] }
 0x160   :  { %1210 = vmatpush.msra.mxu3 %v343_v25  ;;  %1152 = vmatpush.msra.mxu0 %v143_v27  ;;  %v435_v52 = vld [vmem:[#allocation5 + $0x958] sm:$0xff]  ;;  %v2865_v27 = vpop.f32.mrf.mxu3 }
 0x161   :  { %1172 = vmatpush.msra.mxu1 %v207_v28  ;;  %1192 = vmatpush.msra.mxu2 %v271_v29  ;;  %v499_v53 = vld [vmem:[#allocation5 + $0xb58] sm:$0xff] }
 0x162   :  { %1211 = vmatpush.msra.mxu3 %v339_v59  ;;  %1153 = vmatpush.msra.mxu0 %v139_v31  ;;  %v563_v54 = vld [vmem:[#allocation5 + $0xd58] sm:$0xff] }
 0x163   :  { %1173 = vmatpush.msra.mxu1 %v203_v32  ;;  %1193 = vmatpush.msra.mxu2 %v267_v0  ;;  %v631_v55 = vld [vmem:[#allocation5 + $0xf78] sm:$0xff]  ;;  %v2867_v32 = vld [vmem:[#allocation7] sm:$0xf]  ;;  %v2869_v0 = vpop.f32.mrf.mxu1 }
 0x164   :  { %1212 = vmatpush.msra.mxu3 %v335_v1  ;;  %1218 = vmatpush.msrb.mxu0 %v455_v34  ;;  %v431_v56 = vld [vmem:[#allocation5 + $0x938] sm:$0xff] }
 0x165   :  { %1238 = vmatpush.msrb.mxu1 %v519_v35  ;;  %1258 = vmatpush.msrb.mxu2 %v583_v36  ;;  %v495_v57 = vld [vmem:[#allocation5 + $0xb38] sm:$0xff] }
 0x166   :  { %1213 = vmatpush.msra.mxu3 %v331_v37  ;;  %1219 = vmatpush.msrb.mxu0 %v451_v39  ;;  %v559_v58 = vld [vmem:[#allocation5 + $0xd38] sm:$0xff]  ;;  %v650_v37 = vperm.slane %v2867_v32, 0 }
 0x167   :  { %1239 = vmatpush.msrb.mxu1 %v515_v40  ;;  %1259 = vmatpush.msrb.mxu2 %v579_v41  ;;  %v627_v60 = vld [vmem:[#allocation5 + $0xf58] sm:$0xff]  ;;  %v651_v40 = vperm.slane %v2867_v32, 1  ;;  %v2874_v41 = vpop.f32.mrf.mxu2 }
 0x168   :  { %1278 = vmatpush.msrb.mxu3 %v647_v42  ;;  %1220 = vmatpush.msrb.mxu0 %v447_v15  ;;  %v427_v62 = vld [vmem:[#allocation5 + $0x918] sm:$0xff] }
 0x169   :  { %1240 = vmatpush.msrb.mxu1 %v511_v43  ;;  %1260 = vmatpush.msrb.mxu2 %v575_v44  ;;  %v491_v63 = vld [vmem:[#allocation5 + $0xb18] sm:$0xff]  ;;  %v835_v43 = vpop.f32.mrf.mxu0 }
 0x16a   :  { %1279 = vmatpush.msrb.mxu3 %v643_v45  ;;  %1221 = vmatpush.msrb.mxu0 %v443_v20  ;;  %v555_v3 = vld [vmem:[#allocation5 + $0xd18] sm:$0xff]  ;;  %v676_v20 = vadd.f32 %v2857_v51, %v650_v37  ;;  %v1366_v51 = vld [vmem:[#allocation8 + $0x1e0] sm:$0xff] }
 0x16b   :  { %1241 = vmatpush.msrb.mxu1 %v507_v21  ;;  %1261 = vmatpush.msrb.mxu2 %v571_v46  ;;  %v623_v4 = vld [vmem:[#allocation5 + $0xf38] sm:$0xff]  ;;  %v1330_v37 = vld [vmem:[#allocation8 + $0xc0] sm:$0xff] }
 0x16c   :  { %1280 = vmatpush.msrb.mxu3 %v639_v47  ;;  %1222 = vmatpush.msrb.mxu0 %v439_v48  ;;  %v423_v5 = vld [vmem:[#allocation5 + $0x8f8] sm:$0xff]  ;;  %v836_v47 = vadd.f32 %v835_v43, %v651_v40  ;;  %v2879_v48 = vpop.f32.mrf.mxu3  ;;  %v1462_v40 = vld [vmem:[#allocation8 + $0x4e0] sm:$0xff] }
 0x16d   :  { %1242 = vmatpush.msrb.mxu1 %v503_v49  ;;  %1262 = vmatpush.msrb.mxu2 %v567_v26  ;;  %v487_v6 = vld [vmem:[#allocation5 + $0xaf8] sm:$0xff]  ;;  %v855_v26 = vpop.f32.mrf.mxu1  ;;  %v1326_v43 = vld [vmem:[#allocation8 + $0xa0] sm:$0xff] }
 0x16e   :  { %1281 = vmatpush.msrb.mxu3 %v635_v50  ;;  %1223 = vmatpush.msrb.mxu0 %v435_v52  ;;  %v551_v8 = vld [vmem:[#allocation5 + $0xcf8] sm:$0xff]  ;;  %v696_v52 = vadd.f32 %v2859_v61, %v676_v20  ;;  %v1358_v61 = vld [vmem:[#allocation8 + $0x1a0] sm:$0xff] }
 0x16f   :  { %1243 = vmatpush.msrb.mxu1 %v499_v53  ;;  %1263 = vmatpush.msrb.mxu2 %v563_v54  ;;  %v619_v9 = vld [vmem:[#allocation5 + $0xf18] sm:$0xff]  ;;  %v1430_v53 = vld [vmem:[#allocation8 + $0x3e0] sm:$0xff] }
 0x170   :  { %1282 = vmatpush.msrb.mxu3 %v631_v55  ;;  %1224 = vmatpush.msrb.mxu0 %v431_v56  ;;  %v419_v12 = vld [vmem:[#allocation5 + $0x8d8] sm:$0xff]  ;;  %v856_v55 = vadd.f32 %v855_v26, %v836_v47  ;;  %v1362_v56 = vld [vmem:[#allocation8 + $0x1c0] sm:$0xff] }
 0x171   :  { %1244 = vmatpush.msrb.mxu1 %v495_v57  ;;  %1264 = vmatpush.msrb.mxu2 %v559_v58  ;;  %v483_v14 = vld [vmem:[#allocation5 + $0xad8] sm:$0xff]  ;;  %v1426_v57 = vld [vmem:[#allocation8 + $0x3c0] sm:$0xff] }
 0x172   :  { %1283 = vmatpush.msrb.mxu3 %v627_v60  ;;  %1225 = vmatpush.msrb.mxu0 %v427_v62  ;;  %v547_v16 = vld [vmem:[#allocation5 + $0xcd8] sm:$0xff]  ;;  %v1494_v58 = vld [vmem:[#allocation8 + $0x5e0] sm:$0xff]  ;;  %v716_v60 = vadd.f32 %v2861_v10, %v696_v52  ;;  %v915_v10 = vpop.f32.mrf.mxu0 }
 0x173   :  { %1245 = vmatpush.msrb.mxu1 %v491_v63  ;;  %1265 = vmatpush.msrb.mxu2 %v555_v3  ;;  %v615_v17 = vld [vmem:[#allocation5 + $0xef8] sm:$0xff]  ;;  %v1422_v62 = vld [vmem:[#allocation8 + $0x3a0] sm:$0xff] }
 0x174   :  { %1284 = vmatpush.msrb.mxu3 %v623_v4  ;;  %1226 = vmatpush.msrb.mxu0 %v423_v5  ;;  %v415_v22 = vld [vmem:[#allocation5 + $0x8b8] sm:$0xff]  ;;  %v895_v3 = vpop.f32.mrf.mxu3  ;;  %v1490_v4 = vld [vmem:[#allocation8 + $0x5c0] sm:$0xff] }
 0x175   :  { %1246 = vmatpush.msrb.mxu1 %v487_v6  ;;  %1266 = vmatpush.msrb.mxu2 %v551_v8  ;;  %v479_v23 = vld [vmem:[#allocation5 + $0xab8] sm:$0xff]  ;;  %v1418_v5 = vld [vmem:[#allocation8 + $0x380] sm:$0xff]  ;;  %v736_v8 = vadd.f32 %v2865_v27, %v716_v60  ;;  %v1431_v60 = vld [vmem:[#allocation8 + $0x3e8] sm:$0xff] }
 0x176   :  { %1285 = vmatpush.msrb.mxu3 %v619_v9  ;;  %1227 = vmatpush.msrb.mxu0 %v419_v12  ;;  %v543_v24 = vld [vmem:[#allocation5 + $0xcb8] sm:$0xff]  ;;  %v1486_v6 = vld [vmem:[#allocation8 + $0x5a0] sm:$0xff] }
 0x177   :  { %1247 = vmatpush.msrb.mxu1 %v483_v14  ;;  %v611_v25 = vld [vmem:[#allocation5 + $0xed8] sm:$0xff]  ;;  %1267 = vmatpush.msrb.mxu2 %v547_v16  ;;  %v1350_v9 = vld [vmem:[#allocation8 + $0x160] sm:$0xff] }
 0x178   :  { %1286 = vmatpush.msrb.mxu3 %v615_v17  ;;  %v411_v28 = vld [vmem:[#allocation5 + $0x898] sm:$0xff]  ;;  %1228 = vmatpush.msrb.mxu0 %v415_v22  ;;  %v1482_v12 = vld [vmem:[#allocation8 + $0x580] sm:$0xff]  ;;  %v756_v17 = vadd.f32 %v2863_v18, %v736_v8  ;;  %v1419_v8 = vld [vmem:[#allocation8 + $0x388] sm:$0xff] }
 0x179   :  { %v475_v29 = vld [vmem:[#allocation5 + $0xa98] sm:$0xff]  ;;  %1248 = vmatpush.msrb.mxu1 %v479_v23  ;;  %1268 = vmatpush.msrb.mxu2 %v543_v24  ;;  %v1346_v14 = vld [vmem:[#allocation8 + $0x140] sm:$0xff] }
 0x17a   :  { %v539_v59 = vld [vmem:[#allocation5 + $0xc98] sm:$0xff]  ;;  %1287 = vmatpush.msrb.mxu3 %v611_v25  ;;  %1229 = vmatpush.msrb.mxu0 %v411_v28  ;;  %v1410_v16 = vld [vmem:[#allocation8 + $0x340] sm:$0xff]  ;;  %v935_v25 = vpop.f32.mrf.mxu1 }
 0x17b   :  { %v607_v31 = vld [vmem:[#allocation5 + $0xeb8] sm:$0xff]  ;;  %1249 = vmatpush.msrb.mxu1 %v475_v29  ;;  %1269 = vmatpush.msrb.mxu2 %v539_v59  ;;  %v1342_v23 = vld [vmem:[#allocation8 + $0x120] sm:$0xff] }
 0x17c   :  { %v407_v1 = vld [vmem:[#allocation5 + $0x878] sm:$0xff]  ;;  %1288 = vmatpush.msrb.mxu3 %v607_v31  ;;  %1194 = vmatmul.f32.vlgmr.msra.gmra.mxu2 %v2833_v7  ;;  %v1406_v24 = vld [vmem:[#allocation8 + $0x320] sm:$0xff]  ;;  %v776_v31 = vadd.f32 %v2869_v0, %v756_v17  ;;  %v975_v0 = vpop.f32.mrf.mxu3  ;;  %v1407_v17 = vld [vmem:[#allocation8 + $0x328] sm:$0xff] }
 0x17d   :  { %v471_v34 = vld [vmem:[#allocation5 + $0xa78] sm:$0xff]  ;;  %1230 = vmatpush.msrb.mxu0 %v407_v1  ;;  %1214 = vmatmul.f32.vlgmr.msra.gmra.mxu3 %v2839_v13  ;;  %v1474_v27 = vld [vmem:[#allocation8 + $0x540] sm:$0xff] }
 0x17e   :  { %v535_v35 = vld [vmem:[#allocation5 + $0xc78] sm:$0xff]  ;;  %1250 = vmatpush.msrb.mxu1 %v471_v34  ;;  %1154 = vmatmul.f32.vlgmr.msra.gmra.mxu0 %v2836_v11  ;;  %v1338_v28 = vld [vmem:[#allocation8 + $0x100] sm:$0xff] }
 0x17f   :  { %v603_v36 = vld [vmem:[#allocation5 + $0xe98] sm:$0xff]  ;;  %1270 = vmatpush.msrb.mxu2 %v535_v35  ;;  %1174 = vmatmul.f32.vlgmr.msra.gmra.mxu1 %v2842_v19  ;;  %v875_v19 = vpop.f32.mrf.mxu2  ;;  %v1402_v29 = vld [vmem:[#allocation8 + $0x300] sm:$0xff] }
 0x180   :  { %v403_v39 = vld [vmem:[#allocation5 + $0x858] sm:$0xff]  ;;  %1289 = vmatpush.msrb.mxu3 %v603_v36  ;;  %v876_v63 = vadd.f32 %v875_v19, %v856_v55  ;;  %v1470_v59 = vld [vmem:[#allocation8 + $0x520] sm:$0xff] }
 0x181   :  { %v467_v42 = vld [vmem:[#allocation5 + $0xa58] sm:$0xff]  ;;  %1231 = vmatpush.msrb.mxu0 %v403_v39  ;;  %v1334_v34 = vld [vmem:[#allocation8 + $0xe0] sm:$0xff] }
 0x182   :  { %v531_v15 = vld [vmem:[#allocation5 + $0xc58] sm:$0xff]  ;;  %1251 = vmatpush.msrb.mxu1 %v467_v42  ;;  %v1398_v35 = vld [vmem:[#allocation8 + $0x2e0] sm:$0xff]  ;;  %v796_v42 = vadd.f32 %v2874_v41, %v776_v31 }
 0x183   :  { %v599_v44 = vld [vmem:[#allocation5 + $0xe78] sm:$0xff]  ;;  %1271 = vmatpush.msrb.mxu2 %v531_v15  ;;  %v1466_v36 = vld [vmem:[#allocation8 + $0x500] sm:$0xff] }
 0x184   :  { %v399_v45 = vld [vmem:[#allocation5 + $0x838] sm:$0xff]  ;;  %1290 = vmatpush.msrb.mxu3 %v599_v44  ;;  %v1394_v39 = vld [vmem:[#allocation8 + $0x2c0] sm:$0xff] }
 0x185   :  { %v463_v7 = vld [vmem:[#allocation5 + $0xa38] sm:$0xff]  ;;  %1232 = vmatpush.msrb.mxu0 %v399_v45  ;;  %v1390_v44 = vld [vmem:[#allocation8 + $0x2a0] sm:$0xff] }
 0x186   :  { %v527_v21 = vld [vmem:[#allocation5 + $0xc38] sm:$0xff]  ;;  %1252 = vmatpush.msrb.mxu1 %v463_v7  ;;  %v1458_v45 = vld [vmem:[#allocation8 + $0x4c0] sm:$0xff] }
 0x187   :  { %v595_v46 = vld [vmem:[#allocation5 + $0xe58] sm:$0xff]  ;;  %1272 = vmatpush.msrb.mxu2 %v527_v21  ;;  %v955_v18 = vpop.f32.mrf.mxu2  ;;  %v1322_v7 = vld [vmem:[#allocation8 + $0x80] sm:$0xff] }
 0x188   :  { %v395_v49 = vld [vmem:[#allocation5 + $0x818] sm:$0xff]  ;;  %1291 = vmatpush.msrb.mxu3 %v595_v46  ;;  %v1386_v20 = vld [vmem:[#allocation8 + $0x280] sm:$0xff]  ;;  %v816_v46 = vadd.f32 %v2879_v48, %v796_v42  ;;  %v1463_v42 = vld [vmem:[#allocation8 + $0x4e8] sm:$0xff] }
 0x189   :  { %v459_v11 = vld [vmem:[#allocation5 + $0xa18] sm:$0xff]  ;;  %1233 = vmatpush.msrb.mxu0 %v395_v49  ;;  %v1454_v21 = vld [vmem:[#allocation8 + $0x4a0] sm:$0xff] }
 0x18a   :  { %v523_v13 = vld [vmem:[#allocation5 + $0xc18] sm:$0xff]  ;;  %1253 = vmatpush.msrb.mxu1 %v459_v11  ;;  %1234 = vmatmul.f32.vlgmr.msrb.gmra.mxu0 %v2848_v33  ;;  %v896_v33 = vadd.f32 %v895_v3, %v876_v63  ;;  %v1318_v49 = vld [vmem:[#allocation8 + $0x60] sm:$0xff]  ;;  %v1427_v63 = vld [vmem:[#allocation8 + $0x3c8] sm:$0xff] }
 0x18b   :  { %v591_v50 = vld [vmem:[#allocation5 + $0xe38] sm:$0xff]  ;;  %1273 = vmatpush.msrb.mxu2 %v523_v13  ;;  %1572 = vmatpush.msra.mxu0 %v1366_v51  ;;  %v1382_v11 = vld [vmem:[#allocation8 + $0x260] sm:$0xff]  ;;  %v1298_v51 = vmul.f32 0.1, %v816_v46 }
 0x18c   :  { %v587_v54 = vld [vmem:[#allocation5 + $0xe18] sm:$0xff]  ;;  %1292 = vmatpush.msrb.mxu3 %v591_v50  ;;  %1274 = vmatmul.f32.vlgmr.msrb.gmra.mxu2 %v2845_v30  ;;  %v1354_v30 = vld [vmem:[#allocation8 + $0x180] sm:$0xff]  ;;  %v916_v22 = vadd.f32 %v915_v10, %v896_v33  ;;  %v1491_v33 = vld [vmem:[#allocation8 + $0x5c8] sm:$0xff] }
 0x18d   :  { %1592 = vmatpush.msra.mxu1 %v1430_v53  ;;  %1573 = vmatpush.msra.mxu0 %v1362_v56  ;;  %v1450_v41 = vld [vmem:[#allocation8 + $0x480] sm:$0xff]  ;;  %v2893_v56 = vmax.f32 %v816_v46, %v1298_v51  ;;  %v1487_v10 = vld [vmem:[#allocation8 + $0x5a8] sm:$0xff] }
 0x18e   :  { %1293 = vmatpush.msrb.mxu3 %v587_v54  ;;  %1254 = vmatmul.f32.vlgmr.msrb.gmra.mxu1 %v2854_v38  ;;  %v1478_v38 = vld [vmem:[#allocation8 + $0x560] sm:$0xff]  ;;  %v936_v1 = vadd.f32 %v935_v25, %v916_v22  ;;  %v1479_v22 = vld [vmem:[#allocation8 + $0x568] sm:$0xff] }
 0x18f   :  { %1294 = vmatmul.f32.vlgmr.msrb.gmra.mxu3 %v2851_v2  ;;  %1593 = vmatpush.msra.mxu1 %v1426_v57  ;;  %v1414_v2 = vld [vmem:[#allocation8 + $0x360] sm:$0xff]  ;;  %v1475_v25 = vld [vmem:[#allocation8 + $0x548] sm:$0xff] }
 0x190   :  { %1612 = vmatpush.msra.mxu2 %v1494_v58  ;;  %1574 = vmatpush.msra.mxu0 %v1358_v61  ;;  %v956_v15 = vadd.f32 %v955_v18, %v936_v1  ;;  %v1314_v26 = vld [vmem:[#allocation8 + $0x40] sm:$0xff]  ;;  %v1367_v58 = vld [vmem:[#allocation8 + $0x1e8] sm:$0xff] }
 0x191   :  { %1594 = vmatpush.msra.mxu1 %v1422_v62  ;;  %v1378_v13 = vld [vmem:[#allocation8 + $0x240] sm:$0xff]  ;;  %v1363_v62 = vld [vmem:[#allocation8 + $0x1c8] sm:$0xff] }
 0x192   :  { %1613 = vmatpush.msra.mxu2 %v1490_v4  ;;  %1575 = vmatpush.msra.mxu0 %v1354_v30  ;;  %v976_v47 = vadd.f32 %v975_v0, %v956_v15  ;;  %v1446_v50 = vld [vmem:[#allocation8 + $0x460] sm:$0xff]  ;;  %v1359_v4 = vld [vmem:[#allocation8 + $0x1a8] sm:$0xff]  ;;  %v1015_v0 = vpop.f32.mrf.mxu1 }
 0x193   :  { %1595 = vmatpush.msra.mxu1 %v1418_v5  ;;  %v1310_v53 = vld [vmem:[#allocation8 + $0x20] sm:$0xff]  ;;  %v1423_v30 = vld [vmem:[#allocation8 + $0x3a8] sm:$0xff] }
 0x194   :  { %1614 = vmatpush.msra.mxu2 %v1486_v6  ;;  %1576 = vmatpush.msra.mxu0 %v1350_v9  ;;  %v1299_v52 = vmul.f32 0.1, %v976_v47  ;;  %v1374_v54 = vld [vmem:[#allocation8 + $0x220] sm:$0xff]  ;;  %v1495_v5 = vld [vmem:[#allocation8 + $0x5e8] sm:$0xff] }
 0x195   :  { %1596 = vmatpush.msra.mxu1 %v1414_v2  ;;  %v1442_v48 = vld [vmem:[#allocation8 + $0x440] sm:$0xff]  ;;  %v1355_v6 = vld [vmem:[#allocation8 + $0x188] sm:$0xff] }
 0x196   :  { %1615 = vmatpush.msra.mxu2 %v1482_v12  ;;  %1577 = vmatpush.msra.mxu0 %v1346_v14  ;;  %v1306_v55 = vld [vmem:[#allocation8] sm:$0xff]  ;;  %v2895_v57 = vmax.f32 %v976_v47, %v1299_v52  ;;  %v1351_v9 = vld [vmem:[#allocation8 + $0x168] sm:$0xff] }
 0x197   :  { %1597 = vmatpush.msra.mxu1 %v1410_v16  ;;  %v1370_v19 = vld [vmem:[#allocation8 + $0x200] sm:$0xff]  ;;  %v1415_v2 = vld [vmem:[#allocation8 + $0x368] sm:$0xff] }
 0x198   :  { %1616 = vmatpush.msra.mxu2 %v1478_v38  ;;  %1578 = vmatpush.msra.mxu0 %v1342_v23  ;;  %v1438_v61 = vld [vmem:[#allocation8 + $0x420] sm:$0xff]  ;;  %v1347_v12 = vld [vmem:[#allocation8 + $0x148] sm:$0xff] }
 0x199   :  { %1598 = vmatpush.msra.mxu1 %v1406_v24  ;;  %v1434_v3 = vld [vmem:[#allocation8 + $0x400] sm:$0xff]  ;;  %v1411_v14 = vld [vmem:[#allocation8 + $0x348] sm:$0xff] }
 0x19a   :  { %1617 = vmatpush.msra.mxu2 %v1474_v27  ;;  %1579 = vmatpush.msra.mxu0 %v1338_v28  ;;  %v1483_v16 = vld [vmem:[#allocation8 + $0x588] sm:$0xff]  ;;  %v1558_v31 = vld [vmem:[#allocation8 + $0x7e0] sm:$0xff] }
 0x19b   :  { %1599 = vmatpush.msra.mxu1 %v1402_v29  ;;  %v1343_v38 = vld [vmem:[#allocation8 + $0x128] sm:$0xff]  ;;  %v652_v29 = vperm.slane %v2867_v32, 2  ;;  %1632 = vmatpush.msra.mxu3 %v1558_v31  ;;  %v1550_v15 = vld [vmem:[#allocation8 + $0x7a0] sm:$0xff] }
 0x19c   :  { %1618 = vmatpush.msra.mxu2 %v1470_v59  ;;  %1580 = vmatpush.msra.mxu0 %v1334_v34  ;;  %v1339_v23 = vld [vmem:[#allocation8 + $0x108] sm:$0xff] }
 0x19d   :  { %1600 = vmatpush.msra.mxu1 %v1398_v35  ;;  %v1403_v24 = vld [vmem:[#allocation8 + $0x308] sm:$0xff]  ;;  %v995_v35 = vpop.f32.mrf.mxu0 }
 0x19e   :  { %1619 = vmatpush.msra.mxu2 %v1466_v36  ;;  %1581 = vmatpush.msra.mxu0 %v1330_v37  ;;  %v1335_v27 = vld [vmem:[#allocation8 + $0xe8] sm:$0xff]  ;;  %v1554_v36 = vld [vmem:[#allocation8 + $0x7c0] sm:$0xff] }
 0x19f   :  { %1601 = vmatpush.msra.mxu1 %v1394_v39  ;;  %v1399_v28 = vld [vmem:[#allocation8 + $0x2e8] sm:$0xff]  ;;  %1633 = vmatpush.msra.mxu3 %v1554_v36  ;;  %v1510_v36 = vld [vmem:[#allocation8 + $0x660] sm:$0xff] }
 0x1a0   :  { %1620 = vmatpush.msra.mxu2 %v1462_v40  ;;  %1582 = vmatpush.msra.mxu0 %v1326_v43  ;;  %v1471_v59 = vld [vmem:[#allocation8 + $0x528] sm:$0xff]  ;;  %v996_v40 = vadd.f32 %v995_v35, %v652_v29  ;;  %v1352_v29 = vld [vmem:[#allocation8 + $0x170] sm:$0xff] }
 0x1a1   :  { %1602 = vmatpush.msra.mxu1 %v1390_v44  ;;  %v1331_v1 = vld [vmem:[#allocation8 + $0xc8] sm:$0xff]  ;;  %1634 = vmatpush.msra.mxu3 %v1550_v15  ;;  %v1412_v35 = vld [vmem:[#allocation8 + $0x350] sm:$0xff] }
 0x1a2   :  { %1621 = vmatpush.msra.mxu2 %v1458_v45  ;;  %1583 = vmatpush.msra.mxu0 %v1322_v7  ;;  %v1395_v34 = vld [vmem:[#allocation8 + $0x2c8] sm:$0xff]  ;;  %v1016_v45 = vadd.f32 %v1015_v0, %v996_v40  ;;  %v1492_v40 = vld [vmem:[#allocation8 + $0x5d0] sm:$0xff]  ;;  %v1502_v0 = vld [vmem:[#allocation8 + $0x620] sm:$0xff] }
 0x1a3   :  { %1603 = vmatpush.msra.mxu1 %v1386_v20  ;;  %v1467_v18 = vld [vmem:[#allocation8 + $0x508] sm:$0xff]  ;;  %v1340_v15 = vld [vmem:[#allocation8 + $0x110] sm:$0xff] }
 0x1a4   :  { %1622 = vmatpush.msra.mxu2 %v1454_v21  ;;  %1584 = vmatpush.msra.mxu0 %v1318_v49  ;;  %v1327_v37 = vld [vmem:[#allocation8 + $0xa8] sm:$0xff]  ;;  %v1546_v21 = vld [vmem:[#allocation8 + $0x780] sm:$0xff] }
 0x1a5   :  { %1604 = vmatpush.msra.mxu1 %v1382_v11  ;;  %v1391_v39 = vld [vmem:[#allocation8 + $0x2a8] sm:$0xff]  ;;  %1635 = vmatpush.msra.mxu3 %v1546_v21  ;;  %v1498_v21 = vld [vmem:[#allocation8 + $0x600] sm:$0xff] }
 0x1a6   :  { %1623 = vmatpush.msra.mxu2 %v1450_v41  ;;  %1585 = vmatpush.msra.mxu0 %v1314_v26  ;;  %v1323_v43 = vld [vmem:[#allocation8 + $0x88] sm:$0xff]  ;;  %v1542_v41 = vld [vmem:[#allocation8 + $0x760] sm:$0xff] }
 0x1a7   :  { %1605 = vmatpush.msra.mxu1 %v1378_v13  ;;  %v1387_v44 = vld [vmem:[#allocation8 + $0x288] sm:$0xff]  ;;  %1636 = vmatpush.msra.mxu3 %v1542_v41  ;;  %v1392_v41 = vld [vmem:[#allocation8 + $0x2b0] sm:$0xff] }
 0x1a8   :  { %1624 = vmatpush.msra.mxu2 %v1446_v50  ;;  %1586 = vmatpush.msra.mxu0 %v1310_v53  ;;  %v1459_v20 = vld [vmem:[#allocation8 + $0x4c8] sm:$0xff]  ;;  %v1055_v50 = vpop.f32.mrf.mxu3  ;;  %v1538_v53 = vld [vmem:[#allocation8 + $0x740] sm:$0xff] }
 0x1a9   :  { %1606 = vmatpush.msra.mxu1 %v1374_v54  ;;  %v1319_v46 = vld [vmem:[#allocation8 + $0x68] sm:$0xff]  ;;  %1637 = vmatpush.msra.mxu3 %v1538_v53  ;;  %v1476_v53 = vld [vmem:[#allocation8 + $0x550] sm:$0xff] }
 0x1aa   :  { %1625 = vmatpush.msra.mxu2 %v1442_v48  ;;  %1587 = vmatpush.msra.mxu0 %v1306_v55  ;;  %v1383_v47 = vld [vmem:[#allocation8 + $0x268] sm:$0xff] }
 0x1ab   :  { %1607 = vmatpush.msra.mxu1 %v1370_v19  ;;  %1588 = vmatmul.f32.vlgmr.msra.gmra.mxu0 %v2893_v56  ;;  %v1455_v11 = vld [vmem:[#allocation8 + $0x4a8] sm:$0xff] }
 0x1ac   :  { %1608 = vmatmul.f32.vlgmr.msra.gmra.mxu1 %v2895_v57  ;;  %1652 = vmatpush.msrb.mxu0 %v1367_v58  ;;  %v1315_v26 = vld [vmem:[#allocation8 + $0x48] sm:$0xff]  ;;  %v1534_v58 = vld [vmem:[#allocation8 + $0x720] sm:$0xff] }
 0x1ad   :  { %1672 = vmatpush.msrb.mxu1 %v1431_v60  ;;  %1626 = vmatpush.msra.mxu2 %v1438_v61  ;;  %v1379_v13 = vld [vmem:[#allocation8 + $0x248] sm:$0xff] }
 0x1ae   :  { %1653 = vmatpush.msrb.mxu0 %v1363_v62  ;;  %v1451_v52 = vld [vmem:[#allocation8 + $0x488] sm:$0xff]  ;;  %1638 = vmatpush.msra.mxu3 %v1534_v58  ;;  %v1316_v58 = vld [vmem:[#allocation8 + $0x50] sm:$0xff] }
 0x1af   :  { %1673 = vmatpush.msrb.mxu1 %v1427_v63  ;;  %1627 = vmatpush.msra.mxu2 %v1434_v3  ;;  %v1311_v54 = vld [vmem:[#allocation8 + $0x28] sm:$0xff]  ;;  %v1530_v63 = vld [vmem:[#allocation8 + $0x700] sm:$0xff]  ;;  %v1368_v3 = vld [vmem:[#allocation8 + $0x1f0] sm:$0xff] }
 0x1b0   :  { %1654 = vmatpush.msrb.mxu0 %v1359_v4  ;;  %v1375_v48 = vld [vmem:[#allocation8 + $0x228] sm:$0xff]  ;;  %v1432_v4 = vld [vmem:[#allocation8 + $0x3f0] sm:$0xff]  ;;  %1639 = vmatpush.msra.mxu3 %v1530_v63 }
 0x1b1   :  { %1674 = vmatpush.msrb.mxu1 %v1423_v30  ;;  %1692 = vmatpush.msrb.mxu2 %v1495_v5  ;;  %v1447_v19 = vld [vmem:[#allocation8 + $0x468] sm:$0xff]  ;;  %v1312_v63 = vld [vmem:[#allocation8 + $0x30] sm:$0xff] }
 0x1b2   :  { %1655 = vmatpush.msrb.mxu0 %v1355_v6  ;;  %v1307_v60 = vld [vmem:[#allocation8 + $0x8] sm:$0xff] }
 0x1b3   :  { %1675 = vmatpush.msrb.mxu1 %v1419_v8  ;;  %1693 = vmatpush.msrb.mxu2 %v1491_v33  ;;  %v1371_v61 = vld [vmem:[#allocation8 + $0x208] sm:$0xff]  ;;  %v1364_v33 = vld [vmem:[#allocation8 + $0x1d0] sm:$0xff] }
 0x1b4   :  { %1656 = vmatpush.msrb.mxu0 %v1351_v9  ;;  %v1443_v8 = vld [vmem:[#allocation8 + $0x448] sm:$0xff]  ;;  %v1428_v9 = vld [vmem:[#allocation8 + $0x3d0] sm:$0xff] }
 0x1b5   :  { %1676 = vmatpush.msrb.mxu1 %v1415_v2  ;;  %1694 = vmatpush.msrb.mxu2 %v1487_v10  ;;  %v1439_v10 = vld [vmem:[#allocation8 + $0x428] sm:$0xff] }
 0x1b6   :  { %1657 = vmatpush.msrb.mxu0 %v1347_v12  ;;  %v1526_v12 = vld [vmem:[#allocation8 + $0x6e0] sm:$0xff] }
 0x1b7   :  { %1677 = vmatpush.msrb.mxu1 %v1411_v14  ;;  %1695 = vmatpush.msrb.mxu2 %v1483_v16  ;;  %v1360_v14 = vld [vmem:[#allocation8 + $0x1b0] sm:$0xff] }
 0x1b8   :  { %1658 = vmatpush.msrb.mxu0 %v1343_v38  ;;  %v1424_v16 = vld [vmem:[#allocation8 + $0x3b0] sm:$0xff]  ;;  %1640 = vmatpush.msra.mxu3 %v1526_v12  ;;  %v1365_v12 = vld [vmem:[#allocation8 + $0x1d8] sm:$0xff] }
 0x1b9   :  { %1678 = vmatpush.msrb.mxu1 %v1407_v17  ;;  %1696 = vmatpush.msrb.mxu2 %v1479_v22  ;;  %v1435_v22 = vld [vmem:[#allocation8 + $0x408] sm:$0xff] }
 0x1ba   :  { %1659 = vmatpush.msrb.mxu0 %v1339_v23  ;;  %v1035_v7 = vpop.f32.mrf.mxu2  ;;  %v1522_v23 = vld [vmem:[#allocation8 + $0x6c0] sm:$0xff] }
 0x1bb   :  { %1679 = vmatpush.msrb.mxu1 %v1403_v24  ;;  %1697 = vmatpush.msrb.mxu2 %v1475_v25  ;;  %v1036_v49 = vadd.f32 %v1035_v7, %v1016_v45  ;;  %v1356_v24 = vld [vmem:[#allocation8 + $0x190] sm:$0xff] }
 0x1bc   :  { %1660 = vmatpush.msrb.mxu0 %v1335_v27  ;;  %v1420_v25 = vld [vmem:[#allocation8 + $0x390] sm:$0xff]  ;;  %1641 = vmatpush.msra.mxu3 %v1522_v23 }
 0x1bd   :  { %1680 = vmatpush.msrb.mxu1 %v1399_v28  ;;  %1698 = vmatpush.msrb.mxu2 %v1471_v59  ;;  %v1056_v51 = vadd.f32 %v1055_v50, %v1036_v49  ;;  %v1518_v28 = vld [vmem:[#allocation8 + $0x6a0] sm:$0xff]  ;;  %v1416_v59 = vld [vmem:[#allocation8 + $0x370] sm:$0xff] }
 0x1be   :  { %1661 = vmatpush.msrb.mxu0 %v1331_v1  ;;  %v1075_v55 = vpop.f32.mrf.mxu0  ;;  %1642 = vmatpush.msra.mxu3 %v1518_v28  ;;  %v1514_v1 = vld [vmem:[#allocation8 + $0x680] sm:$0xff]  ;;  %v1336_v45 = vld [vmem:[#allocation8 + $0xf0] sm:$0xff] }
 0x1bf   :  { %1681 = vmatpush.msrb.mxu1 %v1395_v34  ;;  %1699 = vmatpush.msrb.mxu2 %v1467_v18  ;;  %v1076_v62 = vadd.f32 %v1075_v55, %v1056_v51  ;;  %v1348_v34 = vld [vmem:[#allocation8 + $0x150] sm:$0xff]  ;;  %v1547_v55 = vld [vmem:[#allocation8 + $0x788] sm:$0xff] }
 0x1c0   :  { %1662 = vmatpush.msrb.mxu0 %v1327_v37  ;;  %1643 = vmatpush.msra.mxu3 %v1514_v1  ;;  %v1496_v18 = vld [vmem:[#allocation8 + $0x5f0] sm:$0xff]  ;;  %v1417_v1 = vld [vmem:[#allocation8 + $0x378] sm:$0xff] }
 0x1c1   :  { %1682 = vmatpush.msrb.mxu1 %v1391_v39  ;;  %1700 = vmatpush.msrb.mxu2 %v1463_v42  ;;  %v1344_v37 = vld [vmem:[#allocation8 + $0x130] sm:$0xff]  ;;  %v1506_v42 = vld [vmem:[#allocation8 + $0x640] sm:$0xff] }
 0x1c2   :  { %1663 = vmatpush.msrb.mxu0 %v1323_v43  ;;  %v1408_v39 = vld [vmem:[#allocation8 + $0x330] sm:$0xff]  ;;  %1644 = vmatpush.msra.mxu3 %v1510_v36  ;;  %v1413_v36 = vld [vmem:[#allocation8 + $0x358] sm:$0xff] }
 0x1c3   :  { %1683 = vmatpush.msrb.mxu1 %v1387_v44  ;;  %1701 = vmatpush.msrb.mxu2 %v1459_v20  ;;  %v1404_v43 = vld [vmem:[#allocation8 + $0x310] sm:$0xff] }
 0x1c4   :  { %1664 = vmatpush.msrb.mxu0 %v1319_v46  ;;  %1645 = vmatpush.msra.mxu3 %v1506_v42  ;;  %v1488_v44 = vld [vmem:[#allocation8 + $0x5b0] sm:$0xff]  ;;  %v1559_v46 = vld [vmem:[#allocation8 + $0x7e8] sm:$0xff]  ;;  %v1409_v42 = vld [vmem:[#allocation8 + $0x338] sm:$0xff] }
 0x1c5   :  { %1684 = vmatpush.msrb.mxu1 %v1383_v47  ;;  %1702 = vmatpush.msrb.mxu2 %v1455_v11  ;;  %v1095_v30 = vpop.f32.mrf.mxu1  ;;  %v1400_v7 = vld [vmem:[#allocation8 + $0x2f0] sm:$0xff] }
 0x1c6   :  { %1665 = vmatpush.msrb.mxu0 %v1315_v26  ;;  %v1096_v5 = vadd.f32 %v1095_v30, %v1076_v62  ;;  %1646 = vmatpush.msra.mxu3 %v1502_v0  ;;  %v1484_v20 = vld [vmem:[#allocation8 + $0x590] sm:$0xff]  ;;  %v1555_v26 = vld [vmem:[#allocation8 + $0x7c8] sm:$0xff]  ;;  %v1405_v0 = vld [vmem:[#allocation8 + $0x318] sm:$0xff] }
 0x1c7   :  { %1685 = vmatpush.msrb.mxu1 %v1379_v13  ;;  %1703 = vmatpush.msrb.mxu2 %v1451_v52  ;;  %v1332_v47 = vld [vmem:[#allocation8 + $0xd0] sm:$0xff]  ;;  %v1551_v52 = vld [vmem:[#allocation8 + $0x7a8] sm:$0xff] }
 0x1c8   :  { %1666 = vmatpush.msrb.mxu0 %v1311_v54  ;;  %v1115_v6 = vpop.f32.mrf.mxu2  ;;  %v1396_v49 = vld [vmem:[#allocation8 + $0x2d0] sm:$0xff]  ;;  %1647 = vmatpush.msra.mxu3 %v1498_v21  ;;  %v1497_v21 = vld [vmem:[#allocation8 + $0x5f8] sm:$0xff] }
 0x1c9   :  { %1686 = vmatpush.msrb.mxu1 %v1375_v48  ;;  %1704 = vmatpush.msrb.mxu2 %v1447_v19  ;;  %v1116_v2 = vadd.f32 %v1115_v6, %v1096_v5  ;;  %v1135_v38 = vpop.f32.mrf.mxu3  ;;  %v1328_v11 = vld [vmem:[#allocation8 + $0xb0] sm:$0xff] }
 0x1ca   :  { %1667 = vmatpush.msrb.mxu0 %v1307_v60  ;;  %1712 = vmatpush.msrb.mxu3 %v1559_v46  ;;  %v1480_v13 = vld [vmem:[#allocation8 + $0x570] sm:$0xff]  ;;  %v1499_v46 = vld [vmem:[#allocation8 + $0x608] sm:$0xff] }
 0x1cb   :  { %1687 = vmatpush.msrb.mxu1 %v1371_v61  ;;  %1668 = vmatmul.f32.vlgmr.msrb.gmra.mxu0 %v2893_v56  ;;  %v1136_v17 = vadd.f32 %v1135_v38, %v1116_v2  ;;  %v1324_v50 = vld [vmem:[#allocation8 + $0x90] sm:$0xff]  ;;  %v1543_v61 = vld [vmem:[#allocation8 + $0x768] sm:$0xff] }
 0x1cc   :  { %1688 = vmatmul.f32.vlgmr.msrb.gmra.mxu1 %v2895_v57  ;;  %1732 = vmatpush.msra.mxu0 %v1368_v3  ;;  %v1388_v51 = vld [vmem:[#allocation8 + $0x290] sm:$0xff]  ;;  %v1527_v38 = vld [vmem:[#allocation8 + $0x6e8] sm:$0xff] }
 0x1cd   :  { %1752 = vmatpush.msra.mxu1 %v1432_v4  ;;  %1705 = vmatpush.msrb.mxu2 %v1443_v8  ;;  %v1300_v27 = vmul.f32 0.1, %v1136_v17  ;;  %v1320_v54 = vld [vmem:[#allocation8 + $0x70] sm:$0xff]  ;;  %v1539_v4 = vld [vmem:[#allocation8 + $0x748] sm:$0xff] }
 0x1ce   :  { %1733 = vmatpush.msra.mxu0 %v1364_v33  ;;  %1713 = vmatpush.msrb.mxu3 %v1555_v26  ;;  %v1384_v48 = vld [vmem:[#allocation8 + $0x270] sm:$0xff]  ;;  %v1535_v8 = vld [vmem:[#allocation8 + $0x728] sm:$0xff]  ;;  %v1369_v33 = vld [vmem:[#allocation8 + $0x1f8] sm:$0xff] }
 0x1cf   :  { %1753 = vmatpush.msra.mxu1 %v1428_v9  ;;  %1706 = vmatpush.msrb.mxu2 %v1439_v10  ;;  %v2902_v31 = vmax.f32 %v1136_v17, %v1300_v27  ;;  %v1472_v19 = vld [vmem:[#allocation8 + $0x530] sm:$0xff]  ;;  %v1433_v9 = vld [vmem:[#allocation8 + $0x3f8] sm:$0xff]  ;;  %v1531_v10 = vld [vmem:[#allocation8 + $0x708] sm:$0xff] }
 0x1d0   :  { %1734 = vmatpush.msra.mxu0 %v1360_v14  ;;  %1714 = vmatpush.msrb.mxu3 %v1551_v52  ;;  %v1380_v60 = vld [vmem:[#allocation8 + $0x250] sm:$0xff]  ;;  %v1429_v14 = vld [vmem:[#allocation8 + $0x3d8] sm:$0xff] }
 0x1d1   :  { %1754 = vmatpush.msra.mxu1 %v1424_v16  ;;  %1707 = vmatpush.msrb.mxu2 %v1435_v22  ;;  %v1468_v62 = vld [vmem:[#allocation8 + $0x510] sm:$0xff]  ;;  %v1361_v17 = vld [vmem:[#allocation8 + $0x1b8] sm:$0xff] }
 0x1d2   :  { %1735 = vmatpush.msra.mxu0 %v1356_v24  ;;  %1628 = vmatmul.f32.vlgmr.msra.gmra.mxu2 %v2902_v31  ;;  %v1376_v3 = vld [vmem:[#allocation8 + $0x230] sm:$0xff]  ;;  %v1425_v22 = vld [vmem:[#allocation8 + $0x3b8] sm:$0xff]  ;;  %v1523_v24 = vld [vmem:[#allocation8 + $0x6c8] sm:$0xff] }
 0x1d3   :  { %1755 = vmatpush.msra.mxu1 %v1420_v25  ;;  %1772 = vmatpush.msra.mxu2 %v1496_v18  ;;  %v1464_v30 = vld [vmem:[#allocation8 + $0x4f0] sm:$0xff]  ;;  %v1357_v25 = vld [vmem:[#allocation8 + $0x198] sm:$0xff] }
 0x1d4   :  { %1736 = vmatpush.msra.mxu0 %v1352_v29  ;;  %1715 = vmatpush.msrb.mxu3 %v1547_v55  ;;  %v1308_v5 = vld [vmem:[#allocation8 + $0x10] sm:$0xff]  ;;  %v1421_v27 = vld [vmem:[#allocation8 + $0x398] sm:$0xff]  ;;  %v1519_v29 = vld [vmem:[#allocation8 + $0x6a8] sm:$0xff] }
 0x1d5   :  { %1756 = vmatpush.msra.mxu1 %v1416_v59  ;;  %1773 = vmatpush.msra.mxu2 %v1492_v40  ;;  %v1372_v6 = vld [vmem:[#allocation8 + $0x210] sm:$0xff]  ;;  %v1353_v59 = vld [vmem:[#allocation8 + $0x178] sm:$0xff] }
 0x1d6   :  { %1737 = vmatpush.msra.mxu0 %v1348_v34  ;;  %1716 = vmatpush.msrb.mxu3 %v1543_v61  ;;  %v1460_v2 = vld [vmem:[#allocation8 + $0x4d0] sm:$0xff]  ;;  %v1349_v18 = vld [vmem:[#allocation8 + $0x158] sm:$0xff] }
 0x1d7   :  { %1757 = vmatpush.msra.mxu1 %v1412_v35  ;;  %1774 = vmatpush.msra.mxu2 %v1488_v44  ;;  %v1456_v16 = vld [vmem:[#allocation8 + $0x4b0] sm:$0xff]  ;;  %v1515_v35 = vld [vmem:[#allocation8 + $0x688] sm:$0xff]  ;;  %v1345_v40 = vld [vmem:[#allocation8 + $0x138] sm:$0xff] }
 0x1d8   :  { %1738 = vmatpush.msra.mxu0 %v1344_v37  ;;  %1717 = vmatpush.msrb.mxu3 %v1539_v4  ;;  %v1452_v23 = vld [vmem:[#allocation8 + $0x490] sm:$0xff]  ;;  %v1341_v44 = vld [vmem:[#allocation8 + $0x118] sm:$0xff] }
 0x1d9   :  { %1758 = vmatpush.msra.mxu1 %v1408_v39  ;;  %1775 = vmatpush.msra.mxu2 %v1484_v20  ;;  %v1448_v28 = vld [vmem:[#allocation8 + $0x470] sm:$0xff]  ;;  %v1511_v39 = vld [vmem:[#allocation8 + $0x668] sm:$0xff]  ;;  %v1401_v20 = vld [vmem:[#allocation8 + $0x2f8] sm:$0xff] }
 0x1da   :  { %1739 = vmatpush.msra.mxu0 %v1340_v15  ;;  %1708 = vmatmul.f32.vlgmr.msrb.gmra.mxu2 %v2902_v31  ;;  %v1444_v34 = vld [vmem:[#allocation8 + $0x450] sm:$0xff]  ;;  %v1393_v26 = vld [vmem:[#allocation8 + $0x2b8] sm:$0xff] }
 0x1db   :  { %1759 = vmatpush.msra.mxu1 %v1404_v43  ;;  %1776 = vmatpush.msra.mxu2 %v1480_v13  ;;  %v1440_v37 = vld [vmem:[#allocation8 + $0x430] sm:$0xff]  ;;  %v1507_v43 = vld [vmem:[#allocation8 + $0x648] sm:$0xff]  ;;  %v653_v13 = vperm.slane %v2867_v32, 3  ;;  %v1389_v52 = vld [vmem:[#allocation8 + $0x298] sm:$0xff] }
 0x1dc   :  { %1740 = vmatpush.msra.mxu0 %v1336_v45  ;;  %1718 = vmatpush.msrb.mxu3 %v1535_v8  ;;  %v1436_v15 = vld [vmem:[#allocation8 + $0x410] sm:$0xff]  ;;  %v1503_v45 = vld [vmem:[#allocation8 + $0x628] sm:$0xff]  ;;  %v1385_v55 = vld [vmem:[#allocation8 + $0x278] sm:$0xff] }
 0x1dd   :  { %1760 = vmatpush.msra.mxu1 %v1400_v7  ;;  %1777 = vmatpush.msra.mxu2 %v1476_v53  ;;  %v1337_v7 = vld [vmem:[#allocation8 + $0xf8] sm:$0xff] }
 0x1de   :  { %1741 = vmatpush.msra.mxu0 %v1332_v47  ;;  %1719 = vmatpush.msrb.mxu3 %v1531_v10  ;;  %v1333_v47 = vld [vmem:[#allocation8 + $0xd8] sm:$0xff] }
 0x1df   :  { %1761 = vmatpush.msra.mxu1 %v1396_v49  ;;  %1778 = vmatpush.msra.mxu2 %v1472_v19  ;;  %v1397_v49 = vld [vmem:[#allocation8 + $0x2d8] sm:$0xff] }
 0x1e0   :  { %1742 = vmatpush.msra.mxu0 %v1328_v11  ;;  %1720 = vmatpush.msrb.mxu3 %v1527_v38  ;;  %v1493_v11 = vld [vmem:[#allocation8 + $0x5d8] sm:$0xff] }
 0x1e1   :  { %1762 = vmatpush.msra.mxu1 %v1392_v41  ;;  %1779 = vmatpush.msra.mxu2 %v1468_v62  ;;  %v1329_v41 = vld [vmem:[#allocation8 + $0xb8] sm:$0xff] }
 0x1e2   :  { %1743 = vmatpush.msra.mxu0 %v1324_v50  ;;  %1721 = vmatpush.msrb.mxu3 %v1523_v24  ;;  %v1489_v50 = vld [vmem:[#allocation8 + $0x5b8] sm:$0xff] }
 0x1e3   :  { %1763 = vmatpush.msra.mxu1 %v1388_v51  ;;  %1780 = vmatpush.msra.mxu2 %v1464_v30  ;;  %v1325_v51 = vld [vmem:[#allocation8 + $0x98] sm:$0xff] }
 0x1e4   :  { %1744 = vmatpush.msra.mxu0 %v1320_v54  ;;  %1722 = vmatpush.msrb.mxu3 %v1519_v29  ;;  %v1485_v53 = vld [vmem:[#allocation8 + $0x598] sm:$0xff] }
 0x1e5   :  { %1764 = vmatpush.msra.mxu1 %v1384_v48  ;;  %1781 = vmatpush.msra.mxu2 %v1460_v2  ;;  %v1321_v48 = vld [vmem:[#allocation8 + $0x78] sm:$0xff] }
 0x1e6   :  { %1745 = vmatpush.msra.mxu0 %v1316_v58  ;;  %1723 = vmatpush.msrb.mxu3 %v1515_v35  ;;  %v1481_v58 = vld [vmem:[#allocation8 + $0x578] sm:$0xff] }
 0x1e7   :  { %1765 = vmatpush.msra.mxu1 %v1380_v60  ;;  %1782 = vmatpush.msra.mxu2 %v1456_v16  ;;  %v1317_v32 = vld [vmem:[#allocation8 + $0x58] sm:$0xff] }
 0x1e8   :  { %1746 = vmatpush.msra.mxu0 %v1312_v63  ;;  %1724 = vmatpush.msrb.mxu3 %v1511_v39  ;;  %v1381_v60 = vld [vmem:[#allocation8 + $0x258] sm:$0xff]  ;;  %v1548_v39 = vld [vmem:[#allocation8 + $0x790] sm:$0xff] }
 0x1e9   :  { %1766 = vmatpush.msra.mxu1 %v1376_v3  ;;  %1783 = vmatpush.msra.mxu2 %v1452_v23  ;;  %v1477_v62 = vld [vmem:[#allocation8 + $0x558] sm:$0xff] }
 0x1ea   :  { %1747 = vmatpush.msra.mxu0 %v1308_v5  ;;  %1725 = vmatpush.msrb.mxu3 %v1507_v43  ;;  %v1313_v4 = vld [vmem:[#allocation8 + $0x38] sm:$0xff]  ;;  %v1532_v43 = vld [vmem:[#allocation8 + $0x710] sm:$0xff] }
 0x1eb   :  { %1767 = vmatpush.msra.mxu1 %v1372_v6  ;;  %1748 = vmatmul.f32.vlgmr.msra.gmra.mxu0 %v2893_v56  ;;  %v1377_v30 = vld [vmem:[#allocation8 + $0x238] sm:$0xff] }
 0x1ec   :  { %1768 = vmatmul.f32.vlgmr.msra.gmra.mxu1 %v2895_v57  ;;  %1812 = vmatpush.msrb.mxu0 %v1369_v33  ;;  %v1473_v5 = vld [vmem:[#allocation8 + $0x538] sm:$0xff] }
 0x1ed   :  { %1832 = vmatpush.msrb.mxu1 %v1433_v9  ;;  %1784 = vmatpush.msra.mxu2 %v1448_v28  ;;  %v1309_v8 = vld [vmem:[#allocation8 + $0x18] sm:$0xff] }
 0x1ee   :  { %1813 = vmatpush.msrb.mxu0 %v1365_v12  ;;  %1726 = vmatpush.msrb.mxu3 %v1503_v45  ;;  %v1373_v33 = vld [vmem:[#allocation8 + $0x218] sm:$0xff]  ;;  %v1520_v45 = vld [vmem:[#allocation8 + $0x6b0] sm:$0xff] }
 0x1ef   :  { %1833 = vmatpush.msrb.mxu1 %v1429_v14  ;;  %1785 = vmatpush.msra.mxu2 %v1444_v34  ;;  %v1469_v2 = vld [vmem:[#allocation8 + $0x518] sm:$0xff] }
 0x1f0   :  { %1814 = vmatpush.msrb.mxu0 %v1361_v17  ;;  %1727 = vmatpush.msrb.mxu3 %v1499_v46  ;;  %v1465_v12 = vld [vmem:[#allocation8 + $0x4f8] sm:$0xff]  ;;  %v1500_v46 = vld [vmem:[#allocation8 + $0x610] sm:$0xff] }
 0x1f1   :  { %1834 = vmatpush.msrb.mxu1 %v1425_v22  ;;  %1786 = vmatpush.msra.mxu2 %v1440_v37  ;;  %v1461_v38 = vld [vmem:[#allocation8 + $0x4d8] sm:$0xff]  ;;  %v1552_v37 = vld [vmem:[#allocation8 + $0x7b0] sm:$0xff] }
 0x1f2   :  { %1815 = vmatpush.msrb.mxu0 %v1357_v25  ;;  %v1457_v23 = vld [vmem:[#allocation8 + $0x4b8] sm:$0xff] }
 0x1f3   :  { %1835 = vmatpush.msrb.mxu1 %v1421_v27  ;;  %1787 = vmatpush.msra.mxu2 %v1436_v15  ;;  %v1453_v27 = vld [vmem:[#allocation8 + $0x498] sm:$0xff]  ;;  %v1536_v15 = vld [vmem:[#allocation8 + $0x730] sm:$0xff] }
 0x1f4   :  { %1816 = vmatpush.msrb.mxu0 %v1353_v59  ;;  %1788 = vmatmul.f32.vlgmr.msra.gmra.mxu2 %v2902_v31  ;;  %v1449_v59 = vld [vmem:[#allocation8 + $0x478] sm:$0xff] }
 0x1f5   :  { %1836 = vmatpush.msrb.mxu1 %v1417_v1  ;;  %1852 = vmatpush.msrb.mxu2 %v1497_v21  ;;  %v1445_v34 = vld [vmem:[#allocation8 + $0x458] sm:$0xff]  ;;  %v1504_v21 = vld [vmem:[#allocation8 + $0x630] sm:$0xff] }
 0x1f6   :  { %1817 = vmatpush.msrb.mxu0 %v1349_v18  ;;  %v1441_v35 = vld [vmem:[#allocation8 + $0x438] sm:$0xff]  ;;  %v1556_v18 = vld [vmem:[#allocation8 + $0x7d0] sm:$0xff] }
 0x1f7   :  { %1837 = vmatpush.msrb.mxu1 %v1413_v36  ;;  %1853 = vmatpush.msrb.mxu2 %v1493_v11  ;;  %v1437_v36 = vld [vmem:[#allocation8 + $0x418] sm:$0xff] }
 0x1f8   :  { %1818 = vmatpush.msrb.mxu0 %v1345_v40  ;;  %v1544_v40 = vld [vmem:[#allocation8 + $0x770] sm:$0xff]  ;;  %v1553_v11 = vld [vmem:[#allocation8 + $0x7b8] sm:$0xff] }
 0x1f9   :  { %1838 = vmatpush.msrb.mxu1 %v1409_v42  ;;  %1854 = vmatpush.msrb.mxu2 %v1489_v50  ;;  %v1540_v42 = vld [vmem:[#allocation8 + $0x750] sm:$0xff]  ;;  %v1541_v50 = vld [vmem:[#allocation8 + $0x758] sm:$0xff] }
 0x1fa   :  { %1819 = vmatpush.msrb.mxu0 %v1341_v44  ;;  %v1528_v44 = vld [vmem:[#allocation8 + $0x6f0] sm:$0xff] }
 0x1fb   :  { %1839 = vmatpush.msrb.mxu1 %v1405_v0  ;;  %v1155_v54 = vpop.f32.mrf.mxu0  ;;  %1855 = vmatpush.msrb.mxu2 %v1485_v53  ;;  %v1524_v0 = vld [vmem:[#allocation8 + $0x6d0] sm:$0xff]  ;;  %v1529_v53 = vld [vmem:[#allocation8 + $0x6f8] sm:$0xff] }
 0x1fc   :  { %1820 = vmatpush.msrb.mxu0 %v1337_v7  ;;  %v1156_v19 = vadd.f32 %v1155_v54, %v653_v13  ;;  %v1175_v61 = vpop.f32.mrf.mxu1  ;;  %v1516_v7 = vld [vmem:[#allocation8 + $0x690] sm:$0xff]  ;;  %v1545_v13 = vld [vmem:[#allocation8 + $0x778] sm:$0xff] }
 0x1fd   :  { %1840 = vmatpush.msrb.mxu1 %v1401_v20  ;;  %1856 = vmatpush.msrb.mxu2 %v1481_v58  ;;  %v1508_v20 = vld [vmem:[#allocation8 + $0x650] sm:$0xff]  ;;  %v1525_v54 = vld [vmem:[#allocation8 + $0x6d8] sm:$0xff]  ;;  %v1952_v58 = vld [vmem:[#allocation11 + $0x1a0] sm:$0xff] }
 0x1fe   :  { %1821 = vmatpush.msrb.mxu0 %v1333_v47  ;;  %v1176_v63 = vadd.f32 %v1175_v61, %v1156_v19  ;;  %v1561_v47 = vld [vmem:[#allocation8 + $0x7f8] sm:$0xff]  ;;  %v2020_v61 = vld [vmem:[#allocation11 + $0x3c0] sm:$0xff] }
 0x1ff   :  { %1841 = vmatpush.msrb.mxu1 %v1397_v49  ;;  %v1195_v3 = vpop.f32.mrf.mxu2  ;;  %1857 = vmatpush.msrb.mxu2 %v1477_v62  ;;  %v1557_v49 = vld [vmem:[#allocation8 + $0x7d8] sm:$0xff] }
 0x200   :  { %1822 = vmatpush.msrb.mxu0 %v1329_v41  ;;  %v1196_v6 = vadd.f32 %v1195_v3, %v1176_v63  ;;  %v1215_v9 = vpop.f32.mrf.mxu3  ;;  %v1960_v41 = vld [vmem:[#allocation11 + $0x1e0] sm:$0xff]  ;;  %v1517_v19 = vld [vmem:[#allocation8 + $0x698] sm:$0xff] }
 0x201   :  { %1842 = vmatpush.msrb.mxu1 %v1393_v26  ;;  %1858 = vmatpush.msrb.mxu2 %v1473_v5  ;;  %v1549_v26 = vld [vmem:[#allocation8 + $0x798] sm:$0xff]  ;;  %v1944_v63 = vld [vmem:[#allocation11 + $0x160] sm:$0xff] }
 0x202   :  { %1823 = vmatpush.msrb.mxu0 %v1325_v51  ;;  %v1216_v10 = vadd.f32 %v1215_v9, %v1196_v6  ;;  %v1537_v51 = vld [vmem:[#allocation8 + $0x738] sm:$0xff]  ;;  %v2016_v3 = vld [vmem:[#allocation11 + $0x3a0] sm:$0xff] }
 0x203   :  { %1843 = vmatpush.msrb.mxu1 %v1389_v52  ;;  %1859 = vmatpush.msrb.mxu2 %v1469_v2  ;;  %v1533_v52 = vld [vmem:[#allocation8 + $0x718] sm:$0xff]  ;;  %v2012_v5 = vld [vmem:[#allocation11 + $0x380] sm:$0xff] }
 0x204   :  { %1824 = vmatpush.msrb.mxu0 %v1321_v48  ;;  %v1521_v48 = vld [vmem:[#allocation8 + $0x6b8] sm:$0xff]  ;;  %v1932_v2 = vld [vmem:[#allocation11 + $0x100] sm:$0xff] }
 0x205   :  { %1844 = vmatpush.msrb.mxu1 %v1385_v55  ;;  %1860 = vmatpush.msrb.mxu2 %v1465_v12  ;;  %v1956_v55 = vld [vmem:[#allocation11 + $0x1c0] sm:$0xff]  ;;  %v1513_v62 = vld [vmem:[#allocation8 + $0x678] sm:$0xff] }
 0x206   :  { %1825 = vmatpush.msrb.mxu0 %v1317_v32  ;;  %v1948_v32 = vld [vmem:[#allocation11 + $0x180] sm:$0xff]  ;;  %v1505_v6 = vld [vmem:[#allocation8 + $0x638] sm:$0xff] }
 0x207   :  { %1845 = vmatpush.msrb.mxu1 %v1381_v60  ;;  %v1235_v14 = vpop.f32.mrf.mxu0  ;;  %1861 = vmatpush.msrb.mxu2 %v1461_v38  ;;  %v2024_v60 = vld [vmem:[#allocation11 + $0x3e0] sm:$0xff]  ;;  %v1501_v9 = vld [vmem:[#allocation8 + $0x618] sm:$0xff] }
 0x208   :  { %1826 = vmatpush.msrb.mxu0 %v1313_v4  ;;  %v1236_v16 = vadd.f32 %v1235_v14, %v1216_v10  ;;  %v1509_v4 = vld [vmem:[#allocation8 + $0x658] sm:$0xff]  ;;  %v2004_v10 = vld [vmem:[#allocation11 + $0x340] sm:$0xff] }
 0x209   :  { %1846 = vmatpush.msrb.mxu1 %v1377_v30  ;;  %1862 = vmatpush.msrb.mxu2 %v1457_v23  ;;  %v1940_v30 = vld [vmem:[#allocation11 + $0x140] sm:$0xff] }
 0x20a   :  { %1827 = vmatpush.msrb.mxu0 %v1309_v8  ;;  %v1936_v8 = vld [vmem:[#allocation11 + $0x120] sm:$0xff] }
 0x20b   :  { %1847 = vmatpush.msrb.mxu1 %v1373_v33  ;;  %1828 = vmatmul.f32.vlgmr.msrb.gmra.mxu0 %v2893_v56  ;;  %v1255_v17 = vpop.f32.mrf.mxu1  ;;  %v2008_v33 = vld [vmem:[#allocation11 + $0x360] sm:$0xff] }
 0x20c   :  { %1848 = vmatmul.f32.vlgmr.msrb.gmra.mxu1 %v2895_v57  ;;  %v1256_v22 = vadd.f32 %v1255_v17, %v1236_v16  ;;  %1863 = vmatpush.msrb.mxu2 %v1453_v27  ;;  %v1560_v57 = vld [vmem:[#allocation8 + $0x7f0] sm:$0xff]  ;;  %v1928_v12 = vld [vmem:[#allocation11 + $0xe0] sm:$0xff] }
 0x20d   :  { %2166 = vmatpush.msra.mxu0 %v1960_v41  ;;  %2186 = vmatpush.msra.mxu1 %v2024_v60  ;;  %v2000_v14 = vld [vmem:[#allocation11 + $0x320] sm:$0xff]  ;;  %v2013_v41 = vld [vmem:[#allocation11 + $0x388] sm:$0xff] }
 0x20e   :  { %1864 = vmatpush.msrb.mxu2 %v1449_v59  ;;  %v1924_v16 = vld [vmem:[#allocation11 + $0xc0] sm:$0xff] }
 0x20f   :  { %v1275_v24 = vpop.f32.mrf.mxu2  ;;  %2167 = vmatpush.msra.mxu0 %v1956_v55  ;;  %2187 = vmatpush.msra.mxu1 %v2020_v61  ;;  %v1996_v38 = vld [vmem:[#allocation11 + $0x300] sm:$0xff]  ;;  %v2001_v55 = vld [vmem:[#allocation11 + $0x328] sm:$0xff] }
 0x210   :  { %v1276_v25 = vadd.f32 %v1275_v24, %v1256_v22  ;;  %1865 = vmatpush.msrb.mxu2 %v1445_v34  ;;  %v1920_v17 = vld [vmem:[#allocation11 + $0xa0] sm:$0xff]  ;;  %v1913_v61 = vld [vmem:[#allocation11 + $0x68] sm:$0xff] }
 0x211   :  { %2168 = vmatpush.msra.mxu0 %v1952_v58  ;;  %2188 = vmatpush.msra.mxu1 %v2016_v3  ;;  %v1916_v22 = vld [vmem:[#allocation11 + $0x80] sm:$0xff]  ;;  %v1917_v58 = vld [vmem:[#allocation11 + $0x88] sm:$0xff] }
 0x212   :  { %v1295_v28 = vpop.f32.mrf.mxu3  ;;  %1866 = vmatpush.msrb.mxu2 %v1441_v35  ;;  %v1912_v23 = vld [vmem:[#allocation11 + $0x60] sm:$0xff]  ;;  %v1909_v3 = vld [vmem:[#allocation11 + $0x48] sm:$0xff] }
 0x213   :  { %v1296_v29 = vadd.f32 %v1295_v28, %v1276_v25  ;;  %2169 = vmatpush.msra.mxu0 %v1948_v32  ;;  %2189 = vmatpush.msra.mxu1 %v2012_v5  ;;  %v1992_v24 = vld [vmem:[#allocation11 + $0x2e0] sm:$0xff]  ;;  %v1997_v32 = vld [vmem:[#allocation11 + $0x308] sm:$0xff] }
 0x214   :  { %1867 = vmatpush.msrb.mxu2 %v1437_v36  ;;  %v1908_v25 = vld [vmem:[#allocation11 + $0x40] sm:$0xff]  ;;  %v1905_v5 = vld [vmem:[#allocation11 + $0x28] sm:$0xff] }
 0x215   :  { %v1301_v1 = vmul.f32 0.1, %v1296_v29  ;;  %1868 = vmatmul.f32.vlgmr.msrb.gmra.mxu2 %v2902_v31  ;;  %v1512_v31 = vld [vmem:[#allocation8 + $0x670] sm:$0xff]  ;;  %2170 = vmatpush.msra.mxu0 %v1944_v63  ;;  %v1988_v27 = vld [vmem:[#allocation11 + $0x2c0] sm:$0xff] }
 0x216   :  { %2190 = vmatpush.msra.mxu1 %v2008_v33  ;;  %v1904_v28 = vld [vmem:[#allocation11 + $0x20] sm:$0xff]  ;;  %v1901_v33 = vld [vmem:[#allocation11 + $0x8] sm:$0xff] }
 0x217   :  { %v2912_v56 = vmax.f32 %v1296_v29, %v1301_v1  ;;  %2171 = vmatpush.msra.mxu0 %v1940_v30  ;;  %v1984_v29 = vld [vmem:[#allocation11 + $0x2a0] sm:$0xff] }
 0x218   :  { %2191 = vmatpush.msra.mxu1 %v2004_v10  ;;  %v2088_v59 = vld [vmem:[#allocation11 + $0x5e0] sm:$0xff]  ;;  %v2089_v10 = vld [vmem:[#allocation11 + $0x5e8] sm:$0xff] }
 0x219   :  { %1648 = vmatmul.f32.vlgmr.msra.gmra.mxu3 %v2912_v56  ;;  %2172 = vmatpush.msra.mxu0 %v1936_v8  ;;  %v1900_v1 = vld [vmem:[#allocation11] sm:$0xff] }
 0x21a   :  { %1792 = vmatpush.msra.mxu3 %v1560_v57  ;;  %2192 = vmatpush.msra.mxu1 %v2000_v14  ;;  %v1980_v34 = vld [vmem:[#allocation11 + $0x280] sm:$0xff] }
 0x21b   :  { %2173 = vmatpush.msra.mxu0 %v1932_v2  ;;  %2206 = vmatpush.msra.mxu2 %v2088_v59  ;;  %v1976_v57 = vld [vmem:[#allocation11 + $0x260] sm:$0xff]  ;;  %v2073_v59 = vld [vmem:[#allocation11 + $0x568] sm:$0xff] }
 0x21c   :  { %1793 = vmatpush.msra.mxu3 %v1556_v18  ;;  %2193 = vmatpush.msra.mxu1 %v1996_v38  ;;  %v2084_v35 = vld [vmem:[#allocation11 + $0x5c0] sm:$0xff]  ;;  %v1957_v18 = vld [vmem:[#allocation11 + $0x1c8] sm:$0xff] }
 0x21d   :  { %2174 = vmatpush.msra.mxu0 %v1928_v12  ;;  %2207 = vmatpush.msra.mxu2 %v2084_v35  ;;  %v1972_v36 = vld [vmem:[#allocation11 + $0x240] sm:$0xff]  ;;  %v1977_v12 = vld [vmem:[#allocation11 + $0x268] sm:$0xff] }
 0x21e   :  { %1794 = vmatpush.msra.mxu3 %v1552_v37  ;;  %2194 = vmatpush.msra.mxu1 %v1992_v24  ;;  %v2080_v37 = vld [vmem:[#allocation11 + $0x5a0] sm:$0xff]  ;;  %v1973_v38 = vld [vmem:[#allocation11 + $0x248] sm:$0xff] }
 0x21f   :  { %2175 = vmatpush.msra.mxu0 %v1924_v16  ;;  %2208 = vmatpush.msra.mxu2 %v2080_v37  ;;  %v2040_v60 = vld [vmem:[#allocation11 + $0x460] sm:$0xff]  ;;  %v2085_v16 = vld [vmem:[#allocation11 + $0x5c8] sm:$0xff] }
 0x220   :  { %1795 = vmatpush.msra.mxu3 %v1548_v39  ;;  %2195 = vmatpush.msra.mxu1 %v1988_v27  ;;  %v1953_v39 = vld [vmem:[#allocation11 + $0x1a8] sm:$0xff]  ;;  %v2036_v63 = vld [vmem:[#allocation11 + $0x440] sm:$0xff] }
 0x221   :  { %1728 = vmatmul.f32.vlgmr.msrb.gmra.mxu3 %v2912_v56  ;;  %2176 = vmatpush.msra.mxu0 %v1920_v17  ;;  %v2032_v30 = vld [vmem:[#allocation11 + $0x420] sm:$0xff]  ;;  %v1965_v27 = vld [vmem:[#allocation11 + $0x208] sm:$0xff] }
 0x222   :  { %1796 = vmatpush.msra.mxu3 %v1544_v40  ;;  %2196 = vmatpush.msra.mxu1 %v1984_v29  ;;  %v1968_v40 = vld [vmem:[#allocation11 + $0x220] sm:$0xff]  ;;  %v2919_v29 = vld [vmem:[#allocation10] sm:$0xf]  ;;  %v2061_v37 = vld [vmem:[#allocation11 + $0x508] sm:$0xff] }
 0x223   :  { %2177 = vmatpush.msra.mxu0 %v1916_v22  ;;  %v2028_v8 = vld [vmem:[#allocation11 + $0x400] sm:$0xff]  ;;  %v2081_v22 = vld [vmem:[#allocation11 + $0x5a8] sm:$0xff] }
 0x224   :  { %1797 = vmatpush.msra.mxu3 %v1540_v42  ;;  %2197 = vmatpush.msra.mxu1 %v1980_v34  ;;  %v2076_v42 = vld [vmem:[#allocation11 + $0x580] sm:$0xff]  ;;  %v2069_v34 = vld [vmem:[#allocation11 + $0x548] sm:$0xff] }
 0x225   :  { %2178 = vmatpush.msra.mxu0 %v1912_v23  ;;  %2209 = vmatpush.msra.mxu2 %v2076_v42  ;;  %v2152_v2 = vld [vmem:[#allocation11 + $0x7e0] sm:$0xff]  ;;  %v1969_v23 = vld [vmem:[#allocation11 + $0x228] sm:$0xff] }
 0x226   :  { %1798 = vmatpush.msra.mxu3 %v1536_v15  ;;  %2198 = vmatpush.msra.mxu1 %v1976_v57  ;;  %v1949_v15 = vld [vmem:[#allocation11 + $0x188] sm:$0xff]  ;;  %v2148_v14 = vld [vmem:[#allocation11 + $0x7c0] sm:$0xff] }
 0x227   :  { %2179 = vmatpush.msra.mxu0 %v1908_v25  ;;  %v2144_v17 = vld [vmem:[#allocation11 + $0x7a0] sm:$0xff]  ;;  %v2077_v25 = vld [vmem:[#allocation11 + $0x588] sm:$0xff] }
 0x228   :  { %1799 = vmatpush.msra.mxu3 %v1532_v43  ;;  %2199 = vmatpush.msra.mxu1 %v1972_v36  ;;  %v1964_v43 = vld [vmem:[#allocation11 + $0x200] sm:$0xff]  ;;  %v1589_v35 = vpop.f32.mrf.mxu0 }
 0x229   :  { %2180 = vmatpush.msra.mxu0 %v1904_v28  ;;  %v2140_v24 = vld [vmem:[#allocation11 + $0x780] sm:$0xff] }
 0x22a   :  { %1800 = vmatpush.msra.mxu3 %v1528_v44  ;;  %2200 = vmatpush.msra.mxu1 %v1968_v40  ;;  %v2072_v44 = vld [vmem:[#allocation11 + $0x560] sm:$0xff] }
 0x22b   :  { %2181 = vmatpush.msra.mxu0 %v1900_v1  ;;  %2210 = vmatpush.msra.mxu2 %v2072_v44  ;;  %v2136_v28 = vld [vmem:[#allocation11 + $0x760] sm:$0xff]  ;;  %v1609_v44 = vpop.f32.mrf.mxu1 }
 0x22c   :  { %1801 = vmatpush.msra.mxu3 %v1524_v0  ;;  %v1945_v0 = vld [vmem:[#allocation11 + $0x168] sm:$0xff]  ;;  %2201 = vmatpush.msra.mxu1 %v1964_v43  ;;  %v2132_v1 = vld [vmem:[#allocation11 + $0x740] sm:$0xff] }
 0x22d   :  { %v2128_v57 = vld [vmem:[#allocation11 + $0x720] sm:$0xff] }
 0x22e   :  { %1802 = vmatpush.msra.mxu3 %v1520_v45  ;;  %v2025_v45 = vld [vmem:[#allocation11 + $0x3e8] sm:$0xff]  ;;  %v2124_v36 = vld [vmem:[#allocation11 + $0x700] sm:$0xff] }
 0x22f   :  { %2266 = vmatpush.msrb.mxu1 %v2025_v45  ;;  %v2120_v40 = vld [vmem:[#allocation11 + $0x6e0] sm:$0xff] }
 0x230   :  { %1803 = vmatpush.msra.mxu3 %v1516_v7  ;;  %v2068_v7 = vld [vmem:[#allocation11 + $0x540] sm:$0xff] }
 0x231   :  { %2211 = vmatpush.msra.mxu2 %v2068_v7  ;;  %v2116_v43 = vld [vmem:[#allocation11 + $0x6c0] sm:$0xff]  ;;  %v1565_v7 = vperm.slane %v2919_v29, 1 }
 0x232   :  { %1804 = vmatpush.msra.mxu3 %v1512_v31  ;;  %v1941_v31 = vld [vmem:[#allocation11 + $0x148] sm:$0xff] }
 0x234   :  { %1805 = vmatpush.msra.mxu3 %v1508_v20  ;;  %v2021_v20 = vld [vmem:[#allocation11 + $0x3c8] sm:$0xff] }
 0x235   :  { %2267 = vmatpush.msrb.mxu1 %v2021_v20 }
 0x236   :  { %1806 = vmatpush.msra.mxu3 %v1504_v21  ;;  %v2064_v21 = vld [vmem:[#allocation11 + $0x520] sm:$0xff] }
 0x237   :  { %2212 = vmatpush.msra.mxu2 %v2064_v21  ;;  %v2049_v21 = vld [vmem:[#allocation11 + $0x4a8] sm:$0xff] }
 0x238   :  { %1807 = vmatpush.msra.mxu3 %v1500_v46  ;;  %v1937_v46 = vld [vmem:[#allocation11 + $0x128] sm:$0xff] }
 0x239   :  { %1808 = vmatmul.f32.vlgmr.msra.gmra.mxu3 %v2912_v56 }
 0x23a   :  { %1872 = vmatpush.msrb.mxu3 %v1561_v47  ;;  %v2017_v47 = vld [vmem:[#allocation11 + $0x3a8] sm:$0xff] }
 0x23b   :  { %2268 = vmatpush.msrb.mxu1 %v2017_v47  ;;  %v2108_v47 = vld [vmem:[#allocation11 + $0x680] sm:$0xff] }
 0x23c   :  { %1873 = vmatpush.msrb.mxu3 %v1557_v49  ;;  %v2060_v49 = vld [vmem:[#allocation11 + $0x500] sm:$0xff] }
 0x23d   :  { %2213 = vmatpush.msra.mxu2 %v2060_v49  ;;  %2269 = vmatpush.msrb.mxu1 %v2013_v41 }
 0x23e   :  { %1874 = vmatpush.msrb.mxu3 %v1553_v11  ;;  %v1933_v11 = vld [vmem:[#allocation11 + $0x108] sm:$0xff] }
 0x240   :  { %1875 = vmatpush.msrb.mxu3 %v1549_v26  ;;  %v2056_v26 = vld [vmem:[#allocation11 + $0x4e0] sm:$0xff] }
 0x241   :  { %2214 = vmatpush.msra.mxu2 %v2056_v26 }
 0x242   :  { %1876 = vmatpush.msrb.mxu3 %v1545_v13  ;;  %v1929_v13 = vld [vmem:[#allocation11 + $0xe8] sm:$0xff] }
 0x244   :  { %1877 = vmatpush.msrb.mxu3 %v1541_v50  ;;  %v2009_v50 = vld [vmem:[#allocation11 + $0x368] sm:$0xff] }
 0x245   :  { %2270 = vmatpush.msrb.mxu1 %v2009_v50  ;;  %v2104_v50 = vld [vmem:[#allocation11 + $0x660] sm:$0xff] }
 0x246   :  { %1878 = vmatpush.msrb.mxu3 %v1537_v51  ;;  %v2052_v51 = vld [vmem:[#allocation11 + $0x4c0] sm:$0xff] }
 0x247   :  { %2215 = vmatpush.msra.mxu2 %v2052_v51  ;;  %v2041_v51 = vld [vmem:[#allocation11 + $0x468] sm:$0xff] }
 0x248   :  { %1879 = vmatpush.msrb.mxu3 %v1533_v52  ;;  %v1925_v52 = vld [vmem:[#allocation11 + $0xc8] sm:$0xff]  ;;  %v1669_v20 = vpop.f32.mrf.mxu0 }
 0x249   :  { %v1670_v41 = vadd.f32 %v1669_v20, %v1565_v7  ;;  %v1994_v20 = vld [vmem:[#allocation11 + $0x2f0] sm:$0xff] }
 0x24a   :  { %1880 = vmatpush.msrb.mxu3 %v1529_v53  ;;  %v2005_v53 = vld [vmem:[#allocation11 + $0x348] sm:$0xff] }
 0x24b   :  { %2271 = vmatpush.msrb.mxu1 %v2005_v53 }
 0x24c   :  { %1881 = vmatpush.msrb.mxu3 %v1525_v54  ;;  %v2048_v54 = vld [vmem:[#allocation11 + $0x4a0] sm:$0xff] }
 0x24d   :  { %2216 = vmatpush.msra.mxu2 %v2048_v54  ;;  %2272 = vmatpush.msrb.mxu1 %v2001_v55  ;;  %v1962_v55 = vld [vmem:[#allocation11 + $0x1f0] sm:$0xff] }
 0x24e   :  { %1882 = vmatpush.msrb.mxu3 %v1521_v48  ;;  %v1921_v48 = vld [vmem:[#allocation11 + $0xa8] sm:$0xff] }
 0x24f   :  { %2273 = vmatpush.msrb.mxu1 %v1997_v32  ;;  %v2096_v32 = vld [vmem:[#allocation11 + $0x620] sm:$0xff] }
 0x250   :  { %1883 = vmatpush.msrb.mxu3 %v1517_v19  ;;  %v2044_v19 = vld [vmem:[#allocation11 + $0x480] sm:$0xff] }
 0x251   :  { %2217 = vmatpush.msra.mxu2 %v2044_v19  ;;  %v2100_v19 = vld [vmem:[#allocation11 + $0x640] sm:$0xff] }
 0x252   :  { %1884 = vmatpush.msrb.mxu3 %v1513_v62  ;;  %v1993_v62 = vld [vmem:[#allocation11 + $0x2e8] sm:$0xff] }
 0x253   :  { %2218 = vmatpush.msra.mxu2 %v2040_v60  ;;  %2274 = vmatpush.msrb.mxu1 %v1993_v62  ;;  %v2033_v60 = vld [vmem:[#allocation11 + $0x428] sm:$0xff]  ;;  %v1958_v62 = vld [vmem:[#allocation11 + $0x1d0] sm:$0xff] }
 0x254   :  { %1885 = vmatpush.msrb.mxu3 %v1509_v4  ;;  %v1989_v4 = vld [vmem:[#allocation11 + $0x2c8] sm:$0xff] }
 0x255   :  { %2219 = vmatpush.msra.mxu2 %v2036_v63  ;;  %2275 = vmatpush.msrb.mxu1 %v1989_v4  ;;  %v1629_v42 = vpop.f32.mrf.mxu2  ;;  %v2092_v63 = vld [vmem:[#allocation11 + $0x600] sm:$0xff]  ;;  %v2029_v4 = vld [vmem:[#allocation11 + $0x408] sm:$0xff] }
 0x256   :  { %1886 = vmatpush.msrb.mxu3 %v1505_v6  ;;  %v1985_v6 = vld [vmem:[#allocation11 + $0x2a8] sm:$0xff] }
 0x257   :  { %2220 = vmatpush.msra.mxu2 %v2032_v30  ;;  %2276 = vmatpush.msrb.mxu1 %v1985_v6  ;;  %v2153_v6 = vld [vmem:[#allocation11 + $0x7e8] sm:$0xff] }
 0x258   :  { %1887 = vmatpush.msrb.mxu3 %v1501_v9  ;;  %v1981_v9 = vld [vmem:[#allocation11 + $0x288] sm:$0xff] }
 0x259   :  { %1888 = vmatmul.f32.vlgmr.msrb.gmra.mxu3 %v2912_v56  ;;  %v1961_v56 = vld [vmem:[#allocation11 + $0x1e8] sm:$0xff]  ;;  %2221 = vmatpush.msra.mxu2 %v2028_v8 }
 0x25a   :  { %2246 = vmatpush.msrb.mxu0 %v1961_v56  ;;  %2226 = vmatpush.msra.mxu3 %v2152_v2  ;;  %v1564_v56 = vperm.slane %v2919_v29, 0  ;;  %v2149_v8 = vld [vmem:[#allocation11 + $0x7c8] sm:$0xff] }
 0x25b   :  { %2277 = vmatpush.msrb.mxu1 %v1981_v9  ;;  %2286 = vmatpush.msrb.mxu2 %v2089_v10  ;;  %v1950_v9 = vld [vmem:[#allocation11 + $0x190] sm:$0xff] }
 0x25c   :  { %2247 = vmatpush.msrb.mxu0 %v1957_v18  ;;  %2227 = vmatpush.msra.mxu3 %v2148_v14  ;;  %v2065_v18 = vld [vmem:[#allocation11 + $0x528] sm:$0xff]  ;;  %v1946_v10 = vld [vmem:[#allocation11 + $0x170] sm:$0xff] }
 0x25d   :  { %2278 = vmatpush.msrb.mxu1 %v1977_v12  ;;  %2287 = vmatpush.msrb.mxu2 %v2085_v16  ;;  %v1709_v53 = vpop.f32.mrf.mxu2  ;;  %v2026_v12 = vld [vmem:[#allocation11 + $0x3f0] sm:$0xff]  ;;  %v2145_v14 = vld [vmem:[#allocation11 + $0x7a8] sm:$0xff] }
 0x25e   :  { %2248 = vmatpush.msrb.mxu0 %v1953_v39  ;;  %2228 = vmatpush.msra.mxu3 %v2144_v17  ;;  %v1590_v39 = vadd.f32 %v1589_v35, %v1564_v56  ;;  %v1942_v16 = vld [vmem:[#allocation11 + $0x150] sm:$0xff]  ;;  %v2141_v17 = vld [vmem:[#allocation11 + $0x788] sm:$0xff] }
 0x25f   :  { %2279 = vmatpush.msrb.mxu1 %v1973_v38  ;;  %2288 = vmatpush.msrb.mxu2 %v2081_v22  ;;  %v2022_v38 = vld [vmem:[#allocation11 + $0x3d0] sm:$0xff] }
 0x260   :  { %2249 = vmatpush.msrb.mxu0 %v1949_v15  ;;  %2229 = vmatpush.msra.mxu3 %v2140_v24  ;;  %v2057_v15 = vld [vmem:[#allocation11 + $0x4e8] sm:$0xff]  ;;  %v1610_v45 = vadd.f32 %v1609_v44, %v1590_v39  ;;  %v1938_v22 = vld [vmem:[#allocation11 + $0x130] sm:$0xff] }
 0x261   :  { %2280 = vmatpush.msrb.mxu1 %v1969_v23  ;;  %2289 = vmatpush.msrb.mxu2 %v2077_v25  ;;  %v2018_v23 = vld [vmem:[#allocation11 + $0x3b0] sm:$0xff]  ;;  %v2137_v24 = vld [vmem:[#allocation11 + $0x768] sm:$0xff] }
 0x262   :  { %2250 = vmatpush.msrb.mxu0 %v1945_v0  ;;  %2230 = vmatpush.msra.mxu3 %v2136_v28  ;;  %v2053_v0 = vld [vmem:[#allocation11 + $0x4c8] sm:$0xff]  ;;  %v1934_v25 = vld [vmem:[#allocation11 + $0x110] sm:$0xff] }
 0x263   :  { %2281 = vmatpush.msrb.mxu1 %v1965_v27  ;;  %2290 = vmatpush.msrb.mxu2 %v2073_v59  ;;  %v2014_v27 = vld [vmem:[#allocation11 + $0x390] sm:$0xff]  ;;  %v2133_v28 = vld [vmem:[#allocation11 + $0x748] sm:$0xff]  ;;  %v1566_v59 = vperm.slane %v2919_v29, 2 }
 0x264   :  { %2251 = vmatpush.msrb.mxu0 %v1941_v31  ;;  %2231 = vmatpush.msra.mxu3 %v2132_v1  ;;  %v2112_v31 = vld [vmem:[#allocation11 + $0x6a0] sm:$0xff]  ;;  %v1930_v1 = vld [vmem:[#allocation11 + $0xf0] sm:$0xff] }
 0x265   :  { %2291 = vmatpush.msrb.mxu2 %v2069_v34  ;;  %v2010_v34 = vld [vmem:[#allocation11 + $0x370] sm:$0xff] }
 0x266   :  { %2252 = vmatpush.msrb.mxu0 %v1937_v46  ;;  %2232 = vmatpush.msra.mxu3 %v2128_v57  ;;  %v1630_v46 = vadd.f32 %v1629_v42, %v1610_v45  ;;  %v2129_v57 = vld [vmem:[#allocation11 + $0x728] sm:$0xff]  ;;  %v1926_v35 = vld [vmem:[#allocation11 + $0xd0] sm:$0xff] }
 0x267   :  { %2292 = vmatpush.msrb.mxu2 %v2065_v18  ;;  %v2006_v18 = vld [vmem:[#allocation11 + $0x350] sm:$0xff]  ;;  %v2121_v42 = vld [vmem:[#allocation11 + $0x6e8] sm:$0xff] }
 0x268   :  { %2253 = vmatpush.msrb.mxu0 %v1933_v11  ;;  %2233 = vmatpush.msra.mxu3 %v2124_v36  ;;  %v2045_v11 = vld [vmem:[#allocation11 + $0x488] sm:$0xff]  ;;  %v1749_v56 = vpop.f32.mrf.mxu0  ;;  %v1922_v39 = vld [vmem:[#allocation11 + $0xb0] sm:$0xff] }
 0x269   :  { %2293 = vmatpush.msrb.mxu2 %v2061_v37  ;;  %v2125_v36 = vld [vmem:[#allocation11 + $0x708] sm:$0xff]  ;;  %v1750_v37 = vadd.f32 %v1749_v56, %v1566_v59  ;;  %v1567_v59 = vperm.slane %v2919_v29, 3  ;;  %v1931_v56 = vld [vmem:[#allocation11 + $0xf8] sm:$0xff] }
 0x26a   :  { %2254 = vmatpush.msrb.mxu0 %v1929_v13  ;;  %2234 = vmatpush.msra.mxu3 %v2120_v40  ;;  %v2002_v40 = vld [vmem:[#allocation11 + $0x330] sm:$0xff]  ;;  %v2117_v45 = vld [vmem:[#allocation11 + $0x6c8] sm:$0xff]  ;;  %v2003_v29 = vld [vmem:[#allocation11 + $0x338] sm:$0xff] }
 0x26b   :  { %2294 = vmatpush.msrb.mxu2 %v2057_v15  ;;  %v1918_v15 = vld [vmem:[#allocation11 + $0x90] sm:$0xff] }
 0x26c   :  { %2255 = vmatpush.msrb.mxu0 %v1925_v52  ;;  %2235 = vmatpush.msra.mxu3 %v2116_v43  ;;  %v1689_v52 = vpop.f32.mrf.mxu1  ;;  %v1998_v43 = vld [vmem:[#allocation11 + $0x310] sm:$0xff] }
 0x26d   :  { %2295 = vmatpush.msrb.mxu2 %v2053_v0  ;;  %v1690_v54 = vadd.f32 %v1689_v52, %v1670_v41  ;;  %v2109_v41 = vld [vmem:[#allocation11 + $0x688] sm:$0xff] }
 0x26e   :  { %2256 = vmatpush.msrb.mxu0 %v1921_v48  ;;  %2236 = vmatpush.msra.mxu3 %v2112_v31  ;;  %v1914_v31 = vld [vmem:[#allocation11 + $0x70] sm:$0xff] }
 0x26f   :  { %2296 = vmatpush.msrb.mxu2 %v2049_v21  ;;  %v2113_v21 = vld [vmem:[#allocation11 + $0x6a8] sm:$0xff] }
 0x270   :  { %2257 = vmatpush.msrb.mxu0 %v1917_v58  ;;  %2237 = vmatpush.msra.mxu3 %v2108_v47  ;;  %v2037_v58 = vld [vmem:[#allocation11 + $0x448] sm:$0xff]  ;;  %v1910_v47 = vld [vmem:[#allocation11 + $0x50] sm:$0xff] }
 0x271   :  { %2297 = vmatpush.msrb.mxu2 %v2045_v11 }
 0x272   :  { %2258 = vmatpush.msrb.mxu0 %v1913_v61  ;;  %2238 = vmatpush.msra.mxu3 %v2104_v50  ;;  %v1710_v61 = vadd.f32 %v1709_v53, %v1690_v54  ;;  %v1986_v50 = vld [vmem:[#allocation11 + $0x2b0] sm:$0xff] }
 0x273   :  { %2298 = vmatpush.msrb.mxu2 %v2041_v51  ;;  %v2105_v51 = vld [vmem:[#allocation11 + $0x668] sm:$0xff]  ;;  %v1902_v53 = vld [vmem:[#allocation11 + $0x10] sm:$0xff] }
 0x274   :  { %2259 = vmatpush.msrb.mxu0 %v1909_v3  ;;  %2239 = vmatpush.msra.mxu3 %v2100_v19  ;;  %v1769_v44 = vpop.f32.mrf.mxu1  ;;  %v1982_v54 = vld [vmem:[#allocation11 + $0x290] sm:$0xff] }
 0x275   :  { %2299 = vmatpush.msrb.mxu2 %v2037_v58  ;;  %v1770_v7 = vadd.f32 %v1769_v44, %v1750_v37  ;;  %v2090_v19 = vld [vmem:[#allocation11 + $0x5f0] sm:$0xff]  ;;  %v1963_v58 = vld [vmem:[#allocation11 + $0x1f8] sm:$0xff] }
 0x276   :  { %2260 = vmatpush.msrb.mxu0 %v1905_v5  ;;  %2240 = vmatpush.msra.mxu3 %v2096_v32  ;;  %v1954_v5 = vld [vmem:[#allocation11 + $0x1b0] sm:$0xff]  ;;  %v1919_v44 = vld [vmem:[#allocation11 + $0x98] sm:$0xff] }
 0x277   :  { %2300 = vmatpush.msrb.mxu2 %v2033_v60  ;;  %v1789_v0 = vpop.f32.mrf.mxu2  ;;  %v1978_v32 = vld [vmem:[#allocation11 + $0x270] sm:$0xff]  ;;  %v2101_v60 = vld [vmem:[#allocation11 + $0x648] sm:$0xff] }
 0x278   :  { %2261 = vmatpush.msrb.mxu0 %v1901_v33  ;;  %2241 = vmatpush.msra.mxu3 %v2092_v63  ;;  %v1974_v63 = vld [vmem:[#allocation11 + $0x250] sm:$0xff] }
 0x279   :  { %2301 = vmatpush.msrb.mxu2 %v2029_v4  ;;  %v2082_v4 = vld [vmem:[#allocation11 + $0x5b0] sm:$0xff] }
 0x27a   :  { %2306 = vmatpush.msrb.mxu3 %v2153_v6  ;;  %v2093_v6 = vld [vmem:[#allocation11 + $0x608] sm:$0xff] }
 0x27c   :  { %2307 = vmatpush.msrb.mxu3 %v2149_v8  ;;  %v2078_v8 = vld [vmem:[#allocation11 + $0x590] sm:$0xff] }
 0x27e   :  { %2308 = vmatpush.msrb.mxu3 %v2145_v14  ;;  %v2027_v14 = vld [vmem:[#allocation11 + $0x3f8] sm:$0xff] }
 0x280   :  { %2309 = vmatpush.msrb.mxu3 %v2141_v17  ;;  %v2023_v17 = vld [vmem:[#allocation11 + $0x3d8] sm:$0xff] }
 0x282   :  { %2310 = vmatpush.msrb.mxu3 %v2137_v24  ;;  %v2019_v24 = vld [vmem:[#allocation11 + $0x3b8] sm:$0xff] }
 0x284   :  { %2311 = vmatpush.msrb.mxu3 %v2133_v28  ;;  %v2015_v28 = vld [vmem:[#allocation11 + $0x398] sm:$0xff] }
 0x286   :  { %2312 = vmatpush.msrb.mxu3 %v2129_v57  ;;  %v2011_v57 = vld [vmem:[#allocation11 + $0x378] sm:$0xff] }
 0x288   :  { %2313 = vmatpush.msrb.mxu3 %v2125_v36  ;;  %v2007_v36 = vld [vmem:[#allocation11 + $0x358] sm:$0xff] }
 0x28a   :  { %2314 = vmatpush.msrb.mxu3 %v2121_v42  ;;  %v2046_v42 = vld [vmem:[#allocation11 + $0x490] sm:$0xff] }
 0x28c   :  { %2315 = vmatpush.msrb.mxu3 %v2117_v45 }
 0x28e   :  { %2316 = vmatpush.msrb.mxu3 %v2113_v21 }
 0x290   :  { %2317 = vmatpush.msrb.mxu3 %v2109_v41 }
 0x292   :  { %2318 = vmatpush.msrb.mxu3 %v2105_v51 }
 0x294   :  { %2319 = vmatpush.msrb.mxu3 %v2101_v60  ;;  %v1979_v60 = vld [vmem:[#allocation11 + $0x278] sm:$0xff] }
 0x29c   :  { %v1649_v49 = vpop.f32.mrf.mxu3 }
 0x29d   :  { %v1650_v26 = vadd.f32 %v1649_v49, %v1630_v46  ;;  %v1790_v46 = vadd.f32 %v1789_v0, %v1770_v7  ;;  %v1990_v49 = vld [vmem:[#allocation11 + $0x2d0] sm:$0xff]  ;;  %v1999_v0 = vld [vmem:[#allocation11 + $0x318] sm:$0xff] }
 0x29e   :  { %v2042_v7 = vld [vmem:[#allocation11 + $0x470] sm:$0xff] }
 0x29f   :  { %v1892_v13 = vmul.f32 0.1, %v1650_v26 }
 0x2a1   :  { %v2923_v48 = vmax.f32 %v1650_v26, %v1892_v13  ;;  %v1906_v13 = vld [vmem:[#allocation11 + $0x30] sm:$0xff] }
 0x2a3   :  { %2182 = vmatmul.f32.vlgmr.msra.gmra.mxu0 %v2923_v48 }
 0x2a4   :  { %2326 = vmatpush.msra.mxu0 %v1962_v55  ;;  %v1729_v3 = vpop.f32.mrf.mxu3 }
 0x2a5   :  { %v1730_v30 = vadd.f32 %v1729_v3, %v1710_v61  ;;  %v2086_v61 = vld [vmem:[#allocation11 + $0x5d0] sm:$0xff]  ;;  %v2097_v3 = vld [vmem:[#allocation11 + $0x628] sm:$0xff] }
 0x2a6   :  { %2327 = vmatpush.msra.mxu0 %v1958_v62  ;;  %v1959_v62 = vld [vmem:[#allocation11 + $0x1d8] sm:$0xff]  ;;  %2320 = vmatpush.msrb.mxu3 %v2097_v3  ;;  %v2146_v3 = vld [vmem:[#allocation11 + $0x7b0] sm:$0xff] }
 0x2a7   :  { %v1893_v33 = vmul.f32 0.1, %v1730_v30 }
 0x2a8   :  { %2328 = vmatpush.msra.mxu0 %v1954_v5  ;;  %v1970_v5 = vld [vmem:[#allocation11 + $0x230] sm:$0xff]  ;;  %2321 = vmatpush.msrb.mxu3 %v2093_v6  ;;  %v2079_v6 = vld [vmem:[#allocation11 + $0x598] sm:$0xff] }
 0x2a9   :  { %v2926_v2 = vmax.f32 %v1730_v30, %v1893_v33  ;;  %v1955_v30 = vld [vmem:[#allocation11 + $0x1b8] sm:$0xff] }
 0x2aa   :  { %2329 = vmatpush.msra.mxu0 %v1950_v9  ;;  %v1951_v33 = vld [vmem:[#allocation11 + $0x198] sm:$0xff]  ;;  %v1966_v9 = vld [vmem:[#allocation11 + $0x210] sm:$0xff] }
 0x2ab   :  { %2202 = vmatmul.f32.vlgmr.msra.gmra.mxu1 %v2926_v2  ;;  %2262 = vmatmul.f32.vlgmr.msrb.gmra.mxu0 %v2923_v48 }
 0x2ac   :  { %2330 = vmatpush.msra.mxu0 %v1946_v10  ;;  %2346 = vmatpush.msra.mxu1 %v2026_v12  ;;  %v2074_v10 = vld [vmem:[#allocation11 + $0x570] sm:$0xff]  ;;  %v1947_v12 = vld [vmem:[#allocation11 + $0x178] sm:$0xff] }
 0x2ae   :  { %2331 = vmatpush.msra.mxu0 %v1942_v16  ;;  %2347 = vmatpush.msra.mxu1 %v2022_v38  ;;  %v2070_v16 = vld [vmem:[#allocation11 + $0x550] sm:$0xff]  ;;  %v1943_v38 = vld [vmem:[#allocation11 + $0x158] sm:$0xff] }
 0x2b0   :  { %2332 = vmatpush.msra.mxu0 %v1938_v22  ;;  %2348 = vmatpush.msra.mxu1 %v2018_v23  ;;  %v2066_v22 = vld [vmem:[#allocation11 + $0x530] sm:$0xff]  ;;  %v1939_v23 = vld [vmem:[#allocation11 + $0x138] sm:$0xff] }
 0x2b2   :  { %2333 = vmatpush.msra.mxu0 %v1934_v25  ;;  %2349 = vmatpush.msra.mxu1 %v2014_v27  ;;  %v2062_v25 = vld [vmem:[#allocation11 + $0x510] sm:$0xff]  ;;  %v1935_v27 = vld [vmem:[#allocation11 + $0x118] sm:$0xff] }
 0x2b3   :  { %2282 = vmatmul.f32.vlgmr.msrb.gmra.mxu1 %v2926_v2 }
 0x2b4   :  { %2334 = vmatpush.msra.mxu0 %v1930_v1  ;;  %2350 = vmatpush.msra.mxu1 %v2010_v34  ;;  %v2058_v1 = vld [vmem:[#allocation11 + $0x4f0] sm:$0xff]  ;;  %v1829_v34 = vpop.f32.mrf.mxu0 }
 0x2b5   :  { %v1830_v37 = vadd.f32 %v1829_v34, %v1567_v59  ;;  %v2106_v59 = vld [vmem:[#allocation11 + $0x670] sm:$0xff] }
 0x2b6   :  { %2335 = vmatpush.msra.mxu0 %v1926_v35  ;;  %2351 = vmatpush.msra.mxu1 %v2006_v18  ;;  %v2054_v35 = vld [vmem:[#allocation11 + $0x4d0] sm:$0xff]  ;;  %v1927_v18 = vld [vmem:[#allocation11 + $0xd8] sm:$0xff] }
 0x2b7   :  { %v2102_v34 = vld [vmem:[#allocation11 + $0x650] sm:$0xff] }
 0x2b8   :  { %2336 = vmatpush.msra.mxu0 %v1922_v39  ;;  %2352 = vmatpush.msra.mxu1 %v2002_v40  ;;  %v2050_v39 = vld [vmem:[#allocation11 + $0x4b0] sm:$0xff]  ;;  %v1923_v40 = vld [vmem:[#allocation11 + $0xb8] sm:$0xff] }
 0x2ba   :  { %2337 = vmatpush.msra.mxu0 %v1918_v15  ;;  %2353 = vmatpush.msra.mxu1 %v1998_v43  ;;  %v1849_v15 = vpop.f32.mrf.mxu1  ;;  %v1869_v43 = vpop.f32.mrf.mxu2 }
 0x2bb   :  { %v1850_v45 = vadd.f32 %v1849_v15, %v1830_v37  ;;  %v2155_v37 = vld [vmem:[#allocation11 + $0x7f8] sm:$0xff] }
 0x2bc   :  { %v1809_v11 = vpop.f32.mrf.mxu3  ;;  %2338 = vmatpush.msra.mxu0 %v1914_v31  ;;  %2354 = vmatpush.msra.mxu1 %v1994_v20  ;;  %v1915_v31 = vld [vmem:[#allocation11 + $0x78] sm:$0xff] }
 0x2bd   :  { %v1810_v26 = vadd.f32 %v1809_v11, %v1790_v46  ;;  %v1995_v20 = vld [vmem:[#allocation11 + $0x2f8] sm:$0xff]  ;;  %v1870_v21 = vadd.f32 %v1869_v43, %v1850_v45  ;;  %v2038_v46 = vld [vmem:[#allocation11 + $0x450] sm:$0xff] }
 0x2be   :  { %2339 = vmatpush.msra.mxu0 %v1910_v47  ;;  %2355 = vmatpush.msra.mxu1 %v1990_v49  ;;  %v1911_v49 = vld [vmem:[#allocation11 + $0x58] sm:$0xff] }
 0x2bf   :  { %v1894_v52 = vmul.f32 0.1, %v1810_v26  ;;  %v1991_v11 = vld [vmem:[#allocation11 + $0x2d8] sm:$0xff] }
 0x2c0   :  { %2340 = vmatpush.msra.mxu0 %v1906_v13  ;;  %2356 = vmatpush.msra.mxu1 %v1986_v50  ;;  %v1907_v13 = vld [vmem:[#allocation11 + $0x38] sm:$0xff] }
 0x2c1   :  { %v2932_v55 = vmax.f32 %v1810_v26, %v1894_v52  ;;  %v2034_v26 = vld [vmem:[#allocation11 + $0x430] sm:$0xff]  ;;  %v1987_v50 = vld [vmem:[#allocation11 + $0x2b8] sm:$0xff] }
 0x2c2   :  { %2341 = vmatpush.msra.mxu0 %v1902_v53  ;;  %2357 = vmatpush.msra.mxu1 %v1982_v54  ;;  %v2030_v52 = vld [vmem:[#allocation11 + $0x410] sm:$0xff]  ;;  %v1903_v53 = vld [vmem:[#allocation11 + $0x18] sm:$0xff] }
 0x2c3   :  { %2222 = vmatmul.f32.vlgmr.msra.gmra.mxu2 %v2932_v55  ;;  %2342 = vmatmul.f32.vlgmr.msra.gmra.mxu0 %v2923_v48  ;;  %v1983_v54 = vld [vmem:[#allocation11 + $0x298] sm:$0xff] }
 0x2c4   :  { %2366 = vmatpush.msra.mxu2 %v2090_v19  ;;  %2406 = vmatpush.msrb.mxu0 %v1963_v58  ;;  %v2154_v58 = vld [vmem:[#allocation11 + $0x7f0] sm:$0xff]  ;;  %v2135_v15 = vld [vmem:[#allocation11 + $0x758] sm:$0xff] }
 0x2c5   :  { %2358 = vmatpush.msra.mxu1 %v1978_v32  ;;  %v2091_v32 = vld [vmem:[#allocation11 + $0x5f8] sm:$0xff] }
 0x2c6   :  { %2367 = vmatpush.msra.mxu2 %v2086_v61  ;;  %2407 = vmatpush.msrb.mxu0 %v1959_v62  ;;  %v2150_v61 = vld [vmem:[#allocation11 + $0x7d0] sm:$0xff]  ;;  %v2087_v62 = vld [vmem:[#allocation11 + $0x5d8] sm:$0xff] }
 0x2c7   :  { %2359 = vmatpush.msra.mxu1 %v1974_v63  ;;  %v1975_v63 = vld [vmem:[#allocation11 + $0x258] sm:$0xff] }
 0x2c8   :  { %2368 = vmatpush.msra.mxu2 %v2082_v4  ;;  %2408 = vmatpush.msrb.mxu0 %v1955_v30  ;;  %v2083_v4 = vld [vmem:[#allocation11 + $0x5b8] sm:$0xff] }
 0x2c9   :  { %2360 = vmatpush.msra.mxu1 %v1970_v5  ;;  %v1971_v30 = vld [vmem:[#allocation11 + $0x238] sm:$0xff]  ;;  %v2142_v5 = vld [vmem:[#allocation11 + $0x790] sm:$0xff] }
 0x2ca   :  { %2369 = vmatpush.msra.mxu2 %v2078_v8  ;;  %2409 = vmatpush.msrb.mxu0 %v1951_v33  ;;  %v1967_v8 = vld [vmem:[#allocation11 + $0x218] sm:$0xff]  ;;  %v2138_v33 = vld [vmem:[#allocation11 + $0x770] sm:$0xff] }
 0x2cb   :  { %2361 = vmatpush.msra.mxu1 %v1966_v9  ;;  %2302 = vmatmul.f32.vlgmr.msrb.gmra.mxu2 %v2932_v55  ;;  %v2075_v9 = vld [vmem:[#allocation11 + $0x578] sm:$0xff] }
 0x2cc   :  { %2362 = vmatmul.f32.vlgmr.msra.gmra.mxu1 %v2926_v2  ;;  %2370 = vmatpush.msra.mxu2 %v2074_v10  ;;  %v2071_v10 = vld [vmem:[#allocation11 + $0x558] sm:$0xff] }
 0x2cd   :  { %2410 = vmatpush.msrb.mxu0 %v1947_v12  ;;  %2426 = vmatpush.msrb.mxu1 %v2027_v14  ;;  %v2130_v12 = vld [vmem:[#allocation11 + $0x730] sm:$0xff]  ;;  %v2067_v14 = vld [vmem:[#allocation11 + $0x538] sm:$0xff] }
 0x2ce   :  { %2371 = vmatpush.msra.mxu2 %v2070_v16  ;;  %v2126_v16 = vld [vmem:[#allocation11 + $0x710] sm:$0xff]  ;;  %v2131_v43 = vld [vmem:[#allocation11 + $0x738] sm:$0xff] }
 0x2cf   :  { %2411 = vmatpush.msrb.mxu0 %v1943_v38  ;;  %2427 = vmatpush.msrb.mxu1 %v2023_v17  ;;  %v2063_v38 = vld [vmem:[#allocation11 + $0x518] sm:$0xff]  ;;  %v2122_v17 = vld [vmem:[#allocation11 + $0x6f0] sm:$0xff] }
 0x2d0   :  { %2372 = vmatpush.msra.mxu2 %v2066_v22  ;;  %v2059_v22 = vld [vmem:[#allocation11 + $0x4f8] sm:$0xff] }
 0x2d1   :  { %2412 = vmatpush.msrb.mxu0 %v1939_v23  ;;  %2428 = vmatpush.msrb.mxu1 %v2019_v24  ;;  %v2118_v23 = vld [vmem:[#allocation11 + $0x6d0] sm:$0xff]  ;;  %v2055_v24 = vld [vmem:[#allocation11 + $0x4d8] sm:$0xff] }
 0x2d2   :  { %2373 = vmatpush.msra.mxu2 %v2062_v25  ;;  %v2051_v25 = vld [vmem:[#allocation11 + $0x4b8] sm:$0xff] }
 0x2d3   :  { %2413 = vmatpush.msrb.mxu0 %v1935_v27  ;;  %2429 = vmatpush.msrb.mxu1 %v2015_v28  ;;  %v2110_v27 = vld [vmem:[#allocation11 + $0x690] sm:$0xff]  ;;  %v2047_v28 = vld [vmem:[#allocation11 + $0x498] sm:$0xff] }
 0x2d4   :  { %2374 = vmatpush.msra.mxu2 %v2058_v1  ;;  %v2043_v1 = vld [vmem:[#allocation11 + $0x478] sm:$0xff] }
 0x2d5   :  { %2414 = vmatpush.msrb.mxu0 %v1931_v56  ;;  %2430 = vmatpush.msrb.mxu1 %v2011_v57  ;;  %v2039_v56 = vld [vmem:[#allocation11 + $0x458] sm:$0xff]  ;;  %v2098_v57 = vld [vmem:[#allocation11 + $0x630] sm:$0xff] }
 0x2d6   :  { %2375 = vmatpush.msra.mxu2 %v2054_v35  ;;  %v2035_v35 = vld [vmem:[#allocation11 + $0x438] sm:$0xff] }
 0x2d7   :  { %2415 = vmatpush.msrb.mxu0 %v1927_v18  ;;  %2431 = vmatpush.msrb.mxu1 %v2007_v36  ;;  %v2094_v18 = vld [vmem:[#allocation11 + $0x610] sm:$0xff]  ;;  %v2031_v36 = vld [vmem:[#allocation11 + $0x418] sm:$0xff] }
 0x2d8   :  { %2376 = vmatpush.msra.mxu2 %v2050_v39  ;;  %v2151_v39 = vld [vmem:[#allocation11 + $0x7d8] sm:$0xff] }
 0x2d9   :  { %2416 = vmatpush.msrb.mxu0 %v1923_v40  ;;  %2432 = vmatpush.msrb.mxu1 %v2003_v29  ;;  %v2147_v40 = vld [vmem:[#allocation11 + $0x7b8] sm:$0xff] }
 0x2da   :  { %2377 = vmatpush.msra.mxu2 %v2046_v42  ;;  %v2143_v29 = vld [vmem:[#allocation11 + $0x798] sm:$0xff] }
 0x2db   :  { %2417 = vmatpush.msrb.mxu0 %v1919_v44  ;;  %2433 = vmatpush.msrb.mxu1 %v1999_v0  ;;  %v2139_v42 = vld [vmem:[#allocation11 + $0x778] sm:$0xff] }
 0x2dc   :  { %v1889_v47 = vpop.f32.mrf.mxu3  ;;  %2378 = vmatpush.msra.mxu2 %v2042_v7  ;;  %v2127_v44 = vld [vmem:[#allocation11 + $0x718] sm:$0xff] }
 0x2dd   :  { %v1890_v41 = vadd.f32 %v1889_v47, %v1870_v21  ;;  %2418 = vmatpush.msrb.mxu0 %v1915_v31  ;;  %2434 = vmatpush.msrb.mxu1 %v1995_v20  ;;  %v2123_v0 = vld [vmem:[#allocation11 + $0x6f8] sm:$0xff]  ;;  %v2156_v47 = vld [vmem:[#allocation13] sm:$0xf] }
 0x2de   :  { %2379 = vmatpush.msra.mxu2 %v2038_v46  ;;  %v2119_v45 = vld [vmem:[#allocation11 + $0x6d8] sm:$0xff] }
 0x2df   :  { %v1895_v51 = vmul.f32 0.1, %v1890_v41  ;;  %2419 = vmatpush.msrb.mxu0 %v1911_v49  ;;  %2435 = vmatpush.msrb.mxu1 %v1991_v11  ;;  %v2115_v7 = vld [vmem:[#allocation11 + $0x6b8] sm:$0xff]  ;;  %v2158_v49 = vperm.slane %v2156_v47, 0 }
 0x2e0   :  { %2380 = vmatpush.msra.mxu2 %v2034_v26  ;;  %v2107_v31 = vld [vmem:[#allocation11 + $0x678] sm:$0xff] }
 0x2e1   :  { %v2939_v19 = vmax.f32 %v1890_v41, %v1895_v51  ;;  %2420 = vmatpush.msrb.mxu0 %v1907_v13  ;;  %2436 = vmatpush.msrb.mxu1 %v1987_v50  ;;  %v2103_v20 = vld [vmem:[#allocation11 + $0x658] sm:$0xff] }
 0x2e2   :  { %2381 = vmatpush.msra.mxu2 %v2030_v52  ;;  %v2099_v21 = vld [vmem:[#allocation11 + $0x638] sm:$0xff]  ;;  %v2159_v52 = vperm.slane %v2156_v47, 1 }
 0x2e3   :  { %2421 = vmatpush.msrb.mxu0 %v1903_v53  ;;  %2437 = vmatpush.msrb.mxu1 %v1983_v54  ;;  %v2095_v46 = vld [vmem:[#allocation11 + $0x618] sm:$0xff] }
 0x2e4   :  { %2242 = vmatmul.f32.vlgmr.msra.gmra.mxu3 %v2939_v19  ;;  %2382 = vmatmul.f32.vlgmr.msra.gmra.mxu2 %v2932_v55 }
 0x2e5   :  { %2386 = vmatpush.msra.mxu3 %v2154_v58  ;;  %2422 = vmatmul.f32.vlgmr.msrb.gmra.mxu0 %v2923_v48  ;;  %v2134_v48 = vld [vmem:[#allocation11 + $0x750] sm:$0xff] }
 0x2e6   :  { %2446 = vmatpush.msrb.mxu2 %v2091_v32  ;;  %2438 = vmatpush.msrb.mxu1 %v1979_v60 }
 0x2e7   :  { %2387 = vmatpush.msra.mxu3 %v2150_v61 }
 0x2e8   :  { %2447 = vmatpush.msrb.mxu2 %v2087_v62  ;;  %2439 = vmatpush.msrb.mxu1 %v1975_v63 }
 0x2e9   :  { %2388 = vmatpush.msra.mxu3 %v2146_v3 }
 0x2ea   :  { %2448 = vmatpush.msrb.mxu2 %v2083_v4  ;;  %2440 = vmatpush.msrb.mxu1 %v1971_v30  ;;  %v2160_v4 = vperm.slane %v2156_v47, 2 }
 0x2eb   :  { %2389 = vmatpush.msra.mxu3 %v2142_v5 }
 0x2ec   :  { %2449 = vmatpush.msrb.mxu2 %v2079_v6  ;;  %2441 = vmatpush.msrb.mxu1 %v1967_v8 }
 0x2ed   :  { %2322 = vmatmul.f32.vlgmr.msrb.gmra.mxu3 %v2939_v19  ;;  %2442 = vmatmul.f32.vlgmr.msrb.gmra.mxu1 %v2926_v2  ;;  %v2114_v2 = vld [vmem:[#allocation11 + $0x6b0] sm:$0xff] }
 0x2ee   :  { %2390 = vmatpush.msra.mxu3 %v2138_v33  ;;  %2450 = vmatpush.msrb.mxu2 %v2075_v9 }
 0x2f0   :  { %2391 = vmatpush.msra.mxu3 %v2134_v48  ;;  %2451 = vmatpush.msrb.mxu2 %v2071_v10 }
 0x2f2   :  { %2392 = vmatpush.msra.mxu3 %v2130_v12  ;;  %2452 = vmatpush.msrb.mxu2 %v2067_v14  ;;  %v2161_v12 = vperm.slane %v2156_v47, 3 }
 0x2f4   :  { %2393 = vmatpush.msra.mxu3 %v2126_v16  ;;  %2453 = vmatpush.msrb.mxu2 %v2063_v38 }
 0x2f6   :  { %2394 = vmatpush.msra.mxu3 %v2122_v17  ;;  %2454 = vmatpush.msrb.mxu2 %v2059_v22 }
 0x2f8   :  { %2395 = vmatpush.msra.mxu3 %v2118_v23  ;;  %2455 = vmatpush.msrb.mxu2 %v2055_v24 }
 0x2fa   :  { %2396 = vmatpush.msra.mxu3 %v2114_v2  ;;  %2456 = vmatpush.msrb.mxu2 %v2051_v25 }
 0x2fc   :  { %2397 = vmatpush.msra.mxu3 %v2110_v27  ;;  %2457 = vmatpush.msrb.mxu2 %v2047_v28 }
 0x2fe   :  { %2398 = vmatpush.msra.mxu3 %v2106_v59  ;;  %2458 = vmatpush.msrb.mxu2 %v2043_v1 }
 0x300   :  { %2399 = vmatpush.msra.mxu3 %v2102_v34  ;;  %2459 = vmatpush.msrb.mxu2 %v2039_v56 }
 0x302   :  { %2400 = vmatpush.msra.mxu3 %v2098_v57  ;;  %2460 = vmatpush.msrb.mxu2 %v2035_v35 }
 0x304   :  { %2401 = vmatpush.msra.mxu3 %v2094_v18  ;;  %2461 = vmatpush.msrb.mxu2 %v2031_v36 }
 0x305   :  { %2402 = vmatmul.f32.vlgmr.msra.gmra.mxu3 %v2939_v19  ;;  %2462 = vmatmul.f32.vlgmr.msrb.gmra.mxu2 %v2932_v55  ;;  %v2111_v55 = vld [vmem:[#allocation11 + $0x698] sm:$0xff] }
 0x306   :  { %2466 = vmatpush.msrb.mxu3 %v2155_v37 }
 0x308   :  { %2467 = vmatpush.msrb.mxu3 %v2151_v39 }
 0x30a   :  { %2468 = vmatpush.msrb.mxu3 %v2147_v40 }
 0x30c   :  { %2469 = vmatpush.msrb.mxu3 %v2143_v29 }
 0x30e   :  { %2470 = vmatpush.msrb.mxu3 %v2139_v42 }
 0x310   :  { %2471 = vmatpush.msrb.mxu3 %v2135_v15 }
 0x312   :  { %2472 = vmatpush.msrb.mxu3 %v2131_v43 }
 0x314   :  { %2473 = vmatpush.msrb.mxu3 %v2127_v44 }
 0x316   :  { %2474 = vmatpush.msrb.mxu3 %v2123_v0 }
 0x318   :  { %2475 = vmatpush.msrb.mxu3 %v2119_v45 }
 0x31a   :  { %2476 = vmatpush.msrb.mxu3 %v2115_v7 }
 0x31c   :  { %2477 = vmatpush.msrb.mxu3 %v2111_v55 }
 0x31e   :  { %2478 = vmatpush.msrb.mxu3 %v2107_v31 }
 0x320   :  { %2479 = vmatpush.msrb.mxu3 %v2103_v20  ;;  %v2183_v11 = vpop.f32.mrf.mxu0 }
 0x321   :  { %v2184_v26 = vadd.f32 %v2183_v11, %v2158_v49 }
 0x322   :  { %2480 = vmatpush.msrb.mxu3 %v2099_v21 }
 0x324   :  { %2481 = vmatpush.msrb.mxu3 %v2095_v46 }
 0x325   :  { %2482 = vmatmul.f32.vlgmr.msrb.gmra.mxu3 %v2939_v19 }
 0x328   :  { %v2203_v41 = vpop.f32.mrf.mxu1  ;;  %v2263_v54 = vpop.f32.mrf.mxu0 }
 0x329   :  { %v2204_v50 = vadd.f32 %v2203_v41, %v2184_v26  ;;  %v2264_v60 = vadd.f32 %v2263_v54, %v2159_v52 }
 0x330   :  { %v2283_v32 = vpop.f32.mrf.mxu1 }
 0x331   :  { %v2284_v62 = vadd.f32 %v2283_v32, %v2264_v60 }
 0x340   :  { %v2343_v30 = vpop.f32.mrf.mxu0 }
 0x341   :  { %v2344_v6 = vadd.f32 %v2343_v30, %v2160_v4 }
 0x346   :  { %v2223_v13 = vpop.f32.mrf.mxu2 }
 0x347   :  { %v2224_v51 = vadd.f32 %v2223_v13, %v2204_v50 }
 0x349   :  { %v2363_v5 = vpop.f32.mrf.mxu1 }
 0x34a   :  { %v2364_v33 = vadd.f32 %v2363_v5, %v2344_v6 }
 0x34e   :  { %v2303_v61 = vpop.f32.mrf.mxu2 }
 0x34f   :  { %v2304_v63 = vadd.f32 %v2303_v61, %v2284_v62 }
 0x362   :  { %v2423_v14 = vpop.f32.mrf.mxu0 }
 0x363   :  { %v2424_v38 = vadd.f32 %v2423_v14, %v2161_v12 }
 0x367   :  { %v2243_v53 = vpop.f32.mrf.mxu3  ;;  %v2383_v8 = vpop.f32.mrf.mxu2 }
 0x368   :  { %v2244_v58 = vadd.f32 %v2243_v53, %v2224_v51  ;;  %v2384_v9 = vadd.f32 %v2383_v8, %v2364_v33 }
 0x36a   :  { %2486 = vst [vmem:[#allocation14] sm:$0xff] %v2244_v58  ;;  %v2443_v16 = vpop.f32.mrf.mxu1 }
 0x36b   :  { %v2444_v22 = vadd.f32 %v2443_v16, %v2424_v38 }
 0x370   :  { %v2323_v3 = vpop.f32.mrf.mxu3 }
 0x371   :  { %v2324_v19 = vadd.f32 %v2323_v3, %v2304_v63 }
 0x373   :  { %2487 = vst [vmem:[#allocation14 + $0x8] sm:$0xff] %v2324_v19 }
 0x388   :  { %v2403_v48 = vpop.f32.mrf.mxu3  ;;  %v2463_v17 = vpop.f32.mrf.mxu2 }
 0x389   :  { %v2404_v10 = vadd.f32 %v2403_v48, %v2384_v9  ;;  %v2464_v23 = vadd.f32 %v2463_v17, %v2444_v22 }
 0x38b   :  { %2488 = vst [vmem:[#allocation14 + $0x10] sm:$0xff] %v2404_v10 }
 0x3a8   :  { %v2483_v24 = vpop.f32.mrf.mxu3 }
 0x3a9   :  { %v2484_v2 = vadd.f32 %v2483_v24, %v2464_v23 }
 0x3ab   :  { %2489 = vst [vmem:[#allocation14 + $0x18] sm:$0xff] %v2484_v2 }
 0x3ac   :  { %2500 = dma.vmem_to_hbm [thread:$0]  %s2496_s6, 512, %s2498_s12, [#allocation4]  }
 0x3ad   :  { %2728 = dma.done.wait [#allocation4], 512  }
 0x3ae   :  { %2729 = vsyncadd [#allocation4], 4294966784 }
 0x3af   :  { %2505 = vsyncpa [#allocation3], 1 }
 0x3b0   :  { %2506 = vsyncpa [#allocation6], 1 }
 0x3b1   :  { %2507 = vsyncpa [#allocation9], 1 }
 0x3b2   :  { %2508 = vsyncpa [#allocation12], 1 }
 0x3b3   :  { %2509 = vsyncpa [#allocation4], 1 }

</bundles_post_ra>
